<compile_context>
chip_gen: v6e
topology: v6e:2x2x1
jax: 0.10.0
libtpu: 0.0.40
codegen_flags: <defaults>
</compile_context>

<pallas_src>
import functools

import jax
import jax.numpy as jnp
from jax import lax
from jax.experimental import pallas as pl
from jax.experimental.pallas import tpu as pltpu

EPS = 1e-5


# ----------------------------------- kernel -----------------------------------


def resnet_kernel(x_ref, sh_ref, k_ref, bn_ref, chm_ref, ones_ref, ph_ref, pw_ref,
                  o_ref, *, num_blocks, planes, batch, height, width):
    H, W, N, C = height, width, batch, planes
    LANES = C * N * W
    cnt = float(N * H * W)
    HI = lax.Precision.HIGHEST

    def mxdot(a, b):
        return jnp.dot(a, b, preferred_element_type=jnp.float32, precision=HI)

    P = x_ref[...]              # (H, LANES) packed activations
    chm = chm_ref[...]          # (LANES, LANES) same-channel indicator
    ones_row = ones_ref[...]    # (1, H)

    def conv3x3(y, conv_idx):
        # conv(y) = sum_kh (Sh_kh @ y) @ K_kh  -- pure MXU, f32 accumulate.
        acc = None
        for kh in range(3):
            r = mxdot(sh_ref[kh], y)                      # (H, LANES) shifted rows
            t = mxdot(r, k_ref[conv_idx * 3 + kh])        # lane mixing + weights
            acc = t if acc is None else acc + t
        return acc

    def batchnorm(y, bn_idx, relu):
        # Per-channel sums via two tiny MXU dots each for y and y*y; results stay
        # as (1, LANES) vregs (every lane holds its own channel's statistic).
        ysq = y * y
        ch_sum = mxdot(mxdot(ones_row, y), chm)           # (1, LANES)
        ch_sq = mxdot(mxdot(ones_row, ysq), chm)          # (1, LANES)
        mean = ch_sum * (1.0 / cnt)
        var = ch_sq * (1.0 / cnt) - mean * mean           # biased (torch train mode)
        g = bn_ref[pl.ds(2 * bn_idx, 1), :]               # (1, LANES) per-lane gamma
        b = bn_ref[pl.ds(2 * bn_idx + 1, 1), :]           # (1, LANES) per-lane beta
        scale = g * lax.rsqrt(var + EPS)                  # EUP
        shift = b - mean * scale
        out = y * scale + shift
        if relu:
            out = jnp.maximum(out, 0.0)
        return out

    cur = P
    for blk in range(num_blocks):
        identity = cur                                    # stride 1, in==out planes
        t = conv3x3(cur, 2 * blk)
        t = batchnorm(t, 2 * blk, relu=True)
        t = conv3x3(t, 2 * blk + 1)
        t = batchnorm(t, 2 * blk + 1, relu=False)
        cur = jnp.maximum(t + identity, 0.0)

    # avg_pool2d(out, 2): two chained MXU dots, then one bulk store.
    pooled = mxdot(mxdot(ph_ref[...], cur), pw_ref[...])
    o_ref[...] = pooled.astype(o_ref.dtype)


# --------------------------------- wrapper -------------------------------------


def resnet_forward(x, conv_ws, bn_ps, *, num_blocks, planes):
    N, C, H, W = x.shape
    assert C == planes
    SEG = N * W
    LANES = C * SEG
    dtype = x.dtype

    lanes = jnp.arange(LANES)
    c_of = lanes // SEG
    n_of = (lanes % SEG) // W
    w_of = lanes % W

    # ---- lane-dense packing of activations -----------------------------------
    x_packed = jnp.transpose(x, (2, 1, 0, 3)).reshape(H, LANES)   # (H, C*N*W)

    # ---- row shift-with-zero matrices (H-boundary padding baked in) ----------
    hh = jnp.arange(H)
    sh_tab = jnp.stack([(hh[None, :] == (hh[:, None] + (kh - 1))).astype(dtype)
                        for kh in range(3)])                      # (3, H, H)

    # ---- per-conv, per-kh lane mixing matrices --------------------------------
    # K_kh[lane_in, lane_out] = w[c_out, c_in, kh, w_in - w_out + 1]
    #   when n_in == n_out and |w_in - w_out| <= 1, else 0 (W-boundary baked in).
    c_i, c_j = c_of[:, None], c_of[None, :]
    n_i, n_j = n_of[:, None], n_of[None, :]
    w_i, w_j = w_of[:, None], w_of[None, :]
    dk = w_i - w_j + 1
    valid = (n_i == n_j) & (dk >= 0) & (dk <= 2)
    kw_idx = jnp.clip(dk, 0, 2)
    k_rows = []
    for (w1, w2) in conv_ws:
        for wk in (w1, w2):                                        # OIHW (co, ci, 3, 3)
            for kh in range(3):
                k_rows.append(jnp.where(valid, wk[c_j, c_i, kh, kw_idx],
                                        0.0).astype(dtype))
    k_tab = jnp.stack(k_rows)                                      # (nconv*3, L, L)

    # ---- per-lane BN gamma / beta rows ----------------------------------------
    bn_rows = []
    for (g1, b1, g2, b2) in bn_ps:
        for g, b in ((g1, b1), (g2, b2)):
            bn_rows.append(g[c_of])
            bn_rows.append(b[c_of])
    bn_tab = jnp.stack(bn_rows).astype(dtype)                      # (4*blocks, LANES)

    # ---- BN stats helpers ------------------------------------------------------
    chm = (c_i == c_j).astype(dtype)                               # (LANES, LANES)
    ones_row = jnp.ones((1, H), dtype)

    # ---- pooling matrices: rows (H -> H/2), lanes block-diag over (c, n) ------
    ph = 0.5 * (jnp.arange(H)[None, :] // 2 ==
                jnp.arange(H // 2)[:, None]).astype(dtype)         # (H/2, H)
    pw_small = 0.5 * (jnp.arange(W)[:, None] // 2 ==
                      jnp.arange(W // 2)[None, :]).astype(dtype)   # (W, W/2)
    pw_blk = jnp.kron(jnp.eye(C * N, dtype=dtype), pw_small)       # (LANES, LANES/2)

    kernel = functools.partial(resnet_kernel, num_blocks=num_blocks, planes=planes,
                               batch=N, height=H, width=W)
    vmem_spec = lambda: pl.BlockSpec(memory_space=pltpu.MemorySpace.VMEM)
    pooled = pl.pallas_call(
        kernel,
        out_shape=jax.ShapeDtypeStruct((H // 2, LANES // 2), dtype),
        in_specs=[vmem_spec() for _ in range(8)],
        out_specs=vmem_spec(),
    )(x_packed, sh_tab, k_tab, bn_tab, chm, ones_row, ph, pw_blk)

    # unpack: (H/2, C*N*(W/2)) -> (N, C, H/2, W/2)
    return jnp.transpose(pooled.reshape(H // 2, C, N, W // 2), (2, 1, 0, 3))


# --------------------------- pure-JAX reference ---------------------------------


def ref_forward(x, conv_ws, bn_ps):
    def conv(y, w):
        return lax.conv_general_dilated(
            y, w, window_strides=(1, 1), padding=((1, 1), (1, 1)),
            dimension_numbers=("NCHW", "OIHW", "NCHW"),
            precision=lax.Precision.HIGHEST)

    def bn(y, g, bb):
        m = jnp.mean(y, axis=(0, 2, 3), keepdims=True)
        v = jnp.mean((y - m) ** 2, axis=(0, 2, 3), keepdims=True)
        return (y - m) * lax.rsqrt(v + EPS) * g.reshape(1, -1, 1, 1) + bb.reshape(1, -1, 1, 1)

    out = x
    for (w1, w2), (g1, b1, g2, b2) in zip(conv_ws, bn_ps):
        h = jax.nn.relu(bn(conv(out, w1), g1, b1))
        h = bn(conv(h, w2), g2, b2)
        out = jax.nn.relu(h + out)
    n, c, hh, ww = out.shape
    return out.reshape(n, c, hh // 2, 2, ww // 2, 2).mean(axis=(3, 5))


# ----------------------------------- main ---------------------------------------


if __name__ == "__main__":
    num_blocks = [2]          # ResNet(BasicBlock, [2]) -> layer1 has 2 blocks
    planes = 2                # self.in_planes = 2, _make_layer(block, 2, ...)
    N, C, H, W = 2, 2, 16, 16

    key = jax.random.PRNGKey(0)
    key, kx = jax.random.split(key)
    x = jax.random.normal(kx, (N, C, H, W), jnp.float32)

    # Deterministic synthetic parameters (conv: no bias; BN: gamma/beta).
    conv_ws, bn_ps = [], []
    for _ in range(num_blocks[0]):
        key, k1, k2, k3, k4, k5, k6 = jax.random.split(key, 7)
        w1 = 0.25 * jax.random.normal(k1, (planes, planes, 3, 3), jnp.float32)
        w2 = 0.25 * jax.random.normal(k2, (planes, planes, 3, 3), jnp.float32)
        g1 = 1.0 + 0.1 * jax.random.normal(k3, (planes,), jnp.float32)
        b1 = 0.1 * jax.random.normal(k4, (planes,), jnp.float32)
        g2 = 1.0 + 0.1 * jax.random.normal(k5, (planes,), jnp.float32)
        b2 = 0.1 * jax.random.normal(k6, (planes,), jnp.float32)
        conv_ws.append((w1, w2))
        bn_ps.append((g1, b1, g2, b2))

    out = resnet_forward(x, conv_ws, bn_ps, num_blocks=num_blocks[0], planes=planes)
    out = jax.block_until_ready(out)

    ref = ref_forward(x, conv_ws, bn_ps)
    assert out.shape == (N, planes, H // 2, W // 2), out.shape
    max_err = float(jnp.max(jnp.abs(out - ref)))
    assert jnp.allclose(out, ref, atol=1e-2, rtol=1e-2), f"max abs err = {max_err}"
    print("KERNEL_OK")
</pallas_src>

<mosaic_0001>
module attributes {stable_mosaic.version = 11 : i64} {
  func.func @resnet_kernel(%arg0: memref<16x64xf32, #tpu.memory_space<vmem>>, %arg1: memref<3x16x16xf32, #tpu.memory_space<vmem>>, %arg2: memref<12x64x64xf32, #tpu.memory_space<vmem>>, %arg3: memref<8x64xf32, #tpu.memory_space<vmem>>, %arg4: memref<64x64xf32, #tpu.memory_space<vmem>>, %arg5: memref<1x16xf32, #tpu.memory_space<vmem>>, %arg6: memref<8x16xf32, #tpu.memory_space<vmem>>, %arg7: memref<64x32xf32, #tpu.memory_space<vmem>>, %arg8: memref<8x32xf32, #tpu.memory_space<vmem>>) attributes {dimension_semantics = [], scalar_prefetch = 0 : i64, scratch_operands = 0 : i64, tpu.core_type = #tpu.core_type<tc>} {
    %c0 = arith.constant 0 : index
    %c0_0 = arith.constant 0 : index
    %0 = vector.load %arg0[%c0, %c0_0] : memref<16x64xf32, #tpu.memory_space<vmem>>, vector<16x64xf32>
    %c0_1 = arith.constant 0 : index
    %c0_2 = arith.constant 0 : index
    %1 = vector.load %arg4[%c0_1, %c0_2] : memref<64x64xf32, #tpu.memory_space<vmem>>, vector<64x64xf32>
    %c0_3 = arith.constant 0 : index
    %c0_4 = arith.constant 0 : index
    %2 = vector.load %arg5[%c0_3, %c0_4] : memref<1x16xf32, #tpu.memory_space<vmem>>, vector<1x16xf32>
    %c0_5 = arith.constant 0 : index
    %c0_6 = arith.constant 0 : index
    %c0_7 = arith.constant 0 : index
    %3 = vector.load %arg1[%c0_5, %c0_6, %c0_7] : memref<3x16x16xf32, #tpu.memory_space<vmem>>, vector<1x16x16xf32>
    %4 = vector.shape_cast %3 : vector<1x16x16xf32> to vector<16x16xf32>
    %cst = arith.constant dense<0.000000e+00> : vector<16x64xf32>
    %5 = tpu.matmul %4, %0, %cst {dimension_numbers = #tpu.dot_dimension_numbers<[1], [0], [0], [1], [0, 0, 1, 1], [], []>, precision = #tpu.contract_precision<fp32>} : vector<16x16xf32>, vector<16x64xf32>, vector<16x64xf32> -> vector<16x64xf32>
    %c0_8 = arith.constant 0 : index
    %c0_9 = arith.constant 0 : index
    %c0_10 = arith.constant 0 : index
    %6 = vector.load %arg2[%c0_8, %c0_9, %c0_10] : memref<12x64x64xf32, #tpu.memory_space<vmem>>, vector<1x64x64xf32>
    %7 = vector.shape_cast %6 : vector<1x64x64xf32> to vector<64x64xf32>
    %cst_11 = arith.constant dense<0.000000e+00> : vector<16x64xf32>
    %8 = tpu.matmul %5, %7, %cst_11 {dimension_numbers = #tpu.dot_dimension_numbers<[1], [0], [0], [1], [0, 0, 1, 1], [], []>, precision = #tpu.contract_precision<fp32>} : vector<16x64xf32>, vector<64x64xf32>, vector<16x64xf32> -> vector<16x64xf32>
    %c1 = arith.constant 1 : index
    %c0_12 = arith.constant 0 : index
    %c0_13 = arith.constant 0 : index
    %9 = vector.load %arg1[%c1, %c0_12, %c0_13] : memref<3x16x16xf32, #tpu.memory_space<vmem>>, vector<1x16x16xf32>
    %10 = vector.shape_cast %9 : vector<1x16x16xf32> to vector<16x16xf32>
    %cst_14 = arith.constant dense<0.000000e+00> : vector<16x64xf32>
    %11 = tpu.matmul %10, %0, %cst_14 {dimension_numbers = #tpu.dot_dimension_numbers<[1], [0], [0], [1], [0, 0, 1, 1], [], []>, precision = #tpu.contract_precision<fp32>} : vector<16x16xf32>, vector<16x64xf32>, vector<16x64xf32> -> vector<16x64xf32>
    %c1_15 = arith.constant 1 : index
    %c0_16 = arith.constant 0 : index
    %c0_17 = arith.constant 0 : index
    %12 = vector.load %arg2[%c1_15, %c0_16, %c0_17] : memref<12x64x64xf32, #tpu.memory_space<vmem>>, vector<1x64x64xf32>
    %13 = vector.shape_cast %12 : vector<1x64x64xf32> to vector<64x64xf32>
    %cst_18 = arith.constant dense<0.000000e+00> : vector<16x64xf32>
    %14 = tpu.matmul %11, %13, %cst_18 {dimension_numbers = #tpu.dot_dimension_numbers<[1], [0], [0], [1], [0, 0, 1, 1], [], []>, precision = #tpu.contract_precision<fp32>} : vector<16x64xf32>, vector<64x64xf32>, vector<16x64xf32> -> vector<16x64xf32>
    %15 = arith.addf %8, %14 : vector<16x64xf32>
    %c2 = arith.constant 2 : index
    %c0_19 = arith.constant 0 : index
    %c0_20 = arith.constant 0 : index
    %16 = vector.load %arg1[%c2, %c0_19, %c0_20] : memref<3x16x16xf32, #tpu.memory_space<vmem>>, vector<1x16x16xf32>
    %17 = vector.shape_cast %16 : vector<1x16x16xf32> to vector<16x16xf32>
    %cst_21 = arith.constant dense<0.000000e+00> : vector<16x64xf32>
    %18 = tpu.matmul %17, %0, %cst_21 {dimension_numbers = #tpu.dot_dimension_numbers<[1], [0], [0], [1], [0, 0, 1, 1], [], []>, precision = #tpu.contract_precision<fp32>} : vector<16x16xf32>, vector<16x64xf32>, vector<16x64xf32> -> vector<16x64xf32>
    %c2_22 = arith.constant 2 : index
    %c0_23 = arith.constant 0 : index
    %c0_24 = arith.constant 0 : index
    %19 = vector.load %arg2[%c2_22, %c0_23, %c0_24] : memref<12x64x64xf32, #tpu.memory_space<vmem>>, vector<1x64x64xf32>
    %20 = vector.shape_cast %19 : vector<1x64x64xf32> to vector<64x64xf32>
    %cst_25 = arith.constant dense<0.000000e+00> : vector<16x64xf32>
    %21 = tpu.matmul %18, %20, %cst_25 {dimension_numbers = #tpu.dot_dimension_numbers<[1], [0], [0], [1], [0, 0, 1, 1], [], []>, precision = #tpu.contract_precision<fp32>} : vector<16x64xf32>, vector<64x64xf32>, vector<16x64xf32> -> vector<16x64xf32>
    %22 = arith.addf %15, %21 : vector<16x64xf32>
    %23 = arith.mulf %22, %22 : vector<16x64xf32>
    %cst_26 = arith.constant dense<0.000000e+00> : vector<1x64xf32>
    %24 = tpu.matmul %2, %22, %cst_26 {dimension_numbers = #tpu.dot_dimension_numbers<[1], [0], [0], [1], [0, 0, 1, 1], [], []>, precision = #tpu.contract_precision<fp32>} : vector<1x16xf32>, vector<16x64xf32>, vector<1x64xf32> -> vector<1x64xf32>
    %cst_27 = arith.constant dense<0.000000e+00> : vector<1x64xf32>
    %25 = tpu.matmul %24, %1, %cst_27 {dimension_numbers = #tpu.dot_dimension_numbers<[1], [0], [0], [1], [0, 0, 1, 1], [], []>, precision = #tpu.contract_precision<fp32>} : vector<1x64xf32>, vector<64x64xf32>, vector<1x64xf32> -> vector<1x64xf32>
    %cst_28 = arith.constant dense<0.000000e+00> : vector<1x64xf32>
    %26 = tpu.matmul %2, %23, %cst_28 {dimension_numbers = #tpu.dot_dimension_numbers<[1], [0], [0], [1], [0, 0, 1, 1], [], []>, precision = #tpu.contract_precision<fp32>} : vector<1x16xf32>, vector<16x64xf32>, vector<1x64xf32> -> vector<1x64xf32>
    %cst_29 = arith.constant dense<0.000000e+00> : vector<1x64xf32>
    %27 = tpu.matmul %26, %1, %cst_29 {dimension_numbers = #tpu.dot_dimension_numbers<[1], [0], [0], [1], [0, 0, 1, 1], [], []>, precision = #tpu.contract_precision<fp32>} : vector<1x64xf32>, vector<64x64xf32>, vector<1x64xf32> -> vector<1x64xf32>
    %cst_30 = arith.constant 0.001953125 : f32
    %28 = vector.broadcast %cst_30 : f32 to vector<1x64xf32>
    %29 = arith.mulf %25, %28 : vector<1x64xf32>
    %cst_31 = arith.constant 0.001953125 : f32
    %30 = vector.broadcast %cst_31 : f32 to vector<1x64xf32>
    %31 = arith.mulf %27, %30 : vector<1x64xf32>
    %32 = arith.mulf %29, %29 : vector<1x64xf32>
    %33 = arith.subf %31, %32 : vector<1x64xf32>
    %c0_32 = arith.constant 0 : index
    %c0_33 = arith.constant 0 : index
    %34 = vector.load %arg3[%c0_32, %c0_33] : memref<8x64xf32, #tpu.memory_space<vmem>>, vector<1x64xf32>
    %c1_34 = arith.constant 1 : index
    %c0_35 = arith.constant 0 : index
    %35 = vector.load %arg3[%c1_34, %c0_35] : memref<8x64xf32, #tpu.memory_space<vmem>>, vector<1x64xf32>
    %cst_36 = arith.constant 9.99999974E-6 : f32
    %36 = vector.broadcast %cst_36 : f32 to vector<1x64xf32>
    %37 = arith.addf %33, %36 : vector<1x64xf32>
    %38 = math.rsqrt %37 : vector<1x64xf32>
    %39 = arith.mulf %34, %38 : vector<1x64xf32>
    %40 = arith.mulf %29, %39 : vector<1x64xf32>
    %41 = arith.subf %35, %40 : vector<1x64xf32>
    %42 = vector.broadcast %39 : vector<1x64xf32> to vector<16x64xf32>
    %43 = arith.mulf %22, %42 : vector<16x64xf32>
    %44 = vector.broadcast %41 : vector<1x64xf32> to vector<16x64xf32>
    %45 = arith.addf %43, %44 : vector<16x64xf32>
    %cst_37 = arith.constant 0.000000e+00 : f32
    %46 = vector.broadcast %cst_37 : f32 to vector<16x64xf32>
    %47 = arith.maximumf %45, %46 : vector<16x64xf32>
    %c0_38 = arith.constant 0 : index
    %c0_39 = arith.constant 0 : index
    %c0_40 = arith.constant 0 : index
    %48 = vector.load %arg1[%c0_38, %c0_39, %c0_40] : memref<3x16x16xf32, #tpu.memory_space<vmem>>, vector<1x16x16xf32>
    %49 = vector.shape_cast %48 : vector<1x16x16xf32> to vector<16x16xf32>
    %cst_41 = arith.constant dense<0.000000e+00> : vector<16x64xf32>
    %50 = tpu.matmul %49, %47, %cst_41 {dimension_numbers = #tpu.dot_dimension_numbers<[1], [0], [0], [1], [0, 0, 1, 1], [], []>, precision = #tpu.contract_precision<fp32>} : vector<16x16xf32>, vector<16x64xf32>, vector<16x64xf32> -> vector<16x64xf32>
    %c3 = arith.constant 3 : index
    %c0_42 = arith.constant 0 : index
    %c0_43 = arith.constant 0 : index
    %51 = vector.load %arg2[%c3, %c0_42, %c0_43] : memref<12x64x64xf32, #tpu.memory_space<vmem>>, vector<1x64x64xf32>
    %52 = vector.shape_cast %51 : vector<1x64x64xf32> to vector<64x64xf32>
    %cst_44 = arith.constant dense<0.000000e+00> : vector<16x64xf32>
    %53 = tpu.matmul %50, %52, %cst_44 {dimension_numbers = #tpu.dot_dimension_numbers<[1], [0], [0], [1], [0, 0, 1, 1], [], []>, precision = #tpu.contract_precision<fp32>} : vector<16x64xf32>, vector<64x64xf32>, vector<16x64xf32> -> vector<16x64xf32>
    %c1_45 = arith.constant 1 : index
    %c0_46 = arith.constant 0 : index
    %c0_47 = arith.constant 0 : index
    %54 = vector.load %arg1[%c1_45, %c0_46, %c0_47] : memref<3x16x16xf32, #tpu.memory_space<vmem>>, vector<1x16x16xf32>
    %55 = vector.shape_cast %54 : vector<1x16x16xf32> to vector<16x16xf32>
    %cst_48 = arith.constant dense<0.000000e+00> : vector<16x64xf32>
    %56 = tpu.matmul %55, %47, %cst_48 {dimension_numbers = #tpu.dot_dimension_numbers<[1], [0], [0], [1], [0, 0, 1, 1], [], []>, precision = #tpu.contract_precision<fp32>} : vector<16x16xf32>, vector<16x64xf32>, vector<16x64xf32> -> vector<16x64xf32>
    %c4 = arith.constant 4 : index
    %c0_49 = arith.constant 0 : index
    %c0_50 = arith.constant 0 : index
    %57 = vector.load %arg2[%c4, %c0_49, %c0_50] : memref<12x64x64xf32, #tpu.memory_space<vmem>>, vector<1x64x64xf32>
    %58 = vector.shape_cast %57 : vector<1x64x64xf32> to vector<64x64xf32>
    %cst_51 = arith.constant dense<0.000000e+00> : vector<16x64xf32>
    %59 = tpu.matmul %56, %58, %cst_51 {dimension_numbers = #tpu.dot_dimension_numbers<[1], [0], [0], [1], [0, 0, 1, 1], [], []>, precision = #tpu.contract_precision<fp32>} : vector<16x64xf32>, vector<64x64xf32>, vector<16x64xf32> -> vector<16x64xf32>
    %60 = arith.addf %53, %59 : vector<16x64xf32>
    %c2_52 = arith.constant 2 : index
    %c0_53 = arith.constant 0 : index
    %c0_54 = arith.constant 0 : index
    %61 = vector.load %arg1[%c2_52, %c0_53, %c0_54] : memref<3x16x16xf32, #tpu.memory_space<vmem>>, vector<1x16x16xf32>
    %62 = vector.shape_cast %61 : vector<1x16x16xf32> to vector<16x16xf32>
    %cst_55 = arith.constant dense<0.000000e+00> : vector<16x64xf32>
    %63 = tpu.matmul %62, %47, %cst_55 {dimension_numbers = #tpu.dot_dimension_numbers<[1], [0], [0], [1], [0, 0, 1, 1], [], []>, precision = #tpu.contract_precision<fp32>} : vector<16x16xf32>, vector<16x64xf32>, vector<16x64xf32> -> vector<16x64xf32>
    %c5 = arith.constant 5 : index
    %c0_56 = arith.constant 0 : index
    %c0_57 = arith.constant 0 : index
    %64 = vector.load %arg2[%c5, %c0_56, %c0_57] : memref<12x64x64xf32, #tpu.memory_space<vmem>>, vector<1x64x64xf32>
    %65 = vector.shape_cast %64 : vector<1x64x64xf32> to vector<64x64xf32>
    %cst_58 = arith.constant dense<0.000000e+00> : vector<16x64xf32>
    %66 = tpu.matmul %63, %65, %cst_58 {dimension_numbers = #tpu.dot_dimension_numbers<[1], [0], [0], [1], [0, 0, 1, 1], [], []>, precision = #tpu.contract_precision<fp32>} : vector<16x64xf32>, vector<64x64xf32>, vector<16x64xf32> -> vector<16x64xf32>
    %67 = arith.addf %60, %66 : vector<16x64xf32>
    %68 = arith.mulf %67, %67 : vector<16x64xf32>
    %cst_59 = arith.constant dense<0.000000e+00> : vector<1x64xf32>
    %69 = tpu.matmul %2, %67, %cst_59 {dimension_numbers = #tpu.dot_dimension_numbers<[1], [0], [0], [1], [0, 0, 1, 1], [], []>, precision = #tpu.contract_precision<fp32>} : vector<1x16xf32>, vector<16x64xf32>, vector<1x64xf32> -> vector<1x64xf32>
    %cst_60 = arith.constant dense<0.000000e+00> : vector<1x64xf32>
    %70 = tpu.matmul %69, %1, %cst_60 {dimension_numbers = #tpu.dot_dimension_numbers<[1], [0], [0], [1], [0, 0, 1, 1], [], []>, precision = #tpu.contract_precision<fp32>} : vector<1x64xf32>, vector<64x64xf32>, vector<1x64xf32> -> vector<1x64xf32>
    %cst_61 = arith.constant dense<0.000000e+00> : vector<1x64xf32>
    %71 = tpu.matmul %2, %68, %cst_61 {dimension_numbers = #tpu.dot_dimension_numbers<[1], [0], [0], [1], [0, 0, 1, 1], [], []>, precision = #tpu.contract_precision<fp32>} : vector<1x16xf32>, vector<16x64xf32>, vector<1x64xf32> -> vector<1x64xf32>
    %cst_62 = arith.constant dense<0.000000e+00> : vector<1x64xf32>
    %72 = tpu.matmul %71, %1, %cst_62 {dimension_numbers = #tpu.dot_dimension_numbers<[1], [0], [0], [1], [0, 0, 1, 1], [], []>, precision = #tpu.contract_precision<fp32>} : vector<1x64xf32>, vector<64x64xf32>, vector<1x64xf32> -> vector<1x64xf32>
    %cst_63 = arith.constant 0.001953125 : f32
    %73 = vector.broadcast %cst_63 : f32 to vector<1x64xf32>
    %74 = arith.mulf %70, %73 : vector<1x64xf32>
    %cst_64 = arith.constant 0.001953125 : f32
    %75 = vector.broadcast %cst_64 : f32 to vector<1x64xf32>
    %76 = arith.mulf %72, %75 : vector<1x64xf32>
    %77 = arith.mulf %74, %74 : vector<1x64xf32>
    %78 = arith.subf %76, %77 : vector<1x64xf32>
    %c2_65 = arith.constant 2 : index
    %c0_66 = arith.constant 0 : index
    %79 = vector.load %arg3[%c2_65, %c0_66] : memref<8x64xf32, #tpu.memory_space<vmem>>, vector<1x64xf32>
    %c3_67 = arith.constant 3 : index
    %c0_68 = arith.constant 0 : index
    %80 = vector.load %arg3[%c3_67, %c0_68] : memref<8x64xf32, #tpu.memory_space<vmem>>, vector<1x64xf32>
    %cst_69 = arith.constant 9.99999974E-6 : f32
    %81 = vector.broadcast %cst_69 : f32 to vector<1x64xf32>
    %82 = arith.addf %78, %81 : vector<1x64xf32>
    %83 = math.rsqrt %82 : vector<1x64xf32>
    %84 = arith.mulf %79, %83 : vector<1x64xf32>
    %85 = arith.mulf %74, %84 : vector<1x64xf32>
    %86 = arith.subf %80, %85 : vector<1x64xf32>
    %87 = vector.broadcast %84 : vector<1x64xf32> to vector<16x64xf32>
    %88 = arith.mulf %67, %87 : vector<16x64xf32>
    %89 = vector.broadcast %86 : vector<1x64xf32> to vector<16x64xf32>
    %90 = arith.addf %88, %89 : vector<16x64xf32>
    %91 = arith.addf %90, %0 : vector<16x64xf32>
    %cst_70 = arith.constant 0.000000e+00 : f32
    %92 = vector.broadcast %cst_70 : f32 to vector<16x64xf32>
    %93 = arith.maximumf %91, %92 : vector<16x64xf32>
    %c0_71 = arith.constant 0 : index
    %c0_72 = arith.constant 0 : index
    %c0_73 = arith.constant 0 : index
    %94 = vector.load %arg1[%c0_71, %c0_72, %c0_73] : memref<3x16x16xf32, #tpu.memory_space<vmem>>, vector<1x16x16xf32>
    %95 = vector.shape_cast %94 : vector<1x16x16xf32> to vector<16x16xf32>
    %cst_74 = arith.constant dense<0.000000e+00> : vector<16x64xf32>
    %96 = tpu.matmul %95, %93, %cst_74 {dimension_numbers = #tpu.dot_dimension_numbers<[1], [0], [0], [1], [0, 0, 1, 1], [], []>, precision = #tpu.contract_precision<fp32>} : vector<16x16xf32>, vector<16x64xf32>, vector<16x64xf32> -> vector<16x64xf32>
    %c6 = arith.constant 6 : index
    %c0_75 = arith.constant 0 : index
    %c0_76 = arith.constant 0 : index
    %97 = vector.load %arg2[%c6, %c0_75, %c0_76] : memref<12x64x64xf32, #tpu.memory_space<vmem>>, vector<1x64x64xf32>
    %98 = vector.shape_cast %97 : vector<1x64x64xf32> to vector<64x64xf32>
    %cst_77 = arith.constant dense<0.000000e+00> : vector<16x64xf32>
    %99 = tpu.matmul %96, %98, %cst_77 {dimension_numbers = #tpu.dot_dimension_numbers<[1], [0], [0], [1], [0, 0, 1, 1], [], []>, precision = #tpu.contract_precision<fp32>} : vector<16x64xf32>, vector<64x64xf32>, vector<16x64xf32> -> vector<16x64xf32>
    %c1_78 = arith.constant 1 : index
    %c0_79 = arith.constant 0 : index
    %c0_80 = arith.constant 0 : index
    %100 = vector.load %arg1[%c1_78, %c0_79, %c0_80] : memref<3x16x16xf32, #tpu.memory_space<vmem>>, vector<1x16x16xf32>
    %101 = vector.shape_cast %100 : vector<1x16x16xf32> to vector<16x16xf32>
    %cst_81 = arith.constant dense<0.000000e+00> : vector<16x64xf32>
    %102 = tpu.matmul %101, %93, %cst_81 {dimension_numbers = #tpu.dot_dimension_numbers<[1], [0], [0], [1], [0, 0, 1, 1], [], []>, precision = #tpu.contract_precision<fp32>} : vector<16x16xf32>, vector<16x64xf32>, vector<16x64xf32> -> vector<16x64xf32>
    %c7 = arith.constant 7 : index
    %c0_82 = arith.constant 0 : index
    %c0_83 = arith.constant 0 : index
    %103 = vector.load %arg2[%c7, %c0_82, %c0_83] : memref<12x64x64xf32, #tpu.memory_space<vmem>>, vector<1x64x64xf32>
    %104 = vector.shape_cast %103 : vector<1x64x64xf32> to vector<64x64xf32>
    %cst_84 = arith.constant dense<0.000000e+00> : vector<16x64xf32>
    %105 = tpu.matmul %102, %104, %cst_84 {dimension_numbers = #tpu.dot_dimension_numbers<[1], [0], [0], [1], [0, 0, 1, 1], [], []>, precision = #tpu.contract_precision<fp32>} : vector<16x64xf32>, vector<64x64xf32>, vector<16x64xf32> -> vector<16x64xf32>
    %106 = arith.addf %99, %105 : vector<16x64xf32>
    %c2_85 = arith.constant 2 : index
    %c0_86 = arith.constant 0 : index
    %c0_87 = arith.constant 0 : index
    %107 = vector.load %arg1[%c2_85, %c0_86, %c0_87] : memref<3x16x16xf32, #tpu.memory_space<vmem>>, vector<1x16x16xf32>
    %108 = vector.shape_cast %107 : vector<1x16x16xf32> to vector<16x16xf32>
    %cst_88 = arith.constant dense<0.000000e+00> : vector<16x64xf32>
    %109 = tpu.matmul %108, %93, %cst_88 {dimension_numbers = #tpu.dot_dimension_numbers<[1], [0], [0], [1], [0, 0, 1, 1], [], []>, precision = #tpu.contract_precision<fp32>} : vector<16x16xf32>, vector<16x64xf32>, vector<16x64xf32> -> vector<16x64xf32>
    %c8 = arith.constant 8 : index
    %c0_89 = arith.constant 0 : index
    %c0_90 = arith.constant 0 : index
    %110 = vector.load %arg2[%c8, %c0_89, %c0_90] : memref<12x64x64xf32, #tpu.memory_space<vmem>>, vector<1x64x64xf32>
    %111 = vector.shape_cast %110 : vector<1x64x64xf32> to vector<64x64xf32>
    %cst_91 = arith.constant dense<0.000000e+00> : vector<16x64xf32>
    %112 = tpu.matmul %109, %111, %cst_91 {dimension_numbers = #tpu.dot_dimension_numbers<[1], [0], [0], [1], [0, 0, 1, 1], [], []>, precision = #tpu.contract_precision<fp32>} : vector<16x64xf32>, vector<64x64xf32>, vector<16x64xf32> -> vector<16x64xf32>
    %113 = arith.addf %106, %112 : vector<16x64xf32>
    %114 = arith.mulf %113, %113 : vector<16x64xf32>
    %cst_92 = arith.constant dense<0.000000e+00> : vector<1x64xf32>
    %115 = tpu.matmul %2, %113, %cst_92 {dimension_numbers = #tpu.dot_dimension_numbers<[1], [0], [0], [1], [0, 0, 1, 1], [], []>, precision = #tpu.contract_precision<fp32>} : vector<1x16xf32>, vector<16x64xf32>, vector<1x64xf32> -> vector<1x64xf32>
    %cst_93 = arith.constant dense<0.000000e+00> : vector<1x64xf32>
    %116 = tpu.matmul %115, %1, %cst_93 {dimension_numbers = #tpu.dot_dimension_numbers<[1], [0], [0], [1], [0, 0, 1, 1], [], []>, precision = #tpu.contract_precision<fp32>} : vector<1x64xf32>, vector<64x64xf32>, vector<1x64xf32> -> vector<1x64xf32>
    %cst_94 = arith.constant dense<0.000000e+00> : vector<1x64xf32>
    %117 = tpu.matmul %2, %114, %cst_94 {dimension_numbers = #tpu.dot_dimension_numbers<[1], [0], [0], [1], [0, 0, 1, 1], [], []>, precision = #tpu.contract_precision<fp32>} : vector<1x16xf32>, vector<16x64xf32>, vector<1x64xf32> -> vector<1x64xf32>
    %cst_95 = arith.constant dense<0.000000e+00> : vector<1x64xf32>
    %118 = tpu.matmul %117, %1, %cst_95 {dimension_numbers = #tpu.dot_dimension_numbers<[1], [0], [0], [1], [0, 0, 1, 1], [], []>, precision = #tpu.contract_precision<fp32>} : vector<1x64xf32>, vector<64x64xf32>, vector<1x64xf32> -> vector<1x64xf32>
    %cst_96 = arith.constant 0.001953125 : f32
    %119 = vector.broadcast %cst_96 : f32 to vector<1x64xf32>
    %120 = arith.mulf %116, %119 : vector<1x64xf32>
    %cst_97 = arith.constant 0.001953125 : f32
    %121 = vector.broadcast %cst_97 : f32 to vector<1x64xf32>
    %122 = arith.mulf %118, %121 : vector<1x64xf32>
    %123 = arith.mulf %120, %120 : vector<1x64xf32>
    %124 = arith.subf %122, %123 : vector<1x64xf32>
    %c4_98 = arith.constant 4 : index
    %c0_99 = arith.constant 0 : index
    %125 = vector.load %arg3[%c4_98, %c0_99] : memref<8x64xf32, #tpu.memory_space<vmem>>, vector<1x64xf32>
    %c5_100 = arith.constant 5 : index
    %c0_101 = arith.constant 0 : index
    %126 = vector.load %arg3[%c5_100, %c0_101] : memref<8x64xf32, #tpu.memory_space<vmem>>, vector<1x64xf32>
    %cst_102 = arith.constant 9.99999974E-6 : f32
    %127 = vector.broadcast %cst_102 : f32 to vector<1x64xf32>
    %128 = arith.addf %124, %127 : vector<1x64xf32>
    %129 = math.rsqrt %128 : vector<1x64xf32>
    %130 = arith.mulf %125, %129 : vector<1x64xf32>
    %131 = arith.mulf %120, %130 : vector<1x64xf32>
    %132 = arith.subf %126, %131 : vector<1x64xf32>
    %133 = vector.broadcast %130 : vector<1x64xf32> to vector<16x64xf32>
    %134 = arith.mulf %113, %133 : vector<16x64xf32>
    %135 = vector.broadcast %132 : vector<1x64xf32> to vector<16x64xf32>
    %136 = arith.addf %134, %135 : vector<16x64xf32>
    %cst_103 = arith.constant 0.000000e+00 : f32
    %137 = vector.broadcast %cst_103 : f32 to vector<16x64xf32>
    %138 = arith.maximumf %136, %137 : vector<16x64xf32>
    %c0_104 = arith.constant 0 : index
    %c0_105 = arith.constant 0 : index
    %c0_106 = arith.constant 0 : index
    %139 = vector.load %arg1[%c0_104, %c0_105, %c0_106] : memref<3x16x16xf32, #tpu.memory_space<vmem>>, vector<1x16x16xf32>
    %140 = vector.shape_cast %139 : vector<1x16x16xf32> to vector<16x16xf32>
    %cst_107 = arith.constant dense<0.000000e+00> : vector<16x64xf32>
    %141 = tpu.matmul %140, %138, %cst_107 {dimension_numbers = #tpu.dot_dimension_numbers<[1], [0], [0], [1], [0, 0, 1, 1], [], []>, precision = #tpu.contract_precision<fp32>} : vector<16x16xf32>, vector<16x64xf32>, vector<16x64xf32> -> vector<16x64xf32>
    %c9 = arith.constant 9 : index
    %c0_108 = arith.constant 0 : index
    %c0_109 = arith.constant 0 : index
    %142 = vector.load %arg2[%c9, %c0_108, %c0_109] : memref<12x64x64xf32, #tpu.memory_space<vmem>>, vector<1x64x64xf32>
    %143 = vector.shape_cast %142 : vector<1x64x64xf32> to vector<64x64xf32>
    %cst_110 = arith.constant dense<0.000000e+00> : vector<16x64xf32>
    %144 = tpu.matmul %141, %143, %cst_110 {dimension_numbers = #tpu.dot_dimension_numbers<[1], [0], [0], [1], [0, 0, 1, 1], [], []>, precision = #tpu.contract_precision<fp32>} : vector<16x64xf32>, vector<64x64xf32>, vector<16x64xf32> -> vector<16x64xf32>
    %c1_111 = arith.constant 1 : index
    %c0_112 = arith.constant 0 : index
    %c0_113 = arith.constant 0 : index
    %145 = vector.load %arg1[%c1_111, %c0_112, %c0_113] : memref<3x16x16xf32, #tpu.memory_space<vmem>>, vector<1x16x16xf32>
    %146 = vector.shape_cast %145 : vector<1x16x16xf32> to vector<16x16xf32>
    %cst_114 = arith.constant dense<0.000000e+00> : vector<16x64xf32>
    %147 = tpu.matmul %146, %138, %cst_114 {dimension_numbers = #tpu.dot_dimension_numbers<[1], [0], [0], [1], [0, 0, 1, 1], [], []>, precision = #tpu.contract_precision<fp32>} : vector<16x16xf32>, vector<16x64xf32>, vector<16x64xf32> -> vector<16x64xf32>
    %c10 = arith.constant 10 : index
    %c0_115 = arith.constant 0 : index
    %c0_116 = arith.constant 0 : index
    %148 = vector.load %arg2[%c10, %c0_115, %c0_116] : memref<12x64x64xf32, #tpu.memory_space<vmem>>, vector<1x64x64xf32>
    %149 = vector.shape_cast %148 : vector<1x64x64xf32> to vector<64x64xf32>
    %cst_117 = arith.constant dense<0.000000e+00> : vector<16x64xf32>
    %150 = tpu.matmul %147, %149, %cst_117 {dimension_numbers = #tpu.dot_dimension_numbers<[1], [0], [0], [1], [0, 0, 1, 1], [], []>, precision = #tpu.contract_precision<fp32>} : vector<16x64xf32>, vector<64x64xf32>, vector<16x64xf32> -> vector<16x64xf32>
    %151 = arith.addf %144, %150 : vector<16x64xf32>
    %c2_118 = arith.constant 2 : index
    %c0_119 = arith.constant 0 : index
    %c0_120 = arith.constant 0 : index
    %152 = vector.load %arg1[%c2_118, %c0_119, %c0_120] : memref<3x16x16xf32, #tpu.memory_space<vmem>>, vector<1x16x16xf32>
    %153 = vector.shape_cast %152 : vector<1x16x16xf32> to vector<16x16xf32>
    %cst_121 = arith.constant dense<0.000000e+00> : vector<16x64xf32>
    %154 = tpu.matmul %153, %138, %cst_121 {dimension_numbers = #tpu.dot_dimension_numbers<[1], [0], [0], [1], [0, 0, 1, 1], [], []>, precision = #tpu.contract_precision<fp32>} : vector<16x16xf32>, vector<16x64xf32>, vector<16x64xf32> -> vector<16x64xf32>
    %c11 = arith.constant 11 : index
    %c0_122 = arith.constant 0 : index
    %c0_123 = arith.constant 0 : index
    %155 = vector.load %arg2[%c11, %c0_122, %c0_123] : memref<12x64x64xf32, #tpu.memory_space<vmem>>, vector<1x64x64xf32>
    %156 = vector.shape_cast %155 : vector<1x64x64xf32> to vector<64x64xf32>
    %cst_124 = arith.constant dense<0.000000e+00> : vector<16x64xf32>
    %157 = tpu.matmul %154, %156, %cst_124 {dimension_numbers = #tpu.dot_dimension_numbers<[1], [0], [0], [1], [0, 0, 1, 1], [], []>, precision = #tpu.contract_precision<fp32>} : vector<16x64xf32>, vector<64x64xf32>, vector<16x64xf32> -> vector<16x64xf32>
    %158 = arith.addf %151, %157 : vector<16x64xf32>
    %159 = arith.mulf %158, %158 : vector<16x64xf32>
    %cst_125 = arith.constant dense<0.000000e+00> : vector<1x64xf32>
    %160 = tpu.matmul %2, %158, %cst_125 {dimension_numbers = #tpu.dot_dimension_numbers<[1], [0], [0], [1], [0, 0, 1, 1], [], []>, precision = #tpu.contract_precision<fp32>} : vector<1x16xf32>, vector<16x64xf32>, vector<1x64xf32> -> vector<1x64xf32>
    %cst_126 = arith.constant dense<0.000000e+00> : vector<1x64xf32>
    %161 = tpu.matmul %160, %1, %cst_126 {dimension_numbers = #tpu.dot_dimension_numbers<[1], [0], [0], [1], [0, 0, 1, 1], [], []>, precision = #tpu.contract_precision<fp32>} : vector<1x64xf32>, vector<64x64xf32>, vector<1x64xf32> -> vector<1x64xf32>
    %cst_127 = arith.constant dense<0.000000e+00> : vector<1x64xf32>
    %162 = tpu.matmul %2, %159, %cst_127 {dimension_numbers = #tpu.dot_dimension_numbers<[1], [0], [0], [1], [0, 0, 1, 1], [], []>, precision = #tpu.contract_precision<fp32>} : vector<1x16xf32>, vector<16x64xf32>, vector<1x64xf32> -> vector<1x64xf32>
    %cst_128 = arith.constant dense<0.000000e+00> : vector<1x64xf32>
    %163 = tpu.matmul %162, %1, %cst_128 {dimension_numbers = #tpu.dot_dimension_numbers<[1], [0], [0], [1], [0, 0, 1, 1], [], []>, precision = #tpu.contract_precision<fp32>} : vector<1x64xf32>, vector<64x64xf32>, vector<1x64xf32> -> vector<1x64xf32>
    %cst_129 = arith.constant 0.001953125 : f32
    %164 = vector.broadcast %cst_129 : f32 to vector<1x64xf32>
    %165 = arith.mulf %161, %164 : vector<1x64xf32>
    %cst_130 = arith.constant 0.001953125 : f32
    %166 = vector.broadcast %cst_130 : f32 to vector<1x64xf32>
    %167 = arith.mulf %163, %166 : vector<1x64xf32>
    %168 = arith.mulf %165, %165 : vector<1x64xf32>
    %169 = arith.subf %167, %168 : vector<1x64xf32>
    %c6_131 = arith.constant 6 : index
    %c0_132 = arith.constant 0 : index
    %170 = vector.load %arg3[%c6_131, %c0_132] : memref<8x64xf32, #tpu.memory_space<vmem>>, vector<1x64xf32>
    %c7_133 = arith.constant 7 : index
    %c0_134 = arith.constant 0 : index
    %171 = vector.load %arg3[%c7_133, %c0_134] : memref<8x64xf32, #tpu.memory_space<vmem>>, vector<1x64xf32>
    %cst_135 = arith.constant 9.99999974E-6 : f32
    %172 = vector.broadcast %cst_135 : f32 to vector<1x64xf32>
    %173 = arith.addf %169, %172 : vector<1x64xf32>
    %174 = math.rsqrt %173 : vector<1x64xf32>
    %175 = arith.mulf %170, %174 : vector<1x64xf32>
    %176 = arith.mulf %165, %175 : vector<1x64xf32>
    %177 = arith.subf %171, %176 : vector<1x64xf32>
    %178 = vector.broadcast %175 : vector<1x64xf32> to vector<16x64xf32>
    %179 = arith.mulf %158, %178 : vector<16x64xf32>
    %180 = vector.broadcast %177 : vector<1x64xf32> to vector<16x64xf32>
    %181 = arith.addf %179, %180 : vector<16x64xf32>
    %182 = arith.addf %181, %93 : vector<16x64xf32>
    %cst_136 = arith.constant 0.000000e+00 : f32
    %183 = vector.broadcast %cst_136 : f32 to vector<16x64xf32>
    %184 = arith.maximumf %182, %183 : vector<16x64xf32>
    %c0_137 = arith.constant 0 : index
    %c0_138 = arith.constant 0 : index
    %185 = vector.load %arg6[%c0_137, %c0_138] : memref<8x16xf32, #tpu.memory_space<vmem>>, vector<8x16xf32>
    %cst_139 = arith.constant dense<0.000000e+00> : vector<8x64xf32>
    %186 = tpu.matmul %185, %184, %cst_139 {dimension_numbers = #tpu.dot_dimension_numbers<[1], [0], [0], [1], [0, 0, 1, 1], [], []>, precision = #tpu.contract_precision<fp32>} : vector<8x16xf32>, vector<16x64xf32>, vector<8x64xf32> -> vector<8x64xf32>
    %c0_140 = arith.constant 0 : index
    %c0_141 = arith.constant 0 : index
    %187 = vector.load %arg7[%c0_140, %c0_141] : memref<64x32xf32, #tpu.memory_space<vmem>>, vector<64x32xf32>
    %cst_142 = arith.constant dense<0.000000e+00> : vector<8x32xf32>
    %188 = tpu.matmul %186, %187, %cst_142 {dimension_numbers = #tpu.dot_dimension_numbers<[1], [0], [0], [1], [0, 0, 1, 1], [], []>, precision = #tpu.contract_precision<fp32>} : vector<8x64xf32>, vector<64x32xf32>, vector<8x32xf32> -> vector<8x32xf32>
    %c0_143 = arith.constant 0 : index
    %c0_144 = arith.constant 0 : index
    %189 = vector.load %arg8[%c0_143, %c0_144] : memref<8x32xf32, #tpu.memory_space<vmem>>, vector<8x32xf32>
    tpu.vector_store %arg8[%c0_143, %c0_144], %188 {strides = array<i32>} : memref<8x32xf32, #tpu.memory_space<vmem>>, vector<8x32xf32>,
    return
  }
}

</mosaic_0001>

<bundles_post_ra>
// kernel: tpu_custom_call.1
= control target key start
LH: loop header
LB: loop body
LE: loop exit
PB: predicated region body
PF: predicated region fallthrough
CT: control target
= control target key end

     0   :  { %13 = vsyncpa [#allocation3], 0  ;;  %s32086_s0 = inlined_call_operand.vmem [shape: f32[16,64], index: 0, kind: input, shape index: {}]   ;;  %s32087_s1 = inlined_call_operand.hbm [shape: f32[3,16,16], index: 1, kind: input, shape index: {}]   ;;  %s32088_s2 = inlined_call_operand.hbm [shape: f32[12,64,64], index: 2, kind: input, shape index: {}]   ;;  %s32089_s3 = inlined_call_operand.vmem [shape: f32[8,64], index: 3, kind: input, shape index: {}]   ;;  %s32090_s4 = inlined_call_operand.vmem [shape: f32[64,64], index: 4, kind: input, shape index: {}]   ;;  %s32091_s5 = inlined_call_operand.vmem [shape: f32[1,16], index: 5, kind: input, shape index: {}]   ;;  %s32092_s6 = inlined_call_operand.vmem [shape: f32[8,16], index: 6, kind: input, shape index: {}]   ;;  %s32093_s7 = inlined_call_operand.vmem [shape: f32[64,32], index: 7, kind: input, shape index: {}]   ;;  %s32094_s8 = inlined_call_operand.hbm [shape: f32[8,32], index: 8, kind: output, shape index: {}]  }
   0x1   :  { %14 = vsyncpa [#allocation6], 0 }
   0x2   :  { %15 = vsyncpa [#allocation4], 0  ;;  %s27419_s27 = smov [#allocation2]  }
   0x3   :  { %s23_s28 = sshll.u32 %s27419_s27, 4  ;;  %s24_s28 = int_to_ptr.vmem [resolvable:$true] %s23_s28 }
   0x4   :  { %s27361_s29 = scalar_lea.vmem %s24_s28, 768  ;;  %p27366_p1 = scmp.lt.s32.totalorder %s24_s28, %s24_s28 }
   0x5   :  { %p27362_p0 = scmp.ne.s32.totalorder %s24_s28, %s27361_s29  ;;  %p27367_p2 = scmp.lt.s32.totalorder %s27361_s29, %s27361_s29 }
   0x7   :  { %p27368_p3 = por %p27367_p2, %p27366_p1 }
   0x9   :  { %p27369_p4 = pnand %p27368_p3, %p27362_p0 }
   0xb   :  { %27372 = shalt.err (!%p27369_p4)
}
   0xc   :  { %s27420_s30 = smov 128   ;;  %s27421_s9 = smov 8  }
   0xd   :  { %29 = dma.hbm_to_vmem [thread:$0]  %s32087_s1, 768, %s24_s28, [#allocation3], %s27420_s30, %s27420_s30, %s27421_s9  }
   0xe   :  { %s27422_s12 = smov [#allocation5]  }
   0xf   :  { %s35_s13 = sshll.u32 %s27422_s12, 4  ;;  %s36_s13 = int_to_ptr.vmem [resolvable:$true] %s35_s13 }
  0x10   :  { %s27381_s14 = scalar_lea.vmem %s36_s13, 12288  ;;  %p27386_p6 = scmp.lt.s32.totalorder %s36_s13, %s36_s13 }
  0x11   :  { %p27382_p5 = scmp.ne.s32.totalorder %s36_s13, %s27381_s14  ;;  %p27387_p7 = scmp.lt.s32.totalorder %s27381_s14, %s27381_s14 }
  0x13   :  { %p27388_p8 = por %p27387_p7, %p27386_p6 }
  0x15   :  { %p27389_p9 = pnand %p27388_p8, %p27382_p5 }
  0x17   :  { %27392 = shalt.err (!%p27389_p9)
}
  0x18   :  { %41 = dma.hbm_to_vmem [thread:$0]  %s32088_s2, 12288, %s36_s13, [#allocation6], %s27420_s30, %s27420_s30, %s27421_s9  }
  0x19   :  { %27413 = dma.done.wait [#allocation3], 768  }
  0x1a   :  { %27414 = vsyncadd [#allocation3], 4294966528 }
  0x1b   :  { %27415 = dma.done.wait [#allocation6], 12288  }
  0x1c   :  { %27416 = vsyncadd [#allocation6], 4294955008  ;;  %vm71_vm0 = vcmask 130048   ;;  %v59_v0 = vld [vmem:[%s32086_s0 + $0x8] sm:$0xff]  ;;  %v58_v1 = vld [vmem:[%s32086_s0] sm:$0xff]  ;;  %vm1108_vm1 = vcmask 523264  }
  0x1d   :  { %v27483_v2 = vand.u32 4294901760, %v59_v0  ;;  %v27485_v3 = vand.u32 4294901760, %v58_v1  ;;  %v69_v4 = vld [vmem:[#allocation2] sm:$0xff]  ;;  %v70_v5 = vld [vmem:[#allocation2 + $0x8] sm:$0xff]  ;;  %v589_v6 = vld [vmem:[#allocation2 + $0x10] sm:$0xff]  ;;  %vm27424_vm2 = vmmov 0  }
  0x1e   :  { %v73_v7 = vsel %vm71_vm0, %v69_v4, 0  ;;  %v76_v8 = vsel %vm71_vm0, %v70_v5, 0  ;;  %v590_v13 = vld [vmem:[#allocation2 + $0x18] sm:$0xff]  ;;  %v592_v14 = vsel %vm71_vm0, %v589_v6, 0  ;;  %v1107_v40 = vld [vmem:[#allocation5 + $0x78] sm:$0xff]  ;;  %v1106_v42 = vld [vmem:[#allocation5 + $0x70] sm:$0xff] }
  0x1f   :  { %24060 = vmatprep.subr.mxu0 %v27483_v2  ;;  %v27491_v9 = vsub.f32 %v59_v0, %v27483_v2  ;;  %v27493_v10 = vand.u32 4294901760, %v73_v7  ;;  %v27495_v11 = vand.u32 4294901760, %v76_v8  ;;  %v27498_v12 = vsub.f32 %v58_v1, %v27485_v3  ;;  %v1105_v45 = vld [vmem:[#allocation5 + $0x68] sm:$0xff]  ;;  %v1104_v49 = vld [vmem:[#allocation5 + $0x60] sm:$0xff]  ;;  %v1103_v54 = vld [vmem:[#allocation5 + $0x58] sm:$0xff] }
  0x20   :  { %24061 = vmatpush3.msra.mxu0 %v27483_v2  ;;  %v595_v19 = vsel %vm71_vm0, %v590_v13, 0  ;;  %v27529_v24 = vand.u32 4294901760, %v592_v14  ;;  %v27631_v41 = vand.u32 4294901760, %v1107_v40  ;;  %v27636_v44 = vand.u32 4294901760, %v1106_v42  ;;  %v1102_v60 = vld [vmem:[#allocation5 + $0x50] sm:$0xff]  ;;  %v1101_v4 = vld [vmem:[#allocation5 + $0x48] sm:$0xff] }
  0x21   :  { %32311 = vst [vmem:[#allocation11_spill] sm:$0xff] %v27493_v10  ;;  %32312 = vst [vmem:[#allocation12_spill] sm:$0xff] %v27495_v11  ;;  %24062 = vmatprep.subr.mxu0 %v27485_v3  ;;  %v27504_v15 = vand.u32 4294901760, %v27491_v9  ;;  %v27507_v16 = vsub.f32 %v73_v7, %v27493_v10  ;;  %v27510_v17 = vsub.f32 %v76_v8, %v27495_v11  ;;  %v27513_v18 = vand.u32 4294901760, %v27498_v12 }
  0x22   :  { %24071 = vmatprep.mubr.f32.mxu1 %v27493_v10  ;;  %24063 = vmatpush3.msra.mxu0 %v27485_v3  ;;  %32317 = vst [vmem:[#allocation17_spill] sm:$0xff] %v27529_v24  ;;  %v27539_v29 = vand.u32 4294901760, %v595_v19  ;;  %v27550_v32 = vsub.f32 %v592_v14, %v27529_v24  ;;  %v27634_v43 = vsub.f32 %v1107_v40, %v27631_v41  ;;  %v27646_v48 = vand.u32 4294901760, %v1105_v45  ;;  %v1100_v14 = vld [vmem:[#allocation5 + $0x40] sm:$0xff] }
  0x23   :  { %32313 = vst [vmem:[#allocation13_spill] sm:$0xff] %v27507_v16  ;;  %32314 = vst [vmem:[#allocation14_spill] sm:$0xff] %v27510_v17  ;;  %v197_v20 = vsub.f32 %v27491_v9, %v27504_v15  ;;  %v27521_v21 = vand.u32 4294901760, %v27507_v16  ;;  %v27524_v22 = vand.u32 4294901760, %v27510_v17  ;;  %v204_v23 = vsub.f32 %v27498_v12, %v27513_v18  ;;  %24074 = vmatprep.subr.mxu0 %v27491_v9 }
  0x24   :  { %32318 = vst [vmem:[#allocation18_spill] sm:$0xff] %v27539_v29  ;;  %32321 = vst [vmem:[#allocation21_spill] sm:$0xff] %v27550_v32  ;;  %v27555_v33 = vsub.f32 %v595_v19, %v27539_v29  ;;  %v27564_v34 = vand.u32 4294901760, %v27550_v32  ;;  %v27641_v46 = vand.u32 4294901760, %v27634_v43  ;;  %v27644_v47 = vsub.f32 %v1106_v42, %v27636_v44 }
  0x25   :  { %32315 = vst [vmem:[#allocation15_spill] sm:$0xff] %v27521_v21  ;;  %32316 = vst [vmem:[#allocation16_spill] sm:$0xff] %v27524_v22  ;;  %v27531_v25 = vand.u32 4294901760, %v197_v20  ;;  %v148_v26 = vsub.f32 %v27507_v16, %v27521_v21  ;;  %v158_v27 = vsub.f32 %v27510_v17, %v27524_v22  ;;  %v27537_v28 = vand.u32 4294901760, %v204_v23 }
  0x26   :  { %32322 = vst [vmem:[#allocation22_spill] sm:$0xff] %v27555_v33  ;;  %32323 = vst [vmem:[#allocation23_spill] sm:$0xff] %v27564_v34  ;;  %v27569_v35 = vand.u32 4294901760, %v27555_v33  ;;  %v667_v36 = vsub.f32 %v27550_v32, %v27564_v34  ;;  %v1228_v50 = vsub.f32 %v27634_v43, %v27641_v46  ;;  %v27653_v51 = vand.u32 4294901760, %v27644_v47 }
  0x27   :  { %24067 = vmatprep.subr.mxu1 %v27531_v25  ;;  %v27542_v30 = vand.u32 4294901760, %v148_v26  ;;  %v27544_v31 = vand.u32 4294901760, %v158_v27  ;;  %v27656_v52 = vsub.f32 %v1105_v45, %v27646_v48  ;;  %v27658_v53 = vand.u32 4294901760, %v1104_v49 }
  0x28   :  { %24068 = vmatpush3.msra.mxu1 %v27531_v25  ;;  %32324 = vst [vmem:[#allocation24_spill] sm:$0xff] %v27569_v35  ;;  %v677_v37 = vsub.f32 %v27555_v33, %v27569_v35  ;;  %v27589_v38 = vand.u32 4294901760, %v667_v36  ;;  %v1229_v55 = vand.u32 4294901760, %v1228_v50  ;;  %v1235_v56 = vsub.f32 %v27644_v47, %v27653_v51 }
  0x29   :  { %32319 = vst [vmem:[#allocation19_spill] sm:$0xff] %v27542_v30  ;;  %32320 = vst [vmem:[#allocation20_spill] sm:$0xff] %v27544_v31  ;;  %24064 = vmatprep.mubr.f32.mxu0 %v27542_v30  ;;  %24069 = vmatprep.subr.mxu1 %v27537_v28  ;;  %v27665_v57 = vand.u32 4294901760, %v27656_v52  ;;  %v27668_v58 = vsub.f32 %v1104_v49, %v27658_v53  ;;  %v27671_v59 = vand.u32 4294901760, %v1103_v54  ;;  %v27679_v0 = vand.u32 4294901760, %v1102_v60 }
  0x2a   :  { %24065 = vmatmul.mubr.f32.vlgmr.msra.gmra.mxu0 %v27544_v31  ;;  %24070 = vmatpush3.msra.mxu1 %v27537_v28  ;;  %32325 = vst [vmem:[#allocation25_spill] sm:$0xff] %v27589_v38  ;;  %v27593_v39 = vand.u32 4294901760, %v677_v37  ;;  %v1236_v61 = vand.u32 4294901760, %v1235_v56  ;;  %v27690_v8 = vand.u32 4294901760, %v1101_v4  ;;  %v27703_v26 = vand.u32 4294901760, %v1100_v14 }
  0x2b   :  { %24075 = vmatpush3.msra.mxu0 %v27491_v9  ;;  %24072 = vmatmul.mubr.f32.vlgmr.msra.gmra.mxu1 %v27495_v11  ;;  %v1242_v62 = vsub.f32 %v27656_v52, %v27665_v57  ;;  %v27677_v63 = vand.u32 4294901760, %v27668_v58  ;;  %v27682_v1 = vsub.f32 %v1103_v54, %v27671_v59  ;;  %v27688_v7 = vsub.f32 %v1102_v60, %v27679_v0 }
  0x2c   :  { %24076 = vmatprep.subr.mxu0 %v27498_v12  ;;  %24081 = vmatprep.subr.mxu1 %v27483_v2  ;;  %32326 = vst [vmem:[#allocation26_spill] sm:$0xff] %v27593_v39  ;;  %v27701_v23 = vsub.f32 %v1101_v4, %v27690_v8  ;;  %v27715_v40 = vsub.f32 %v1100_v14, %v27703_v26  ;;  %vm22386_vm3 = vcmask 261120  }
  0x2d   :  { %24077 = vmatpush3.msra.mxu0 %v27498_v12  ;;  %24078 = vmatprep.mubr.f32.mxu0 %v27507_v16  ;;  %v1243_v5 = vand.u32 4294901760, %v1242_v62  ;;  %v1249_v6 = vsub.f32 %v27668_v58, %v27677_v63  ;;  %v27694_v13 = vand.u32 4294901760, %v27682_v1  ;;  %v27698_v20 = vand.u32 4294901760, %v27688_v7 }
  0x2e   :  { %24082 = vmatpush3.msra.mxu1 %v27483_v2  ;;  %24079 = vmatmul.mubr.f32.vlgmr.msra.gmra.mxu0 %v27510_v17  ;;  %v27712_v37 = vand.u32 4294901760, %v27701_v23  ;;  %v27722_v50 = vand.u32 4294901760, %v27715_v40 }
  0x2f   :  { %24083 = vmatprep.subr.mxu1 %v27485_v3  ;;  %24088 = vmatprep.subr.mxu0 %v27504_v15  ;;  %v1250_v19 = vand.u32 4294901760, %v1249_v6  ;;  %v1256_v27 = vsub.f32 %v27682_v1, %v27694_v13  ;;  %v1263_v36 = vsub.f32 %v27688_v7, %v27698_v20 }
  0x30   :  { %24084 = vmatpush3.msra.mxu1 %v27485_v3  ;;  %24085 = vmatprep.mubr.f32.mxu1 %v27521_v21  ;;  %v1270_v49 = vsub.f32 %v27701_v23, %v27712_v37 }
  0x31   :  { %24089 = vmatpush3.msra.mxu0 %v27504_v15  ;;  %24086 = vmatmul.mubr.f32.vlgmr.msra.gmra.mxu1 %v27524_v22  ;;  %v1257_v42 = vand.u32 4294901760, %v1256_v27  ;;  %v1264_v45 = vand.u32 4294901760, %v1263_v36 }
  0x32   :  { %24090 = vmatprep.subr.mxu0 %v27513_v18  ;;  %24095 = vmatprep.subr.mxu1 %v27483_v2  ;;  %v1271_v54 = vand.u32 4294901760, %v1270_v49 }
  0x33   :  { %24091 = vmatpush3.msra.mxu0 %v27513_v18  ;;  %24092 = vmatprep.mubr.f32.mxu0 %v27493_v10 }
  0x34   :  { %24096 = vmatpush3.msra.mxu1 %v27483_v2  ;;  %24093 = vmatmul.mubr.f32.vlgmr.msra.gmra.mxu0 %v27495_v11 }
  0x35   :  { %24097 = vmatprep.subr.mxu1 %v27485_v3  ;;  %24102 = vmatprep.subr.mxu0 %v27483_v2 }
  0x36   :  { %24098 = vmatpush3.msra.mxu1 %v27485_v3  ;;  %24099 = vmatprep.mubr.f32.mxu1 %v27493_v10 }
  0x37   :  { %24103 = vmatpush3.msra.mxu0 %v27483_v2  ;;  %24100 = vmatmul.mubr.f32.vlgmr.msra.gmra.mxu1 %v27495_v11 }
  0x38   :  { %24104 = vmatprep.subr.mxu0 %v27485_v3  ;;  %24109 = vmatprep.subr.mxu1 %v27531_v25 }
  0x39   :  { %24105 = vmatpush3.msra.mxu0 %v27485_v3  ;;  %24106 = vmatprep.mubr.f32.mxu0 %v27589_v38 }
  0x3a   :  { %24110 = vmatpush3.msra.mxu1 %v27531_v25  ;;  %24107 = vmatmul.mubr.f32.vlgmr.msra.gmra.mxu0 %v27593_v39 }
  0x3b   :  { %24111 = vmatprep.subr.mxu1 %v27537_v28  ;;  %24116 = vmatprep.subr.mxu0 %v27491_v9 }
  0x3c   :  { %24112 = vmatpush3.msra.mxu1 %v27537_v28  ;;  %24113 = vmatprep.mubr.f32.mxu1 %v27529_v24 }
  0x3d   :  { %24117 = vmatpush3.msra.mxu0 %v27491_v9  ;;  %24114 = vmatmul.mubr.f32.vlgmr.msra.gmra.mxu1 %v27539_v29 }
  0x3e   :  { %24118 = vmatprep.subr.mxu0 %v27498_v12  ;;  %24123 = vmatprep.subr.mxu1 %v27483_v2 }
  0x3f   :  { %24119 = vmatpush3.msra.mxu0 %v27498_v12  ;;  %24120 = vmatprep.mubr.f32.mxu0 %v27550_v32 }
  0x40   :  { %24124 = vmatpush3.msra.mxu1 %v27483_v2  ;;  %24121 = vmatmul.mubr.f32.vlgmr.msra.gmra.mxu0 %v27555_v33 }
  0x41   :  { %24125 = vmatprep.subr.mxu1 %v27485_v3  ;;  %24130 = vmatprep.subr.mxu0 %v27504_v15 }
  0x42   :  { %24126 = vmatpush3.msra.mxu1 %v27485_v3  ;;  %24127 = vmatprep.mubr.f32.mxu1 %v27564_v34 }
  0x43   :  { %24131 = vmatpush3.msra.mxu0 %v27504_v15  ;;  %24128 = vmatmul.mubr.f32.vlgmr.msra.gmra.mxu1 %v27569_v35 }
  0x44   :  { %24132 = vmatprep.subr.mxu0 %v27513_v18  ;;  %24137 = vmatprep.subr.mxu1 %v27483_v2 }
  0x45   :  { %24133 = vmatpush3.msra.mxu0 %v27513_v18  ;;  %24134 = vmatprep.mubr.f32.mxu0 %v27529_v24 }
  0x46   :  { %24138 = vmatpush3.msra.mxu1 %v27483_v2  ;;  %24135 = vmatmul.mubr.f32.vlgmr.msra.gmra.mxu0 %v27539_v29 }
  0x47   :  { %24139 = vmatprep.subr.mxu1 %v27485_v3  ;;  %24141 = vmatprep.mubr.f32.mxu1 %v27529_v24 }
  0x48   :  { %24140 = vmatpush3.msra.mxu1 %v27485_v3  ;;  %24144 = vmatprep.subr.mxu0 %v27631_v41 }
  0x49   :  { %24142 = vmatmul.mubr.f32.vlgmr.msra.gmra.mxu1 %v27539_v29  ;;  %24145 = vmatpush3.msra.mxu0 %v27631_v41 }
  0x4a   :  { %24146 = vmatprep.subr.mxu0 %v27636_v44  ;;  %24163 = vmatprep.subr.mxu1 %v1229_v55 }
  0x4b   :  { %24147 = vmatpush3.msra.mxu0 %v27636_v44  ;;  %24164 = vmatpush3.msra.mxu1 %v1229_v55  ;;  %v1277_v55 = vsub.f32 %v27715_v40, %v27722_v50 }
  0x4c   :  { %24148 = vmatprep.subr.mxu0 %v27646_v48  ;;  %24165 = vmatprep.subr.mxu1 %v1236_v61 }
  0x4d   :  { %24149 = vmatpush3.msra.mxu0 %v27646_v48  ;;  %24166 = vmatpush3.msra.mxu1 %v1236_v61  ;;  %v1278_v56 = vand.u32 4294901760, %v1277_v55 }
  0x4e   :  { %24150 = vmatprep.subr.mxu0 %v27658_v53  ;;  %24167 = vmatprep.subr.mxu1 %v1243_v5 }
  0x4f   :  { %24151 = vmatpush3.msra.mxu0 %v27658_v53  ;;  %24168 = vmatpush3.msra.mxu1 %v1243_v5 }
  0x50   :  { %24152 = vmatprep.subr.mxu0 %v27671_v59  ;;  %24169 = vmatprep.subr.mxu1 %v1250_v19 }
  0x51   :  { %24153 = vmatpush3.msra.mxu0 %v27671_v59  ;;  %24170 = vmatpush3.msra.mxu1 %v1250_v19 }
  0x52   :  { %24154 = vmatprep.subr.mxu0 %v27679_v0  ;;  %24171 = vmatprep.subr.mxu1 %v1257_v42 }
  0x53   :  { %24155 = vmatpush3.msra.mxu0 %v27679_v0  ;;  %24172 = vmatpush3.msra.mxu1 %v1257_v42 }
  0x54   :  { %24156 = vmatprep.subr.mxu0 %v27690_v8  ;;  %24173 = vmatprep.subr.mxu1 %v1264_v45 }
  0x55   :  { %24157 = vmatpush3.msra.mxu0 %v27690_v8  ;;  %24174 = vmatpush3.msra.mxu1 %v1264_v45 }
  0x56   :  { %24158 = vmatprep.subr.mxu0 %v27703_v26  ;;  %24175 = vmatprep.subr.mxu1 %v1271_v54 }
  0x57   :  { %24159 = vmatpush3.msra.mxu0 %v27703_v26  ;;  %24176 = vmatpush3.msra.mxu1 %v1271_v54 }
  0x58   :  { %24182 = vmatprep.subr.mxu0 %v27634_v43  ;;  %24177 = vmatprep.subr.mxu1 %v1278_v56 }
  0x59   :  { %24178 = vmatpush3.msra.mxu1 %v1278_v56 }
  0x5a   :  { %24201 = vmatprep.subr.mxu1 %v27631_v41 }
  0xea   :  { %v24066_v60 = vpop.f32.mrf.mxu0 }
  0xeb   :  { %v24073_v61 = vpop.f32.mrf.mxu1 }
  0xec   :  { %v151_v62 = vpop.f32.mrf.mxu0  ;;  %v249_v4 = vadd.f32 %v24073_v61, %v24066_v60 }
  0xed   :  { %v242_v5 = vpop.f32.mrf.mxu1 }
  0xee   :  { %v24080_v6 = vpop.f32.mrf.mxu0 }
  0xef   :  { %v332_v14 = vadd.f32 %v24080_v6, %v249_v4 }
  0xf0   :  { %v324_v19 = vpop.f32.mrf.mxu0 }
  0xf1   :  { %v24087_v27 = vpop.f32.mrf.mxu1 }
  0xf2   :  { %v415_v36 = vadd.f32 %v24087_v27, %v332_v14 }
  0xf3   :  { %v27729_v42 = vpop.f32.mrf.mxu1 }
  0xf4   :  { %v24094_v45 = vpop.f32.mrf.mxu0 }
  0xf5   :  { %v498_v49 = vadd.f32 %v24094_v45, %v415_v36 }
  0xf6   :  { %v27731_v55 = vpop.f32.mrf.mxu0 }
  0xf7   :  { %v24101_v54 = vpop.f32.mrf.mxu1 }
  0xf8   :  { %v27733_v56 = vadd.f32 %v24101_v54, %v498_v49 }
  0xf9   :  { %v27735_v35 = vpop.f32.mrf.mxu1 }
  0xfa   :  { %v24108_v34 = vpop.f32.mrf.mxu0 }
  0xfc   :  { %v670_v29 = vpop.f32.mrf.mxu0 }
  0xfd   :  { %v24115_v60 = vpop.f32.mrf.mxu1 }
  0xfe   :  { %v768_v61 = vadd.f32 %v24115_v60, %v24108_v34 }
  0xff   :  { %v761_v24 = vpop.f32.mrf.mxu1 }
 0x100   :  { %v762_v4 = vadd.f32 %v761_v24, %v670_v29  ;;  %v24122_v6 = vpop.f32.mrf.mxu0 }
 0x101   :  { %v851_v33 = vadd.f32 %v24122_v6, %v768_v61 }
 0x102   :  { %v843_v14 = vpop.f32.mrf.mxu0 }
 0x103   :  { %v844_v27 = vadd.f32 %v843_v14, %v762_v4  ;;  %v24129_v32 = vpop.f32.mrf.mxu1 }
 0x104   :  { %v934_v39 = vadd.f32 %v24129_v32, %v851_v33 }
 0x105   :  { %v925_v36 = vpop.f32.mrf.mxu1 }
 0x106   :  { %v926_v45 = vadd.f32 %v925_v36, %v844_v27  ;;  %v24136_v38 = vpop.f32.mrf.mxu0 }
 0x107   :  { %v1017_v22 = vadd.f32 %v24136_v38, %v934_v39 }
 0x108   :  { %v1010_v49 = vpop.f32.mrf.mxu0 }
 0x109   :  { %v1011_v54 = vadd.f32 %v1010_v49, %v926_v45  ;;  %v24143_v21 = vpop.f32.mrf.mxu1  ;;  %v582_v45 = vld [vmem:[#allocation5 + $0x10] sm:$0xff] }
 0x10a   :  { %v1096_v11 = vadd.f32 %v24143_v21, %v1017_v22  ;;  %v243_v22 = vadd.f32 %v242_v5, %v151_v62  ;;  %v587_v5 = vld [vmem:[#allocation5 + $0x38] sm:$0xff] }
 0x10b   :  { %v1089_v17 = vpop.f32.mrf.mxu1 }
 0x10c   :  { %v1113_v34 = vsel %vm1108_vm1, %v1096_v11, 0  ;;  %v1090_v60 = vadd.f32 %v1089_v17, %v1011_v54  ;;  %v325_v6 = vadd.f32 %v324_v19, %v243_v22 }
 0x10d   :  { %v27738_v24 = vand.u32 4294901760, %v1113_v34 }
 0x10e   :  { %v1110_v29 = vsel %vm1108_vm1, %v1090_v60, 0  ;;  %v407_v62 = vadd.f32 %v27729_v42, %v325_v6 }
 0x10f   :  { %v27742_v61 = vsub.f32 %v1113_v34, %v27738_v24  ;;  %v27744_v32 = vand.u32 4294901760, %v1110_v29  ;;  %v27831_v34 = vand.u32 4294901760, %v582_v45 }
 0x110   :  { %v492_v19 = vadd.f32 %v27731_v55, %v407_v62  ;;  %v584_v55 = vld [vmem:[#allocation5 + $0x20] sm:$0xff] }
 0x111   :  { %v1200_v33 = vand.u32 4294901760, %v27742_v61  ;;  %v1189_v38 = vsub.f32 %v1110_v29, %v27744_v32  ;;  %24179 = vmatprep.mubr.f32.mxu1 %v27744_v32  ;;  %v27800_v36 = vand.u32 4294901760, %v584_v55 }
 0x112   :  { %24180 = vmatmul.mubr.f32.vlgmr.msra.gmra.mxu1 %v27738_v24  ;;  %v571_v14 = vadd.f32 %v27735_v35, %v492_v19  ;;  %v1699_v19 = vsel %vm1108_vm1, %v27733_v56, 0 }
 0x113   :  { %24202 = vmatpush3.msra.mxu1 %v27631_v41  ;;  %v1190_v11 = vand.u32 4294901760, %v1189_v38  ;;  %v1201_v17 = vsub.f32 %v27742_v61, %v1200_v33  ;;  %v27823_v49 = vsub.f32 %v584_v55, %v27800_v36  ;;  %v27909_v55 = vand.u32 4294901760, %v1699_v19 }
 0x114   :  { %24203 = vmatprep.subr.mxu1 %v27636_v44 }
 0x115   :  { %24204 = vmatpush3.msra.mxu1 %v27636_v44  ;;  %24217 = vmatprep.mubr.f32.mxu1 %v1190_v11  ;;  %v1191_v21 = vsub.f32 %v1189_v38, %v1190_v11  ;;  %v1202_v4 = vand.u32 4294901760, %v1201_v17 }
 0x116   :  { %24205 = vmatprep.subr.mxu1 %v27646_v48 }
 0x117   :  { %24206 = vmatpush3.msra.mxu1 %v27646_v48  ;;  %v1192_v39 = vand.u32 4294901760, %v1191_v21 }
 0x118   :  { %24207 = vmatprep.subr.mxu1 %v27658_v53 }
 0x119   :  { %24208 = vmatpush3.msra.mxu1 %v27658_v53  ;;  %24160 = vmatprep.mubr.f32.mxu0 %v1192_v39 }
 0x11a   :  { %24209 = vmatprep.subr.mxu1 %v27671_v59  ;;  %24161 = vmatmul.mubr.f32.vlgmr.msra.gmra.mxu0 %v1202_v4 }
 0x11b   :  { %24183 = vmatpush3.msra.mxu0 %v27634_v43  ;;  %24210 = vmatpush3.msra.mxu1 %v27671_v59  ;;  %v27773_v43 = vand.u32 4294901760, %v587_v5 }
 0x11c   :  { %24184 = vmatprep.subr.mxu0 %v27644_v47  ;;  %24198 = vmatprep.mubr.f32.mxu0 %v1189_v38  ;;  %v27858_v38 = vsub.f32 %v582_v45, %v27831_v34 }
 0x11d   :  { %24211 = vmatprep.subr.mxu1 %v27679_v0  ;;  %24185 = vmatpush3.msra.mxu0 %v27644_v47  ;;  %v586_v47 = vld [vmem:[#allocation5 + $0x30] sm:$0xff] }
 0x11e   :  { %24212 = vmatpush3.msra.mxu1 %v27679_v0  ;;  %24186 = vmatprep.subr.mxu0 %v27656_v52  ;;  %v27781_v42 = vand.u32 4294901760, %v586_v47  ;;  %v27881_v39 = vand.u32 4294901760, %v27858_v38 }
 0x11f   :  { %24213 = vmatprep.subr.mxu1 %v27690_v8  ;;  %24187 = vmatpush3.msra.mxu0 %v27656_v52  ;;  %v585_v52 = vld [vmem:[#allocation5 + $0x28] sm:$0xff] }
 0x120   :  { %24214 = vmatpush3.msra.mxu1 %v27690_v8  ;;  %24188 = vmatprep.subr.mxu0 %v27668_v58  ;;  %v27791_v27 = vand.u32 4294901760, %v585_v52 }
 0x121   :  { %24215 = vmatprep.subr.mxu1 %v27703_v26  ;;  %24189 = vmatpush3.msra.mxu0 %v27668_v58  ;;  %v27786_v58 = vsub.f32 %v587_v5, %v27773_v43  ;;  %v1849_v5 = vsub.f32 %v27858_v38, %v27881_v39 }
 0x122   :  { %24216 = vmatpush3.msra.mxu1 %v27703_v26  ;;  %24190 = vmatprep.subr.mxu0 %v27682_v1 }
 0x123   :  { %24218 = vmatmul.mubr.f32.vlgmr.msra.gmra.mxu1 %v1200_v33  ;;  %24239 = vmatprep.subr.mxu1 %v27631_v41  ;;  %v27805_v35 = vand.u32 4294901760, %v27786_v58  ;;  %v1850_v56 = vand.u32 4294901760, %v1849_v5 }
 0x124   :  { %24191 = vmatpush3.msra.mxu0 %v27682_v1  ;;  %24240 = vmatpush3.msra.mxu1 %v27631_v41  ;;  %v583_v41 = vld [vmem:[#allocation5 + $0x18] sm:$0xff]  ;;  %v27798_v1 = vsub.f32 %v586_v47, %v27781_v42 }
 0x125   :  { %24255 = vmatprep.mubr.f32.mxu1 %v27744_v32  ;;  %24192 = vmatprep.subr.mxu0 %v27688_v7 }
 0x126   :  { %24241 = vmatprep.subr.mxu1 %v27636_v44  ;;  %24193 = vmatpush3.msra.mxu0 %v27688_v7  ;;  %v27811_v7 = vsub.f32 %v585_v52, %v27791_v27 }
 0x127   :  { %24242 = vmatpush3.msra.mxu1 %v27636_v44  ;;  %24194 = vmatprep.subr.mxu0 %v27701_v23  ;;  %v1696_v44 = vsel %vm1108_vm1, %v571_v14, 0 }
 0x128   :  { %24243 = vmatprep.subr.mxu1 %v27646_v48  ;;  %24195 = vmatpush3.msra.mxu0 %v27701_v23  ;;  %v27813_v23 = vand.u32 4294901760, %v583_v41  ;;  %v27825_v54 = vand.u32 4294901760, %v1696_v44  ;;  %v27836_v60 = vand.u32 4294901760, %v27811_v7 }
 0x129   :  { %24244 = vmatpush3.msra.mxu1 %v27646_v48  ;;  %24196 = vmatprep.subr.mxu0 %v27715_v40  ;;  %v27820_v48 = vand.u32 4294901760, %v27798_v1 }
 0x12a   :  { %24245 = vmatprep.subr.mxu1 %v27658_v53  ;;  %24197 = vmatpush3.msra.mxu0 %v27715_v40  ;;  %v581_v40 = vld [vmem:[#allocation5 + $0x8] sm:$0xff]  ;;  %v27839_v29 = vsub.f32 %v583_v41, %v27813_v23  ;;  %v27853_v33 = vsub.f32 %v1696_v44, %v27825_v54  ;;  %v1828_v11 = vsub.f32 %v27811_v7, %v27836_v60 }
 0x12b   :  { %24246 = vmatpush3.msra.mxu1 %v27658_v53  ;;  %24199 = vmatmul.mubr.f32.vlgmr.msra.gmra.mxu0 %v27742_v61  ;;  %v1814_v53 = vsub.f32 %v27786_v58, %v27805_v35  ;;  %v580_v61 = vld [vmem:[#allocation5] sm:$0xff] }
 0x12c   :  { %24220 = vmatprep.subr.mxu0 %v27641_v46  ;;  %24247 = vmatprep.subr.mxu1 %v27671_v59  ;;  %v27867_v17 = vand.u32 4294901760, %v27839_v29  ;;  %v1776_v22 = vand.u32 4294901760, %v27853_v33 }
 0x12d   :  { %24221 = vmatpush3.msra.mxu0 %v27641_v46  ;;  %24236 = vmatprep.mubr.f32.mxu0 %v27744_v32  ;;  %v27843_v46 = vand.u32 4294901760, %v581_v40  ;;  %v27850_v32 = vand.u32 4294901760, %v27823_v49 }
 0x12e   :  { %24248 = vmatpush3.msra.mxu1 %v27671_v59  ;;  %24222 = vmatprep.subr.mxu0 %v27653_v51  ;;  %v1821_v59 = vsub.f32 %v27798_v1, %v27820_v48  ;;  %v1842_v4 = vsub.f32 %v27839_v29, %v27867_v17 }
 0x12f   :  { %24249 = vmatprep.subr.mxu1 %v27679_v0  ;;  %24223 = vmatpush3.msra.mxu0 %v27653_v51  ;;  %v1815_v51 = vand.u32 4294901760, %v1814_v53  ;;  %v1835_v21 = vsub.f32 %v27823_v49, %v27850_v32 }
 0x130   :  { %24250 = vmatpush3.msra.mxu1 %v27679_v0  ;;  %24224 = vmatprep.subr.mxu0 %v27665_v57  ;;  %v27860_v0 = vand.u32 4294901760, %v580_v61  ;;  %v1843_v52 = vand.u32 4294901760, %v1842_v4 }
 0x131   :  { %24251 = vmatprep.subr.mxu1 %v27690_v8  ;;  %24225 = vmatpush3.msra.mxu0 %v27665_v57  ;;  %v27872_v57 = vsub.f32 %v581_v40, %v27843_v46  ;;  %v1836_v62 = vand.u32 4294901760, %v1835_v21 }
 0x132   :  { %24252 = vmatpush3.msra.mxu1 %v27690_v8  ;;  %24226 = vmatprep.subr.mxu0 %v27677_v63  ;;  %v1822_v8 = vand.u32 4294901760, %v1821_v59 }
 0x133   :  { %24253 = vmatprep.subr.mxu1 %v27703_v26  ;;  %24227 = vmatpush3.msra.mxu0 %v27677_v63  ;;  %v27884_v63 = vsub.f32 %v580_v61, %v27860_v0  ;;  %v27892_v6 = vand.u32 4294901760, %v27872_v57 }
 0x134   :  { %24254 = vmatpush3.msra.mxu1 %v27703_v26  ;;  %24228 = vmatprep.subr.mxu0 %v27694_v13  ;;  %v1829_v26 = vand.u32 4294901760, %v1828_v11 }
 0x135   :  { %24256 = vmatmul.mubr.f32.vlgmr.msra.gmra.mxu1 %v27738_v24  ;;  %24277 = vmatprep.subr.mxu1 %v1815_v51  ;;  %v27900_v47 = vand.u32 4294901760, %v27884_v63 }
 0x136   :  { %24229 = vmatpush3.msra.mxu0 %v27694_v13  ;;  %24278 = vmatpush3.msra.mxu1 %v1815_v51  ;;  %v1777_v13 = vsub.f32 %v27853_v33, %v1776_v22 }
 0x137   :  { %24293 = vmatprep.mubr.f32.mxu1 %v27825_v54  ;;  %24230 = vmatprep.subr.mxu0 %v27698_v20 }
 0x138   :  { %24279 = vmatprep.subr.mxu1 %v1822_v8  ;;  %24231 = vmatpush3.msra.mxu0 %v27698_v20  ;;  %v1856_v20 = vsub.f32 %v27872_v57, %v27892_v6  ;;  %v1778_v14 = vand.u32 4294901760, %v1777_v13 }
 0x139   :  { %24280 = vmatpush3.msra.mxu1 %v1822_v8  ;;  %24232 = vmatprep.subr.mxu0 %v27712_v37 }
 0x13a   :  { %24281 = vmatprep.subr.mxu1 %v1829_v26  ;;  %24233 = vmatpush3.msra.mxu0 %v27712_v37  ;;  %v1863_v37 = vsub.f32 %v27884_v63, %v27900_v47  ;;  %v1857_v41 = vand.u32 4294901760, %v1856_v20 }
 0x13b   :  { %24282 = vmatpush3.msra.mxu1 %v1829_v26  ;;  %24234 = vmatprep.subr.mxu0 %v27722_v50  ;;  %v2794_v26 = vld [vmem:[#allocation5 + $0x88] sm:$0xff] }
 0x13c   :  { %24283 = vmatprep.subr.mxu1 %v1836_v62  ;;  %24235 = vmatpush3.msra.mxu0 %v27722_v50  ;;  %v27918_v50 = vsub.f32 %v1699_v19, %v27909_v55  ;;  %v28127_v13 = vand.u32 4294901760, %v2794_v26 }
 0x13d   :  { %24284 = vmatpush3.msra.mxu1 %v1836_v62  ;;  %24237 = vmatmul.mubr.f32.vlgmr.msra.gmra.mxu0 %v27738_v24  ;;  %v1864_v24 = vand.u32 4294901760, %v1863_v37 }
 0x13e   :  { %24258 = vmatprep.subr.mxu0 %v27773_v43  ;;  %24285 = vmatprep.subr.mxu1 %v1843_v52  ;;  %v1786_v44 = vand.u32 4294901760, %v27918_v50  ;;  %v28138_v20 = vsub.f32 %v2794_v26, %v28127_v13 }
 0x13f   :  { %24259 = vmatpush3.msra.mxu0 %v27773_v43  ;;  %24274 = vmatprep.mubr.f32.mxu0 %v1778_v14 }
 0x140   :  { %24286 = vmatpush3.msra.mxu1 %v1843_v52  ;;  %24260 = vmatprep.subr.mxu0 %v27781_v42  ;;  %v1787_v45 = vsub.f32 %v27918_v50, %v1786_v44  ;;  %v28149_v37 = vand.u32 4294901760, %v28138_v20 }
 0x141   :  { %24287 = vmatprep.subr.mxu1 %v1850_v56  ;;  %24261 = vmatpush3.msra.mxu0 %v27781_v42 }
 0x142   :  { %24288 = vmatpush3.msra.mxu1 %v1850_v56  ;;  %24262 = vmatprep.subr.mxu0 %v27791_v27  ;;  %v1788_v40 = vand.u32 4294901760, %v1787_v45 }
 0x143   :  { %24289 = vmatprep.subr.mxu1 %v1857_v41  ;;  %24263 = vmatpush3.msra.mxu0 %v27791_v27 }
 0x144   :  { %24290 = vmatpush3.msra.mxu1 %v1857_v41  ;;  %24264 = vmatprep.subr.mxu0 %v27800_v36 }
 0x145   :  { %24291 = vmatprep.subr.mxu1 %v1864_v24  ;;  %24265 = vmatpush3.msra.mxu0 %v27800_v36 }
 0x146   :  { %24292 = vmatpush3.msra.mxu1 %v1864_v24  ;;  %24266 = vmatprep.subr.mxu0 %v27813_v23 }
 0x147   :  { %24294 = vmatmul.mubr.f32.vlgmr.msra.gmra.mxu1 %v27909_v55  ;;  %24315 = vmatprep.subr.mxu1 %v27773_v43 }
 0x148   :  { %24267 = vmatpush3.msra.mxu0 %v27813_v23  ;;  %24316 = vmatpush3.msra.mxu1 %v27773_v43 }
 0x149   :  { %24331 = vmatprep.mubr.f32.mxu1 %v1776_v22  ;;  %24268 = vmatprep.subr.mxu0 %v27831_v34 }
 0x14a   :  { %24317 = vmatprep.subr.mxu1 %v27781_v42  ;;  %24269 = vmatpush3.msra.mxu0 %v27831_v34 }
 0x14b   :  { %24318 = vmatpush3.msra.mxu1 %v27781_v42  ;;  %24270 = vmatprep.subr.mxu0 %v27843_v46 }
 0x14c   :  { %24319 = vmatprep.subr.mxu1 %v27791_v27  ;;  %24271 = vmatpush3.msra.mxu0 %v27843_v46 }
 0x14d   :  { %24320 = vmatpush3.msra.mxu1 %v27791_v27  ;;  %24272 = vmatprep.subr.mxu0 %v27860_v0 }
 0x14e   :  { %24321 = vmatprep.subr.mxu1 %v27800_v36  ;;  %24273 = vmatpush3.msra.mxu0 %v27860_v0 }
 0x14f   :  { %24322 = vmatpush3.msra.mxu1 %v27800_v36  ;;  %24275 = vmatmul.mubr.f32.vlgmr.msra.gmra.mxu0 %v1788_v40 }
 0x150   :  { %24296 = vmatprep.subr.mxu0 %v27786_v58  ;;  %24323 = vmatprep.subr.mxu1 %v27813_v23 }
 0x151   :  { %24297 = vmatpush3.msra.mxu0 %v27786_v58  ;;  %24312 = vmatprep.mubr.f32.mxu0 %v27853_v33  ;;  %v2282_v58 = vld [vmem:[#allocation2 + $0x20] sm:$0xff]  ;;  %v2796_v33 = vld [vmem:[#allocation5 + $0x98] sm:$0xff] }
 0x152   :  { %24324 = vmatpush3.msra.mxu1 %v27813_v23  ;;  %24298 = vmatprep.subr.mxu0 %v27798_v1 }
 0x153   :  { %24325 = vmatprep.subr.mxu1 %v27831_v34  ;;  %24299 = vmatpush3.msra.mxu0 %v27798_v1  ;;  %v2285_v1 = vsel %vm71_vm0, %v2282_v58, 0 }
 0x154   :  { %24326 = vmatpush3.msra.mxu1 %v27831_v34  ;;  %24300 = vmatprep.subr.mxu0 %v27811_v7 }
 0x155   :  { %24327 = vmatprep.subr.mxu1 %v27843_v46  ;;  %24301 = vmatpush3.msra.mxu0 %v27811_v7  ;;  %v2283_v7 = vld [vmem:[#allocation2 + $0x28] sm:$0xff] }
 0x156   :  { %24328 = vmatpush3.msra.mxu1 %v27843_v46  ;;  %24302 = vmatprep.subr.mxu0 %v27823_v49 }
 0x157   :  { %24329 = vmatprep.subr.mxu1 %v27860_v0  ;;  %24303 = vmatpush3.msra.mxu0 %v27823_v49  ;;  %v2288_v49 = vsel %vm71_vm0, %v2283_v7, 0 }
 0x158   :  { %24330 = vmatpush3.msra.mxu1 %v27860_v0  ;;  %24304 = vmatprep.subr.mxu0 %v27839_v29 }
 0x159   :  { %24332 = vmatmul.mubr.f32.vlgmr.msra.gmra.mxu1 %v1786_v44  ;;  %24353 = vmatprep.subr.mxu1 %v27773_v43  ;;  %v2962_v44 = vsub.f32 %v28138_v20, %v28149_v37 }
 0x15a   :  { %24305 = vmatpush3.msra.mxu0 %v27839_v29  ;;  %24354 = vmatpush3.msra.mxu1 %v27773_v43  ;;  %v27976_v43 = vand.u32 4294901760, %v2285_v1  ;;  %v2797_v29 = vld [vmem:[#allocation5 + $0xa0] sm:$0xff] }
 0x15b   :  { %24369 = vmatprep.mubr.f32.mxu1 %v27825_v54  ;;  %24306 = vmatprep.subr.mxu0 %v27858_v38  ;;  %v2963_v40 = vand.u32 4294901760, %v2962_v44 }
 0x15c   :  { %24355 = vmatprep.subr.mxu1 %v27781_v42  ;;  %24307 = vmatpush3.msra.mxu0 %v27858_v38  ;;  %32327 = vst [vmem:[#allocation27_spill] sm:$0xff] %v27976_v43 }
 0x15d   :  { %24356 = vmatpush3.msra.mxu1 %v27781_v42  ;;  %24308 = vmatprep.subr.mxu0 %v27872_v57  ;;  %v27985_v42 = vand.u32 4294901760, %v2288_v49 }
 0x15e   :  { %24357 = vmatprep.subr.mxu1 %v27791_v27  ;;  %24309 = vmatpush3.msra.mxu0 %v27872_v57  ;;  %v2795_v57 = vld [vmem:[#allocation5 + $0x90] sm:$0xff] }
 0x15f   :  { %24358 = vmatpush3.msra.mxu1 %v27791_v27  ;;  %24310 = vmatprep.subr.mxu0 %v27884_v63  ;;  %32328 = vst [vmem:[#allocation28_spill] sm:$0xff] %v27985_v42  ;;  %v27990_v27 = vsub.f32 %v2285_v1, %v27976_v43 }
 0x160   :  { %24359 = vmatprep.subr.mxu1 %v27800_v36  ;;  %24311 = vmatpush3.msra.mxu0 %v27884_v63 }
 0x161   :  { %24360 = vmatpush3.msra.mxu1 %v27800_v36  ;;  %24313 = vmatmul.mubr.f32.vlgmr.msra.gmra.mxu0 %v27918_v50  ;;  %32329 = vst [vmem:[#allocation29_spill] sm:$0xff] %v27990_v27  ;;  %v27999_v36 = vsub.f32 %v2288_v49, %v27985_v42 }
 0x162   :  { %24334 = vmatprep.subr.mxu0 %v27805_v35  ;;  %24361 = vmatprep.subr.mxu1 %v27813_v23 }
 0x163   :  { %24335 = vmatpush3.msra.mxu0 %v27805_v35  ;;  %24350 = vmatprep.mubr.f32.mxu0 %v27825_v54  ;;  %32330 = vst [vmem:[#allocation30_spill] sm:$0xff] %v27999_v36  ;;  %v28004_v35 = vand.u32 4294901760, %v27990_v27 }
 0x164   :  { %24362 = vmatpush3.msra.mxu1 %v27813_v23  ;;  %24336 = vmatprep.subr.mxu0 %v27820_v48  ;;  %v28013_v23 = vand.u32 4294901760, %v27999_v36 }
 0x165   :  { %24363 = vmatprep.subr.mxu1 %v27831_v34  ;;  %24337 = vmatpush3.msra.mxu0 %v27820_v48  ;;  %32331 = vst [vmem:[#allocation31_spill] sm:$0xff] %v28004_v35  ;;  %v2360_v48 = vsub.f32 %v27990_v27, %v28004_v35 }
 0x166   :  { %24364 = vmatpush3.msra.mxu1 %v27831_v34  ;;  %24338 = vmatprep.subr.mxu0 %v27836_v60  ;;  %32332 = vst [vmem:[#allocation32_spill] sm:$0xff] %v28013_v23  ;;  %v2370_v54 = vsub.f32 %v27999_v36, %v28013_v23 }
 0x167   :  { %24365 = vmatprep.subr.mxu1 %v27843_v46  ;;  %24339 = vmatpush3.msra.mxu0 %v27836_v60  ;;  %v28028_v53 = vand.u32 4294901760, %v2360_v48 }
 0x168   :  { %24366 = vmatpush3.msra.mxu1 %v27843_v46  ;;  %24340 = vmatprep.subr.mxu0 %v27850_v32 }
 0x169   :  { %24367 = vmatprep.subr.mxu1 %v27860_v0  ;;  %24341 = vmatpush3.msra.mxu0 %v27850_v32  ;;  %32333 = vst [vmem:[#allocation33_spill] sm:$0xff] %v28028_v53  ;;  %v28095_v32 = vand.u32 4294901760, %v2797_v29 }
 0x16a   :  { %24368 = vmatpush3.msra.mxu1 %v27860_v0  ;;  %24342 = vmatprep.subr.mxu0 %v27867_v17 }
 0x16b   :  { %24370 = vmatmul.mubr.f32.vlgmr.msra.gmra.mxu1 %v27909_v55  ;;  %24343 = vmatpush3.msra.mxu0 %v27867_v17  ;;  %v28105_v11 = vsub.f32 %v2797_v29, %v28095_v32  ;;  %v28108_v17 = vand.u32 4294901760, %v2796_v33 }
 0x16c   :  { %24344 = vmatprep.subr.mxu0 %v27881_v39  ;;  %24379 = vmatprep.subr.mxu1 %v27531_v25 }
 0x16d   :  { %24345 = vmatpush3.msra.mxu0 %v27881_v39  ;;  %24380 = vmatpush3.msra.mxu1 %v27531_v25  ;;  %v28037_v25 = vand.u32 4294901760, %v2370_v54  ;;  %v28114_v22 = vand.u32 4294901760, %v28105_v11  ;;  %v28116_v39 = vand.u32 4294901760, %v2795_v57  ;;  %v28119_v63 = vsub.f32 %v2796_v33, %v28108_v17 }
 0x16e   :  { %24346 = vmatprep.subr.mxu0 %v27892_v6  ;;  %24381 = vmatprep.subr.mxu1 %v27537_v28 }
 0x16f   :  { %24347 = vmatpush3.msra.mxu0 %v27892_v6  ;;  %24382 = vmatpush3.msra.mxu1 %v27537_v28  ;;  %32334 = vst [vmem:[#allocation34_spill] sm:$0xff] %v28037_v25  ;;  %v2941_v6 = vsub.f32 %v28105_v11, %v28114_v22  ;;  %v28125_v62 = vsub.f32 %v2795_v57, %v28116_v39  ;;  %v28131_v5 = vand.u32 4294901760, %v28119_v63 }
 0x170   :  { %24348 = vmatprep.subr.mxu0 %v27900_v47  ;;  %24383 = vmatprep.mubr.f32.mxu1 %v27976_v43 }
 0x171   :  { %24349 = vmatpush3.msra.mxu0 %v27900_v47  ;;  %24384 = vmatmul.mubr.f32.vlgmr.msra.gmra.mxu1 %v27985_v42  ;;  %v2793_v47 = vld [vmem:[#allocation5 + $0x80] sm:$0xff]  ;;  %v2942_v19 = vand.u32 4294901760, %v2941_v6  ;;  %v28135_v52 = vand.u32 4294901760, %v28125_v62  ;;  %v2948_v14 = vsub.f32 %v28119_v63, %v28131_v5 }
 0x172   :  { %24351 = vmatmul.mubr.f32.vlgmr.msra.gmra.mxu0 %v27909_v55  ;;  %24372 = vmatprep.subr.mxu0 %v27483_v2  ;;  %v28140_v55 = vand.u32 4294901760, %v2793_v47 }
 0x173   :  { %24373 = vmatpush3.msra.mxu0 %v27483_v2  ;;  %24376 = vmatprep.mubr.f32.mxu0 %v28028_v53  ;;  %v2955_v56 = vsub.f32 %v28125_v62, %v28135_v52  ;;  %v2949_v50 = vand.u32 4294901760, %v2948_v14 }
 0x174   :  { %24374 = vmatprep.subr.mxu0 %v27485_v3  ;;  %24393 = vmatprep.subr.mxu1 %v27483_v2  ;;  %v28152_v41 = vsub.f32 %v2793_v47, %v28140_v55 }
 0x175   :  { %24375 = vmatpush3.msra.mxu0 %v27485_v3  ;;  %24394 = vmatpush3.msra.mxu1 %v27483_v2  ;;  %v2956_v24 = vand.u32 4294901760, %v2955_v56 }
 0x176   :  { %24377 = vmatmul.mubr.f32.vlgmr.msra.gmra.mxu0 %v28037_v25  ;;  %24386 = vmatprep.subr.mxu0 %v27491_v9  ;;  %v28159_v45 = vand.u32 4294901760, %v28152_v41 }
 0x177   :  { %24387 = vmatpush3.msra.mxu0 %v27491_v9  ;;  %24395 = vmatprep.subr.mxu1 %v27485_v3  ;;  %v2800_v9 = vld [vmem:[#allocation5 + $0xb8] sm:$0xff] }
 0x178   :  { %24388 = vmatprep.subr.mxu0 %v27498_v12  ;;  %24390 = vmatprep.mubr.f32.mxu0 %v27990_v27  ;;  %v2969_v58 = vsub.f32 %v28152_v41, %v28159_v45 }
 0x179   :  { %24389 = vmatpush3.msra.mxu0 %v27498_v12  ;;  %24396 = vmatpush3.msra.mxu1 %v27485_v3  ;;  %v28068_v12 = vand.u32 4294901760, %v2800_v9 }
 0x17a   :  { %24397 = vmatprep.mubr.f32.mxu1 %v28004_v35  ;;  %24391 = vmatmul.mubr.f32.vlgmr.msra.gmra.mxu0 %v27999_v36  ;;  %v2970_v1 = vand.u32 4294901760, %v2969_v58 }
 0x17b   :  { %24398 = vmatmul.mubr.f32.vlgmr.msra.gmra.mxu1 %v28013_v23  ;;  %24400 = vmatprep.subr.mxu0 %v27504_v15 }
 0x17c   :  { %24407 = vmatprep.subr.mxu1 %v27483_v2  ;;  %24401 = vmatpush3.msra.mxu0 %v27504_v15  ;;  %v28071_v15 = vsub.f32 %v2800_v9, %v28068_v12 }
 0x17d   :  { %24408 = vmatpush3.msra.mxu1 %v27483_v2  ;;  %24402 = vmatprep.subr.mxu0 %v27513_v18  ;;  %v2799_v2 = vld [vmem:[#allocation5 + $0xb0] sm:$0xff] }
 0x17e   :  { %24409 = vmatprep.subr.mxu1 %v27485_v3  ;;  %24403 = vmatpush3.msra.mxu0 %v27513_v18  ;;  %v28073_v28 = vand.u32 4294901760, %v2799_v2  ;;  %v2798_v18 = vld [vmem:[#allocation5 + $0xa8] sm:$0xff] }
 0x17f   :  { %24404 = vmatprep.mubr.f32.mxu0 %v27976_v43  ;;  %24410 = vmatpush3.msra.mxu1 %v27485_v3  ;;  %v28078_v3 = vand.u32 4294901760, %v28071_v15  ;;  %v28083_v60 = vand.u32 4294901760, %v2798_v18 }
 0x180   :  { %24411 = vmatprep.mubr.f32.mxu1 %v27976_v43  ;;  %24405 = vmatmul.mubr.f32.vlgmr.msra.gmra.mxu0 %v27985_v42  ;;  %v28081_v34 = vsub.f32 %v2799_v2, %v28073_v28 }
 0x181   :  { %24412 = vmatmul.mubr.f32.vlgmr.msra.gmra.mxu1 %v27985_v42  ;;  %24414 = vmatprep.subr.mxu0 %v28068_v12  ;;  %v2920_v61 = vsub.f32 %v28071_v15, %v28078_v3  ;;  %v28093_v59 = vsub.f32 %v2798_v18, %v28083_v60 }
 0x182   :  { %24415 = vmatpush3.msra.mxu0 %v28068_v12  ;;  %v28090_v46 = vand.u32 4294901760, %v28081_v34 }
 0x183   :  { %24416 = vmatprep.subr.mxu0 %v28073_v28  ;;  %v2921_v51 = vand.u32 4294901760, %v2920_v61  ;;  %v28102_v0 = vand.u32 4294901760, %v28093_v59 }
 0x184   :  { %24417 = vmatpush3.msra.mxu0 %v28073_v28  ;;  %v2927_v38 = vsub.f32 %v28081_v34, %v28090_v46 }
 0x185   :  { %24418 = vmatprep.subr.mxu0 %v28083_v60  ;;  %24433 = vmatprep.subr.mxu1 %v2921_v51  ;;  %v2934_v21 = vsub.f32 %v28093_v59, %v28102_v0 }
 0x186   :  { %24419 = vmatpush3.msra.mxu0 %v28083_v60  ;;  %v2928_v8 = vand.u32 4294901760, %v2927_v38  ;;  %24434 = vmatpush3.msra.mxu1 %v2921_v51 }
 0x187   :  { %24420 = vmatprep.subr.mxu0 %v28095_v32  ;;  %v2935_v4 = vand.u32 4294901760, %v2934_v21 }
 0x188   :  { %24421 = vmatpush3.msra.mxu0 %v28095_v32  ;;  %24435 = vmatprep.subr.mxu1 %v2928_v8 }
 0x189   :  { %24422 = vmatprep.subr.mxu0 %v28108_v17  ;;  %24436 = vmatpush3.msra.mxu1 %v2928_v8 }
 0x18a   :  { %24423 = vmatpush3.msra.mxu0 %v28108_v17  ;;  %24437 = vmatprep.subr.mxu1 %v2935_v4 }
 0x18b   :  { %24424 = vmatprep.subr.mxu0 %v28116_v39  ;;  %24438 = vmatpush3.msra.mxu1 %v2935_v4 }
 0x18c   :  { %24425 = vmatpush3.msra.mxu0 %v28116_v39  ;;  %24439 = vmatprep.subr.mxu1 %v2942_v19 }
 0x18d   :  { %24426 = vmatprep.subr.mxu0 %v28127_v13  ;;  %24440 = vmatpush3.msra.mxu1 %v2942_v19 }
 0x18e   :  { %24427 = vmatpush3.msra.mxu0 %v28127_v13  ;;  %24441 = vmatprep.subr.mxu1 %v2949_v50 }
 0x18f   :  { %24428 = vmatprep.subr.mxu0 %v28140_v55  ;;  %24442 = vmatpush3.msra.mxu1 %v2949_v50 }
 0x190   :  { %24429 = vmatpush3.msra.mxu0 %v28140_v55  ;;  %24443 = vmatprep.subr.mxu1 %v2956_v24 }
 0x191   :  { %24452 = vmatprep.subr.mxu0 %v28071_v15  ;;  %24444 = vmatpush3.msra.mxu1 %v2956_v24 }
 0x192   :  { %24445 = vmatprep.subr.mxu1 %v2963_v40 }
 0x193   :  { %24446 = vmatpush3.msra.mxu1 %v2963_v40 }
 0x194   :  { %24447 = vmatprep.subr.mxu1 %v2970_v1 }
 0x195   :  { %24448 = vmatpush3.msra.mxu1 %v2970_v1 }
 0x196   :  { %24471 = vmatprep.subr.mxu1 %v28068_v12 }
 0x1d2   :  { %v24181_v7 = vpop.f32.mrf.mxu1 }
 0x1d4   :  { %v28168_v9 = vpop.f32.mrf.mxu1 }
 0x1da   :  { %v24162_v49 = vpop.f32.mrf.mxu0 }
 0x1db   :  { %v1322_v48 = vadd.f32 %v24181_v7, %v24162_v49 }
 0x1dc   :  { %v28166_v54 = vpop.f32.mrf.mxu0 }
 0x1e3   :  { %v24219_v29 = vpop.f32.mrf.mxu1 }
 0x1e5   :  { %v28172_v51 = vpop.f32.mrf.mxu1 }
 0x1eb   :  { %v24200_v2 = vpop.f32.mrf.mxu0 }
 0x1ec   :  { %v1417_v18 = vadd.f32 %v24200_v2, %v1322_v48 }
 0x1ed   :  { %v28170_v33 = vpop.f32.mrf.mxu0 }
 0x1ee   :  { %v1506_v61 = vadd.f32 %v24219_v29, %v1417_v18 }
 0x1f5   :  { %v24257_v8 = vpop.f32.mrf.mxu1 }
 0x1f7   :  { %v28176_v4 = vpop.f32.mrf.mxu1 }
 0x1fd   :  { %v24238_v38 = vpop.f32.mrf.mxu0 }
 0x1fe   :  { %v1607_v57 = vadd.f32 %v24238_v38, %v1506_v61 }
 0x1ff   :  { %v28174_v26 = vpop.f32.mrf.mxu0 }
 0x200   :  { %v1692_v21 = vadd.f32 %v24257_v8, %v1607_v57 }
 0x207   :  { %v24295_v19 = vpop.f32.mrf.mxu1 }
 0x209   :  { %v28180_v50 = vpop.f32.mrf.mxu1 }
 0x20f   :  { %v24276_v6 = vpop.f32.mrf.mxu0 }
 0x210   :  { %v1791_v47 = vadd.f32 %v24276_v6, %v1692_v21 }
 0x211   :  { %v28178_v56 = vpop.f32.mrf.mxu0 }
 0x212   :  { %v1908_v14 = vadd.f32 %v24295_v19, %v1791_v47 }
 0x219   :  { %v24333_v40 = vpop.f32.mrf.mxu1 }
 0x21b   :  { %v28182_v1 = vpop.f32.mrf.mxu1 }
 0x221   :  { %v24314_v24 = vpop.f32.mrf.mxu0 }
 0x222   :  { %v2003_v44 = vadd.f32 %v24314_v24, %v1908_v14 }
 0x223   :  { %v28184_v49 = vpop.f32.mrf.mxu0 }
 0x224   :  { %v2092_v58 = vadd.f32 %v24333_v40, %v2003_v44 }
 0x22b   :  { %v24371_v7 = vpop.f32.mrf.mxu1 }
 0x22d   :  { %v28186_v48 = vpop.f32.mrf.mxu1 }
 0x231   :  { %v24385_v29 = vpop.f32.mrf.mxu1 }
 0x232   :  { %v24352_v2 = vpop.f32.mrf.mxu0 }
 0x233   :  { %v2193_v18 = vadd.f32 %v24352_v2, %v2092_v58  ;;  %v2454_v8 = vpop.f32.mrf.mxu1 }
 0x234   :  { %v28188_v61 = vpop.f32.mrf.mxu0 }
 0x235   :  { %v28190_v38 = vadd.f32 %v24371_v7, %v2193_v18 }
 0x236   :  { %v24378_v57 = vpop.f32.mrf.mxu0 }
 0x237   :  { %v2461_v6 = vadd.f32 %v24385_v29, %v24378_v57 }
 0x238   :  { %v2363_v21 = vpop.f32.mrf.mxu0 }
 0x239   :  { %v2455_v19 = vadd.f32 %v2454_v8, %v2363_v21 }
 0x23a   :  { %v24392_v47 = vpop.f32.mrf.mxu0 }
 0x23b   :  { %v2544_v14 = vadd.f32 %v24392_v47, %v2461_v6  ;;  %v24399_v24 = vpop.f32.mrf.mxu1 }
 0x23c   :  { %v2536_v44 = vpop.f32.mrf.mxu0 }
 0x23d   :  { %v2627_v40 = vadd.f32 %v24399_v24, %v2544_v14  ;;  %v2537_v36 = vadd.f32 %v2536_v44, %v2455_v19  ;;  %v2618_v27 = vpop.f32.mrf.mxu1 }
 0x23f   :  { %v2619_v25 = vadd.f32 %v2618_v27, %v2537_v36 }
 0x240   :  { %v24406_v53 = vpop.f32.mrf.mxu0 }
 0x241   :  { %v2710_v58 = vadd.f32 %v24406_v53, %v2627_v40  ;;  %v24413_v2 = vpop.f32.mrf.mxu1  ;;  %v1316_v53 = vadd.f32 %v28168_v9, %v28166_v54 }
 0x242   :  { %v2703_v23 = vpop.f32.mrf.mxu0 }
 0x243   :  { %v2789_v35 = vadd.f32 %v24413_v2, %v2710_v58  ;;  %v2704_v7 = vadd.f32 %v2703_v23, %v2619_v25  ;;  %v2782_v18 = vpop.f32.mrf.mxu1  ;;  %v32135_v23 = vmov 0.0   ;;  %v1410_v25 = vadd.f32 %v28170_v33, %v1316_v53 }
 0x245   :  { %v2805_v42 = vsel %vm1108_vm1, %v2789_v35, 0  ;;  %v2783_v43 = vadd.f32 %v2782_v18, %v2704_v7 }
 0x246   :  { %v28193_v29 = vand.u32 4294901760, %v2805_v42 }
 0x247   :  { %v2802_v57 = vsel %vm1108_vm1, %v2783_v43, 0 }
 0x248   :  { %v2891_v8 = vsub.f32 %v2805_v42, %v28193_v29  ;;  %v2880_v21 = vand.u32 4294901760, %v2802_v57 }
 0x24a   :  { %v2892_v6 = vand.u32 4294901760, %v2891_v8  ;;  %v2881_v47 = vsub.f32 %v2802_v57, %v2880_v21  ;;  %24449 = vmatprep.mubr.f32.mxu1 %v2880_v21 }
 0x24b   :  { %24450 = vmatmul.mubr.f32.vlgmr.msra.gmra.mxu1 %v28193_v29 }
 0x24c   :  { %24472 = vmatpush3.msra.mxu1 %v28068_v12  ;;  %v2882_v27 = vand.u32 4294901760, %v2881_v47  ;;  %v2893_v36 = vsub.f32 %v2891_v8, %v2892_v6 }
 0x24d   :  { %24473 = vmatprep.subr.mxu1 %v28073_v28 }
 0x24e   :  { %24474 = vmatpush3.msra.mxu1 %v28073_v28  ;;  %24487 = vmatprep.mubr.f32.mxu1 %v2882_v27  ;;  %v2883_v35 = vsub.f32 %v2881_v47, %v2882_v27  ;;  %v2894_v42 = vand.u32 4294901760, %v2893_v36  ;;  %v66_v27 = vld [vmem:[%s32090_s4 + $0x30] sm:$0xff] }
 0x24f   :  { %24475 = vmatprep.subr.mxu1 %v28083_v60 }
 0x250   :  { %24476 = vmatpush3.msra.mxu1 %v28083_v60  ;;  %v2884_v43 = vand.u32 4294901760, %v2883_v35  ;;  %v28346_v35 = vand.u32 4294901760, %v66_v27 }
 0x251   :  { %24477 = vmatprep.subr.mxu1 %v28095_v32 }
 0x252   :  { %24478 = vmatpush3.msra.mxu1 %v28095_v32  ;;  %24430 = vmatprep.mubr.f32.mxu0 %v2884_v43  ;;  %32341 = vst [vmem:[#allocation41_spill] sm:$0xff] %v28346_v35  ;;  %v65_v43 = vld [vmem:[%s32090_s4 + $0x28] sm:$0xff]  ;;  %v28357_v53 = vsub.f32 %v66_v27, %v28346_v35 }
 0x253   :  { %24479 = vmatprep.subr.mxu1 %v28108_v17  ;;  %24431 = vmatmul.mubr.f32.vlgmr.msra.gmra.mxu0 %v2894_v42 }
 0x254   :  { %24453 = vmatpush3.msra.mxu0 %v28071_v15  ;;  %24480 = vmatpush3.msra.mxu1 %v28108_v17  ;;  %32343 = vst [vmem:[#allocation43_spill] sm:$0xff] %v28357_v53 }
 0x255   :  { %24454 = vmatprep.subr.mxu0 %v28081_v34  ;;  %24468 = vmatprep.mubr.f32.mxu0 %v2881_v47 }
 0x256   :  { %24481 = vmatprep.subr.mxu1 %v28116_v39  ;;  %24455 = vmatpush3.msra.mxu0 %v28081_v34 }
 0x257   :  { %24482 = vmatpush3.msra.mxu1 %v28116_v39  ;;  %24456 = vmatprep.subr.mxu0 %v28093_v59 }
 0x258   :  { %24483 = vmatprep.subr.mxu1 %v28127_v13  ;;  %24457 = vmatpush3.msra.mxu0 %v28093_v59 }
 0x259   :  { %24484 = vmatpush3.msra.mxu1 %v28127_v13  ;;  %24458 = vmatprep.subr.mxu0 %v28105_v11 }
 0x25a   :  { %24485 = vmatprep.subr.mxu1 %v28140_v55  ;;  %24459 = vmatpush3.msra.mxu0 %v28105_v11 }
 0x25b   :  { %24486 = vmatpush3.msra.mxu1 %v28140_v55  ;;  %24460 = vmatprep.subr.mxu0 %v28119_v63 }
 0x25c   :  { %24488 = vmatmul.mubr.f32.vlgmr.msra.gmra.mxu1 %v2892_v6  ;;  %24509 = vmatprep.subr.mxu1 %v28068_v12  ;;  %v67_v6 = vld [vmem:[%s32090_s4 + $0x38] sm:$0xff] }
 0x25d   :  { %24461 = vmatpush3.msra.mxu0 %v28119_v63  ;;  %24510 = vmatpush3.msra.mxu1 %v28068_v12  ;;  %v1498_v12 = vadd.f32 %v28172_v51, %v1410_v25  ;;  %v28338_v47 = vand.u32 4294901760, %v67_v6  ;;  %v28359_v25 = vand.u32 4294901760, %v65_v43 }
 0x25e   :  { %24525 = vmatprep.mubr.f32.mxu1 %v2880_v21  ;;  %24462 = vmatprep.subr.mxu0 %v28125_v62 }
 0x25f   :  { %24511 = vmatprep.subr.mxu1 %v28073_v28  ;;  %24463 = vmatpush3.msra.mxu0 %v28125_v62  ;;  %v1601_v15 = vadd.f32 %v28174_v26, %v1498_v12  ;;  %32339 = vst [vmem:[#allocation39_spill] sm:$0xff] %v28338_v47  ;;  %v28344_v36 = vsub.f32 %v67_v6, %v28338_v47  ;;  %32344 = vst [vmem:[#allocation44_spill] sm:$0xff] %v28359_v25  ;;  %v64_v12 = vld [vmem:[%s32090_s4 + $0x20] sm:$0xff] }
 0x260   :  { %24512 = vmatpush3.msra.mxu1 %v28073_v28  ;;  %24464 = vmatprep.subr.mxu0 %v28138_v20 }
 0x261   :  { %24513 = vmatprep.subr.mxu1 %v28083_v60  ;;  %24465 = vmatpush3.msra.mxu0 %v28138_v20  ;;  %v1686_v34 = vadd.f32 %v28176_v4, %v1601_v15  ;;  %32340 = vst [vmem:[#allocation40_spill] sm:$0xff] %v28344_v36  ;;  %v28354_v42 = vand.u32 4294901760, %v28344_v36 }
 0x262   :  { %24514 = vmatpush3.msra.mxu1 %v28083_v60  ;;  %24466 = vmatprep.subr.mxu0 %v28152_v41 }
 0x263   :  { %24515 = vmatprep.subr.mxu1 %v28095_v32  ;;  %24467 = vmatpush3.msra.mxu0 %v28152_v41  ;;  %32342 = vst [vmem:[#allocation42_spill] sm:$0xff] %v28354_v42  ;;  %v3959_v15 = vsub.f32 %v28344_v36, %v28354_v42 }
 0x264   :  { %24516 = vmatpush3.msra.mxu1 %v28095_v32  ;;  %24469 = vmatmul.mubr.f32.vlgmr.msra.gmra.mxu0 %v2891_v8  ;;  %v1781_v32 = vadd.f32 %v28178_v56, %v1686_v34  ;;  %v28374_v34 = vand.u32 4294901760, %v64_v12 }
 0x265   :  { %24490 = vmatprep.subr.mxu0 %v28078_v3  ;;  %24517 = vmatprep.subr.mxu1 %v28108_v17 }
 0x266   :  { %24491 = vmatpush3.msra.mxu0 %v28078_v3  ;;  %24506 = vmatprep.mubr.f32.mxu0 %v2880_v21  ;;  %v68_v3 = vld [vmem:[%s32091_s5] sm:$0x1]  ;;  %32347 = vst [vmem:[#allocation47_spill] sm:$0xff] %v28374_v34 }
 0x267   :  { %24518 = vmatpush3.msra.mxu1 %v28108_v17  ;;  %24492 = vmatprep.subr.mxu0 %v28090_v46  ;;  %v3392_v59 = vsel %vm71_vm0, %v68_v3, 0  ;;  %v28372_v3 = vsub.f32 %v65_v43, %v28359_v25 }
 0x268   :  { %24519 = vmatprep.subr.mxu1 %v28116_v39  ;;  %24493 = vmatpush3.msra.mxu0 %v28090_v46  ;;  %v28279_v11 = vand.u32 4294901760, %v3392_v59 }
 0x269   :  { %24520 = vmatpush3.msra.mxu1 %v28116_v39  ;;  %24494 = vmatprep.subr.mxu0 %v28102_v0  ;;  %32346 = vst [vmem:[#allocation46_spill] sm:$0xff] %v28372_v3 }
 0x26a   :  { %24521 = vmatprep.subr.mxu1 %v28127_v13  ;;  %24495 = vmatpush3.msra.mxu0 %v28102_v0  ;;  %32335 = vst [vmem:[#allocation35_spill] sm:$0xff] %v28279_v11  ;;  %v28284_v20 = vsub.f32 %v3392_v59, %v28279_v11 }
 0x26b   :  { %24522 = vmatpush3.msra.mxu1 %v28127_v13  ;;  %24496 = vmatprep.subr.mxu0 %v28114_v22 }
 0x26c   :  { %24523 = vmatprep.subr.mxu1 %v28140_v55  ;;  %24497 = vmatpush3.msra.mxu0 %v28114_v22  ;;  %v1902_v22 = vadd.f32 %v28180_v50, %v1781_v32  ;;  %32336 = vst [vmem:[#allocation36_spill] sm:$0xff] %v28284_v20  ;;  %v28288_v33 = vand.u32 4294901760, %v28284_v20  ;;  %v28386_v32 = vand.u32 4294901760, %v28372_v3 }
 0x26d   :  { %24524 = vmatpush3.msra.mxu1 %v28140_v55  ;;  %24498 = vmatprep.subr.mxu0 %v28131_v5 }
 0x26e   :  { %24526 = vmatmul.mubr.f32.vlgmr.msra.gmra.mxu1 %v28193_v29  ;;  %24499 = vmatpush3.msra.mxu0 %v28131_v5  ;;  %v1996_v13 = vadd.f32 %v28184_v49, %v1902_v22  ;;  %32337 = vst [vmem:[#allocation37_spill] sm:$0xff] %v28288_v33  ;;  %v3464_v14 = vsub.f32 %v28284_v20, %v28288_v33  ;;  %32349 = vst [vmem:[#allocation49_spill] sm:$0xff] %v28386_v32  ;;  %v62_v22 = vld [vmem:[%s32090_s4 + $0x10] sm:$0xff] }
 0x26f   :  { %24500 = vmatprep.subr.mxu0 %v28135_v52  ;;  %24535 = vmatprep.subr.mxu1 %v32135_v23 }
 0x270   :  { %24501 = vmatpush3.msra.mxu0 %v28135_v52  ;;  %24539 = vmatprep.mubr.msk.f32.mxu1 %vm27424_vm2, %v32135_v23  ;;  %v2084_v41 = vadd.f32 %v28182_v1, %v1996_v13  ;;  %v28406_v13 = vand.u32 4294901760, %v62_v22 }
 0x271   :  { %24502 = vmatprep.subr.mxu0 %v28149_v37 }
 0x272   :  { %24503 = vmatpush3.msra.mxu0 %v28149_v37  ;;  %v2187_v51 = vadd.f32 %v28188_v61, %v2084_v41  ;;  %v28300_v61 = vand.u32 4294901760, %v3464_v14  ;;  %32354 = vst [vmem:[#allocation54_spill] sm:$0xff] %v28406_v13  ;;  %v28422_v41 = vsub.f32 %v62_v22, %v28406_v13 }
 0x273   :  { %24504 = vmatprep.subr.mxu0 %v28159_v45 }
 0x274   :  { %24505 = vmatpush3.msra.mxu0 %v28159_v45  ;;  %v2272_v24 = vadd.f32 %v28186_v48, %v2187_v51  ;;  %32338 = vst [vmem:[#allocation38_spill] sm:$0xff] %v28300_v61  ;;  %32357 = vst [vmem:[#allocation57_spill] sm:$0xff] %v28422_v41 }
 0x275   :  { %24507 = vmatmul.mubr.f32.vlgmr.msra.gmra.mxu0 %v28193_v29  ;;  %24528 = vmatprep.subr.mxu0 %v32135_v23 }
 0x276   :  { %24532 = vmatprep.mubr.msk.f32.mxu0 %vm27424_vm2, %v32135_v23 }
 0x30b   :  { %v24451_v60 = vpop.f32.mrf.mxu1 }
 0x30d   :  { %v3007_v17 = vpop.f32.mrf.mxu1 }
 0x313   :  { %v24432_v28 = vpop.f32.mrf.mxu0 }
 0x314   :  { %v3014_v39 = vadd.f32 %v24451_v60, %v24432_v28  ;;  %v28369_v28 = vand.u32 4294901760, %v28357_v53  ;;  %v63_v60 = vld [vmem:[%s32090_s4 + $0x18] sm:$0xff] }
 0x315   :  { %v2886_v46 = vpop.f32.mrf.mxu0 }
 0x316   :  { %v3008_v5 = vadd.f32 %v3007_v17, %v2886_v46  ;;  %32345 = vst [vmem:[#allocation45_spill] sm:$0xff] %v28369_v28  ;;  %v28381_v46 = vand.u32 4294901760, %v3959_v15  ;;  %v3966_v59 = vsub.f32 %v28357_v53, %v28369_v28  ;;  %v28392_v17 = vand.u32 4294901760, %v63_v60 }
 0x318   :  { %32348 = vst [vmem:[#allocation48_spill] sm:$0xff] %v28381_v46  ;;  %32351 = vst [vmem:[#allocation51_spill] sm:$0xff] %v28392_v17 }
 0x31c   :  { %v24489_v63 = vpop.f32.mrf.mxu1 }
 0x31e   :  { %v3189_v37 = vpop.f32.mrf.mxu1 }
 0x324   :  { %v24470_v0 = vpop.f32.mrf.mxu0 }
 0x325   :  { %v3109_v52 = vadd.f32 %v24470_v0, %v3014_v39  ;;  %v28389_v0 = vsub.f32 %v64_v12, %v28374_v34  ;;  %v28399_v39 = vand.u32 4294901760, %v3966_v59 }
 0x326   :  { %v3101_v62 = vpop.f32.mrf.mxu0 }
 0x327   :  { %v3102_v55 = vadd.f32 %v3101_v62, %v3008_v5  ;;  %v3198_v45 = vadd.f32 %v24489_v63, %v3109_v52  ;;  %32350 = vst [vmem:[#allocation50_spill] sm:$0xff] %v28389_v0  ;;  %32352 = vst [vmem:[#allocation52_spill] sm:$0xff] %v28399_v39  ;;  %v3973_v63 = vsub.f32 %v28372_v3, %v28386_v32  ;;  %v28404_v62 = vand.u32 4294901760, %v28389_v0  ;;  %v61_v52 = vld [vmem:[%s32090_s4 + $0x8] sm:$0xff] }
 0x328   :  { %v28410_v5 = vsub.f32 %v63_v60, %v28392_v17 }
 0x329   :  { %v3190_v4 = vadd.f32 %v3189_v37, %v3102_v55  ;;  %32353 = vst [vmem:[#allocation53_spill] sm:$0xff] %v28404_v62  ;;  %v28417_v55 = vand.u32 4294901760, %v3973_v63  ;;  %v3980_v37 = vsub.f32 %v28389_v0, %v28404_v62 }
 0x32a   :  { %32355 = vst [vmem:[#allocation55_spill] sm:$0xff] %v28410_v5 }
 0x32b   :  { %32356 = vst [vmem:[#allocation56_spill] sm:$0xff] %v28417_v55  ;;  %v28436_v51 = vand.u32 4294901760, %v3980_v37 }
 0x32d   :  { %32360 = vst [vmem:[#allocation60_spill] sm:$0xff] %v28436_v51 }
 0x32e   :  { %v24527_v54 = vpop.f32.mrf.mxu1 }
 0x330   :  { %v3377_v19 = vpop.f32.mrf.mxu1 }
 0x335   :  { %v24508_v9 = vpop.f32.mrf.mxu0 }
 0x336   :  { %v3299_v26 = vadd.f32 %v24508_v9, %v3198_v45  ;;  %v28424_v45 = vand.u32 4294901760, %v61_v52  ;;  %v60_v9 = vld [vmem:[%s32090_s4] sm:$0xff] }
 0x337   :  { %v3292_v56 = vpop.f32.mrf.mxu0 }
 0x338   :  { %v3384_v50 = vadd.f32 %v24527_v54, %v3299_v26  ;;  %v3293_v49 = vadd.f32 %v3292_v56, %v3190_v4  ;;  %32358 = vst [vmem:[#allocation58_spill] sm:$0xff] %v28424_v45  ;;  %v28429_v54 = vand.u32 4294901760, %v28410_v5  ;;  %v28439_v26 = vand.u32 4294901760, %v28422_v41 }
 0x339   :  { %v28442_v4 = vsub.f32 %v61_v52, %v28424_v45  ;;  %v28444_v56 = vand.u32 4294901760, %v60_v9 }
 0x33a   :  { %v28295_v1 = vadd.f32 %v3384_v50, %v28190_v38  ;;  %v3378_v44 = vadd.f32 %v3377_v19, %v3293_v49  ;;  %32359 = vst [vmem:[#allocation59_spill] sm:$0xff] %v28429_v54  ;;  %32361 = vst [vmem:[#allocation61_spill] sm:$0xff] %v28439_v26  ;;  %v3987_v50 = vsub.f32 %v28410_v5, %v28429_v54 }
 0x33b   :  { %32362 = vst [vmem:[#allocation62_spill] sm:$0xff] %v28442_v4  ;;  %32363 = vst [vmem:[#allocation63_spill] sm:$0xff] %v28444_v56  ;;  %v3994_v49 = vsub.f32 %v28422_v41, %v28439_v26  ;;  %v28455_v19 = vand.u32 4294901760, %v28442_v4  ;;  %v28458_v14 = vsub.f32 %v60_v9, %v28444_v56 }
 0x33c   :  { %v28297_v40 = vadd.f32 %v3378_v44, %v2272_v24  ;;  %v3423_v58 = vand.u32 4294901760, %v28295_v1  ;;  %v28462_v24 = vand.u32 4294901760, %v3987_v50 }
 0x33d   :  { %32364 = vst [vmem:[#allocation64_spill] sm:$0xff] %v28455_v19  ;;  %32365 = vst [vmem:[#allocation65_spill] sm:$0xff] %v28458_v14  ;;  %v28465_v44 = vand.u32 4294901760, %v3994_v49 }
 0x33e   :  { %24529 = vmatpush3.msra.mxu0 %v3423_v58  ;;  %v3426_v2 = vand.u32 4294901760, %v28297_v40  ;;  %v3501_v7 = vsub.f32 %v28295_v1, %v3423_v58  ;;  %32366 = vst [vmem:[#allocation66_spill] sm:$0xff] %v28462_v24 }
 0x33f   :  { %24530 = vmatprep.subr.mxu0 %v32135_v23  ;;  %32367 = vst [vmem:[#allocation67_spill] sm:$0xff] %v28465_v44 }
 0x340   :  { %24531 = vmatpush3.msra.mxu0 %v3426_v2  ;;  %v3508_v48 = vsub.f32 %v28297_v40, %v3426_v2  ;;  %v3502_v18 = vand.u32 4294901760, %v3501_v7 }
 0x341   :  { %24542 = vmatprep.subr.mxu0 %v32135_v23  ;;  %24533 = vmatmul.mubr.f32.vlgmr.msra.gmra.mxu0 %v28300_v61 }
 0x342   :  { %24543 = vmatpush3.msra.mxu0 %v3501_v7  ;;  %24546 = vmatprep.mubr.msk.f32.mxu0 %vm27424_vm2, %v32135_v23  ;;  %v3503_v38 = vsub.f32 %v3501_v7, %v3502_v18  ;;  %v3509_v29 = vand.u32 4294901760, %v3508_v48 }
 0x343   :  { %24544 = vmatprep.subr.mxu0 %v32135_v23 }
 0x344   :  { %24545 = vmatpush3.msra.mxu0 %v3508_v48  ;;  %v3504_v57 = vand.u32 4294901760, %v3503_v38  ;;  %v3510_v8 = vsub.f32 %v3508_v48, %v3509_v29 }
 0x345   :  { %24556 = vmatprep.subr.mxu0 %v32135_v23  ;;  %24547 = vmatmul.mubr.f32.vlgmr.msra.gmra.mxu0 %v28284_v20 }
 0x346   :  { %24536 = vmatpush3.msra.mxu1 %v3504_v57  ;;  %24557 = vmatpush3.msra.mxu0 %v3502_v18  ;;  %v3511_v21 = vand.u32 4294901760, %v3510_v8 }
 0x347   :  { %24537 = vmatprep.subr.mxu1 %v32135_v23  ;;  %24558 = vmatprep.subr.mxu0 %v32135_v23 }
 0x348   :  { %24538 = vmatpush3.msra.mxu1 %v3511_v21  ;;  %24559 = vmatpush3.msra.mxu0 %v3509_v29 }
 0x349   :  { %24540 = vmatmul.mubr.f32.vlgmr.msra.gmra.mxu1 %v28279_v11  ;;  %24549 = vmatprep.subr.mxu1 %v32135_v23 }
 0x34a   :  { %24550 = vmatpush3.msra.mxu1 %v3423_v58  ;;  %24553 = vmatprep.mubr.msk.f32.mxu1 %vm27424_vm2, %v32135_v23 }
 0x34b   :  { %24551 = vmatprep.subr.mxu1 %v32135_v23  ;;  %24560 = vmatprep.mubr.msk.f32.mxu0 %vm27424_vm2, %v32135_v23 }
 0x34c   :  { %24552 = vmatpush3.msra.mxu1 %v3426_v2  ;;  %24561 = vmatmul.mubr.f32.vlgmr.msra.gmra.mxu0 %v28279_v11 }
 0x34d   :  { %24554 = vmatmul.mubr.f32.vlgmr.msra.gmra.mxu1 %v28288_v33  ;;  %24563 = vmatprep.subr.mxu1 %v32135_v23 }
 0x34e   :  { %24564 = vmatpush3.msra.mxu1 %v3423_v58  ;;  %24567 = vmatprep.mubr.msk.f32.mxu1 %vm27424_vm2, %v32135_v23  ;;  %v4001_v58 = vsub.f32 %v28442_v4, %v28455_v19 }
 0x34f   :  { %24565 = vmatprep.subr.mxu1 %v32135_v23  ;;  %24570 = vmatprep.subr.mxu0 %v32135_v23 }
 0x350   :  { %24566 = vmatpush3.msra.mxu1 %v3426_v2  ;;  %24586 = vmatprep.mubr.msk.f32.mxu0 %vm27424_vm2, %v32135_v23  ;;  %v28470_v2 = vand.u32 4294901760, %v28458_v14  ;;  %v28475_v7 = vand.u32 4294901760, %v4001_v58 }
 0x351   :  { %24568 = vmatmul.mubr.f32.vlgmr.msra.gmra.mxu1 %v28279_v11  ;;  %24589 = vmatprep.subr.mxu1 %v32135_v23 }
 0x352   :  { %24605 = vmatprep.mubr.msk.f32.mxu1 %vm27424_vm2, %v32135_v23  ;;  %24571 = vmatpush3.msra.mxu0 %v28338_v47  ;;  %32368 = vst [vmem:[#allocation68_spill] sm:$0xff] %v28470_v2  ;;  %32369 = vst [vmem:[#allocation69_spill] sm:$0xff] %v28475_v7  ;;  %v4008_v48 = vsub.f32 %v28458_v14, %v28470_v2 }
 0x353   :  { %24572 = vmatprep.subr.mxu0 %v32135_v23  ;;  %24590 = vmatpush3.msra.mxu1 %v28381_v46 }
 0x354   :  { %24573 = vmatpush3.msra.mxu0 %v28346_v35  ;;  %24591 = vmatprep.subr.mxu1 %v32135_v23  ;;  %v28481_v18 = vand.u32 4294901760, %v4008_v48 }
 0x355   :  { %24574 = vmatprep.subr.mxu0 %v32135_v23  ;;  %24592 = vmatpush3.msra.mxu1 %v28399_v39 }
 0x356   :  { %24575 = vmatpush3.msra.mxu0 %v28359_v25  ;;  %24593 = vmatprep.subr.mxu1 %v32135_v23  ;;  %32370 = vst [vmem:[#allocation70_spill] sm:$0xff] %v28481_v18 }
 0x357   :  { %24576 = vmatprep.subr.mxu0 %v32135_v23  ;;  %24594 = vmatpush3.msra.mxu1 %v28417_v55 }
 0x358   :  { %24577 = vmatpush3.msra.mxu0 %v28374_v34  ;;  %24595 = vmatprep.subr.mxu1 %v32135_v23 }
 0x359   :  { %24578 = vmatprep.subr.mxu0 %v32135_v23  ;;  %24596 = vmatpush3.msra.mxu1 %v28436_v51 }
 0x35a   :  { %24579 = vmatpush3.msra.mxu0 %v28392_v17  ;;  %24597 = vmatprep.subr.mxu1 %v32135_v23 }
 0x35b   :  { %24580 = vmatprep.subr.mxu0 %v32135_v23  ;;  %24598 = vmatpush3.msra.mxu1 %v28462_v24 }
 0x35c   :  { %24581 = vmatpush3.msra.mxu0 %v28406_v13  ;;  %24599 = vmatprep.subr.mxu1 %v32135_v23 }
 0x35d   :  { %24582 = vmatprep.subr.mxu0 %v32135_v23  ;;  %24600 = vmatpush3.msra.mxu1 %v28465_v44 }
 0x35e   :  { %24583 = vmatpush3.msra.mxu0 %v28424_v45  ;;  %24601 = vmatprep.subr.mxu1 %v32135_v23 }
 0x35f   :  { %24584 = vmatprep.subr.mxu0 %v32135_v23  ;;  %24602 = vmatpush3.msra.mxu1 %v28475_v7 }
 0x360   :  { %24585 = vmatpush3.msra.mxu0 %v28444_v56  ;;  %24603 = vmatprep.subr.mxu1 %v32135_v23 }
 0x361   :  { %24608 = vmatprep.subr.mxu0 %v32135_v23  ;;  %24604 = vmatpush3.msra.mxu1 %v28481_v18 }
 0x362   :  { %24627 = vmatprep.subr.mxu1 %v32135_v23 }
 0x401   :  { %v3467_v38 = vpop.f32.mrf.mxu0 }
 0x403   :  { %v24534_v29 = vpop.f32.mrf.mxu0 }
 0x405   :  { %v3624_v57 = vpop.f32.mrf.mxu0 }
 0x407   :  { %v24548_v8 = vpop.f32.mrf.mxu0 }
 0x408   :  { %v3389_v8 = vmul.f32 %v28297_v40, %v28297_v40 }
 0x409   :  { %v3548_v21 = vpop.f32.mrf.mxu1 }
 0x40a   :  { %v3549_v6 = vadd.f32 %v3548_v21, %v3467_v38 }
 0x40b   :  { %v24541_v27 = vpop.f32.mrf.mxu1 }
 0x40c   :  { %v3625_v43 = vadd.f32 %v3624_v57, %v3549_v6  ;;  %v3776_v12 = vpop.f32.mrf.mxu0  ;;  %v3390_v57 = vmul.f32 %v28295_v1, %v28295_v1  ;;  %v28529_v6 = vand.u32 4294901760, %v3389_v8 }
 0x40d   :  { %v3699_v15 = vpop.f32.mrf.mxu1 }
 0x40e   :  { %v3700_v60 = vadd.f32 %v3699_v15, %v3625_v43  ;;  %v24562_v59 = vpop.f32.mrf.mxu0  ;;  %v28523_v21 = vand.u32 4294901760, %v3390_v57  ;;  %v28546_v43 = vsub.f32 %v3389_v8, %v28529_v6 }
 0x40f   :  { %v24555_v22 = vpop.f32.mrf.mxu1 }
 0x410   :  { %v3777_v63 = vadd.f32 %v3776_v12, %v3700_v60  ;;  %v28538_v27 = vsub.f32 %v3390_v57, %v28523_v21  ;;  %v4508_v15 = vand.u32 4294901760, %v28546_v43 }
 0x411   :  { %v3849_v52 = vpop.f32.mrf.mxu1 }
 0x412   :  { %v3850_v37 = vadd.f32 %v3849_v52, %v3777_v63  ;;  %v4501_v12 = vand.u32 4294901760, %v28538_v27  ;;  %v4509_v59 = vsub.f32 %v28546_v43, %v4508_v15 }
 0x413   :  { %v24569_v9 = vpop.f32.mrf.mxu1 }
 0x414   :  { %v3854_v50 = vsel %vm1108_vm1, %v3850_v37, 0  ;;  %v4502_v60 = vsub.f32 %v28538_v27, %v4501_v12  ;;  %v4510_v63 = vand.u32 4294901760, %v4509_v59 }
 0x415   :  { %v28488_v49 = vand.u32 4294901760, %v3854_v50 }
 0x416   :  { %v4503_v22 = vand.u32 4294901760, %v4502_v60 }
 0x417   :  { %v3930_v58 = vsub.f32 %v3854_v50, %v28488_v49  ;;  %24606 = vmatmul.mubr.f32.vlgmr.msra.gmra.mxu1 %v28488_v49 }
 0x418   :  { %24628 = vmatpush3.msra.mxu1 %v28338_v47  ;;  %24643 = vmatprep.mubr.msk.f32.mxu1 %vm27424_vm2, %v32135_v23 }
 0x419   :  { %v3931_v48 = vand.u32 4294901760, %v3930_v58  ;;  %24629 = vmatprep.subr.mxu1 %v32135_v23 }
 0x41a   :  { %24630 = vmatpush3.msra.mxu1 %v28346_v35 }
 0x41b   :  { %24631 = vmatprep.subr.mxu1 %v32135_v23  ;;  %v3932_v38 = vsub.f32 %v3930_v58, %v3931_v48 }
 0x41c   :  { %24632 = vmatpush3.msra.mxu1 %v28359_v25 }
 0x41d   :  { %24633 = vmatprep.subr.mxu1 %v32135_v23  ;;  %v3933_v29 = vand.u32 4294901760, %v3932_v38 }
 0x41e   :  { %24634 = vmatpush3.msra.mxu1 %v28374_v34 }
 0x41f   :  { %24635 = vmatprep.subr.mxu1 %v32135_v23  ;;  %24587 = vmatmul.mubr.f32.vlgmr.msra.gmra.mxu0 %v3933_v29 }
 0x420   :  { %24609 = vmatpush3.msra.mxu0 %v28344_v36  ;;  %24636 = vmatpush3.msra.mxu1 %v28392_v17 }
 0x421   :  { %24610 = vmatprep.subr.mxu0 %v32135_v23  ;;  %24637 = vmatprep.subr.mxu1 %v32135_v23 }
 0x422   :  { %24611 = vmatpush3.msra.mxu0 %v28357_v53  ;;  %24638 = vmatpush3.msra.mxu1 %v28406_v13 }
 0x423   :  { %24612 = vmatprep.subr.mxu0 %v32135_v23  ;;  %24639 = vmatprep.subr.mxu1 %v32135_v23 }
 0x424   :  { %24613 = vmatpush3.msra.mxu0 %v28372_v3  ;;  %24640 = vmatpush3.msra.mxu1 %v28424_v45 }
 0x425   :  { %24614 = vmatprep.subr.mxu0 %v32135_v23  ;;  %24641 = vmatprep.subr.mxu1 %v32135_v23 }
 0x426   :  { %24615 = vmatpush3.msra.mxu0 %v28389_v0  ;;  %24642 = vmatpush3.msra.mxu1 %v28444_v56 }
 0x427   :  { %24616 = vmatprep.subr.mxu0 %v32135_v23  ;;  %24644 = vmatmul.mubr.f32.vlgmr.msra.gmra.mxu1 %v3931_v48 }
 0x428   :  { %24665 = vmatprep.subr.mxu1 %v32135_v23  ;;  %24617 = vmatpush3.msra.mxu0 %v28410_v5 }
 0x429   :  { %24666 = vmatpush3.msra.mxu1 %v28338_v47  ;;  %24618 = vmatprep.subr.mxu0 %v32135_v23 }
 0x42a   :  { %24667 = vmatprep.subr.mxu1 %v32135_v23  ;;  %24619 = vmatpush3.msra.mxu0 %v28422_v41 }
 0x42b   :  { %24668 = vmatpush3.msra.mxu1 %v28346_v35  ;;  %24620 = vmatprep.subr.mxu0 %v32135_v23 }
 0x42c   :  { %24669 = vmatprep.subr.mxu1 %v32135_v23  ;;  %24621 = vmatpush3.msra.mxu0 %v28442_v4 }
 0x42d   :  { %24670 = vmatpush3.msra.mxu1 %v28359_v25  ;;  %24622 = vmatprep.subr.mxu0 %v32135_v23 }
 0x42e   :  { %24671 = vmatprep.subr.mxu1 %v32135_v23  ;;  %24623 = vmatpush3.msra.mxu0 %v28458_v14 }
 0x42f   :  { %24624 = vmatprep.mubr.msk.f32.mxu0 %vm27424_vm2, %v32135_v23  ;;  %24672 = vmatpush3.msra.mxu1 %v28374_v34 }
 0x430   :  { %24625 = vmatmul.mubr.f32.vlgmr.msra.gmra.mxu0 %v3930_v58  ;;  %24646 = vmatprep.subr.mxu0 %v32135_v23 }
 0x431   :  { %24673 = vmatprep.subr.mxu1 %v32135_v23  ;;  %24647 = vmatpush3.msra.mxu0 %v28354_v42 }
 0x432   :  { %24674 = vmatpush3.msra.mxu1 %v28392_v17  ;;  %24648 = vmatprep.subr.mxu0 %v32135_v23 }
 0x433   :  { %24675 = vmatprep.subr.mxu1 %v32135_v23  ;;  %24649 = vmatpush3.msra.mxu0 %v28369_v28 }
 0x434   :  { %24676 = vmatpush3.msra.mxu1 %v28406_v13  ;;  %24650 = vmatprep.subr.mxu0 %v32135_v23 }
 0x435   :  { %24677 = vmatprep.subr.mxu1 %v32135_v23  ;;  %24651 = vmatpush3.msra.mxu0 %v28386_v32 }
 0x436   :  { %24678 = vmatpush3.msra.mxu1 %v28424_v45  ;;  %24652 = vmatprep.subr.mxu0 %v32135_v23 }
 0x437   :  { %24679 = vmatprep.subr.mxu1 %v32135_v23  ;;  %24653 = vmatpush3.msra.mxu0 %v28404_v62 }
 0x438   :  { %24680 = vmatpush3.msra.mxu1 %v28444_v56  ;;  %24681 = vmatprep.mubr.msk.f32.mxu1 %vm27424_vm2, %v32135_v23 }
 0x439   :  { %24654 = vmatprep.subr.mxu0 %v32135_v23  ;;  %24682 = vmatmul.mubr.f32.vlgmr.msra.gmra.mxu1 %v28488_v49 }
 0x43a   :  { %24691 = vmatprep.subr.mxu1 %v32135_v23  ;;  %24655 = vmatpush3.msra.mxu0 %v28429_v54 }
 0x43b   :  { %24692 = vmatpush3.msra.mxu1 %v4503_v22  ;;  %24656 = vmatprep.subr.mxu0 %v32135_v23 }
 0x43c   :  { %24693 = vmatprep.subr.mxu1 %v32135_v23  ;;  %24657 = vmatpush3.msra.mxu0 %v28439_v26 }
 0x43d   :  { %24694 = vmatpush3.msra.mxu1 %v4510_v63  ;;  %24658 = vmatprep.subr.mxu0 %v32135_v23 }
 0x43e   :  { %24695 = vmatprep.mubr.msk.f32.mxu1 %vm27424_vm2, %v32135_v23  ;;  %24705 = vmatprep.subr.mxu1 %v32135_v23 }
 0x43f   :  { %24659 = vmatpush3.msra.mxu0 %v28455_v19  ;;  %24696 = vmatmul.mubr.f32.vlgmr.msra.gmra.mxu1 %v28279_v11 }
 0x440   :  { %24706 = vmatpush3.msra.mxu1 %v28523_v21  ;;  %24660 = vmatprep.subr.mxu0 %v32135_v23 }
 0x441   :  { %24707 = vmatprep.subr.mxu1 %v32135_v23  ;;  %24661 = vmatpush3.msra.mxu0 %v28470_v2 }
 0x442   :  { %24662 = vmatprep.mubr.msk.f32.mxu0 %vm27424_vm2, %v32135_v23  ;;  %24708 = vmatpush3.msra.mxu1 %v28529_v6 }
 0x443   :  { %24663 = vmatmul.mubr.f32.vlgmr.msra.gmra.mxu0 %v28488_v49  ;;  %24684 = vmatprep.subr.mxu0 %v32135_v23 }
 0x444   :  { %24709 = vmatprep.mubr.msk.f32.mxu1 %vm27424_vm2, %v32135_v23  ;;  %24719 = vmatprep.subr.mxu1 %v32135_v23 }
 0x445   :  { %24685 = vmatpush3.msra.mxu0 %v28523_v21  ;;  %24710 = vmatmul.mubr.f32.vlgmr.msra.gmra.mxu1 %v28288_v33 }
 0x446   :  { %24720 = vmatpush3.msra.mxu1 %v28523_v21  ;;  %24686 = vmatprep.subr.mxu0 %v32135_v23 }
 0x447   :  { %24721 = vmatprep.subr.mxu1 %v32135_v23  ;;  %24687 = vmatpush3.msra.mxu0 %v28529_v6 }
 0x448   :  { %24688 = vmatprep.mubr.msk.f32.mxu0 %vm27424_vm2, %v32135_v23  ;;  %24722 = vmatpush3.msra.mxu1 %v28529_v6 }
 0x449   :  { %24689 = vmatmul.mubr.f32.vlgmr.msra.gmra.mxu0 %v28300_v61  ;;  %24698 = vmatprep.subr.mxu0 %v32135_v23 }
 0x44a   :  { %24699 = vmatpush3.msra.mxu0 %v28538_v27  ;;  %24702 = vmatprep.mubr.msk.f32.mxu0 %vm27424_vm2, %v32135_v23 }
 0x44b   :  { %24700 = vmatprep.subr.mxu0 %v32135_v23  ;;  %24723 = vmatprep.mubr.msk.f32.mxu1 %vm27424_vm2, %v32135_v23 }
 0x44c   :  { %24701 = vmatpush3.msra.mxu0 %v28546_v43  ;;  %24724 = vmatmul.mubr.f32.vlgmr.msra.gmra.mxu1 %v28279_v11 }
 0x44d   :  { %24703 = vmatmul.mubr.f32.vlgmr.msra.gmra.mxu0 %v28284_v20  ;;  %24712 = vmatprep.subr.mxu0 %v32135_v23 }
 0x44e   :  { %24713 = vmatpush3.msra.mxu0 %v4501_v12  ;;  %24716 = vmatprep.mubr.msk.f32.mxu0 %vm27424_vm2, %v32135_v23 }
 0x44f   :  { %24714 = vmatprep.subr.mxu0 %v32135_v23  ;;  %24745 = vmatprep.subr.mxu1 %v32135_v23 }
 0x450   :  { %24715 = vmatpush3.msra.mxu0 %v4508_v15  ;;  %24746 = vmatpush3.msra.mxu1 %v28381_v46 }
 0x451   :  { %24717 = vmatmul.mubr.f32.vlgmr.msra.gmra.mxu0 %v28279_v11  ;;  %24747 = vmatprep.subr.mxu1 %v32135_v23 }
 0x452   :  { %24748 = vmatpush3.msra.mxu1 %v28399_v39  ;;  %24726 = vmatprep.subr.mxu0 %v32135_v23 }
 0x453   :  { %24749 = vmatprep.subr.mxu1 %v32135_v23  ;;  %24727 = vmatpush3.msra.mxu0 %v28338_v47 }
 0x454   :  { %24750 = vmatpush3.msra.mxu1 %v28417_v55  ;;  %24728 = vmatprep.subr.mxu0 %v32135_v23 }
 0x455   :  { %24751 = vmatprep.subr.mxu1 %v32135_v23  ;;  %24729 = vmatpush3.msra.mxu0 %v28346_v35 }
 0x456   :  { %24752 = vmatpush3.msra.mxu1 %v28436_v51  ;;  %24730 = vmatprep.subr.mxu0 %v32135_v23 }
 0x457   :  { %24753 = vmatprep.subr.mxu1 %v32135_v23  ;;  %24731 = vmatpush3.msra.mxu0 %v28359_v25 }
 0x458   :  { %24754 = vmatpush3.msra.mxu1 %v28462_v24  ;;  %24732 = vmatprep.subr.mxu0 %v32135_v23 }
 0x459   :  { %24755 = vmatprep.subr.mxu1 %v32135_v23  ;;  %24733 = vmatpush3.msra.mxu0 %v28374_v34 }
 0x45a   :  { %24756 = vmatpush3.msra.mxu1 %v28465_v44  ;;  %24734 = vmatprep.subr.mxu0 %v32135_v23 }
 0x45b   :  { %24757 = vmatprep.subr.mxu1 %v32135_v23  ;;  %24761 = vmatprep.mubr.msk.f32.mxu1 %vm27424_vm2, %v32135_v23 }
 0x45c   :  { %24758 = vmatpush3.msra.mxu1 %v28475_v7  ;;  %24735 = vmatpush3.msra.mxu0 %v28392_v17 }
 0x45d   :  { %24759 = vmatprep.subr.mxu1 %v32135_v23  ;;  %24736 = vmatprep.subr.mxu0 %v32135_v23 }
 0x45e   :  { %24760 = vmatpush3.msra.mxu1 %v28481_v18  ;;  %24737 = vmatpush3.msra.mxu0 %v28406_v13 }
 0x45f   :  { %24783 = vmatprep.subr.mxu1 %v32135_v23  ;;  %24738 = vmatprep.subr.mxu0 %v32135_v23 }
 0x460   :  { %24739 = vmatpush3.msra.mxu0 %v28424_v45  ;;  %24742 = vmatprep.mubr.msk.f32.mxu0 %vm27424_vm2, %v32135_v23 }
 0x461   :  { %24740 = vmatprep.subr.mxu0 %v32135_v23 }
 0x462   :  { %24741 = vmatpush3.msra.mxu0 %v28444_v56 }
 0x463   :  { %24764 = vmatprep.subr.mxu0 %v32135_v23 }
 0x4d7   :  { %v4046_v52 = vpop.f32.mrf.mxu1 }
 0x4d9   :  { %v24607_v37 = vpop.f32.mrf.mxu1 }
 0x4df   :  { %v3935_v9 = vpop.f32.mrf.mxu0 }
 0x4e0   :  { %v4047_v50 = vadd.f32 %v4046_v52, %v3935_v9 }
 0x4e1   :  { %v24588_v49 = vpop.f32.mrf.mxu0 }
 0x4e7   :  { %v4215_v58 = vpop.f32.mrf.mxu1 }
 0x4e9   :  { %v24645_v48 = vpop.f32.mrf.mxu1 }
 0x4f0   :  { %v4134_v38 = vpop.f32.mrf.mxu0 }
 0x4f1   :  { %v4135_v29 = vadd.f32 %v4134_v38, %v4047_v50 }
 0x4f2   :  { %v24626_v57 = vpop.f32.mrf.mxu0 }
 0x4f3   :  { %v4216_v8 = vadd.f32 %v4215_v58, %v4135_v29 }
 0x4f9   :  { %v4389_v21 = vpop.f32.mrf.mxu1 }
 0x4fb   :  { %v24683_v6 = vpop.f32.mrf.mxu1 }
 0x4ff   :  { %v4547_v27 = vpop.f32.mrf.mxu1 }
 0x501   :  { %v24697_v43 = vpop.f32.mrf.mxu1 }
 0x503   :  { %v4310_v12 = vpop.f32.mrf.mxu0 }
 0x504   :  { %v4311_v15 = vadd.f32 %v4310_v12, %v4216_v8 }
 0x505   :  { %v24664_v60 = vpop.f32.mrf.mxu0  ;;  %v4698_v59 = vpop.f32.mrf.mxu1 }
 0x506   :  { %v28658_v22 = vadd.f32 %v4389_v21, %v4311_v15 }
 0x507   :  { %v24711_v63 = vpop.f32.mrf.mxu1 }
 0x509   :  { %v4466_v37 = vpop.f32.mrf.mxu0 }
 0x50a   :  { %v4548_v9 = vadd.f32 %v4547_v27, %v4466_v37  ;;  %v32371_v27 = vmov 0.0  }
 0x50b   :  { %v24690_v52 = vpop.f32.mrf.mxu0 }
 0x50c   :  { %v4848_v49 = vpop.f32.mrf.mxu1 }
 0x50d   :  { %v4623_v48 = vpop.f32.mrf.mxu0 }
 0x50e   :  { %v4624_v23 = vadd.f32 %v4623_v48, %v4548_v9  ;;  %v24725_v50 = vpop.f32.mrf.mxu1 }
 0x50f   :  { %v24704_v38 = vpop.f32.mrf.mxu0 }
 0x510   :  { %v4699_v58 = vadd.f32 %v4698_v59, %v4624_v23 }
 0x511   :  { %v4775_v29 = vpop.f32.mrf.mxu0 }
 0x512   :  { %v4776_v57 = vadd.f32 %v4775_v29, %v4699_v58 }
 0x513   :  { %v24718_v6 = vpop.f32.mrf.mxu0 }
 0x514   :  { %v4849_v43 = vadd.f32 %v4848_v49, %v4776_v57 }
 0x516   :  { %v4853_v8 = vsel %vm1108_vm1, %v4849_v43, 0 }
 0x517   :  { %v28661_v12 = vand.u32 4294901760, %v4853_v8 }
 0x519   :  { %v4929_v21 = vsub.f32 %v4853_v8, %v28661_v12  ;;  %24762 = vmatmul.mubr.f32.vlgmr.msra.gmra.mxu1 %v28661_v12  ;;  %v5392_v8 = vmul.f32 0.001953125, %v28658_v22  ;;  %v5397_v22 = vld [vmem:[%s32089_s3 + $0x1] sm:$0x1] }
 0x51a   :  { %24784 = vmatpush3.msra.mxu1 %v28338_v47  ;;  %24799 = vmatprep.mubr.msk.f32.mxu1 %vm27424_vm2, %v32371_v27 }
 0x51b   :  { %v4930_v15 = vand.u32 4294901760, %v4929_v21  ;;  %24785 = vmatprep.subr.mxu1 %v32371_v27 }
 0x51c   :  { %24786 = vmatpush3.msra.mxu1 %v28346_v35 }
 0x51d   :  { %24787 = vmatprep.subr.mxu1 %v32371_v27  ;;  %v4931_v23 = vsub.f32 %v4929_v21, %v4930_v15 }
 0x51e   :  { %24788 = vmatpush3.msra.mxu1 %v28359_v25 }
 0x51f   :  { %24789 = vmatprep.subr.mxu1 %v32371_v27  ;;  %v4932_v60 = vand.u32 4294901760, %v4931_v23  ;;  %v5394_v23 = vmul.f32 %v5392_v8, %v5392_v8 }
 0x520   :  { %24790 = vmatpush3.msra.mxu1 %v28374_v34 }
 0x521   :  { %24791 = vmatprep.subr.mxu1 %v32371_v27  ;;  %24743 = vmatmul.mubr.f32.vlgmr.msra.gmra.mxu0 %v4932_v60 }
 0x522   :  { %24765 = vmatpush3.msra.mxu0 %v28344_v36  ;;  %24792 = vmatpush3.msra.mxu1 %v28392_v17 }
 0x523   :  { %24766 = vmatprep.subr.mxu0 %v32371_v27  ;;  %24793 = vmatprep.subr.mxu1 %v32371_v27 }
 0x524   :  { %24767 = vmatpush3.msra.mxu0 %v28357_v53  ;;  %24794 = vmatpush3.msra.mxu1 %v28406_v13 }
 0x525   :  { %24768 = vmatprep.subr.mxu0 %v32371_v27  ;;  %24795 = vmatprep.subr.mxu1 %v32371_v27 }
 0x526   :  { %24769 = vmatpush3.msra.mxu0 %v28372_v3  ;;  %24796 = vmatpush3.msra.mxu1 %v28424_v45 }
 0x527   :  { %24770 = vmatprep.subr.mxu0 %v32371_v27  ;;  %24797 = vmatprep.subr.mxu1 %v32371_v27 }
 0x528   :  { %24771 = vmatpush3.msra.mxu0 %v28389_v0  ;;  %24798 = vmatpush3.msra.mxu1 %v28444_v56 }
 0x529   :  { %24772 = vmatprep.subr.mxu0 %v32371_v27  ;;  %24800 = vmatmul.mubr.f32.vlgmr.msra.gmra.mxu1 %v4930_v15 }
 0x52a   :  { %24821 = vmatprep.subr.mxu1 %v32371_v27  ;;  %24773 = vmatpush3.msra.mxu0 %v28410_v5 }
 0x52b   :  { %24822 = vmatpush3.msra.mxu1 %v28338_v47  ;;  %24774 = vmatprep.subr.mxu0 %v32371_v27 }
 0x52c   :  { %24823 = vmatprep.subr.mxu1 %v32371_v27  ;;  %24775 = vmatpush3.msra.mxu0 %v28422_v41 }
 0x52d   :  { %24824 = vmatpush3.msra.mxu1 %v28346_v35  ;;  %24776 = vmatprep.subr.mxu0 %v32371_v27 }
 0x52e   :  { %24825 = vmatprep.subr.mxu1 %v32371_v27  ;;  %24777 = vmatpush3.msra.mxu0 %v28442_v4 }
 0x52f   :  { %24826 = vmatpush3.msra.mxu1 %v28359_v25  ;;  %24778 = vmatprep.subr.mxu0 %v32371_v27 }
 0x530   :  { %24827 = vmatprep.subr.mxu1 %v32371_v27  ;;  %24779 = vmatpush3.msra.mxu0 %v28458_v14 }
 0x531   :  { %24780 = vmatprep.mubr.msk.f32.mxu0 %vm27424_vm2, %v32371_v27  ;;  %24828 = vmatpush3.msra.mxu1 %v28374_v34 }
 0x532   :  { %24781 = vmatmul.mubr.f32.vlgmr.msra.gmra.mxu0 %v4929_v21  ;;  %24802 = vmatprep.subr.mxu0 %v32371_v27 }
 0x533   :  { %24829 = vmatprep.subr.mxu1 %v32371_v27  ;;  %24803 = vmatpush3.msra.mxu0 %v28354_v42 }
 0x534   :  { %24830 = vmatpush3.msra.mxu1 %v28392_v17  ;;  %24804 = vmatprep.subr.mxu0 %v32371_v27 }
 0x535   :  { %24831 = vmatprep.subr.mxu1 %v32371_v27  ;;  %24805 = vmatpush3.msra.mxu0 %v28369_v28 }
 0x536   :  { %24832 = vmatpush3.msra.mxu1 %v28406_v13  ;;  %24806 = vmatprep.subr.mxu0 %v32371_v27 }
 0x537   :  { %24833 = vmatprep.subr.mxu1 %v32371_v27  ;;  %24807 = vmatpush3.msra.mxu0 %v28386_v32 }
 0x538   :  { %24834 = vmatpush3.msra.mxu1 %v28424_v45  ;;  %24808 = vmatprep.subr.mxu0 %v32371_v27 }
 0x539   :  { %24835 = vmatprep.subr.mxu1 %v32371_v27  ;;  %24809 = vmatpush3.msra.mxu0 %v28404_v62 }
 0x53a   :  { %24836 = vmatpush3.msra.mxu1 %v28444_v56  ;;  %24837 = vmatprep.mubr.msk.f32.mxu1 %vm27424_vm2, %v32371_v27 }
 0x53b   :  { %24810 = vmatprep.subr.mxu0 %v32371_v27  ;;  %24838 = vmatmul.mubr.f32.vlgmr.msra.gmra.mxu1 %v28661_v12 }
 0x53c   :  { %24811 = vmatpush3.msra.mxu0 %v28429_v54  ;;  %24818 = vmatprep.mubr.msk.f32.mxu0 %vm27424_vm2, %v32371_v27 }
 0x53d   :  { %24812 = vmatprep.subr.mxu0 %v32371_v27  ;;  %24851 = vmatprep.mubr.f32.mxu1 %v27493_v10 }
 0x53e   :  { %24813 = vmatpush3.msra.mxu0 %v28439_v26  ;;  %v6432_v26 = vld [vmem:[#allocation5 + $0x108] sm:$0xff] }
 0x53f   :  { %24814 = vmatprep.subr.mxu0 %v32371_v27  ;;  %v28905_v32 = vand.u32 4294901760, %v6432_v26 }
 0x540   :  { %24815 = vmatpush3.msra.mxu0 %v28455_v19 }
 0x541   :  { %24816 = vmatprep.subr.mxu0 %v32371_v27  ;;  %v28916_v42 = vsub.f32 %v6432_v26, %v28905_v32 }
 0x542   :  { %24817 = vmatpush3.msra.mxu0 %v28470_v2 }
 0x543   :  { %24819 = vmatmul.mubr.f32.vlgmr.msra.gmra.mxu0 %v28661_v12  ;;  %v28927_v14 = vand.u32 4294901760, %v28916_v42 }
 0x544   :  { %24844 = vmatprep.mubr.f32.mxu0 %v27542_v30 }
 0x545   :  { %v6600_v41 = vsub.f32 %v28916_v42, %v28927_v14 }
 0x5d9   :  { %v5045_v59 = vpop.f32.mrf.mxu1 }
 0x5db   :  { %v24763_v63 = vpop.f32.mrf.mxu1 }
 0x5e1   :  { %v4934_v37 = vpop.f32.mrf.mxu0 }
 0x5e2   :  { %v5046_v58 = vadd.f32 %v5045_v59, %v4934_v37  ;;  %v5396_v59 = vld [vmem:[%s32089_s3] sm:$0x1] }
 0x5e3   :  { %v24744_v52 = vpop.f32.mrf.mxu0 }
 0x5e4   :  { %v5403_v52 = vlaneseq }
 0x5e9   :  { %v5214_v9 = vpop.f32.mrf.mxu1 }
 0x5eb   :  { %v24801_v49 = vpop.f32.mrf.mxu1 }
 0x5ec   :  { %v5404_v49 = vshrl.u32 %v5403_v52, 7 }
 0x5ee   :  { %v28743_v37 = vsub.s32 0, %v5404_v49 }
 0x5f0   :  { %32372 = vst [vmem:[#allocation71_spill] sm:$0xff] %v28743_v37 }
 0x5f2   :  { %v5133_v48 = vpop.f32.mrf.mxu0 }
 0x5f3   :  { %v5134_v57 = vadd.f32 %v5133_v48, %v5046_v58 }
 0x5f4   :  { %v24782_v50 = vpop.f32.mrf.mxu0 }
 0x5f5   :  { %v5215_v6 = vadd.f32 %v5214_v9, %v5134_v57 }
 0x5fb   :  { %v5388_v38 = vpop.f32.mrf.mxu1 }
 0x5fd   :  { %v24839_v29 = vpop.f32.mrf.mxu1 }
 0x603   :  { %v5309_v43 = vpop.f32.mrf.mxu0 }
 0x604   :  { %v5310_v21 = vadd.f32 %v5309_v43, %v5215_v6 }
 0x605   :  { %v24820_v12 = vpop.f32.mrf.mxu0 }
 0x606   :  { %v5389_v15 = vadd.f32 %v5388_v38, %v5310_v21 }
 0x608   :  { %v5393_v60 = vmul.f32 0.001953125, %v5389_v15 }
 0x60a   :  { %v5395_v63 = vsub.f32 %v5393_v60, %v5394_v23 }
 0x60c   :  { %v5398_v30 = vadd.f32 1e-05, %v5395_v63 }
 0x60e   :  { %27343 = vrsqrt.f32 %v5398_v30 }
 0x61b   :  { %v27344_v9 = vpop.eup %27343 }
 0x61c   :  { %v5400_v48 = vmul.f32 %v27344_v9, %v5396_v59  ;;  %v32373_v9 = vld [vmem:[#allocation14_spill] sm:$0xff] }
 0x61e   :  { %v5401_v50 = vmul.f32 %v5400_v48, %v5392_v8  ;;  %v5406_v38 = vrot.slane %v5400_v48, %v28743_v37  ;;  %v32374_v48 = vld [vmem:[#allocation12_spill] sm:$0xff] }
 0x620   :  { %v5402_v58 = vsub.f32 %v5397_v22, %v5401_v50  ;;  %v5407_v30 = vmul.f32 %v5406_v38, %v28297_v40  ;;  %v5408_v29 = vmul.f32 %v5406_v38, %v28295_v1  ;;  %v32375_v22 = vld [vmem:[#allocation15_spill] sm:$0xff]  ;;  %v32376_v50 = vld [vmem:[#allocation16_spill] sm:$0xff]  ;;  %v32377_v38 = vld [vmem:[#allocation25_spill] sm:$0xff] }
 0x622   :  { %v5412_v57 = vrot.slane %v5402_v58, %v28743_v37  ;;  %v32378_v58 = vld [vmem:[#allocation26_spill] sm:$0xff]  ;;  %v6433_v37 = vld [vmem:[#allocation5 + $0x110] sm:$0xff] }
 0x623   :  { %v28894_v19 = vand.u32 4294901760, %v6433_v37 }
 0x624   :  { %v5413_v6 = vadd.f32 %v5412_v57, %v5407_v30  ;;  %v5414_v43 = vadd.f32 %v5412_v57, %v5408_v29  ;;  %v32379_v30 = vld [vmem:[#allocation21_spill] sm:$0xff]  ;;  %v32380_v29 = vld [vmem:[#allocation22_spill] sm:$0xff] }
 0x625   :  { %v32381_v57 = vld [vmem:[#allocation17_spill] sm:$0xff]  ;;  %v28903_v62 = vsub.f32 %v6433_v37, %v28894_v19 }
 0x626   :  { %v5415_v21 = vmax.f32 %v5413_v6, 0.0  ;;  %v5416_v12 = vmax.f32 %v5414_v43, 0.0  ;;  %v32382_v6 = vld [vmem:[#allocation18_spill] sm:$0xff]  ;;  %v32383_v43 = vld [vmem:[#allocation23_spill] sm:$0xff] }
 0x628   :  { %v28752_v15 = vand.u32 4294901760, %v5416_v12  ;;  %v28754_v23 = vand.u32 4294901760, %v5415_v21 }
 0x62a   :  { %v28757_v60 = vsub.f32 %v5416_v12, %v28752_v15  ;;  %v28760_v8 = vsub.f32 %v5415_v21, %v28754_v23  ;;  %24840 = vmatprep.subr.mxu0 %v28752_v15  ;;  %v32384_v21 = vld [vmem:[#allocation24_spill] sm:$0xff]  ;;  %v6438_v12 = vld [vmem:[#allocation5 + $0x138] sm:$0xff] }
 0x62b   :  { %24841 = vmatpush3.msra.mxu0 %v28752_v15 }
 0x62c   :  { %24842 = vmatprep.subr.mxu0 %v28754_v23  ;;  %v28766_v1 = vand.u32 4294901760, %v28757_v60  ;;  %v28769_v40 = vand.u32 4294901760, %v28760_v8 }
 0x62d   :  { %24843 = vmatpush3.msra.mxu0 %v28754_v23 }
 0x62e   :  { %24854 = vmatprep.subr.mxu0 %v28757_v60  ;;  %24845 = vmatmul.mubr.f32.vlgmr.msra.gmra.mxu0 %v27544_v31  ;;  %v5536_v63 = vsub.f32 %v28757_v60, %v28766_v1  ;;  %v5543_v52 = vsub.f32 %v28760_v8, %v28769_v40 }
 0x62f   :  { %24855 = vmatpush3.msra.mxu0 %v28757_v60  ;;  %24858 = vmatprep.mubr.f32.mxu0 %v27507_v16 }
 0x630   :  { %24856 = vmatprep.subr.mxu0 %v28760_v8  ;;  %v28781_v49 = vand.u32 4294901760, %v5536_v63  ;;  %v28786_v59 = vand.u32 4294901760, %v5543_v52  ;;  %v28846_v63 = vand.u32 4294901760, %v6438_v12  ;;  %v6437_v52 = vld [vmem:[#allocation5 + $0x130] sm:$0xff] }
 0x631   :  { %24857 = vmatpush3.msra.mxu0 %v28760_v8 }
 0x632   :  { %24847 = vmatprep.subr.mxu1 %v28781_v49  ;;  %24868 = vmatprep.subr.mxu0 %v28766_v1 }
 0x633   :  { %24848 = vmatpush3.msra.mxu1 %v28781_v49  ;;  %24859 = vmatmul.mubr.f32.vlgmr.msra.gmra.mxu0 %v32373_v9 }
 0x634   :  { %24869 = vmatpush3.msra.mxu0 %v28766_v1  ;;  %24849 = vmatprep.subr.mxu1 %v28786_v59 }
 0x635   :  { %24870 = vmatprep.subr.mxu0 %v28769_v40  ;;  %24850 = vmatpush3.msra.mxu1 %v28786_v59 }
 0x636   :  { %24871 = vmatpush3.msra.mxu0 %v28769_v40  ;;  %24852 = vmatmul.mubr.f32.vlgmr.msra.gmra.mxu1 %v32374_v48 }
 0x637   :  { %24861 = vmatprep.subr.mxu1 %v28752_v15  ;;  %24872 = vmatprep.mubr.f32.mxu0 %v27493_v10 }
 0x638   :  { %24882 = vmatprep.subr.mxu0 %v28752_v15  ;;  %24862 = vmatpush3.msra.mxu1 %v28752_v15 }
 0x639   :  { %24873 = vmatmul.mubr.f32.vlgmr.msra.gmra.mxu0 %v32374_v48  ;;  %24863 = vmatprep.subr.mxu1 %v28754_v23 }
 0x63a   :  { %24883 = vmatpush3.msra.mxu0 %v28752_v15  ;;  %24864 = vmatpush3.msra.mxu1 %v28754_v23 }
 0x63b   :  { %24884 = vmatprep.subr.mxu0 %v28754_v23  ;;  %24865 = vmatprep.mubr.f32.mxu1 %v32375_v22 }
 0x63c   :  { %24885 = vmatpush3.msra.mxu0 %v28754_v23  ;;  %24866 = vmatmul.mubr.f32.vlgmr.msra.gmra.mxu1 %v32376_v50 }
 0x63d   :  { %24875 = vmatprep.subr.mxu1 %v28752_v15  ;;  %24886 = vmatprep.mubr.f32.mxu0 %v32377_v38 }
 0x63e   :  { %24896 = vmatprep.subr.mxu0 %v28757_v60  ;;  %24876 = vmatpush3.msra.mxu1 %v28752_v15 }
 0x63f   :  { %24887 = vmatmul.mubr.f32.vlgmr.msra.gmra.mxu0 %v32378_v58  ;;  %24877 = vmatprep.subr.mxu1 %v28754_v23  ;;  %v6435_v58 = vld [vmem:[#allocation5 + $0x120] sm:$0xff] }
 0x640   :  { %24897 = vmatpush3.msra.mxu0 %v28757_v60  ;;  %24878 = vmatpush3.msra.mxu1 %v28754_v23  ;;  %v28873_v22 = vand.u32 4294901760, %v6435_v58 }
 0x641   :  { %24898 = vmatprep.subr.mxu0 %v28760_v8  ;;  %24879 = vmatprep.mubr.f32.mxu1 %v27493_v10 }
 0x642   :  { %24899 = vmatpush3.msra.mxu0 %v28760_v8  ;;  %24880 = vmatmul.mubr.f32.vlgmr.msra.gmra.mxu1 %v32374_v48  ;;  %v28883_v31 = vsub.f32 %v6435_v58, %v28873_v22 }
 0x643   :  { %24889 = vmatprep.subr.mxu1 %v28781_v49  ;;  %24900 = vmatprep.mubr.f32.mxu0 %v32379_v30 }
 0x644   :  { %24910 = vmatprep.subr.mxu0 %v28766_v1  ;;  %24890 = vmatpush3.msra.mxu1 %v28781_v49  ;;  %v28892_v2 = vand.u32 4294901760, %v28883_v31 }
 0x645   :  { %24901 = vmatmul.mubr.f32.vlgmr.msra.gmra.mxu0 %v32380_v29  ;;  %24891 = vmatprep.subr.mxu1 %v28786_v59  ;;  %v6436_v29 = vld [vmem:[#allocation5 + $0x128] sm:$0xff] }
 0x646   :  { %24911 = vmatpush3.msra.mxu0 %v28766_v1  ;;  %24892 = vmatpush3.msra.mxu1 %v28786_v59 }
 0x647   :  { %24912 = vmatprep.subr.mxu0 %v28769_v40  ;;  %24893 = vmatprep.mubr.f32.mxu1 %v32381_v57 }
 0x648   :  { %24913 = vmatpush3.msra.mxu0 %v28769_v40  ;;  %24894 = vmatmul.mubr.f32.vlgmr.msra.gmra.mxu1 %v32382_v6 }
 0x649   :  { %24903 = vmatprep.subr.mxu1 %v28752_v15  ;;  %24907 = vmatprep.mubr.f32.mxu1 %v32383_v43  ;;  %v28849_v43 = vsub.f32 %v6438_v12, %v28846_v63 }
 0x64a   :  { %24904 = vmatpush3.msra.mxu1 %v28752_v15  ;;  %24914 = vmatprep.mubr.f32.mxu0 %v32381_v57 }
 0x64b   :  { %24905 = vmatprep.subr.mxu1 %v28754_v23  ;;  %24915 = vmatmul.mubr.f32.vlgmr.msra.gmra.mxu0 %v32382_v6 }
 0x64c   :  { %24906 = vmatpush3.msra.mxu1 %v28754_v23  ;;  %24924 = vmatprep.subr.mxu0 %v28846_v63 }
 0x64d   :  { %24908 = vmatmul.mubr.f32.vlgmr.msra.gmra.mxu1 %v32384_v21  ;;  %24917 = vmatprep.subr.mxu1 %v28752_v15  ;;  %v28851_v21 = vand.u32 4294901760, %v6437_v52 }
 0x64e   :  { %24918 = vmatpush3.msra.mxu1 %v28752_v15  ;;  %24921 = vmatprep.mubr.f32.mxu1 %v32381_v57  ;;  %v28856_v57 = vand.u32 4294901760, %v28849_v43 }
 0x64f   :  { %24919 = vmatprep.subr.mxu1 %v28754_v23  ;;  %24925 = vmatpush3.msra.mxu0 %v28846_v63  ;;  %v28859_v30 = vsub.f32 %v6437_v52, %v28851_v21  ;;  %v6434_v52 = vld [vmem:[#allocation5 + $0x118] sm:$0xff] }
 0x650   :  { %24920 = vmatpush3.msra.mxu1 %v28754_v23  ;;  %24926 = vmatprep.subr.mxu0 %v28851_v21  ;;  %v6558_v12 = vsub.f32 %v28849_v43, %v28856_v57 }
 0x651   :  { %24922 = vmatmul.mubr.f32.vlgmr.msra.gmra.mxu1 %v32382_v6  ;;  %v28861_v6 = vand.u32 4294901760, %v6436_v29  ;;  %24927 = vmatpush3.msra.mxu0 %v28851_v21  ;;  %v28868_v38 = vand.u32 4294901760, %v28859_v30 }
 0x652   :  { %v6559_v48 = vand.u32 4294901760, %v6558_v12 }
 0x653   :  { %v28871_v50 = vsub.f32 %v6436_v29, %v28861_v6  ;;  %24928 = vmatprep.subr.mxu0 %v28861_v6  ;;  %v6565_v9 = vsub.f32 %v28859_v30, %v28868_v38  ;;  %v28886_v29 = vand.u32 4294901760, %v6434_v52 }
 0x654   :  { %24929 = vmatpush3.msra.mxu0 %v28861_v6  ;;  %24943 = vmatprep.subr.mxu1 %v6559_v48 }
 0x655   :  { %v28880_v16 = vand.u32 4294901760, %v28871_v50  ;;  %24930 = vmatprep.subr.mxu0 %v28873_v22  ;;  %v6566_v10 = vand.u32 4294901760, %v6565_v9  ;;  %24944 = vmatpush3.msra.mxu1 %v6559_v48  ;;  %v28897_v58 = vsub.f32 %v6434_v52, %v28886_v29  ;;  %v6579_v9 = vsub.f32 %v28883_v31, %v28892_v2  ;;  %v6431_v52 = vld [vmem:[#allocation5 + $0x100] sm:$0xff] }
 0x656   :  { %24931 = vmatpush3.msra.mxu0 %v28873_v22  ;;  %v28918_v37 = vand.u32 4294901760, %v6431_v52 }
 0x657   :  { %v6572_v12 = vsub.f32 %v28871_v50, %v28880_v16  ;;  %24932 = vmatprep.subr.mxu0 %v28886_v29  ;;  %24945 = vmatprep.subr.mxu1 %v6566_v10  ;;  %v28909_v48 = vand.u32 4294901760, %v28897_v58  ;;  %v6580_v28 = vand.u32 4294901760, %v6579_v9 }
 0x658   :  { %24933 = vmatpush3.msra.mxu0 %v28886_v29  ;;  %24946 = vmatpush3.msra.mxu1 %v6566_v10  ;;  %v28930_v26 = vsub.f32 %v6431_v52, %v28918_v37  ;;  %v6601_v52 = vand.u32 4294901760, %v6600_v41 }
 0x659   :  { %v6573_v54 = vand.u32 4294901760, %v6572_v12  ;;  %24934 = vmatprep.subr.mxu0 %v28894_v19  ;;  %v28913_v12 = vand.u32 4294901760, %v28903_v62  ;;  %v6586_v10 = vsub.f32 %v28897_v58, %v28909_v48 }
 0x65a   :  { %24935 = vmatpush3.msra.mxu0 %v28894_v19  ;;  %v28937_v5 = vand.u32 4294901760, %v28930_v26 }
 0x65b   :  { %24947 = vmatprep.subr.mxu1 %v6573_v54  ;;  %24936 = vmatprep.subr.mxu0 %v28905_v32  ;;  %v6593_v9 = vsub.f32 %v28903_v62, %v28913_v12  ;;  %v6587_v4 = vand.u32 4294901760, %v6586_v10 }
 0x65c   :  { %24948 = vmatpush3.msra.mxu1 %v6573_v54  ;;  %24937 = vmatpush3.msra.mxu0 %v28905_v32 }
 0x65d   :  { %24949 = vmatprep.subr.mxu1 %v6580_v28  ;;  %24938 = vmatprep.subr.mxu0 %v28918_v37  ;;  %v6594_v54 = vand.u32 4294901760, %v6593_v9 }
 0x65e   :  { %24950 = vmatpush3.msra.mxu1 %v6580_v28  ;;  %24939 = vmatpush3.msra.mxu0 %v28918_v37  ;;  %v6607_v28 = vsub.f32 %v28930_v26, %v28937_v5 }
 0x65f   :  { %24951 = vmatprep.subr.mxu1 %v6587_v4  ;;  %24962 = vmatprep.subr.mxu0 %v28849_v43 }
 0x660   :  { %24952 = vmatpush3.msra.mxu1 %v6587_v4  ;;  %v6608_v10 = vand.u32 4294901760, %v6607_v28 }
 0x661   :  { %24953 = vmatprep.subr.mxu1 %v6594_v54 }
 0x662   :  { %24954 = vmatpush3.msra.mxu1 %v6594_v54 }
 0x663   :  { %24955 = vmatprep.subr.mxu1 %v6601_v52 }
 0x664   :  { %24956 = vmatpush3.msra.mxu1 %v6601_v52 }
 0x665   :  { %24957 = vmatprep.subr.mxu1 %v6608_v10 }
 0x666   :  { %24958 = vmatpush3.msra.mxu1 %v6608_v10 }
 0x667   :  { %24981 = vmatprep.subr.mxu1 %v28846_v63 }
 0x6ee   :  { %v24846_v9 = vpop.f32.mrf.mxu0 }
 0x6f0   :  { %v5490_v0 = vpop.f32.mrf.mxu0 }
 0x6f3   :  { %v24860_v3 = vpop.f32.mrf.mxu0 }
 0x6f5   :  { %v5663_v53 = vpop.f32.mrf.mxu0 }
 0x6f6   :  { %v24853_v36 = vpop.f32.mrf.mxu1 }
 0x6f7   :  { %v5588_v56 = vadd.f32 %v24853_v36, %v24846_v9 }
 0x6f8   :  { %v5581_v4 = vpop.f32.mrf.mxu1 }
 0x6f9   :  { %v5671_v41 = vadd.f32 %v24860_v3, %v5588_v56  ;;  %v24874_v18 = vpop.f32.mrf.mxu0 }
 0x6fb   :  { %v28944_v45 = vpop.f32.mrf.mxu0 }
 0x6fc   :  { %v24867_v7 = vpop.f32.mrf.mxu1 }
 0x6fd   :  { %v5754_v54 = vadd.f32 %v24867_v7, %v5671_v41 }
 0x6fe   :  { %v5745_v28 = vpop.f32.mrf.mxu1 }
 0x6ff   :  { %v5837_v13 = vadd.f32 %v24874_v18, %v5754_v54  ;;  %v24888_v52 = vpop.f32.mrf.mxu0 }
 0x701   :  { %v6001_v44 = vpop.f32.mrf.mxu0 }
 0x702   :  { %v24881_v10 = vpop.f32.mrf.mxu1 }
 0x703   :  { %v28946_v17 = vadd.f32 %v24881_v10, %v5837_v13 }
 0x704   :  { %v28948_v24 = vpop.f32.mrf.mxu1 }
 0x705   :  { %v24902_v51 = vpop.f32.mrf.mxu0 }
 0x707   :  { %v6174_v36 = vpop.f32.mrf.mxu0 }
 0x708   :  { %v24895_v34 = vpop.f32.mrf.mxu1 }
 0x709   :  { %v6099_v55 = vadd.f32 %v24895_v34, %v24888_v52 }
 0x70a   :  { %v6092_v9 = vpop.f32.mrf.mxu1 }
 0x70b   :  { %v6182_v3 = vadd.f32 %v24902_v51, %v6099_v55  ;;  %v6093_v56 = vadd.f32 %v6092_v9, %v6001_v44  ;;  %v24916_v35 = vpop.f32.mrf.mxu0 }
 0x70d   :  { %v6175_v25 = vadd.f32 %v6174_v36, %v6093_v56  ;;  %v24909_v39 = vpop.f32.mrf.mxu1  ;;  %v6341_v46 = vpop.f32.mrf.mxu0  ;;  %v5922_v56 = vld [vmem:[#allocation5 + $0xd0] sm:$0xff] }
 0x70e   :  { %v6265_v7 = vadd.f32 %v24909_v39, %v6182_v3 }
 0x70f   :  { %v6256_v41 = vpop.f32.mrf.mxu1 }
 0x710   :  { %v6348_v18 = vadd.f32 %v24916_v35, %v6265_v7  ;;  %v6257_v54 = vadd.f32 %v6256_v41, %v6175_v25 }
 0x711   :  { %v24923_v47 = vpop.f32.mrf.mxu1 }
 0x712   :  { %v6342_v13 = vadd.f32 %v6341_v46, %v6257_v54  ;;  %v6427_v10 = vadd.f32 %v24923_v47, %v6348_v18  ;;  %v5582_v47 = vadd.f32 %v5581_v4, %v5490_v0  ;;  %v29043_v18 = vand.u32 4294901760, %v5922_v56 }
 0x713   :  { %v6420_v33 = vpop.f32.mrf.mxu1 }
 0x714   :  { %v6443_v11 = vsel %vm1108_vm1, %v6427_v10, 0  ;;  %v6421_v20 = vadd.f32 %v6420_v33, %v6342_v13  ;;  %v5664_v52 = vadd.f32 %v5663_v53, %v5582_v47  ;;  %v5927_v53 = vld [vmem:[#allocation5 + $0xf8] sm:$0xff]  ;;  %v5920_v10 = vld [vmem:[#allocation5 + $0xc0] sm:$0xff] }
 0x715   :  { %v28951_v34 = vand.u32 4294901760, %v6443_v11 }
 0x716   :  { %v6440_v55 = vsel %vm1108_vm1, %v6421_v20, 0  ;;  %v5746_v0 = vadd.f32 %v5745_v28, %v5664_v52 }
 0x717   :  { %v28955_v51 = vsub.f32 %v6443_v11, %v28951_v34  ;;  %v28957_v44 = vand.u32 4294901760, %v6440_v55 }
 0x718   :  { %v5831_v4 = vadd.f32 %v28944_v45, %v5746_v0  ;;  %v5924_v45 = vld [vmem:[#allocation5 + $0xe0] sm:$0xff] }
 0x719   :  { %v6530_v35 = vand.u32 4294901760, %v28955_v51  ;;  %v6519_v25 = vsub.f32 %v6440_v55, %v28957_v44  ;;  %24959 = vmatprep.mubr.f32.mxu1 %v28957_v44  ;;  %v29012_v3 = vand.u32 4294901760, %v5924_v45 }
 0x71a   :  { %24960 = vmatmul.mubr.f32.vlgmr.msra.gmra.mxu1 %v28951_v34  ;;  %v5910_v36 = vadd.f32 %v28948_v24, %v5831_v4 }
 0x71b   :  { %24982 = vmatpush3.msra.mxu1 %v28846_v63  ;;  %v6520_v33 = vand.u32 4294901760, %v6519_v25  ;;  %v6531_v20 = vsub.f32 %v28955_v51, %v6530_v35  ;;  %v29035_v7 = vsub.f32 %v5924_v45, %v29012_v3 }
 0x71c   :  { %24983 = vmatprep.subr.mxu1 %v28851_v21  ;;  %v7026_v24 = vsel %vm1108_vm1, %v5910_v36, 0 }
 0x71d   :  { %24984 = vmatpush3.msra.mxu1 %v28851_v21  ;;  %24997 = vmatprep.mubr.f32.mxu1 %v6520_v33  ;;  %v6521_v11 = vsub.f32 %v6519_v25, %v6520_v33  ;;  %v6532_v39 = vand.u32 4294901760, %v6531_v20  ;;  %v29037_v41 = vand.u32 4294901760, %v7026_v24  ;;  %v29062_v55 = vand.u32 4294901760, %v29035_v7 }
 0x71e   :  { %24985 = vmatprep.subr.mxu1 %v28861_v6 }
 0x71f   :  { %24986 = vmatpush3.msra.mxu1 %v28861_v6  ;;  %v6522_v46 = vand.u32 4294901760, %v6521_v11  ;;  %v7165_v33 = vsub.f32 %v29035_v7, %v29062_v55 }
 0x720   :  { %24987 = vmatprep.subr.mxu1 %v28873_v22 }
 0x721   :  { %24988 = vmatpush3.msra.mxu1 %v28873_v22  ;;  %24940 = vmatprep.mubr.f32.mxu0 %v6522_v46 }
 0x722   :  { %24989 = vmatprep.subr.mxu1 %v28886_v29  ;;  %24941 = vmatmul.mubr.f32.vlgmr.msra.gmra.mxu0 %v6532_v39  ;;  %v7166_v39 = vand.u32 4294901760, %v7165_v33 }
 0x723   :  { %24963 = vmatpush3.msra.mxu0 %v28849_v43  ;;  %24990 = vmatpush3.msra.mxu1 %v28886_v29  ;;  %v28985_v43 = vand.u32 4294901760, %v5927_v53 }
 0x724   :  { %24964 = vmatprep.subr.mxu0 %v28859_v30  ;;  %24978 = vmatprep.mubr.f32.mxu0 %v6519_v25 }
 0x725   :  { %24991 = vmatprep.subr.mxu1 %v28894_v19  ;;  %24965 = vmatpush3.msra.mxu0 %v28859_v30  ;;  %v5926_v30 = vld [vmem:[#allocation5 + $0xf0] sm:$0xff] }
 0x726   :  { %24992 = vmatpush3.msra.mxu1 %v28894_v19  ;;  %24966 = vmatprep.subr.mxu0 %v28871_v50  ;;  %v28993_v28 = vand.u32 4294901760, %v5926_v30 }
 0x727   :  { %24993 = vmatprep.subr.mxu1 %v28905_v32  ;;  %24967 = vmatpush3.msra.mxu0 %v28871_v50  ;;  %v5925_v50 = vld [vmem:[#allocation5 + $0xe8] sm:$0xff] }
 0x728   :  { %24994 = vmatpush3.msra.mxu1 %v28905_v32  ;;  %24968 = vmatprep.subr.mxu0 %v28883_v31  ;;  %v29003_v9 = vand.u32 4294901760, %v5925_v50 }
 0x729   :  { %24995 = vmatprep.subr.mxu1 %v28918_v37  ;;  %24969 = vmatpush3.msra.mxu0 %v28883_v31  ;;  %v28998_v31 = vsub.f32 %v5927_v53, %v28985_v43  ;;  %v7029_v53 = vsel %vm1108_vm1, %v28946_v17, 0 }
 0x72a   :  { %24996 = vmatpush3.msra.mxu1 %v28918_v37  ;;  %24970 = vmatprep.subr.mxu0 %v28897_v58  ;;  %v29121_v4 = vand.u32 4294901760, %v7029_v53 }
 0x72b   :  { %24998 = vmatmul.mubr.f32.vlgmr.msra.gmra.mxu1 %v6530_v35  ;;  %25019 = vmatprep.subr.mxu1 %v28846_v63 }
 0x72c   :  { %24971 = vmatpush3.msra.mxu0 %v28897_v58  ;;  %25020 = vmatpush3.msra.mxu1 %v28846_v63  ;;  %v5923_v63 = vld [vmem:[#allocation5 + $0xd8] sm:$0xff]  ;;  %v29010_v58 = vsub.f32 %v5926_v30, %v28993_v28 }
 0x72d   :  { %25035 = vmatprep.mubr.f32.mxu1 %v28957_v44  ;;  %24972 = vmatprep.subr.mxu0 %v28903_v62 }
 0x72e   :  { %25021 = vmatprep.subr.mxu1 %v28851_v21  ;;  %24973 = vmatpush3.msra.mxu0 %v28903_v62  ;;  %v29017_v62 = vand.u32 4294901760, %v28998_v31 }
 0x72f   :  { %25022 = vmatpush3.msra.mxu1 %v28851_v21  ;;  %24974 = vmatprep.subr.mxu0 %v28916_v42  ;;  %v29025_v21 = vand.u32 4294901760, %v5923_v63 }
 0x730   :  { %25023 = vmatprep.subr.mxu1 %v28861_v6  ;;  %24975 = vmatpush3.msra.mxu0 %v28916_v42  ;;  %v29023_v42 = vsub.f32 %v5925_v50, %v29003_v9 }
 0x731   :  { %25024 = vmatpush3.msra.mxu1 %v28861_v6  ;;  %24976 = vmatprep.subr.mxu0 %v28930_v26  ;;  %v29032_v6 = vand.u32 4294901760, %v29010_v58  ;;  %v29051_v13 = vsub.f32 %v5923_v63, %v29025_v21 }
 0x732   :  { %25025 = vmatprep.subr.mxu1 %v28873_v22  ;;  %24977 = vmatpush3.msra.mxu0 %v28930_v26  ;;  %v5921_v26 = vld [vmem:[#allocation5 + $0xc8] sm:$0xff]  ;;  %v29048_v54 = vand.u32 4294901760, %v29023_v42 }
 0x733   :  { %25026 = vmatpush3.msra.mxu1 %v28873_v22  ;;  %24979 = vmatmul.mubr.f32.vlgmr.msra.gmra.mxu0 %v28955_v51  ;;  %v7144_v22 = vsub.f32 %v28998_v31, %v29017_v62  ;;  %v29065_v51 = vsub.f32 %v7026_v24, %v29037_v41  ;;  %v29079_v25 = vand.u32 4294901760, %v29051_v13 }
 0x734   :  { %25000 = vmatprep.subr.mxu0 %v28856_v57  ;;  %25027 = vmatprep.subr.mxu1 %v28886_v29  ;;  %v7158_v35 = vsub.f32 %v29023_v42, %v29048_v54 }
 0x735   :  { %25001 = vmatpush3.msra.mxu0 %v28856_v57  ;;  %25016 = vmatprep.mubr.f32.mxu0 %v28957_v44  ;;  %v29055_v57 = vand.u32 4294901760, %v5921_v26  ;;  %v29070_v44 = vsub.f32 %v5922_v56, %v29043_v18  ;;  %v7106_v20 = vand.u32 4294901760, %v29065_v51  ;;  %v7172_v47 = vsub.f32 %v29051_v13, %v29079_v25  ;;  %v8118_v56 = vld [vmem:[#allocation5 + $0x160] sm:$0xff] }
 0x736   :  { %25028 = vmatpush3.msra.mxu1 %v28886_v29  ;;  %25002 = vmatprep.subr.mxu0 %v28868_v38  ;;  %v7151_v29 = vsub.f32 %v29010_v58, %v29032_v6 }
 0x737   :  { %25029 = vmatprep.subr.mxu1 %v28894_v19  ;;  %25003 = vmatpush3.msra.mxu0 %v28868_v38  ;;  %v7145_v38 = vand.u32 4294901760, %v7144_v22  ;;  %v29093_v11 = vand.u32 4294901760, %v29070_v44  ;;  %v7173_v30 = vand.u32 4294901760, %v7172_v47  ;;  %v8117_v22 = vld [vmem:[#allocation5 + $0x158] sm:$0xff] }
 0x738   :  { %25030 = vmatpush3.msra.mxu1 %v28894_v19  ;;  %25004 = vmatprep.subr.mxu0 %v28880_v16  ;;  %v29072_v19 = vand.u32 4294901760, %v5920_v10 }
 0x739   :  { %25031 = vmatprep.subr.mxu1 %v28905_v32  ;;  %25005 = vmatpush3.msra.mxu0 %v28880_v16  ;;  %v29084_v16 = vsub.f32 %v5921_v26, %v29055_v57  ;;  %v7179_v52 = vsub.f32 %v29070_v44, %v29093_v11 }
 0x73a   :  { %25032 = vmatpush3.msra.mxu1 %v28905_v32  ;;  %25006 = vmatprep.subr.mxu0 %v28892_v2  ;;  %v7152_v32 = vand.u32 4294901760, %v7151_v29  ;;  %v8116_v29 = vld [vmem:[#allocation5 + $0x150] sm:$0xff] }
 0x73b   :  { %25033 = vmatprep.subr.mxu1 %v28918_v37  ;;  %25007 = vmatpush3.msra.mxu0 %v28892_v2  ;;  %v29096_v2 = vsub.f32 %v5920_v10, %v29072_v19  ;;  %v29104_v46 = vand.u32 4294901760, %v29084_v16  ;;  %v7180_v17 = vand.u32 4294901760, %v7179_v52 }
 0x73c   :  { %25034 = vmatpush3.msra.mxu1 %v28918_v37  ;;  %25008 = vmatprep.subr.mxu0 %v28909_v48  ;;  %v7159_v37 = vand.u32 4294901760, %v7158_v35  ;;  %v8115_v35 = vld [vmem:[#allocation5 + $0x148] sm:$0xff] }
 0x73d   :  { %25036 = vmatmul.mubr.f32.vlgmr.msra.gmra.mxu1 %v28951_v34  ;;  %25057 = vmatprep.subr.mxu1 %v7145_v38  ;;  %v29112_v0 = vand.u32 4294901760, %v29096_v2  ;;  %v29313_v33 = vand.u32 4294901760, %v8115_v35 }
 0x73e   :  { %25009 = vmatpush3.msra.mxu0 %v28909_v48  ;;  %25058 = vmatpush3.msra.mxu1 %v7145_v38  ;;  %v7107_v48 = vsub.f32 %v29065_v51, %v7106_v20 }
 0x73f   :  { %25073 = vmatprep.mubr.f32.mxu1 %v29037_v41  ;;  %25010 = vmatprep.subr.mxu0 %v28913_v12  ;;  %v29324_v47 = vsub.f32 %v8115_v35, %v29313_v33 }
 0x740   :  { %25059 = vmatprep.subr.mxu1 %v7152_v32  ;;  %25011 = vmatpush3.msra.mxu0 %v28913_v12  ;;  %v7186_v12 = vsub.f32 %v29084_v16, %v29104_v46  ;;  %v7108_v50 = vand.u32 4294901760, %v7107_v48 }
 0x741   :  { %25060 = vmatpush3.msra.mxu1 %v7152_v32  ;;  %25012 = vmatprep.subr.mxu0 %v28927_v14  ;;  %v29335_v52 = vand.u32 4294901760, %v29324_v47 }
 0x742   :  { %25061 = vmatprep.subr.mxu1 %v7159_v37  ;;  %25013 = vmatpush3.msra.mxu0 %v28927_v14  ;;  %v7193_v14 = vsub.f32 %v29096_v2, %v29112_v0  ;;  %v7187_v45 = vand.u32 4294901760, %v7186_v12 }
 0x743   :  { %25062 = vmatpush3.msra.mxu1 %v7159_v37  ;;  %25014 = vmatprep.subr.mxu0 %v28937_v5  ;;  %v8283_v12 = vsub.f32 %v29324_v47, %v29335_v52 }
 0x744   :  { %25063 = vmatprep.subr.mxu1 %v7166_v39  ;;  %25015 = vmatpush3.msra.mxu0 %v28937_v5  ;;  %v29130_v5 = vsub.f32 %v7029_v53, %v29121_v4 }
 0x745   :  { %25064 = vmatpush3.msra.mxu1 %v7166_v39  ;;  %25017 = vmatmul.mubr.f32.vlgmr.msra.gmra.mxu0 %v28951_v34  ;;  %v7194_v34 = vand.u32 4294901760, %v7193_v14 }
 0x746   :  { %25038 = vmatprep.subr.mxu0 %v28985_v43  ;;  %25065 = vmatprep.subr.mxu1 %v7173_v30  ;;  %v7116_v36 = vand.u32 4294901760, %v29130_v5 }
 0x747   :  { %25039 = vmatpush3.msra.mxu0 %v28985_v43  ;;  %25054 = vmatprep.mubr.f32.mxu0 %v7108_v50  ;;  %v8284_v50 = vand.u32 4294901760, %v8283_v12 }
 0x748   :  { %25066 = vmatpush3.msra.mxu1 %v7173_v30  ;;  %25040 = vmatprep.subr.mxu0 %v28993_v28  ;;  %v7117_v63 = vsub.f32 %v29130_v5, %v7116_v36 }
 0x749   :  { %25067 = vmatprep.subr.mxu1 %v7180_v17  ;;  %25041 = vmatpush3.msra.mxu0 %v28993_v28 }
 0x74a   :  { %25068 = vmatpush3.msra.mxu1 %v7180_v17  ;;  %25042 = vmatprep.subr.mxu0 %v29003_v9  ;;  %v7118_v24 = vand.u32 4294901760, %v7117_v63 }
 0x74b   :  { %25069 = vmatprep.subr.mxu1 %v7187_v45  ;;  %25043 = vmatpush3.msra.mxu0 %v29003_v9 }
 0x74c   :  { %25070 = vmatpush3.msra.mxu1 %v7187_v45  ;;  %25044 = vmatprep.subr.mxu0 %v29012_v3 }
 0x74d   :  { %25071 = vmatprep.subr.mxu1 %v7194_v34  ;;  %25045 = vmatpush3.msra.mxu0 %v29012_v3 }
 0x74e   :  { %25072 = vmatpush3.msra.mxu1 %v7194_v34  ;;  %25046 = vmatprep.subr.mxu0 %v29025_v21 }
 0x74f   :  { %25074 = vmatmul.mubr.f32.vlgmr.msra.gmra.mxu1 %v29121_v4  ;;  %25095 = vmatprep.subr.mxu1 %v28985_v43 }
 0x750   :  { %25047 = vmatpush3.msra.mxu0 %v29025_v21  ;;  %25096 = vmatpush3.msra.mxu1 %v28985_v43 }
 0x751   :  { %25111 = vmatprep.mubr.f32.mxu1 %v7106_v20  ;;  %25048 = vmatprep.subr.mxu0 %v29043_v18 }
 0x752   :  { %25097 = vmatprep.subr.mxu1 %v28993_v28  ;;  %25049 = vmatpush3.msra.mxu0 %v29043_v18 }
 0x753   :  { %25098 = vmatpush3.msra.mxu1 %v28993_v28  ;;  %25050 = vmatprep.subr.mxu0 %v29055_v57 }
 0x754   :  { %25099 = vmatprep.subr.mxu1 %v29003_v9  ;;  %25051 = vmatpush3.msra.mxu0 %v29055_v57 }
 0x755   :  { %25100 = vmatpush3.msra.mxu1 %v29003_v9  ;;  %25052 = vmatprep.subr.mxu0 %v29072_v19 }
 0x756   :  { %25101 = vmatprep.subr.mxu1 %v29012_v3  ;;  %25053 = vmatpush3.msra.mxu0 %v29072_v19 }
 0x757   :  { %25102 = vmatpush3.msra.mxu1 %v29012_v3  ;;  %25055 = vmatmul.mubr.f32.vlgmr.msra.gmra.mxu0 %v7118_v24 }
 0x758   :  { %25076 = vmatprep.subr.mxu0 %v28998_v31  ;;  %25103 = vmatprep.subr.mxu1 %v29025_v21 }
 0x759   :  { %25077 = vmatpush3.msra.mxu0 %v28998_v31  ;;  %25092 = vmatprep.mubr.f32.mxu0 %v29065_v51  ;;  %v32389_v31 = vld [vmem:[#allocation33_spill] sm:$0xff] }
 0x75a   :  { %25104 = vmatpush3.msra.mxu1 %v29025_v21  ;;  %25078 = vmatprep.subr.mxu0 %v29010_v58 }
 0x75b   :  { %25105 = vmatprep.subr.mxu1 %v29043_v18  ;;  %25079 = vmatpush3.msra.mxu0 %v29010_v58  ;;  %v32391_v58 = vld [vmem:[#allocation29_spill] sm:$0xff] }
 0x75c   :  { %25106 = vmatpush3.msra.mxu1 %v29043_v18  ;;  %25080 = vmatprep.subr.mxu0 %v29023_v42 }
 0x75d   :  { %25107 = vmatprep.subr.mxu1 %v29055_v57  ;;  %25081 = vmatpush3.msra.mxu0 %v29023_v42 }
 0x75e   :  { %25108 = vmatpush3.msra.mxu1 %v29055_v57  ;;  %25082 = vmatprep.subr.mxu0 %v29035_v7 }
 0x75f   :  { %25109 = vmatprep.subr.mxu1 %v29072_v19  ;;  %25083 = vmatpush3.msra.mxu0 %v29035_v7 }
 0x760   :  { %25110 = vmatpush3.msra.mxu1 %v29072_v19  ;;  %25084 = vmatprep.subr.mxu0 %v29051_v13 }
 0x761   :  { %25112 = vmatmul.mubr.f32.vlgmr.msra.gmra.mxu1 %v7116_v36  ;;  %25133 = vmatprep.subr.mxu1 %v28985_v43 }
 0x762   :  { %25085 = vmatpush3.msra.mxu0 %v29051_v13  ;;  %25134 = vmatpush3.msra.mxu1 %v28985_v43  ;;  %v32385_v43 = vld [vmem:[#allocation27_spill] sm:$0xff] }
 0x763   :  { %25149 = vmatprep.mubr.f32.mxu1 %v29037_v41  ;;  %25086 = vmatprep.subr.mxu0 %v29070_v44 }
 0x764   :  { %25135 = vmatprep.subr.mxu1 %v28993_v28  ;;  %25087 = vmatpush3.msra.mxu0 %v29070_v44  ;;  %v29302_v44 = vand.u32 4294901760, %v8116_v29 }
 0x765   :  { %25136 = vmatpush3.msra.mxu1 %v28993_v28  ;;  %25088 = vmatprep.subr.mxu0 %v29084_v16  ;;  %v32386_v28 = vld [vmem:[#allocation28_spill] sm:$0xff] }
 0x766   :  { %25137 = vmatprep.subr.mxu1 %v29003_v9  ;;  %25089 = vmatpush3.msra.mxu0 %v29084_v16  ;;  %v29311_v32 = vsub.f32 %v8116_v29, %v29302_v44 }
 0x767   :  { %25138 = vmatpush3.msra.mxu1 %v29003_v9  ;;  %25090 = vmatprep.subr.mxu0 %v29096_v2  ;;  %v32390_v9 = vld [vmem:[#allocation34_spill] sm:$0xff] }
 0x768   :  { %25139 = vmatprep.subr.mxu1 %v29012_v3  ;;  %25091 = vmatpush3.msra.mxu0 %v29096_v2  ;;  %v29321_v37 = vand.u32 4294901760, %v29311_v32 }
 0x769   :  { %25140 = vmatpush3.msra.mxu1 %v29012_v3  ;;  %25093 = vmatmul.mubr.f32.vlgmr.msra.gmra.mxu0 %v29130_v5 }
 0x76a   :  { %25114 = vmatprep.subr.mxu0 %v29017_v62  ;;  %25141 = vmatprep.subr.mxu1 %v29025_v21  ;;  %v8276_v48 = vsub.f32 %v29311_v32, %v29321_v37 }
 0x76b   :  { %25115 = vmatpush3.msra.mxu0 %v29017_v62  ;;  %25130 = vmatprep.mubr.f32.mxu0 %v29037_v41  ;;  %v29281_v41 = vand.u32 4294901760, %v8118_v56 }
 0x76c   :  { %25142 = vmatpush3.msra.mxu1 %v29025_v21  ;;  %25116 = vmatprep.subr.mxu0 %v29032_v6  ;;  %v8277_v30 = vand.u32 4294901760, %v8276_v48 }
 0x76d   :  { %25143 = vmatprep.subr.mxu1 %v29043_v18  ;;  %25117 = vmatpush3.msra.mxu0 %v29032_v6  ;;  %v29291_v10 = vsub.f32 %v8118_v56, %v29281_v41 }
 0x76e   :  { %25144 = vmatpush3.msra.mxu1 %v29043_v18  ;;  %25118 = vmatprep.subr.mxu0 %v29048_v54 }
 0x76f   :  { %25145 = vmatprep.subr.mxu1 %v29055_v57  ;;  %25119 = vmatpush3.msra.mxu0 %v29048_v54  ;;  %v29300_v38 = vand.u32 4294901760, %v29291_v10 }
 0x770   :  { %25146 = vmatpush3.msra.mxu1 %v29055_v57  ;;  %25120 = vmatprep.subr.mxu0 %v29062_v55  ;;  %v29294_v57 = vand.u32 4294901760, %v8117_v22 }
 0x771   :  { %25147 = vmatprep.subr.mxu1 %v29072_v19  ;;  %25121 = vmatpush3.msra.mxu0 %v29062_v55  ;;  %v8262_v16 = vsub.f32 %v29291_v10, %v29300_v38 }
 0x772   :  { %25148 = vmatpush3.msra.mxu1 %v29072_v19  ;;  %25122 = vmatprep.subr.mxu0 %v29079_v25  ;;  %v29305_v19 = vsub.f32 %v8117_v22, %v29294_v57 }
 0x773   :  { %25150 = vmatmul.mubr.f32.vlgmr.msra.gmra.mxu1 %v29121_v4  ;;  %25159 = vmatprep.subr.mxu1 %v28781_v49  ;;  %v8263_v2 = vand.u32 4294901760, %v8262_v16 }
 0x774   :  { %25123 = vmatpush3.msra.mxu0 %v29079_v25  ;;  %25160 = vmatpush3.msra.mxu1 %v28781_v49  ;;  %v32387_v49 = vld [vmem:[#allocation31_spill] sm:$0xff]  ;;  %v29317_v20 = vand.u32 4294901760, %v29305_v19 }
 0x775   :  { %25124 = vmatprep.subr.mxu0 %v29093_v11  ;;  %25161 = vmatprep.subr.mxu1 %v28786_v59 }
 0x776   :  { %25125 = vmatpush3.msra.mxu0 %v29093_v11  ;;  %25162 = vmatpush3.msra.mxu1 %v28786_v59  ;;  %v32388_v59 = vld [vmem:[#allocation32_spill] sm:$0xff]  ;;  %v8114_v11 = vld [vmem:[#allocation5 + $0x140] sm:$0xff]  ;;  %v8269_v39 = vsub.f32 %v29305_v19, %v29317_v20 }
 0x777   :  { %25126 = vmatprep.subr.mxu0 %v29104_v46  ;;  %25163 = vmatprep.mubr.f32.mxu1 %v32385_v43 }
 0x778   :  { %25173 = vmatprep.subr.mxu1 %v28752_v15  ;;  %25127 = vmatpush3.msra.mxu0 %v29104_v46  ;;  %v29326_v46 = vand.u32 4294901760, %v8114_v11  ;;  %v8270_v53 = vand.u32 4294901760, %v8269_v39 }
 0x779   :  { %25164 = vmatmul.mubr.f32.vlgmr.msra.gmra.mxu1 %v32386_v28  ;;  %25128 = vmatprep.subr.mxu0 %v29112_v0 }
 0x77a   :  { %25174 = vmatpush3.msra.mxu1 %v28752_v15  ;;  %25129 = vmatpush3.msra.mxu0 %v29112_v0  ;;  %v29338_v0 = vsub.f32 %v8114_v11, %v29326_v46 }
 0x77b   :  { %25175 = vmatprep.subr.mxu1 %v28754_v23  ;;  %25131 = vmatmul.mubr.f32.vlgmr.msra.gmra.mxu0 %v29121_v4 }
 0x77c   :  { %25176 = vmatpush3.msra.mxu1 %v28754_v23  ;;  %25152 = vmatprep.subr.mxu0 %v28752_v15  ;;  %v29345_v4 = vand.u32 4294901760, %v29338_v0 }
 0x77d   :  { %25177 = vmatprep.mubr.f32.mxu1 %v32387_v49  ;;  %25187 = vmatprep.subr.mxu1 %v28752_v15 }
 0x77e   :  { %25153 = vmatpush3.msra.mxu0 %v28752_v15  ;;  %25178 = vmatmul.mubr.f32.vlgmr.msra.gmra.mxu1 %v32388_v59  ;;  %v8290_v17 = vsub.f32 %v29338_v0, %v29345_v4 }
 0x77f   :  { %25188 = vmatpush3.msra.mxu1 %v28752_v15  ;;  %25154 = vmatprep.subr.mxu0 %v28754_v23  ;;  %v32392_v15 = vld [vmem:[#allocation30_spill] sm:$0xff] }
 0x780   :  { %25189 = vmatprep.subr.mxu1 %v28754_v23  ;;  %25155 = vmatpush3.msra.mxu0 %v28754_v23  ;;  %v8291_v14 = vand.u32 4294901760, %v8290_v17 }
 0x781   :  { %25156 = vmatprep.mubr.f32.mxu0 %v32389_v31  ;;  %25190 = vmatpush3.msra.mxu1 %v28754_v23  ;;  %v8121_v23 = vld [vmem:[#allocation5 + $0x178] sm:$0xff] }
 0x782   :  { %25157 = vmatmul.mubr.f32.vlgmr.msra.gmra.mxu0 %v32390_v9  ;;  %25166 = vmatprep.subr.mxu0 %v28757_v60 }
 0x783   :  { %25167 = vmatpush3.msra.mxu0 %v28757_v60  ;;  %25170 = vmatprep.mubr.f32.mxu0 %v32391_v58  ;;  %v29254_v60 = vand.u32 4294901760, %v8121_v23 }
 0x784   :  { %25168 = vmatprep.subr.mxu0 %v28760_v8  ;;  %25191 = vmatprep.mubr.f32.mxu1 %v32385_v43 }
 0x785   :  { %25169 = vmatpush3.msra.mxu0 %v28760_v8  ;;  %25192 = vmatmul.mubr.f32.vlgmr.msra.gmra.mxu1 %v32386_v28  ;;  %v8120_v8 = vld [vmem:[#allocation5 + $0x170] sm:$0xff]  ;;  %v29257_v3 = vsub.f32 %v8121_v23, %v29254_v60 }
 0x786   :  { %25171 = vmatmul.mubr.f32.vlgmr.msra.gmra.mxu0 %v32392_v15  ;;  %25180 = vmatprep.subr.mxu0 %v28766_v1  ;;  %v29259_v62 = vand.u32 4294901760, %v8120_v8 }
 0x787   :  { %25181 = vmatpush3.msra.mxu0 %v28766_v1  ;;  %25184 = vmatprep.mubr.f32.mxu0 %v32385_v43  ;;  %v8119_v1 = vld [vmem:[#allocation5 + $0x168] sm:$0xff]  ;;  %v29264_v42 = vand.u32 4294901760, %v29257_v3 }
 0x788   :  { %25182 = vmatprep.subr.mxu0 %v28769_v40  ;;  %v29269_v21 = vand.u32 4294901760, %v8119_v1 }
 0x789   :  { %25183 = vmatpush3.msra.mxu0 %v28769_v40  ;;  %v29267_v40 = vsub.f32 %v8120_v8, %v29259_v62  ;;  %v8241_v6 = vsub.f32 %v29257_v3, %v29264_v42 }
 0x78a   :  { %25185 = vmatmul.mubr.f32.vlgmr.msra.gmra.mxu0 %v32386_v28  ;;  %25194 = vmatprep.subr.mxu0 %v29254_v60  ;;  %v29279_v26 = vsub.f32 %v8119_v1, %v29269_v21 }
 0x78b   :  { %25195 = vmatpush3.msra.mxu0 %v29254_v60  ;;  %v29276_v7 = vand.u32 4294901760, %v29267_v40  ;;  %v8242_v18 = vand.u32 4294901760, %v8241_v6 }
 0x78c   :  { %25196 = vmatprep.subr.mxu0 %v29259_v62  ;;  %v29288_v13 = vand.u32 4294901760, %v29279_v26 }
 0x78d   :  { %25197 = vmatpush3.msra.mxu0 %v29259_v62  ;;  %v8248_v54 = vsub.f32 %v29267_v40, %v29276_v7  ;;  %25213 = vmatprep.subr.mxu1 %v8242_v18 }
 0x78e   :  { %25198 = vmatprep.subr.mxu0 %v29269_v21  ;;  %v8255_v51 = vsub.f32 %v29279_v26, %v29288_v13  ;;  %25214 = vmatpush3.msra.mxu1 %v8242_v18 }
 0x78f   :  { %25199 = vmatpush3.msra.mxu0 %v29269_v21  ;;  %v8249_v55 = vand.u32 4294901760, %v8248_v54 }
 0x790   :  { %25200 = vmatprep.subr.mxu0 %v29281_v41  ;;  %v8256_v25 = vand.u32 4294901760, %v8255_v51 }
 0x791   :  { %25201 = vmatpush3.msra.mxu0 %v29281_v41  ;;  %25215 = vmatprep.subr.mxu1 %v8249_v55 }
 0x792   :  { %25202 = vmatprep.subr.mxu0 %v29294_v57  ;;  %25216 = vmatpush3.msra.mxu1 %v8249_v55 }
 0x793   :  { %25203 = vmatpush3.msra.mxu0 %v29294_v57  ;;  %25217 = vmatprep.subr.mxu1 %v8256_v25 }
 0x794   :  { %25204 = vmatprep.subr.mxu0 %v29302_v44  ;;  %25218 = vmatpush3.msra.mxu1 %v8256_v25 }
 0x795   :  { %25205 = vmatpush3.msra.mxu0 %v29302_v44  ;;  %25219 = vmatprep.subr.mxu1 %v8263_v2 }
 0x796   :  { %25206 = vmatprep.subr.mxu0 %v29313_v33  ;;  %25220 = vmatpush3.msra.mxu1 %v8263_v2 }
 0x797   :  { %25207 = vmatpush3.msra.mxu0 %v29313_v33  ;;  %25221 = vmatprep.subr.mxu1 %v8270_v53 }
 0x798   :  { %25208 = vmatprep.subr.mxu0 %v29326_v46  ;;  %25222 = vmatpush3.msra.mxu1 %v8270_v53 }
 0x799   :  { %25209 = vmatpush3.msra.mxu0 %v29326_v46  ;;  %25223 = vmatprep.subr.mxu1 %v8277_v30 }
 0x79a   :  { %25232 = vmatprep.subr.mxu0 %v29257_v3  ;;  %25224 = vmatpush3.msra.mxu1 %v8277_v30 }
 0x79b   :  { %25225 = vmatprep.subr.mxu1 %v8284_v50 }
 0x79c   :  { %25226 = vmatpush3.msra.mxu1 %v8284_v50 }
 0x79d   :  { %25227 = vmatprep.subr.mxu1 %v8291_v14 }
 0x79e   :  { %25228 = vmatpush3.msra.mxu1 %v8291_v14 }
 0x79f   :  { %25251 = vmatprep.subr.mxu1 %v29254_v60 }
 0x7da   :  { %v24961_v45 = vpop.f32.mrf.mxu1 }
 0x7dc   :  { %v29354_v63 = vpop.f32.mrf.mxu1 }
 0x7e2   :  { %v24942_v5 = vpop.f32.mrf.mxu0 }
 0x7e3   :  { %v6652_v34 = vadd.f32 %v24961_v45, %v24942_v5 }
 0x7e4   :  { %v29352_v36 = vpop.f32.mrf.mxu0 }
 0x7eb   :  { %v24999_v8 = vpop.f32.mrf.mxu1 }
 0x7ed   :  { %v29358_v6 = vpop.f32.mrf.mxu1 }
 0x7f3   :  { %v24980_v24 = vpop.f32.mrf.mxu0 }
 0x7f4   :  { %v6747_v23 = vadd.f32 %v24980_v24, %v6652_v34 }
 0x7f5   :  { %v29356_v56 = vpop.f32.mrf.mxu0 }
 0x7f6   :  { %v6836_v1 = vadd.f32 %v24999_v8, %v6747_v23 }
 0x7fd   :  { %v25037_v54 = vpop.f32.mrf.mxu1 }
 0x7ff   :  { %v29362_v51 = vpop.f32.mrf.mxu1 }
 0x805   :  { %v25018_v22 = vpop.f32.mrf.mxu0 }
 0x806   :  { %v6937_v18 = vadd.f32 %v25018_v22, %v6836_v1 }
 0x807   :  { %v29360_v55 = vpop.f32.mrf.mxu0 }
 0x808   :  { %v7022_v29 = vadd.f32 %v25037_v54, %v6937_v18 }
 0x80f   :  { %v25075_v16 = vpop.f32.mrf.mxu1 }
 0x811   :  { %v29366_v39 = vpop.f32.mrf.mxu1 }
 0x817   :  { %v25056_v35 = vpop.f32.mrf.mxu0 }
 0x818   :  { %v7121_v25 = vadd.f32 %v25056_v35, %v7022_v29 }
 0x819   :  { %v29364_v2 = vpop.f32.mrf.mxu0 }
 0x81a   :  { %v7238_v11 = vadd.f32 %v25075_v16, %v7121_v25 }
 0x821   :  { %v25113_v30 = vpop.f32.mrf.mxu1 }
 0x823   :  { %v29368_v50 = vpop.f32.mrf.mxu1 }
 0x829   :  { %v25094_v48 = vpop.f32.mrf.mxu0 }
 0x82a   :  { %v7333_v53 = vadd.f32 %v25094_v48, %v7238_v11 }
 0x82b   :  { %v29372_v45 = vpop.f32.mrf.mxu0 }
 0x82c   :  { %v7422_v12 = vadd.f32 %v25113_v30, %v7333_v53 }
 0x833   :  { %v25151_v17 = vpop.f32.mrf.mxu1 }
 0x835   :  { %v29370_v14 = vpop.f32.mrf.mxu1 }
 0x839   :  { %v25165_v5 = vpop.f32.mrf.mxu1 }
 0x83b   :  { %v25132_v34 = vpop.f32.mrf.mxu0  ;;  %v7775_v1 = vpop.f32.mrf.mxu1 }
 0x83c   :  { %v7523_v24 = vadd.f32 %v25132_v34, %v7422_v12 }
 0x83d   :  { %v29376_v8 = vpop.f32.mrf.mxu0 }
 0x83e   :  { %v29374_v23 = vadd.f32 %v25151_v17, %v7523_v24  ;;  %v25179_v18 = vpop.f32.mrf.mxu1 }
 0x840   :  { %v7939_v25 = vpop.f32.mrf.mxu1 }
 0x842   :  { %v25158_v22 = vpop.f32.mrf.mxu0 }
 0x843   :  { %v7782_v29 = vadd.f32 %v25165_v5, %v25158_v22 }
 0x844   :  { %v7684_v54 = vpop.f32.mrf.mxu0 }
 0x845   :  { %v7776_v16 = vadd.f32 %v7775_v1, %v7684_v54  ;;  %v25193_v58 = vpop.f32.mrf.mxu1 }
 0x846   :  { %v25172_v35 = vpop.f32.mrf.mxu0 }
 0x847   :  { %v7865_v11 = vadd.f32 %v25172_v35, %v7782_v29  ;;  %v8103_v31 = vpop.f32.mrf.mxu1 }
 0x848   :  { %v7857_v48 = vpop.f32.mrf.mxu0 }
 0x849   :  { %v7948_v53 = vadd.f32 %v25179_v18, %v7865_v11  ;;  %v7858_v30 = vadd.f32 %v7857_v48, %v7776_v16  ;;  %v32393_v48 = vld [vmem:[#allocation36_spill] sm:$0xff] }
 0x84a   :  { %v25186_v15 = vpop.f32.mrf.mxu0 }
 0x84b   :  { %v7940_v9 = vadd.f32 %v7939_v25, %v7858_v30  ;;  %v8031_v12 = vadd.f32 %v25186_v15, %v7948_v53  ;;  %v6646_v15 = vadd.f32 %v29354_v63, %v29352_v36  ;;  %v32394_v30 = vld [vmem:[#allocation35_spill] sm:$0xff] }
 0x84c   :  { %v8024_v17 = vpop.f32.mrf.mxu0 }
 0x84d   :  { %v8110_v34 = vadd.f32 %v25193_v58, %v8031_v12  ;;  %v8025_v24 = vadd.f32 %v8024_v17, %v7940_v9  ;;  %v32395_v12 = vld [vmem:[#allocation37_spill] sm:$0xff]  ;;  %v32396_v17 = vld [vmem:[#allocation39_spill] sm:$0xff] }
 0x84f   :  { %v8126_v59 = vsel %vm1108_vm1, %v8110_v34, 0  ;;  %v8104_v49 = vadd.f32 %v8103_v31, %v8025_v24  ;;  %v32397_v34 = vld [vmem:[#allocation48_spill] sm:$0xff]  ;;  %v32398_v24 = vld [vmem:[#allocation41_spill] sm:$0xff] }
 0x850   :  { %v29379_v28 = vand.u32 4294901760, %v8126_v59 }
 0x851   :  { %v8123_v5 = vsel %vm1108_vm1, %v8104_v49, 0 }
 0x852   :  { %v8212_v1 = vsub.f32 %v8126_v59, %v29379_v28  ;;  %v8201_v22 = vand.u32 4294901760, %v8123_v5 }
 0x854   :  { %v8213_v18 = vand.u32 4294901760, %v8212_v1  ;;  %v8202_v54 = vsub.f32 %v8123_v5, %v8201_v22  ;;  %25229 = vmatprep.mubr.f32.mxu1 %v8201_v22  ;;  %v32399_v5 = vld [vmem:[#allocation52_spill] sm:$0xff] }
 0x855   :  { %25230 = vmatmul.mubr.f32.vlgmr.msra.gmra.mxu1 %v29379_v28 }
 0x856   :  { %25252 = vmatpush3.msra.mxu1 %v29254_v60  ;;  %v8203_v58 = vand.u32 4294901760, %v8202_v54  ;;  %v8214_v9 = vsub.f32 %v8212_v1, %v8213_v18 }
 0x857   :  { %25253 = vmatprep.subr.mxu1 %v29259_v62 }
 0x858   :  { %25254 = vmatpush3.msra.mxu1 %v29259_v62  ;;  %25267 = vmatprep.mubr.f32.mxu1 %v8203_v58  ;;  %v8204_v31 = vsub.f32 %v8202_v54, %v8203_v58  ;;  %v8215_v59 = vand.u32 4294901760, %v8214_v9  ;;  %v32404_v58 = vld [vmem:[#allocation66_spill] sm:$0xff]  ;;  %v32405_v9 = vld [vmem:[#allocation51_spill] sm:$0xff] }
 0x859   :  { %25255 = vmatprep.subr.mxu1 %v29269_v21 }
 0x85a   :  { %25256 = vmatpush3.msra.mxu1 %v29269_v21  ;;  %v8205_v49 = vand.u32 4294901760, %v8204_v31  ;;  %v32406_v31 = vld [vmem:[#allocation67_spill] sm:$0xff] }
 0x85b   :  { %25257 = vmatprep.subr.mxu1 %v29281_v41 }
 0x85c   :  { %25258 = vmatpush3.msra.mxu1 %v29281_v41  ;;  %25210 = vmatprep.mubr.f32.mxu0 %v8205_v49  ;;  %v32407_v49 = vld [vmem:[#allocation54_spill] sm:$0xff] }
 0x85d   :  { %25259 = vmatprep.subr.mxu1 %v29294_v57  ;;  %25211 = vmatmul.mubr.f32.vlgmr.msra.gmra.mxu0 %v8215_v59  ;;  %v32408_v59 = vld [vmem:[#allocation69_spill] sm:$0xff] }
 0x85e   :  { %25233 = vmatpush3.msra.mxu0 %v29257_v3  ;;  %25260 = vmatpush3.msra.mxu1 %v29294_v57 }
 0x85f   :  { %25234 = vmatprep.subr.mxu0 %v29267_v40  ;;  %25248 = vmatprep.mubr.f32.mxu0 %v8202_v54  ;;  %v32403_v54 = vld [vmem:[#allocation60_spill] sm:$0xff] }
 0x860   :  { %25261 = vmatprep.subr.mxu1 %v29302_v44  ;;  %25235 = vmatpush3.msra.mxu0 %v29267_v40 }
 0x861   :  { %25262 = vmatpush3.msra.mxu1 %v29302_v44  ;;  %25236 = vmatprep.subr.mxu0 %v29279_v26 }
 0x862   :  { %25263 = vmatprep.subr.mxu1 %v29313_v33  ;;  %25237 = vmatpush3.msra.mxu0 %v29279_v26 }
 0x863   :  { %25264 = vmatpush3.msra.mxu1 %v29313_v33  ;;  %25238 = vmatprep.subr.mxu0 %v29291_v10 }
 0x864   :  { %25265 = vmatprep.subr.mxu1 %v29326_v46  ;;  %25239 = vmatpush3.msra.mxu0 %v29291_v10 }
 0x865   :  { %25266 = vmatpush3.msra.mxu1 %v29326_v46  ;;  %25240 = vmatprep.subr.mxu0 %v29305_v19 }
 0x866   :  { %25268 = vmatmul.mubr.f32.vlgmr.msra.gmra.mxu1 %v8213_v18  ;;  %25289 = vmatprep.subr.mxu1 %v29254_v60  ;;  %v32402_v18 = vld [vmem:[#allocation47_spill] sm:$0xff] }
 0x867   :  { %25241 = vmatpush3.msra.mxu0 %v29305_v19  ;;  %25290 = vmatpush3.msra.mxu1 %v29254_v60  ;;  %v6740_v60 = vadd.f32 %v29356_v56, %v6646_v15  ;;  %v32409_v15 = vld [vmem:[#allocation58_spill] sm:$0xff] }
 0x868   :  { %25305 = vmatprep.mubr.f32.mxu1 %v8201_v22  ;;  %25242 = vmatprep.subr.mxu0 %v29311_v32 }
 0x869   :  { %25291 = vmatprep.subr.mxu1 %v29259_v62  ;;  %25243 = vmatpush3.msra.mxu0 %v29311_v32  ;;  %v6828_v3 = vadd.f32 %v29358_v6, %v6740_v60  ;;  %v32410_v60 = vld [vmem:[#allocation70_spill] sm:$0xff] }
 0x86a   :  { %25292 = vmatpush3.msra.mxu1 %v29259_v62  ;;  %25244 = vmatprep.subr.mxu0 %v29324_v47 }
 0x86b   :  { %25293 = vmatprep.subr.mxu1 %v29269_v21  ;;  %25245 = vmatpush3.msra.mxu0 %v29324_v47  ;;  %v6931_v62 = vadd.f32 %v29360_v55, %v6828_v3  ;;  %v32411_v3 = vld [vmem:[#allocation63_spill] sm:$0xff] }
 0x86c   :  { %25294 = vmatpush3.msra.mxu1 %v29269_v21  ;;  %25246 = vmatprep.subr.mxu0 %v29338_v0 }
 0x86d   :  { %25295 = vmatprep.subr.mxu1 %v29281_v41  ;;  %25247 = vmatpush3.msra.mxu0 %v29338_v0  ;;  %v7016_v40 = vadd.f32 %v29362_v51, %v6931_v62 }
 0x86e   :  { %25296 = vmatpush3.msra.mxu1 %v29281_v41  ;;  %25249 = vmatmul.mubr.f32.vlgmr.msra.gmra.mxu0 %v8212_v1  ;;  %v32400_v1 = vld [vmem:[#allocation44_spill] sm:$0xff] }
 0x86f   :  { %25270 = vmatprep.subr.mxu0 %v29264_v42  ;;  %25297 = vmatprep.subr.mxu1 %v29294_v57 }
 0x870   :  { %25271 = vmatpush3.msra.mxu0 %v29264_v42  ;;  %25286 = vmatprep.mubr.f32.mxu0 %v8201_v22  ;;  %v32401_v22 = vld [vmem:[#allocation56_spill] sm:$0xff] }
 0x871   :  { %25298 = vmatpush3.msra.mxu1 %v29294_v57  ;;  %25272 = vmatprep.subr.mxu0 %v29276_v7 }
 0x872   :  { %25299 = vmatprep.subr.mxu1 %v29302_v44  ;;  %25273 = vmatpush3.msra.mxu0 %v29276_v7 }
 0x873   :  { %25300 = vmatpush3.msra.mxu1 %v29302_v44  ;;  %25274 = vmatprep.subr.mxu0 %v29288_v13 }
 0x874   :  { %25301 = vmatprep.subr.mxu1 %v29313_v33  ;;  %25275 = vmatpush3.msra.mxu0 %v29288_v13 }
 0x875   :  { %25302 = vmatpush3.msra.mxu1 %v29313_v33  ;;  %25276 = vmatprep.subr.mxu0 %v29300_v38 }
 0x876   :  { %25303 = vmatprep.subr.mxu1 %v29326_v46  ;;  %25277 = vmatpush3.msra.mxu0 %v29300_v38 }
 0x877   :  { %25304 = vmatpush3.msra.mxu1 %v29326_v46  ;;  %25278 = vmatprep.subr.mxu0 %v29317_v20 }
 0x878   :  { %25306 = vmatmul.mubr.f32.vlgmr.msra.gmra.mxu1 %v29379_v28  ;;  %25279 = vmatpush3.msra.mxu0 %v29317_v20 }
 0x879   :  { %25280 = vmatprep.subr.mxu0 %v29321_v37  ;;  %25315 = vmatprep.subr.mxu1 %v32371_v27 }
 0x87a   :  { %25281 = vmatpush3.msra.mxu0 %v29321_v37  ;;  %25319 = vmatprep.mubr.msk.f32.mxu1 %vm27424_vm2, %v32371_v27 }
 0x87b   :  { %25282 = vmatprep.subr.mxu0 %v29335_v52 }
 0x87c   :  { %25283 = vmatpush3.msra.mxu0 %v29335_v52 }
 0x87d   :  { %25284 = vmatprep.subr.mxu0 %v29345_v4 }
 0x87e   :  { %25285 = vmatpush3.msra.mxu0 %v29345_v4 }
 0x87f   :  { %25287 = vmatmul.mubr.f32.vlgmr.msra.gmra.mxu0 %v29379_v28  ;;  %25308 = vmatprep.subr.mxu0 %v32371_v27  ;;  %v7111_v28 = vadd.f32 %v29364_v2, %v7016_v40 }
 0x880   :  { %25312 = vmatprep.mubr.msk.f32.mxu0 %vm27424_vm2, %v32371_v27 }
 0x881   :  { %v7232_v13 = vadd.f32 %v29366_v39, %v7111_v28 }
 0x883   :  { %v7326_v44 = vadd.f32 %v29372_v45, %v7232_v13 }
 0x885   :  { %v7414_v37 = vadd.f32 %v29368_v50, %v7326_v44 }
 0x887   :  { %v7517_v0 = vadd.f32 %v29376_v8, %v7414_v37 }
 0x889   :  { %v7602_v51 = vadd.f32 %v29370_v14, %v7517_v0 }
 0x915   :  { %v25231_v21 = vpop.f32.mrf.mxu1 }
 0x917   :  { %v8328_v41 = vpop.f32.mrf.mxu1 }
 0x91d   :  { %v25212_v42 = vpop.f32.mrf.mxu0 }
 0x91e   :  { %v8335_v10 = vadd.f32 %v25231_v21, %v25212_v42 }
 0x91f   :  { %v8207_v7 = vpop.f32.mrf.mxu0 }
 0x920   :  { %v8329_v19 = vadd.f32 %v8328_v41, %v8207_v7 }
 0x926   :  { %v25269_v57 = vpop.f32.mrf.mxu1 }
 0x928   :  { %v8510_v20 = vpop.f32.mrf.mxu1 }
 0x92e   :  { %v25250_v26 = vpop.f32.mrf.mxu0 }
 0x92f   :  { %v8430_v32 = vadd.f32 %v25250_v26, %v8335_v10 }
 0x930   :  { %v8422_v38 = vpop.f32.mrf.mxu0 }
 0x931   :  { %v8423_v33 = vadd.f32 %v8422_v38, %v8329_v19  ;;  %v8519_v47 = vadd.f32 %v25269_v57, %v8430_v32 }
 0x933   :  { %v8511_v36 = vadd.f32 %v8510_v20, %v8423_v33 }
 0x938   :  { %v25307_v46 = vpop.f32.mrf.mxu1 }
 0x93a   :  { %v8698_v55 = vpop.f32.mrf.mxu1 }
 0x93f   :  { %v25288_v52 = vpop.f32.mrf.mxu0 }
 0x940   :  { %v8620_v4 = vadd.f32 %v25288_v52, %v8519_v47 }
 0x941   :  { %v8613_v63 = vpop.f32.mrf.mxu0 }
 0x942   :  { %v8705_v56 = vadd.f32 %v25307_v46, %v8620_v4  ;;  %v8614_v6 = vadd.f32 %v8613_v63, %v8511_v36  ;;  %v32412_v36 = vld [vmem:[#allocation40_spill] sm:$0xff]  ;;  %v32413_v63 = vld [vmem:[#allocation43_spill] sm:$0xff] }
 0x944   :  { %v29467_v2 = vadd.f32 %v8705_v56, %v29374_v23  ;;  %v8699_v39 = vadd.f32 %v8698_v55, %v8614_v6  ;;  %v32414_v56 = vld [vmem:[#allocation46_spill] sm:$0xff] }
 0x945   :  { %v32415_v55 = vld [vmem:[#allocation50_spill] sm:$0xff] }
 0x946   :  { %v29469_v45 = vadd.f32 %v8699_v39, %v7602_v51  ;;  %v8741_v50 = vand.u32 4294901760, %v29467_v2  ;;  %v8711_v6 = vmul.f32 %v29467_v2, %v29467_v2  ;;  %v32416_v39 = vld [vmem:[#allocation55_spill] sm:$0xff] }
 0x948   :  { %25309 = vmatpush3.msra.mxu0 %v8741_v50  ;;  %v8744_v29 = vand.u32 4294901760, %v29469_v45  ;;  %v8819_v8 = vsub.f32 %v29467_v2, %v8741_v50  ;;  %v8710_v51 = vmul.f32 %v29469_v45, %v29469_v45 }
 0x949   :  { %25310 = vmatprep.subr.mxu0 %v32371_v27 }
 0x94a   :  { %25311 = vmatpush3.msra.mxu0 %v8744_v29  ;;  %v8826_v35 = vsub.f32 %v29469_v45, %v8744_v29  ;;  %v8820_v25 = vand.u32 4294901760, %v8819_v8 }
 0x94b   :  { %25322 = vmatprep.subr.mxu0 %v32371_v27  ;;  %25313 = vmatmul.mubr.f32.vlgmr.msra.gmra.mxu0 %v28300_v61 }
 0x94c   :  { %25323 = vmatpush3.msra.mxu0 %v8819_v8  ;;  %25326 = vmatprep.mubr.msk.f32.mxu0 %vm27424_vm2, %v32371_v27  ;;  %v8821_v14 = vsub.f32 %v8819_v8, %v8820_v25  ;;  %v8827_v23 = vand.u32 4294901760, %v8826_v35  ;;  %v29579_v8 = vand.u32 4294901760, %v8710_v51 }
 0x94d   :  { %25324 = vmatprep.subr.mxu0 %v32371_v27 }
 0x94e   :  { %25325 = vmatpush3.msra.mxu0 %v8826_v35  ;;  %v8822_v16 = vand.u32 4294901760, %v8821_v14  ;;  %v8828_v11 = vsub.f32 %v8826_v35, %v8827_v23  ;;  %v32418_v35 = vld [vmem:[#allocation62_spill] sm:$0xff]  ;;  %v32419_v14 = vld [vmem:[#allocation65_spill] sm:$0xff] }
 0x94f   :  { %25336 = vmatprep.subr.mxu0 %v32371_v27  ;;  %25327 = vmatmul.mubr.f32.vlgmr.msra.gmra.mxu0 %v32393_v48 }
 0x950   :  { %25316 = vmatpush3.msra.mxu1 %v8822_v16  ;;  %25337 = vmatpush3.msra.mxu0 %v8820_v25  ;;  %v8829_v53 = vand.u32 4294901760, %v8828_v11  ;;  %v32420_v16 = vld [vmem:[#allocation42_spill] sm:$0xff] }
 0x951   :  { %25317 = vmatprep.subr.mxu1 %v32371_v27  ;;  %25338 = vmatprep.subr.mxu0 %v32371_v27 }
 0x952   :  { %25318 = vmatpush3.msra.mxu1 %v8829_v53  ;;  %25339 = vmatpush3.msra.mxu0 %v8827_v23  ;;  %v29596_v23 = vsub.f32 %v8710_v51, %v29579_v8  ;;  %v32421_v53 = vld [vmem:[#allocation45_spill] sm:$0xff] }
 0x953   :  { %25320 = vmatmul.mubr.f32.vlgmr.msra.gmra.mxu1 %v32394_v30  ;;  %25329 = vmatprep.subr.mxu1 %v32371_v27 }
 0x954   :  { %25330 = vmatpush3.msra.mxu1 %v8741_v50  ;;  %25333 = vmatprep.mubr.msk.f32.mxu1 %vm27424_vm2, %v32371_v27 }
 0x955   :  { %25331 = vmatprep.subr.mxu1 %v32371_v27  ;;  %25340 = vmatprep.mubr.msk.f32.mxu0 %vm27424_vm2, %v32371_v27 }
 0x956   :  { %25332 = vmatpush3.msra.mxu1 %v8744_v29  ;;  %25341 = vmatmul.mubr.f32.vlgmr.msra.gmra.mxu0 %v32394_v30 }
 0x957   :  { %25334 = vmatmul.mubr.f32.vlgmr.msra.gmra.mxu1 %v32395_v12  ;;  %25343 = vmatprep.subr.mxu1 %v32371_v27 }
 0x958   :  { %25344 = vmatpush3.msra.mxu1 %v8741_v50  ;;  %25347 = vmatprep.mubr.msk.f32.mxu1 %vm27424_vm2, %v32371_v27  ;;  %v29573_v50 = vand.u32 4294901760, %v8711_v6 }
 0x959   :  { %25345 = vmatprep.subr.mxu1 %v32371_v27  ;;  %25350 = vmatprep.subr.mxu0 %v32371_v27 }
 0x95a   :  { %25346 = vmatpush3.msra.mxu1 %v8744_v29  ;;  %25351 = vmatpush3.msra.mxu0 %v32396_v17  ;;  %v32417_v29 = vld [vmem:[#allocation57_spill] sm:$0xff]  ;;  %v29588_v25 = vsub.f32 %v8711_v6, %v29573_v50 }
 0x95b   :  { %25348 = vmatmul.mubr.f32.vlgmr.msra.gmra.mxu1 %v32394_v30  ;;  %25369 = vmatprep.subr.mxu1 %v32371_v27 }
 0x95c   :  { %25370 = vmatpush3.msra.mxu1 %v32397_v34  ;;  %25352 = vmatprep.subr.mxu0 %v32371_v27  ;;  %v9819_v11 = vand.u32 4294901760, %v29588_v25 }
 0x95d   :  { %25371 = vmatprep.subr.mxu1 %v32371_v27  ;;  %25353 = vmatpush3.msra.mxu0 %v32398_v24 }
 0x95e   :  { %25372 = vmatpush3.msra.mxu1 %v32399_v5  ;;  %25354 = vmatprep.subr.mxu0 %v32371_v27 }
 0x95f   :  { %25373 = vmatprep.subr.mxu1 %v32371_v27  ;;  %25355 = vmatpush3.msra.mxu0 %v32400_v1 }
 0x960   :  { %25374 = vmatpush3.msra.mxu1 %v32401_v22  ;;  %25356 = vmatprep.subr.mxu0 %v32371_v27 }
 0x961   :  { %25375 = vmatprep.subr.mxu1 %v32371_v27  ;;  %25357 = vmatpush3.msra.mxu0 %v32402_v18 }
 0x962   :  { %25376 = vmatpush3.msra.mxu1 %v32403_v54  ;;  %25358 = vmatprep.subr.mxu0 %v32371_v27 }
 0x963   :  { %25377 = vmatprep.subr.mxu1 %v32371_v27  ;;  %25385 = vmatprep.mubr.msk.f32.mxu1 %vm27424_vm2, %v32371_v27 }
 0x964   :  { %25378 = vmatpush3.msra.mxu1 %v32404_v58  ;;  %25359 = vmatpush3.msra.mxu0 %v32405_v9 }
 0x965   :  { %25379 = vmatprep.subr.mxu1 %v32371_v27  ;;  %25360 = vmatprep.subr.mxu0 %v32371_v27 }
 0x966   :  { %25380 = vmatpush3.msra.mxu1 %v32406_v31  ;;  %25361 = vmatpush3.msra.mxu0 %v32407_v49 }
 0x967   :  { %25381 = vmatprep.subr.mxu1 %v32371_v27  ;;  %25362 = vmatprep.subr.mxu0 %v32371_v27 }
 0x968   :  { %25382 = vmatpush3.msra.mxu1 %v32408_v59  ;;  %25363 = vmatpush3.msra.mxu0 %v32409_v15 }
 0x969   :  { %25383 = vmatprep.subr.mxu1 %v32371_v27  ;;  %25364 = vmatprep.subr.mxu0 %v32371_v27 }
 0x96a   :  { %25384 = vmatpush3.msra.mxu1 %v32410_v60  ;;  %25365 = vmatpush3.msra.mxu0 %v32411_v3 }
 0x96b   :  { %25407 = vmatprep.subr.mxu1 %v32371_v27  ;;  %25366 = vmatprep.mubr.msk.f32.mxu0 %vm27424_vm2, %v32371_v27 }
 0x96c   :  { %25388 = vmatprep.subr.mxu0 %v32371_v27 }
 0xa0b   :  { %v8785_v62 = vpop.f32.mrf.mxu0 }
 0xa0d   :  { %v25314_v42 = vpop.f32.mrf.mxu0 }
 0xa0e   :  { %v32422_v42 = vld [vmem:[#allocation49_spill] sm:$0xff] }
 0xa0f   :  { %v8942_v40 = vpop.f32.mrf.mxu0 }
 0xa11   :  { %v25328_v21 = vpop.f32.mrf.mxu0 }
 0xa12   :  { %v32423_v21 = vld [vmem:[#allocation53_spill] sm:$0xff] }
 0xa13   :  { %v8866_v7 = vpop.f32.mrf.mxu1 }
 0xa14   :  { %v8867_v28 = vadd.f32 %v8866_v7, %v8785_v62  ;;  %v9826_v62 = vand.u32 4294901760, %v29596_v23 }
 0xa15   :  { %v25321_v26 = vpop.f32.mrf.mxu1 }
 0xa16   :  { %v8943_v41 = vadd.f32 %v8942_v40, %v8867_v28  ;;  %v9094_v13 = vpop.f32.mrf.mxu0  ;;  %v9820_v40 = vsub.f32 %v29588_v25, %v9819_v11  ;;  %v9827_v7 = vsub.f32 %v29596_v23, %v9826_v62  ;;  %v32424_v26 = vld [vmem:[#allocation59_spill] sm:$0xff] }
 0xa17   :  { %v9017_v10 = vpop.f32.mrf.mxu1 }
 0xa18   :  { %v9018_v57 = vadd.f32 %v9017_v10, %v8943_v41  ;;  %v25342_v38 = vpop.f32.mrf.mxu0  ;;  %v9821_v28 = vand.u32 4294901760, %v9820_v40  ;;  %v9828_v41 = vand.u32 4294901760, %v9827_v7  ;;  %v32426_v10 = vld [vmem:[#allocation64_spill] sm:$0xff] }
 0xa19   :  { %v25335_v44 = vpop.f32.mrf.mxu1 }
 0xa1a   :  { %v9095_v19 = vadd.f32 %v9094_v13, %v9018_v57  ;;  %v32425_v13 = vld [vmem:[#allocation61_spill] sm:$0xff]  ;;  %v32427_v57 = vld [vmem:[#allocation68_spill] sm:$0xff] }
 0xa1b   :  { %v9167_v32 = vpop.f32.mrf.mxu1 }
 0xa1c   :  { %v9168_v33 = vadd.f32 %v9167_v32, %v9095_v19 }
 0xa1d   :  { %v25349_v20 = vpop.f32.mrf.mxu1 }
 0xa1e   :  { %v9172_v37 = vsel %vm1108_vm1, %v9168_v33, 0 }
 0xa1f   :  { %v29538_v47 = vand.u32 4294901760, %v9172_v37 }
 0xa21   :  { %v9248_v46 = vsub.f32 %v9172_v37, %v29538_v47  ;;  %25386 = vmatmul.mubr.f32.vlgmr.msra.gmra.mxu1 %v29538_v47 }
 0xa22   :  { %25408 = vmatpush3.msra.mxu1 %v32396_v17  ;;  %25423 = vmatprep.mubr.msk.f32.mxu1 %vm27424_vm2, %v32371_v27 }
 0xa23   :  { %v9249_v52 = vand.u32 4294901760, %v9248_v46  ;;  %25409 = vmatprep.subr.mxu1 %v32371_v27 }
 0xa24   :  { %25410 = vmatpush3.msra.mxu1 %v32398_v24 }
 0xa25   :  { %25411 = vmatprep.subr.mxu1 %v32371_v27  ;;  %v9250_v0 = vsub.f32 %v9248_v46, %v9249_v52 }
 0xa26   :  { %25412 = vmatpush3.msra.mxu1 %v32400_v1 }
 0xa27   :  { %25413 = vmatprep.subr.mxu1 %v32371_v27  ;;  %v9251_v4 = vand.u32 4294901760, %v9250_v0 }
 0xa28   :  { %25414 = vmatpush3.msra.mxu1 %v32402_v18 }
 0xa29   :  { %25415 = vmatprep.subr.mxu1 %v32371_v27  ;;  %25367 = vmatmul.mubr.f32.vlgmr.msra.gmra.mxu0 %v9251_v4 }
 0xa2a   :  { %25389 = vmatpush3.msra.mxu0 %v32412_v36  ;;  %25416 = vmatpush3.msra.mxu1 %v32405_v9 }
 0xa2b   :  { %25390 = vmatprep.subr.mxu0 %v32371_v27  ;;  %25417 = vmatprep.subr.mxu1 %v32371_v27 }
 0xa2c   :  { %25391 = vmatpush3.msra.mxu0 %v32413_v63  ;;  %25418 = vmatpush3.msra.mxu1 %v32407_v49 }
 0xa2d   :  { %25392 = vmatprep.subr.mxu0 %v32371_v27  ;;  %25419 = vmatprep.subr.mxu1 %v32371_v27 }
 0xa2e   :  { %25393 = vmatpush3.msra.mxu0 %v32414_v56  ;;  %25420 = vmatpush3.msra.mxu1 %v32409_v15 }
 0xa2f   :  { %25394 = vmatprep.subr.mxu0 %v32371_v27  ;;  %25421 = vmatprep.subr.mxu1 %v32371_v27 }
 0xa30   :  { %25395 = vmatpush3.msra.mxu0 %v32415_v55  ;;  %25422 = vmatpush3.msra.mxu1 %v32411_v3 }
 0xa31   :  { %25396 = vmatprep.subr.mxu0 %v32371_v27  ;;  %25424 = vmatmul.mubr.f32.vlgmr.msra.gmra.mxu1 %v9249_v52 }
 0xa32   :  { %25445 = vmatprep.subr.mxu1 %v32371_v27  ;;  %25397 = vmatpush3.msra.mxu0 %v32416_v39 }
 0xa33   :  { %25446 = vmatpush3.msra.mxu1 %v32396_v17  ;;  %25398 = vmatprep.subr.mxu0 %v32371_v27 }
 0xa34   :  { %25447 = vmatprep.subr.mxu1 %v32371_v27  ;;  %25399 = vmatpush3.msra.mxu0 %v32417_v29 }
 0xa35   :  { %25448 = vmatpush3.msra.mxu1 %v32398_v24  ;;  %25400 = vmatprep.subr.mxu0 %v32371_v27 }
 0xa36   :  { %25449 = vmatprep.subr.mxu1 %v32371_v27  ;;  %25401 = vmatpush3.msra.mxu0 %v32418_v35 }
 0xa37   :  { %25450 = vmatpush3.msra.mxu1 %v32400_v1  ;;  %25402 = vmatprep.subr.mxu0 %v32371_v27 }
 0xa38   :  { %25451 = vmatprep.subr.mxu1 %v32371_v27  ;;  %25403 = vmatpush3.msra.mxu0 %v32419_v14 }
 0xa39   :  { %25404 = vmatprep.mubr.msk.f32.mxu0 %vm27424_vm2, %v32371_v27  ;;  %25452 = vmatpush3.msra.mxu1 %v32402_v18 }
 0xa3a   :  { %25405 = vmatmul.mubr.f32.vlgmr.msra.gmra.mxu0 %v9248_v46  ;;  %25426 = vmatprep.subr.mxu0 %v32371_v27 }
 0xa3b   :  { %25453 = vmatprep.subr.mxu1 %v32371_v27  ;;  %25427 = vmatpush3.msra.mxu0 %v32420_v16 }
 0xa3c   :  { %25454 = vmatpush3.msra.mxu1 %v32405_v9  ;;  %25428 = vmatprep.subr.mxu0 %v32371_v27 }
 0xa3d   :  { %25455 = vmatprep.subr.mxu1 %v32371_v27  ;;  %25429 = vmatpush3.msra.mxu0 %v32421_v53 }
 0xa3e   :  { %25456 = vmatpush3.msra.mxu1 %v32407_v49  ;;  %25430 = vmatprep.subr.mxu0 %v32371_v27 }
 0xa3f   :  { %25457 = vmatprep.subr.mxu1 %v32371_v27  ;;  %25431 = vmatpush3.msra.mxu0 %v32422_v42 }
 0xa40   :  { %25458 = vmatpush3.msra.mxu1 %v32409_v15  ;;  %25432 = vmatprep.subr.mxu0 %v32371_v27 }
 0xa41   :  { %25459 = vmatprep.subr.mxu1 %v32371_v27  ;;  %25433 = vmatpush3.msra.mxu0 %v32423_v21 }
 0xa42   :  { %25460 = vmatpush3.msra.mxu1 %v32411_v3  ;;  %25461 = vmatprep.mubr.msk.f32.mxu1 %vm27424_vm2, %v32371_v27 }
 0xa43   :  { %25434 = vmatprep.subr.mxu0 %v32371_v27  ;;  %25462 = vmatmul.mubr.f32.vlgmr.msra.gmra.mxu1 %v29538_v47 }
 0xa44   :  { %25471 = vmatprep.subr.mxu1 %v32371_v27  ;;  %25435 = vmatpush3.msra.mxu0 %v32424_v26 }
 0xa45   :  { %25472 = vmatpush3.msra.mxu1 %v9821_v28  ;;  %25436 = vmatprep.subr.mxu0 %v32371_v27 }
 0xa46   :  { %25473 = vmatprep.subr.mxu1 %v32371_v27  ;;  %25437 = vmatpush3.msra.mxu0 %v32425_v13 }
 0xa47   :  { %25474 = vmatpush3.msra.mxu1 %v9828_v41  ;;  %25438 = vmatprep.subr.mxu0 %v32371_v27 }
 0xa48   :  { %25475 = vmatprep.mubr.msk.f32.mxu1 %vm27424_vm2, %v32371_v27  ;;  %25485 = vmatprep.subr.mxu1 %v32371_v27 }
 0xa49   :  { %25439 = vmatpush3.msra.mxu0 %v32426_v10  ;;  %25476 = vmatmul.mubr.f32.vlgmr.msra.gmra.mxu1 %v32394_v30 }
 0xa4a   :  { %25486 = vmatpush3.msra.mxu1 %v29573_v50  ;;  %25440 = vmatprep.subr.mxu0 %v32371_v27 }
 0xa4b   :  { %25487 = vmatprep.subr.mxu1 %v32371_v27  ;;  %25441 = vmatpush3.msra.mxu0 %v32427_v57 }
 0xa4c   :  { %25442 = vmatprep.mubr.msk.f32.mxu0 %vm27424_vm2, %v32371_v27  ;;  %25488 = vmatpush3.msra.mxu1 %v29579_v8 }
 0xa4d   :  { %25443 = vmatmul.mubr.f32.vlgmr.msra.gmra.mxu0 %v29538_v47  ;;  %25464 = vmatprep.subr.mxu0 %v32371_v27 }
 0xa4e   :  { %25489 = vmatprep.mubr.msk.f32.mxu1 %vm27424_vm2, %v32371_v27  ;;  %25499 = vmatprep.subr.mxu1 %v32371_v27 }
 0xa4f   :  { %25465 = vmatpush3.msra.mxu0 %v29573_v50  ;;  %25490 = vmatmul.mubr.f32.vlgmr.msra.gmra.mxu1 %v32395_v12 }
 0xa50   :  { %25500 = vmatpush3.msra.mxu1 %v29573_v50  ;;  %25466 = vmatprep.subr.mxu0 %v32371_v27 }
 0xa51   :  { %25501 = vmatprep.subr.mxu1 %v32371_v27  ;;  %25467 = vmatpush3.msra.mxu0 %v29579_v8 }
 0xa52   :  { %25468 = vmatprep.mubr.msk.f32.mxu0 %vm27424_vm2, %v32371_v27  ;;  %25502 = vmatpush3.msra.mxu1 %v29579_v8 }
 0xa53   :  { %25469 = vmatmul.mubr.f32.vlgmr.msra.gmra.mxu0 %v28300_v61  ;;  %25478 = vmatprep.subr.mxu0 %v32371_v27 }
 0xa54   :  { %25479 = vmatpush3.msra.mxu0 %v29588_v25  ;;  %25482 = vmatprep.mubr.msk.f32.mxu0 %vm27424_vm2, %v32371_v27 }
 0xa55   :  { %25480 = vmatprep.subr.mxu0 %v32371_v27  ;;  %25503 = vmatprep.mubr.msk.f32.mxu1 %vm27424_vm2, %v32371_v27 }
 0xa56   :  { %25481 = vmatpush3.msra.mxu0 %v29596_v23  ;;  %25504 = vmatmul.mubr.f32.vlgmr.msra.gmra.mxu1 %v32394_v30 }
 0xa57   :  { %25483 = vmatmul.mubr.f32.vlgmr.msra.gmra.mxu0 %v32393_v48  ;;  %25492 = vmatprep.subr.mxu0 %v32371_v27 }
 0xa58   :  { %25493 = vmatpush3.msra.mxu0 %v9819_v11  ;;  %25496 = vmatprep.mubr.msk.f32.mxu0 %vm27424_vm2, %v32371_v27 }
 0xa59   :  { %25494 = vmatprep.subr.mxu0 %v32371_v27  ;;  %25525 = vmatprep.subr.mxu1 %v32371_v27 }
 0xa5a   :  { %25495 = vmatpush3.msra.mxu0 %v9826_v62  ;;  %25526 = vmatpush3.msra.mxu1 %v32397_v34 }
 0xa5b   :  { %25497 = vmatmul.mubr.f32.vlgmr.msra.gmra.mxu0 %v32394_v30  ;;  %25527 = vmatprep.subr.mxu1 %v32371_v27 }
 0xa5c   :  { %25528 = vmatpush3.msra.mxu1 %v32399_v5  ;;  %25506 = vmatprep.subr.mxu0 %v32371_v27 }
 0xa5d   :  { %25529 = vmatprep.subr.mxu1 %v32371_v27  ;;  %25507 = vmatpush3.msra.mxu0 %v32396_v17 }
 0xa5e   :  { %25530 = vmatpush3.msra.mxu1 %v32401_v22  ;;  %25508 = vmatprep.subr.mxu0 %v32371_v27 }
 0xa5f   :  { %25531 = vmatprep.subr.mxu1 %v32371_v27  ;;  %25509 = vmatpush3.msra.mxu0 %v32398_v24 }
 0xa60   :  { %25532 = vmatpush3.msra.mxu1 %v32403_v54  ;;  %25510 = vmatprep.subr.mxu0 %v32371_v27 }
 0xa61   :  { %25533 = vmatprep.subr.mxu1 %v32371_v27  ;;  %25511 = vmatpush3.msra.mxu0 %v32400_v1 }
 0xa62   :  { %25534 = vmatpush3.msra.mxu1 %v32404_v58  ;;  %25512 = vmatprep.subr.mxu0 %v32371_v27 }
 0xa63   :  { %25535 = vmatprep.subr.mxu1 %v32371_v27  ;;  %25513 = vmatpush3.msra.mxu0 %v32402_v18 }
 0xa64   :  { %25536 = vmatpush3.msra.mxu1 %v32406_v31  ;;  %25514 = vmatprep.subr.mxu0 %v32371_v27 }
 0xa65   :  { %25537 = vmatprep.subr.mxu1 %v32371_v27  ;;  %25541 = vmatprep.mubr.msk.f32.mxu1 %vm27424_vm2, %v32371_v27 }
 0xa66   :  { %25538 = vmatpush3.msra.mxu1 %v32408_v59  ;;  %25515 = vmatpush3.msra.mxu0 %v32405_v9 }
 0xa67   :  { %25539 = vmatprep.subr.mxu1 %v32371_v27  ;;  %25516 = vmatprep.subr.mxu0 %v32371_v27 }
 0xa68   :  { %25540 = vmatpush3.msra.mxu1 %v32410_v60  ;;  %25517 = vmatpush3.msra.mxu0 %v32407_v49 }
 0xa69   :  { %25563 = vmatprep.subr.mxu1 %v32371_v27  ;;  %25518 = vmatprep.subr.mxu0 %v32371_v27 }
 0xa6a   :  { %25519 = vmatpush3.msra.mxu0 %v32409_v15  ;;  %25522 = vmatprep.mubr.msk.f32.mxu0 %vm27424_vm2, %v32371_v27 }
 0xa6b   :  { %25520 = vmatprep.subr.mxu0 %v32371_v27 }
 0xa6c   :  { %25521 = vmatpush3.msra.mxu0 %v32411_v3 }
 0xa6d   :  { %25544 = vmatprep.subr.mxu0 %v32371_v27 }
 0xae1   :  { %v9364_v38 = vpop.f32.mrf.mxu1 }
 0xae3   :  { %v25387_v44 = vpop.f32.mrf.mxu1 }
 0xae9   :  { %v9253_v19 = vpop.f32.mrf.mxu0 }
 0xaea   :  { %v9365_v32 = vadd.f32 %v9364_v38, %v9253_v19 }
 0xaeb   :  { %v25368_v33 = vpop.f32.mrf.mxu0 }
 0xaf1   :  { %v9533_v20 = vpop.f32.mrf.mxu1 }
 0xaf3   :  { %v25425_v37 = vpop.f32.mrf.mxu1 }
 0xafa   :  { %v9452_v47 = vpop.f32.mrf.mxu0 }
 0xafb   :  { %v9453_v46 = vadd.f32 %v9452_v47, %v9365_v32 }
 0xafc   :  { %v25406_v52 = vpop.f32.mrf.mxu0 }
 0xafd   :  { %v9534_v0 = vadd.f32 %v9533_v20, %v9453_v46 }
 0xb03   :  { %v9707_v4 = vpop.f32.mrf.mxu1 }
 0xb05   :  { %v25463_v6 = vpop.f32.mrf.mxu1 }
 0xb09   :  { %v9865_v51 = vpop.f32.mrf.mxu1 }
 0xb0b   :  { %v25477_v50 = vpop.f32.mrf.mxu1 }
 0xb0d   :  { %v9628_v8 = vpop.f32.mrf.mxu0 }
 0xb0e   :  { %v9629_v25 = vadd.f32 %v9628_v8, %v9534_v0 }
 0xb0f   :  { %v25444_v23 = vpop.f32.mrf.mxu0  ;;  %v10016_v11 = vpop.f32.mrf.mxu1 }
 0xb10   :  { %v29708_v62 = vadd.f32 %v9707_v4, %v9629_v25  ;;  %v32428_v25 = vld [vmem:[#allocation11_spill] sm:$0xff] }
 0xb11   :  { %v25491_v40 = vpop.f32.mrf.mxu1  ;;  %v32429_v23 = vld [vmem:[#allocation19_spill] sm:$0xff] }
 0xb13   :  { %v9784_v7 = vpop.f32.mrf.mxu0 }
 0xb14   :  { %v9866_v41 = vadd.f32 %v9865_v51, %v9784_v7 }
 0xb15   :  { %v25470_v28 = vpop.f32.mrf.mxu0 }
 0xb16   :  { %v10166_v38 = vpop.f32.mrf.mxu1 }
 0xb17   :  { %v9941_v44 = vpop.f32.mrf.mxu0 }
 0xb18   :  { %v9942_v19 = vadd.f32 %v9941_v44, %v9866_v41  ;;  %v25505_v32 = vpop.f32.mrf.mxu1 }
 0xb19   :  { %v25484_v33 = vpop.f32.mrf.mxu0 }
 0xb1a   :  { %v10017_v20 = vadd.f32 %v10016_v11, %v9942_v19 }
 0xb1b   :  { %v10093_v37 = vpop.f32.mrf.mxu0 }
 0xb1c   :  { %v10094_v47 = vadd.f32 %v10093_v37, %v10017_v20 }
 0xb1d   :  { %v25498_v46 = vpop.f32.mrf.mxu0 }
 0xb1e   :  { %v10167_v52 = vadd.f32 %v10166_v38, %v10094_v47 }
 0xb20   :  { %v10171_v0 = vsel %vm1108_vm1, %v10167_v52, 0  ;;  %v10710_v52 = vmul.f32 0.001953125, %v29708_v62  ;;  %v32430_v62 = vld [vmem:[#allocation71_spill] sm:$0xff] }
 0xb21   :  { %v29711_v6 = vand.u32 4294901760, %v10171_v0 }
 0xb23   :  { %v10247_v4 = vsub.f32 %v10171_v0, %v29711_v6  ;;  %25542 = vmatmul.mubr.f32.vlgmr.msra.gmra.mxu1 %v29711_v6 }
 0xb24   :  { %25564 = vmatpush3.msra.mxu1 %v32396_v17  ;;  %25579 = vmatprep.mubr.msk.f32.mxu1 %vm27424_vm2, %v32371_v27 }
 0xb25   :  { %v10248_v51 = vand.u32 4294901760, %v10247_v4  ;;  %25565 = vmatprep.subr.mxu1 %v32371_v27 }
 0xb26   :  { %25566 = vmatpush3.msra.mxu1 %v32398_v24 }
 0xb27   :  { %v10249_v50 = vsub.f32 %v10247_v4, %v10248_v51  ;;  %25567 = vmatprep.subr.mxu1 %v32371_v27 }
 0xb28   :  { %25568 = vmatpush3.msra.mxu1 %v32400_v1 }
 0xb29   :  { %v10250_v8 = vand.u32 4294901760, %v10249_v50  ;;  %25569 = vmatprep.subr.mxu1 %v32371_v27 }
 0xb2a   :  { %25570 = vmatpush3.msra.mxu1 %v32402_v18 }
 0xb2b   :  { %25571 = vmatprep.subr.mxu1 %v32371_v27  ;;  %25523 = vmatmul.mubr.f32.vlgmr.msra.gmra.mxu0 %v10250_v8 }
 0xb2c   :  { %25545 = vmatpush3.msra.mxu0 %v32412_v36  ;;  %25572 = vmatpush3.msra.mxu1 %v32405_v9 }
 0xb2d   :  { %25546 = vmatprep.subr.mxu0 %v32371_v27  ;;  %25573 = vmatprep.subr.mxu1 %v32371_v27 }
 0xb2e   :  { %25547 = vmatpush3.msra.mxu0 %v32413_v63  ;;  %25574 = vmatpush3.msra.mxu1 %v32407_v49 }
 0xb2f   :  { %25548 = vmatprep.subr.mxu0 %v32371_v27  ;;  %25575 = vmatprep.subr.mxu1 %v32371_v27 }
 0xb30   :  { %25549 = vmatpush3.msra.mxu0 %v32414_v56  ;;  %25576 = vmatpush3.msra.mxu1 %v32409_v15 }
 0xb31   :  { %25550 = vmatprep.subr.mxu0 %v32371_v27  ;;  %25577 = vmatprep.subr.mxu1 %v32371_v27 }
 0xb32   :  { %25551 = vmatpush3.msra.mxu0 %v32415_v55  ;;  %25578 = vmatpush3.msra.mxu1 %v32411_v3 }
 0xb33   :  { %25552 = vmatprep.subr.mxu0 %v32371_v27  ;;  %25580 = vmatmul.mubr.f32.vlgmr.msra.gmra.mxu1 %v10248_v51  ;;  %v10712_v51 = vmul.f32 %v10710_v52, %v10710_v52 }
 0xb34   :  { %25601 = vmatprep.subr.mxu1 %v32371_v27  ;;  %25553 = vmatpush3.msra.mxu0 %v32416_v39 }
 0xb35   :  { %25602 = vmatpush3.msra.mxu1 %v32396_v17  ;;  %25554 = vmatprep.subr.mxu0 %v32371_v27 }
 0xb36   :  { %25603 = vmatprep.subr.mxu1 %v32371_v27  ;;  %25555 = vmatpush3.msra.mxu0 %v32417_v29 }
 0xb37   :  { %25604 = vmatpush3.msra.mxu1 %v32398_v24  ;;  %25556 = vmatprep.subr.mxu0 %v32371_v27 }
 0xb38   :  { %25605 = vmatprep.subr.mxu1 %v32371_v27  ;;  %25557 = vmatpush3.msra.mxu0 %v32418_v35 }
 0xb39   :  { %25606 = vmatpush3.msra.mxu1 %v32400_v1  ;;  %25558 = vmatprep.subr.mxu0 %v32371_v27 }
 0xb3a   :  { %25607 = vmatprep.subr.mxu1 %v32371_v27  ;;  %25559 = vmatpush3.msra.mxu0 %v32419_v14 }
 0xb3b   :  { %25560 = vmatprep.mubr.msk.f32.mxu0 %vm27424_vm2, %v32371_v27  ;;  %25608 = vmatpush3.msra.mxu1 %v32402_v18 }
 0xb3c   :  { %25561 = vmatmul.mubr.f32.vlgmr.msra.gmra.mxu0 %v10247_v4  ;;  %25582 = vmatprep.subr.mxu0 %v32371_v27 }
 0xb3d   :  { %25609 = vmatprep.subr.mxu1 %v32371_v27  ;;  %25583 = vmatpush3.msra.mxu0 %v32420_v16 }
 0xb3e   :  { %25610 = vmatpush3.msra.mxu1 %v32405_v9  ;;  %25584 = vmatprep.subr.mxu0 %v32371_v27 }
 0xb3f   :  { %25611 = vmatprep.subr.mxu1 %v32371_v27  ;;  %25585 = vmatpush3.msra.mxu0 %v32421_v53 }
 0xb40   :  { %25612 = vmatpush3.msra.mxu1 %v32407_v49  ;;  %25586 = vmatprep.subr.mxu0 %v32371_v27 }
 0xb41   :  { %25613 = vmatprep.subr.mxu1 %v32371_v27  ;;  %25587 = vmatpush3.msra.mxu0 %v32422_v42 }
 0xb42   :  { %25614 = vmatpush3.msra.mxu1 %v32409_v15  ;;  %25588 = vmatprep.subr.mxu0 %v32371_v27 }
 0xb43   :  { %25615 = vmatprep.subr.mxu1 %v32371_v27  ;;  %25589 = vmatpush3.msra.mxu0 %v32423_v21 }
 0xb44   :  { %25616 = vmatpush3.msra.mxu1 %v32411_v3  ;;  %25617 = vmatprep.mubr.msk.f32.mxu1 %vm27424_vm2, %v32371_v27 }
 0xb45   :  { %25590 = vmatprep.subr.mxu0 %v32371_v27  ;;  %25618 = vmatmul.mubr.f32.vlgmr.msra.gmra.mxu1 %v29711_v6 }
 0xb46   :  { %25591 = vmatpush3.msra.mxu0 %v32424_v26  ;;  %25598 = vmatprep.mubr.msk.f32.mxu0 %vm27424_vm2, %v32371_v27  ;;  %v11752_v26 = vld [vmem:[#allocation5 + $0x1c8] sm:$0xff] }
 0xb47   :  { %25592 = vmatprep.subr.mxu0 %v32371_v27  ;;  %25631 = vmatprep.mubr.f32.mxu1 %v32428_v25  ;;  %v29967_v53 = vand.u32 4294901760, %v11752_v26 }
 0xb48   :  { %25593 = vmatpush3.msra.mxu0 %v32425_v13 }
 0xb49   :  { %25594 = vmatprep.subr.mxu0 %v32371_v27  ;;  %v29978_v14 = vsub.f32 %v11752_v26, %v29967_v53 }
 0xb4a   :  { %25595 = vmatpush3.msra.mxu0 %v32426_v10 }
 0xb4b   :  { %25596 = vmatprep.subr.mxu0 %v32371_v27  ;;  %v29989_v35 = vand.u32 4294901760, %v29978_v14 }
 0xb4c   :  { %25597 = vmatpush3.msra.mxu0 %v32427_v57 }
 0xb4d   :  { %25599 = vmatmul.mubr.f32.vlgmr.msra.gmra.mxu0 %v29711_v6  ;;  %v11920_v39 = vsub.f32 %v29978_v14, %v29989_v35 }
 0xb4e   :  { %25624 = vmatprep.mubr.f32.mxu0 %v32429_v23 }
 0xbe3   :  { %v10363_v11 = vpop.f32.mrf.mxu1 }
 0xbe5   :  { %v25543_v40 = vpop.f32.mrf.mxu1 }
 0xbeb   :  { %v10252_v7 = vpop.f32.mrf.mxu0 }
 0xbec   :  { %v10364_v33 = vadd.f32 %v10363_v11, %v10252_v7  ;;  %v10715_v7 = vld [vmem:[%s32089_s3 + $0x3] sm:$0x1] }
 0xbed   :  { %v25524_v28 = vpop.f32.mrf.mxu0 }
 0xbee   :  { %v10714_v28 = vld [vmem:[%s32089_s3 + $0x2] sm:$0x1] }
 0xbf3   :  { %v10532_v41 = vpop.f32.mrf.mxu1 }
 0xbf5   :  { %v25581_v38 = vpop.f32.mrf.mxu1 }
 0xbfc   :  { %v10451_v44 = vpop.f32.mrf.mxu0 }
 0xbfd   :  { %v10452_v37 = vadd.f32 %v10451_v44, %v10364_v33 }
 0xbfe   :  { %v25562_v19 = vpop.f32.mrf.mxu0 }
 0xbff   :  { %v10533_v47 = vadd.f32 %v10532_v41, %v10452_v37 }
 0xc05   :  { %v10706_v32 = vpop.f32.mrf.mxu1 }
 0xc07   :  { %v25619_v20 = vpop.f32.mrf.mxu1 }
 0xc0d   :  { %v10627_v46 = vpop.f32.mrf.mxu0 }
 0xc0e   :  { %v10628_v0 = vadd.f32 %v10627_v46, %v10533_v47  ;;  %v27351_v46 = vld [vmem:[%s32086_s0] sm:$0xff] }
 0xc0f   :  { %v25600_v6 = vpop.f32.mrf.mxu0 }
 0xc10   :  { %v10707_v4 = vadd.f32 %v10706_v32, %v10628_v0 }
 0xc12   :  { %v10711_v50 = vmul.f32 0.001953125, %v10707_v4 }
 0xc14   :  { %v10713_v8 = vsub.f32 %v10711_v50, %v10712_v51 }
 0xc16   :  { %v10716_v40 = vadd.f32 1e-05, %v10713_v8 }
 0xc18   :  { %27345 = vrsqrt.f32 %v10716_v40 }
 0xc25   :  { %v27346_v38 = vpop.eup %27345 }
 0xc26   :  { %v10718_v11 = vmul.f32 %v27346_v38, %v10714_v28  ;;  %v32433_v38 = vld [vmem:[#allocation20_spill] sm:$0xff] }
 0xc28   :  { %v10719_v41 = vmul.f32 %v10718_v11, %v10710_v52  ;;  %v10724_v44 = vrot.slane %v10718_v11, %v32430_v62  ;;  %v27352_v52 = vld [vmem:[%s32086_s0 + $0x8] sm:$0xff] }
 0xc2a   :  { %v10720_v19 = vsub.f32 %v10715_v7, %v10719_v41  ;;  %v10725_v32 = vmul.f32 %v10724_v44, %v29469_v45  ;;  %v10726_v33 = vmul.f32 %v10724_v44, %v29467_v2  ;;  %v32434_v41 = vld [vmem:[#allocation13_spill] sm:$0xff] }
 0xc2c   :  { %v10730_v20 = vrot.slane %v10720_v19, %v32430_v62 }
 0xc2e   :  { %v10731_v37 = vadd.f32 %v10730_v20, %v10725_v32  ;;  %v10732_v47 = vadd.f32 %v10730_v20, %v10726_v33  ;;  %v32435_v32 = vld [vmem:[#allocation14_spill] sm:$0xff]  ;;  %v32436_v33 = vld [vmem:[#allocation12_spill] sm:$0xff]  ;;  %v32437_v20 = vld [vmem:[#allocation15_spill] sm:$0xff] }
 0xc30   :  { %v10733_v0 = vadd.f32 %v27351_v46, %v10731_v37  ;;  %v10734_v6 = vadd.f32 %v27352_v52, %v10732_v47  ;;  %v32438_v37 = vld [vmem:[#allocation16_spill] sm:$0xff]  ;;  %v32439_v47 = vld [vmem:[#allocation25_spill] sm:$0xff]  ;;  %v32440_v46 = vld [vmem:[#allocation26_spill] sm:$0xff] }
 0xc31   :  { %v32442_v52 = vld [vmem:[#allocation22_spill] sm:$0xff] }
 0xc32   :  { %v29806_v4 = vmax.f32 %v10733_v0, 0.0  ;;  %v29808_v51 = vmax.f32 %v10734_v6, 0.0  ;;  %v32441_v0 = vld [vmem:[#allocation21_spill] sm:$0xff] }
 0xc33   :  { %v32443_v6 = vld [vmem:[#allocation17_spill] sm:$0xff] }
 0xc34   :  { %32431 = vst [vmem:[#allocation27_spill] sm:$0xff] %v29806_v4  ;;  %32432 = vst [vmem:[#allocation72_spill] sm:$0xff] %v29808_v51  ;;  %v29811_v2 = vand.u32 4294901760, %v29808_v51  ;;  %v29814_v45 = vand.u32 4294901760, %v29806_v4 }
 0xc36   :  { %25620 = vmatprep.subr.mxu0 %v29811_v2  ;;  %v29819_v50 = vsub.f32 %v29808_v51, %v29811_v2  ;;  %v29823_v8 = vsub.f32 %v29806_v4, %v29814_v45  ;;  %v32446_v4 = vld [vmem:[#allocation24_spill] sm:$0xff]  ;;  %v11758_v51 = vld [vmem:[#allocation5 + $0x1f8] sm:$0xff] }
 0xc37   :  { %25621 = vmatpush3.msra.mxu0 %v29811_v2 }
 0xc38   :  { %25622 = vmatprep.subr.mxu0 %v29814_v45  ;;  %v29828_v40 = vand.u32 4294901760, %v29819_v50  ;;  %v29831_v28 = vand.u32 4294901760, %v29823_v8 }
 0xc39   :  { %25623 = vmatpush3.msra.mxu0 %v29814_v45 }
 0xc3a   :  { %25634 = vmatprep.subr.mxu0 %v29819_v50  ;;  %25625 = vmatmul.mubr.f32.vlgmr.msra.gmra.mxu0 %v32433_v38  ;;  %v10856_v11 = vsub.f32 %v29819_v50, %v29828_v40  ;;  %v10863_v7 = vsub.f32 %v29823_v8, %v29831_v28 }
 0xc3b   :  { %25635 = vmatpush3.msra.mxu0 %v29819_v50  ;;  %25638 = vmatprep.mubr.f32.mxu0 %v32434_v41 }
 0xc3c   :  { %25636 = vmatprep.subr.mxu0 %v29823_v8  ;;  %v29843_v44 = vand.u32 4294901760, %v10856_v11  ;;  %v29848_v19 = vand.u32 4294901760, %v10863_v7  ;;  %v32444_v11 = vld [vmem:[#allocation18_spill] sm:$0xff]  ;;  %v32445_v7 = vld [vmem:[#allocation23_spill] sm:$0xff] }
 0xc3d   :  { %25637 = vmatpush3.msra.mxu0 %v29823_v8 }
 0xc3e   :  { %25627 = vmatprep.subr.mxu1 %v29843_v44  ;;  %25648 = vmatprep.subr.mxu0 %v29828_v40 }
 0xc3f   :  { %25628 = vmatpush3.msra.mxu1 %v29843_v44  ;;  %25639 = vmatmul.mubr.f32.vlgmr.msra.gmra.mxu0 %v32435_v32 }
 0xc40   :  { %25649 = vmatpush3.msra.mxu0 %v29828_v40  ;;  %25629 = vmatprep.subr.mxu1 %v29848_v19 }
 0xc41   :  { %25650 = vmatprep.subr.mxu0 %v29831_v28  ;;  %25630 = vmatpush3.msra.mxu1 %v29848_v19 }
 0xc42   :  { %25651 = vmatpush3.msra.mxu0 %v29831_v28  ;;  %25632 = vmatmul.mubr.f32.vlgmr.msra.gmra.mxu1 %v32436_v33 }
 0xc43   :  { %25641 = vmatprep.subr.mxu1 %v29811_v2  ;;  %25652 = vmatprep.mubr.f32.mxu0 %v32428_v25 }
 0xc44   :  { %25662 = vmatprep.subr.mxu0 %v29811_v2  ;;  %25642 = vmatpush3.msra.mxu1 %v29811_v2 }
 0xc45   :  { %25653 = vmatmul.mubr.f32.vlgmr.msra.gmra.mxu0 %v32436_v33  ;;  %25643 = vmatprep.subr.mxu1 %v29814_v45 }
 0xc46   :  { %25663 = vmatpush3.msra.mxu0 %v29811_v2  ;;  %25644 = vmatpush3.msra.mxu1 %v29814_v45 }
 0xc47   :  { %25664 = vmatprep.subr.mxu0 %v29814_v45  ;;  %25645 = vmatprep.mubr.f32.mxu1 %v32437_v20 }
 0xc48   :  { %25665 = vmatpush3.msra.mxu0 %v29814_v45  ;;  %25646 = vmatmul.mubr.f32.vlgmr.msra.gmra.mxu1 %v32438_v37  ;;  %v11755_v37 = vld [vmem:[#allocation5 + $0x1e0] sm:$0xff] }
 0xc49   :  { %25655 = vmatprep.subr.mxu1 %v29811_v2  ;;  %25666 = vmatprep.mubr.f32.mxu0 %v32439_v47  ;;  %v29935_v32 = vand.u32 4294901760, %v11755_v37 }
 0xc4a   :  { %25676 = vmatprep.subr.mxu0 %v29819_v50  ;;  %25656 = vmatpush3.msra.mxu1 %v29811_v2 }
 0xc4b   :  { %25667 = vmatmul.mubr.f32.vlgmr.msra.gmra.mxu0 %v32440_v46  ;;  %25657 = vmatprep.subr.mxu1 %v29814_v45  ;;  %v11756_v46 = vld [vmem:[#allocation5 + $0x1e8] sm:$0xff]  ;;  %v29945_v23 = vsub.f32 %v11755_v37, %v29935_v32 }
 0xc4c   :  { %25677 = vmatpush3.msra.mxu0 %v29819_v50  ;;  %25658 = vmatpush3.msra.mxu1 %v29814_v45 }
 0xc4d   :  { %25678 = vmatprep.subr.mxu0 %v29823_v8  ;;  %25659 = vmatprep.mubr.f32.mxu1 %v32428_v25  ;;  %v11753_v25 = vld [vmem:[#allocation5 + $0x1d0] sm:$0xff]  ;;  %v29954_v10 = vand.u32 4294901760, %v29945_v23 }
 0xc4e   :  { %25679 = vmatpush3.msra.mxu0 %v29823_v8  ;;  %25660 = vmatmul.mubr.f32.vlgmr.msra.gmra.mxu1 %v32436_v33  ;;  %v29956_v13 = vand.u32 4294901760, %v11753_v25 }
 0xc4f   :  { %25669 = vmatprep.subr.mxu1 %v29843_v44  ;;  %25680 = vmatprep.mubr.f32.mxu0 %v32441_v0 }
 0xc50   :  { %25690 = vmatprep.subr.mxu0 %v29828_v40  ;;  %25670 = vmatpush3.msra.mxu1 %v29843_v44  ;;  %v29965_v42 = vsub.f32 %v11753_v25, %v29956_v13 }
 0xc51   :  { %25681 = vmatmul.mubr.f32.vlgmr.msra.gmra.mxu0 %v32442_v52  ;;  %25671 = vmatprep.subr.mxu1 %v29848_v19  ;;  %v11757_v52 = vld [vmem:[#allocation5 + $0x1f0] sm:$0xff] }
 0xc52   :  { %25691 = vmatpush3.msra.mxu0 %v29828_v40  ;;  %25672 = vmatpush3.msra.mxu1 %v29848_v19 }
 0xc53   :  { %25692 = vmatprep.subr.mxu0 %v29831_v28  ;;  %25673 = vmatprep.mubr.f32.mxu1 %v32443_v6 }
 0xc54   :  { %25693 = vmatpush3.msra.mxu0 %v29831_v28  ;;  %25674 = vmatmul.mubr.f32.vlgmr.msra.gmra.mxu1 %v32444_v11 }
 0xc55   :  { %25683 = vmatprep.subr.mxu1 %v29811_v2  ;;  %25687 = vmatprep.mubr.f32.mxu1 %v32445_v7  ;;  %v29908_v7 = vand.u32 4294901760, %v11758_v51 }
 0xc56   :  { %25684 = vmatpush3.msra.mxu1 %v29811_v2  ;;  %25694 = vmatprep.mubr.f32.mxu0 %v32443_v6 }
 0xc57   :  { %25685 = vmatprep.subr.mxu1 %v29814_v45  ;;  %25695 = vmatmul.mubr.f32.vlgmr.msra.gmra.mxu0 %v32444_v11  ;;  %v29911_v0 = vsub.f32 %v11758_v51, %v29908_v7 }
 0xc58   :  { %25686 = vmatpush3.msra.mxu1 %v29814_v45  ;;  %25704 = vmatprep.subr.mxu0 %v29908_v7 }
 0xc59   :  { %25688 = vmatmul.mubr.f32.vlgmr.msra.gmra.mxu1 %v32446_v4  ;;  %25697 = vmatprep.subr.mxu1 %v29811_v2  ;;  %v29913_v4 = vand.u32 4294901760, %v11757_v52 }
 0xc5a   :  { %25698 = vmatpush3.msra.mxu1 %v29811_v2  ;;  %25701 = vmatprep.mubr.f32.mxu1 %v32443_v6  ;;  %v29918_v6 = vand.u32 4294901760, %v29911_v0 }
 0xc5b   :  { %25699 = vmatprep.subr.mxu1 %v29814_v45  ;;  %25705 = vmatpush3.msra.mxu0 %v29908_v7  ;;  %v29921_v47 = vsub.f32 %v11757_v52, %v29913_v4  ;;  %v11754_v52 = vld [vmem:[#allocation5 + $0x1d8] sm:$0xff] }
 0xc5c   :  { %25700 = vmatpush3.msra.mxu1 %v29814_v45  ;;  %25706 = vmatprep.subr.mxu0 %v29913_v4  ;;  %v11878_v51 = vsub.f32 %v29911_v0, %v29918_v6 }
 0xc5d   :  { %25702 = vmatmul.mubr.f32.vlgmr.msra.gmra.mxu1 %v32444_v11  ;;  %v29923_v11 = vand.u32 4294901760, %v11756_v46  ;;  %25707 = vmatpush3.msra.mxu0 %v29913_v4  ;;  %v29930_v20 = vand.u32 4294901760, %v29921_v47 }
 0xc5e   :  { %v11879_v41 = vand.u32 4294901760, %v11878_v51 }
 0xc5f   :  { %v29933_v33 = vsub.f32 %v11756_v46, %v29923_v11  ;;  %25708 = vmatprep.subr.mxu0 %v29923_v11  ;;  %v11885_v38 = vsub.f32 %v29921_v47, %v29930_v20  ;;  %v29948_v46 = vand.u32 4294901760, %v11754_v52 }
 0xc60   :  { %25709 = vmatpush3.msra.mxu0 %v29923_v11  ;;  %25723 = vmatprep.subr.mxu1 %v11879_v41 }
 0xc61   :  { %v29942_v62 = vand.u32 4294901760, %v29933_v33  ;;  %25710 = vmatprep.subr.mxu0 %v29935_v32  ;;  %v11886_v57 = vand.u32 4294901760, %v11885_v38  ;;  %25724 = vmatpush3.msra.mxu1 %v11879_v41  ;;  %v29959_v37 = vsub.f32 %v11754_v52, %v29948_v46  ;;  %v11899_v38 = vsub.f32 %v29945_v23, %v29954_v10  ;;  %v11751_v52 = vld [vmem:[#allocation5 + $0x1c0] sm:$0xff] }
 0xc62   :  { %25711 = vmatpush3.msra.mxu0 %v29935_v32  ;;  %v29980_v25 = vand.u32 4294901760, %v11751_v52 }
 0xc63   :  { %v11892_v51 = vsub.f32 %v29933_v33, %v29942_v62  ;;  %25712 = vmatprep.subr.mxu0 %v29948_v46  ;;  %25725 = vmatprep.subr.mxu1 %v11886_v57  ;;  %v29971_v41 = vand.u32 4294901760, %v29959_v37  ;;  %v11900_v16 = vand.u32 4294901760, %v11899_v38 }
 0xc64   :  { %25713 = vmatpush3.msra.mxu0 %v29948_v46  ;;  %25726 = vmatpush3.msra.mxu1 %v11886_v57  ;;  %v29992_v26 = vsub.f32 %v11751_v52, %v29980_v25  ;;  %v11921_v52 = vand.u32 4294901760, %v11920_v39 }
 0xc65   :  { %v11893_v21 = vand.u32 4294901760, %v11892_v51  ;;  %25714 = vmatprep.subr.mxu0 %v29956_v13  ;;  %v29975_v51 = vand.u32 4294901760, %v29965_v42  ;;  %v11906_v57 = vsub.f32 %v29959_v37, %v29971_v41 }
 0xc66   :  { %25715 = vmatpush3.msra.mxu0 %v29956_v13  ;;  %v29999_v55 = vand.u32 4294901760, %v29992_v26 }
 0xc67   :  { %25727 = vmatprep.subr.mxu1 %v11893_v21  ;;  %25716 = vmatprep.subr.mxu0 %v29967_v53  ;;  %v11913_v38 = vsub.f32 %v29965_v42, %v29975_v51  ;;  %v11907_v29 = vand.u32 4294901760, %v11906_v57 }
 0xc68   :  { %25728 = vmatpush3.msra.mxu1 %v11893_v21  ;;  %25717 = vmatpush3.msra.mxu0 %v29967_v53 }
 0xc69   :  { %25729 = vmatprep.subr.mxu1 %v11900_v16  ;;  %25718 = vmatprep.subr.mxu0 %v29980_v25  ;;  %v11914_v21 = vand.u32 4294901760, %v11913_v38 }
 0xc6a   :  { %25730 = vmatpush3.msra.mxu1 %v11900_v16  ;;  %25719 = vmatpush3.msra.mxu0 %v29980_v25  ;;  %v11927_v16 = vsub.f32 %v29992_v26, %v29999_v55 }
 0xc6b   :  { %25731 = vmatprep.subr.mxu1 %v11907_v29  ;;  %25742 = vmatprep.subr.mxu0 %v29911_v0 }
 0xc6c   :  { %25732 = vmatpush3.msra.mxu1 %v11907_v29  ;;  %v11928_v57 = vand.u32 4294901760, %v11927_v16 }
 0xc6d   :  { %25733 = vmatprep.subr.mxu1 %v11914_v21 }
 0xc6e   :  { %25734 = vmatpush3.msra.mxu1 %v11914_v21 }
 0xc6f   :  { %25735 = vmatprep.subr.mxu1 %v11921_v52 }
 0xc70   :  { %25736 = vmatpush3.msra.mxu1 %v11921_v52 }
 0xc71   :  { %25737 = vmatprep.subr.mxu1 %v11928_v57 }
 0xc72   :  { %25738 = vmatpush3.msra.mxu1 %v11928_v57 }
 0xc73   :  { %25761 = vmatprep.subr.mxu1 %v29908_v7 }
 0xcfa   :  { %v25626_v38 = vpop.f32.mrf.mxu0 }
 0xcfc   :  { %v10810_v56 = vpop.f32.mrf.mxu0 }
 0xcff   :  { %v25640_v63 = vpop.f32.mrf.mxu0 }
 0xd01   :  { %v10983_v36 = vpop.f32.mrf.mxu0 }
 0xd02   :  { %v25633_v3 = vpop.f32.mrf.mxu1 }
 0xd03   :  { %v10908_v60 = vadd.f32 %v25633_v3, %v25626_v38 }
 0xd04   :  { %v10901_v29 = vpop.f32.mrf.mxu1 }
 0xd05   :  { %v10991_v39 = vadd.f32 %v25640_v63, %v10908_v60  ;;  %v25654_v15 = vpop.f32.mrf.mxu0 }
 0xd07   :  { %v30006_v59 = vpop.f32.mrf.mxu0 }
 0xd08   :  { %v25647_v49 = vpop.f32.mrf.mxu1 }
 0xd09   :  { %v11074_v21 = vadd.f32 %v25647_v49, %v10991_v39 }
 0xd0a   :  { %v11065_v16 = vpop.f32.mrf.mxu1 }
 0xd0b   :  { %v11157_v31 = vadd.f32 %v25654_v15, %v11074_v21  ;;  %v25668_v52 = vpop.f32.mrf.mxu0 }
 0xd0d   :  { %v11321_v9 = vpop.f32.mrf.mxu0 }
 0xd0e   :  { %v25661_v57 = vpop.f32.mrf.mxu1 }
 0xd0f   :  { %v30008_v58 = vadd.f32 %v25661_v57, %v11157_v31 }
 0xd10   :  { %v30010_v54 = vpop.f32.mrf.mxu1 }
 0xd11   :  { %v25682_v18 = vpop.f32.mrf.mxu0 }
 0xd13   :  { %v11494_v3 = vpop.f32.mrf.mxu0 }
 0xd14   :  { %v25675_v22 = vpop.f32.mrf.mxu1 }
 0xd15   :  { %v11419_v1 = vadd.f32 %v25675_v22, %v25668_v52 }
 0xd16   :  { %v11412_v38 = vpop.f32.mrf.mxu1 }
 0xd17   :  { %v11502_v60 = vadd.f32 %v25682_v18, %v11419_v1  ;;  %v11413_v63 = vadd.f32 %v11412_v38, %v11321_v9  ;;  %v25696_v34 = vpop.f32.mrf.mxu0 }
 0xd19   :  { %v11495_v5 = vadd.f32 %v11494_v3, %v11413_v63  ;;  %v25689_v24 = vpop.f32.mrf.mxu1  ;;  %v11661_v17 = vpop.f32.mrf.mxu0  ;;  %v11242_v63 = vld [vmem:[#allocation5 + $0x190] sm:$0xff] }
 0xd1a   :  { %v11585_v49 = vadd.f32 %v25689_v24, %v11502_v60 }
 0xd1b   :  { %v11576_v39 = vpop.f32.mrf.mxu1 }
 0xd1c   :  { %v11668_v15 = vadd.f32 %v25696_v34, %v11585_v49  ;;  %v11577_v21 = vadd.f32 %v11576_v39, %v11495_v5 }
 0xd1d   :  { %v25703_v12 = vpop.f32.mrf.mxu1 }
 0xd1e   :  { %v11662_v31 = vadd.f32 %v11661_v17, %v11577_v21  ;;  %v11747_v57 = vadd.f32 %v25703_v12, %v11668_v15  ;;  %v30105_v15 = vand.u32 4294901760, %v11242_v63 }
 0xd1f   :  { %v11740_v30 = vpop.f32.mrf.mxu1 }
 0xd20   :  { %v11763_v48 = vsel %vm1108_vm1, %v11747_v57, 0  ;;  %v11741_v61 = vadd.f32 %v11740_v30, %v11662_v31  ;;  %v11240_v57 = vld [vmem:[#allocation5 + $0x180] sm:$0xff] }
 0xd21   :  { %v30013_v22 = vand.u32 4294901760, %v11763_v48 }
 0xd22   :  { %v11760_v1 = vsel %vm1108_vm1, %v11741_v61, 0 }
 0xd23   :  { %v30017_v18 = vsub.f32 %v11763_v48, %v30013_v22  ;;  %v30019_v9 = vand.u32 4294901760, %v11760_v1  ;;  %v10902_v48 = vadd.f32 %v10901_v29, %v10810_v56 }
 0xd25   :  { %v11850_v34 = vand.u32 4294901760, %v30017_v18  ;;  %v11839_v24 = vsub.f32 %v11760_v1, %v30019_v9  ;;  %25739 = vmatprep.mubr.f32.mxu1 %v30019_v9  ;;  %v10984_v52 = vadd.f32 %v10983_v36, %v10902_v48  ;;  %v11247_v36 = vld [vmem:[#allocation5 + $0x1b8] sm:$0xff] }
 0xd26   :  { %25740 = vmatmul.mubr.f32.vlgmr.msra.gmra.mxu1 %v30013_v22 }
 0xd27   :  { %25762 = vmatpush3.msra.mxu1 %v29908_v7  ;;  %v11840_v30 = vand.u32 4294901760, %v11839_v24  ;;  %v11851_v12 = vsub.f32 %v30017_v18, %v11850_v34  ;;  %v11066_v56 = vadd.f32 %v11065_v16, %v10984_v52 }
 0xd28   :  { %25763 = vmatprep.subr.mxu1 %v29913_v4 }
 0xd29   :  { %25764 = vmatpush3.msra.mxu1 %v29913_v4  ;;  %25777 = vmatprep.mubr.f32.mxu1 %v11840_v30  ;;  %v11841_v61 = vsub.f32 %v11839_v24, %v11840_v30  ;;  %v11852_v5 = vand.u32 4294901760, %v11851_v12  ;;  %v11151_v29 = vadd.f32 %v30006_v59, %v11066_v56 }
 0xd2a   :  { %25765 = vmatprep.subr.mxu1 %v29923_v11 }
 0xd2b   :  { %25766 = vmatpush3.msra.mxu1 %v29923_v11  ;;  %v11842_v17 = vand.u32 4294901760, %v11841_v61  ;;  %v11230_v3 = vadd.f32 %v30010_v54, %v11151_v29 }
 0xd2c   :  { %25767 = vmatprep.subr.mxu1 %v29935_v32 }
 0xd2d   :  { %25768 = vmatpush3.msra.mxu1 %v29935_v32  ;;  %25720 = vmatprep.mubr.f32.mxu0 %v11842_v17 }
 0xd2e   :  { %25769 = vmatprep.subr.mxu1 %v29948_v46  ;;  %25721 = vmatmul.mubr.f32.vlgmr.msra.gmra.mxu0 %v11852_v5 }
 0xd2f   :  { %25743 = vmatpush3.msra.mxu0 %v29911_v0  ;;  %25770 = vmatpush3.msra.mxu1 %v29948_v46  ;;  %v30047_v0 = vand.u32 4294901760, %v11247_v36 }
 0xd30   :  { %25744 = vmatprep.subr.mxu0 %v29921_v47  ;;  %25758 = vmatprep.mubr.f32.mxu0 %v11839_v24 }
 0xd31   :  { %25771 = vmatprep.subr.mxu1 %v29956_v13  ;;  %25745 = vmatpush3.msra.mxu0 %v29921_v47  ;;  %v11246_v47 = vld [vmem:[#allocation5 + $0x1b0] sm:$0xff]  ;;  %v30060_v59 = vsub.f32 %v11247_v36, %v30047_v0  ;;  %v12349_v36 = vsel %vm1108_vm1, %v30008_v58, 0 }
 0xd32   :  { %25772 = vmatpush3.msra.mxu1 %v29956_v13  ;;  %25746 = vmatprep.subr.mxu0 %v29933_v33  ;;  %v30055_v16 = vand.u32 4294901760, %v11246_v47  ;;  %v30183_v29 = vand.u32 4294901760, %v12349_v36 }
 0xd33   :  { %25773 = vmatprep.subr.mxu1 %v29967_v53  ;;  %25747 = vmatpush3.msra.mxu0 %v29933_v33  ;;  %v11245_v33 = vld [vmem:[#allocation5 + $0x1a8] sm:$0xff]  ;;  %v30079_v54 = vand.u32 4294901760, %v30060_v59 }
 0xd34   :  { %25774 = vmatpush3.msra.mxu1 %v29967_v53  ;;  %25748 = vmatprep.subr.mxu0 %v29945_v23  ;;  %v30065_v38 = vand.u32 4294901760, %v11245_v33 }
 0xd35   :  { %25775 = vmatprep.subr.mxu1 %v29980_v25  ;;  %25749 = vmatpush3.msra.mxu0 %v29945_v23  ;;  %v11244_v23 = vld [vmem:[#allocation5 + $0x1a0] sm:$0xff] }
 0xd36   :  { %25776 = vmatpush3.msra.mxu1 %v29980_v25  ;;  %25750 = vmatprep.subr.mxu0 %v29959_v37  ;;  %v30074_v60 = vand.u32 4294901760, %v11244_v23 }
 0xd37   :  { %25778 = vmatmul.mubr.f32.vlgmr.msra.gmra.mxu1 %v11850_v34  ;;  %25799 = vmatprep.subr.mxu1 %v29908_v7 }
 0xd38   :  { %25751 = vmatpush3.msra.mxu0 %v29959_v37  ;;  %25800 = vmatpush3.msra.mxu1 %v29908_v7  ;;  %v11243_v7 = vld [vmem:[#allocation5 + $0x198] sm:$0xff]  ;;  %v30072_v37 = vsub.f32 %v11246_v47, %v30055_v16  ;;  %v30097_v49 = vsub.f32 %v11244_v23, %v30074_v60 }
 0xd39   :  { %25815 = vmatprep.mubr.f32.mxu1 %v30019_v9  ;;  %25752 = vmatprep.subr.mxu0 %v29965_v42 }
 0xd3a   :  { %25801 = vmatprep.subr.mxu1 %v29913_v4  ;;  %25753 = vmatpush3.msra.mxu0 %v29965_v42  ;;  %v12346_v42 = vsel %vm1108_vm1, %v11230_v3, 0  ;;  %v30124_v1 = vand.u32 4294901760, %v30097_v49 }
 0xd3b   :  { %25802 = vmatpush3.msra.mxu1 %v29913_v4  ;;  %25754 = vmatprep.subr.mxu0 %v29978_v14  ;;  %v30087_v4 = vand.u32 4294901760, %v11243_v7  ;;  %v30099_v39 = vand.u32 4294901760, %v12346_v42 }
 0xd3c   :  { %25803 = vmatprep.subr.mxu1 %v29923_v11  ;;  %25755 = vmatpush3.msra.mxu0 %v29978_v14  ;;  %v30085_v14 = vsub.f32 %v11245_v33, %v30065_v38  ;;  %v12485_v30 = vsub.f32 %v30097_v49, %v30124_v1 }
 0xd3d   :  { %25804 = vmatpush3.msra.mxu1 %v29923_v11  ;;  %25756 = vmatprep.subr.mxu0 %v29992_v26  ;;  %v30094_v11 = vand.u32 4294901760, %v30072_v37  ;;  %v30113_v31 = vsub.f32 %v11243_v7, %v30087_v4 }
 0xd3e   :  { %25805 = vmatprep.subr.mxu1 %v29935_v32  ;;  %25757 = vmatpush3.msra.mxu0 %v29992_v26  ;;  %v11241_v26 = vld [vmem:[#allocation5 + $0x188] sm:$0xff]  ;;  %v30110_v21 = vand.u32 4294901760, %v30085_v14  ;;  %v12486_v5 = vand.u32 4294901760, %v12485_v30 }
 0xd3f   :  { %25806 = vmatpush3.msra.mxu1 %v29935_v32  ;;  %25759 = vmatmul.mubr.f32.vlgmr.msra.gmra.mxu0 %v30017_v18  ;;  %v12464_v32 = vsub.f32 %v30060_v59, %v30079_v54  ;;  %v30127_v18 = vsub.f32 %v12346_v42, %v30099_v39  ;;  %v30141_v24 = vand.u32 4294901760, %v30113_v31 }
 0xd40   :  { %25780 = vmatprep.subr.mxu0 %v29918_v6  ;;  %25807 = vmatprep.subr.mxu1 %v29948_v46  ;;  %v12478_v34 = vsub.f32 %v30085_v14, %v30110_v21 }
 0xd41   :  { %25781 = vmatpush3.msra.mxu0 %v29918_v6  ;;  %25796 = vmatprep.mubr.f32.mxu0 %v30019_v9  ;;  %v30117_v6 = vand.u32 4294901760, %v11241_v26  ;;  %v30132_v9 = vsub.f32 %v11242_v63, %v30105_v15  ;;  %v12426_v12 = vand.u32 4294901760, %v30127_v18  ;;  %v12492_v48 = vsub.f32 %v30113_v31, %v30141_v24 }
 0xd42   :  { %25808 = vmatpush3.msra.mxu1 %v29948_v46  ;;  %25782 = vmatprep.subr.mxu0 %v29930_v20  ;;  %v12471_v46 = vsub.f32 %v30072_v37, %v30094_v11 }
 0xd43   :  { %25809 = vmatprep.subr.mxu1 %v29956_v13  ;;  %25783 = vmatpush3.msra.mxu0 %v29930_v20  ;;  %v12465_v20 = vand.u32 4294901760, %v12464_v32  ;;  %v30155_v61 = vand.u32 4294901760, %v30132_v9  ;;  %v12493_v47 = vand.u32 4294901760, %v12492_v48 }
 0xd44   :  { %25810 = vmatpush3.msra.mxu1 %v29956_v13  ;;  %25784 = vmatprep.subr.mxu0 %v29942_v62  ;;  %v30134_v13 = vand.u32 4294901760, %v11240_v57 }
 0xd45   :  { %25811 = vmatprep.subr.mxu1 %v29967_v53  ;;  %25785 = vmatpush3.msra.mxu0 %v29942_v62  ;;  %v30146_v62 = vsub.f32 %v11241_v26, %v30117_v6  ;;  %v12499_v52 = vsub.f32 %v30132_v9, %v30155_v61 }
 0xd46   :  { %25812 = vmatpush3.msra.mxu1 %v29967_v53  ;;  %25786 = vmatprep.subr.mxu0 %v29954_v10  ;;  %v12472_v53 = vand.u32 4294901760, %v12471_v46 }
 0xd47   :  { %25813 = vmatprep.subr.mxu1 %v29980_v25  ;;  %25787 = vmatpush3.msra.mxu0 %v29954_v10  ;;  %v30158_v10 = vsub.f32 %v11240_v57, %v30134_v13  ;;  %v30166_v17 = vand.u32 4294901760, %v30146_v62  ;;  %v12500_v58 = vand.u32 4294901760, %v12499_v52 }
 0xd48   :  { %25814 = vmatpush3.msra.mxu1 %v29980_v25  ;;  %25788 = vmatprep.subr.mxu0 %v29971_v41  ;;  %v12479_v25 = vand.u32 4294901760, %v12478_v34 }
 0xd49   :  { %25816 = vmatmul.mubr.f32.vlgmr.msra.gmra.mxu1 %v30013_v22  ;;  %25837 = vmatprep.subr.mxu1 %v12465_v20  ;;  %v30174_v56 = vand.u32 4294901760, %v30158_v10 }
 0xd4a   :  { %25789 = vmatpush3.msra.mxu0 %v29971_v41  ;;  %25838 = vmatpush3.msra.mxu1 %v12465_v20  ;;  %v12427_v41 = vsub.f32 %v30127_v18, %v12426_v12 }
 0xd4b   :  { %25853 = vmatprep.mubr.f32.mxu1 %v30099_v39  ;;  %25790 = vmatprep.subr.mxu0 %v29975_v51 }
 0xd4c   :  { %25839 = vmatprep.subr.mxu1 %v12472_v53  ;;  %25791 = vmatpush3.msra.mxu0 %v29975_v51  ;;  %v12506_v51 = vsub.f32 %v30146_v62, %v30166_v17  ;;  %v12428_v33 = vand.u32 4294901760, %v12427_v41 }
 0xd4d   :  { %25840 = vmatpush3.msra.mxu1 %v12472_v53  ;;  %25792 = vmatprep.subr.mxu0 %v29989_v35 }
 0xd4e   :  { %25841 = vmatprep.subr.mxu1 %v12479_v25  ;;  %25793 = vmatpush3.msra.mxu0 %v29989_v35  ;;  %v12513_v35 = vsub.f32 %v30158_v10, %v30174_v56  ;;  %v12507_v23 = vand.u32 4294901760, %v12506_v51 }
 0xd4f   :  { %25842 = vmatpush3.msra.mxu1 %v12479_v25  ;;  %25794 = vmatprep.subr.mxu0 %v29999_v55 }
 0xd50   :  { %25843 = vmatprep.subr.mxu1 %v12486_v5  ;;  %25795 = vmatpush3.msra.mxu0 %v29999_v55  ;;  %v30192_v55 = vsub.f32 %v12349_v36, %v30183_v29 }
 0xd51   :  { %25844 = vmatpush3.msra.mxu1 %v12486_v5  ;;  %25797 = vmatmul.mubr.f32.vlgmr.msra.gmra.mxu0 %v30013_v22  ;;  %v12514_v22 = vand.u32 4294901760, %v12513_v35 }
 0xd52   :  { %25818 = vmatprep.subr.mxu0 %v30047_v0  ;;  %25845 = vmatprep.subr.mxu1 %v12493_v47  ;;  %v12436_v3 = vand.u32 4294901760, %v30192_v55 }
 0xd53   :  { %25819 = vmatpush3.msra.mxu0 %v30047_v0  ;;  %25834 = vmatprep.mubr.f32.mxu0 %v12428_v33 }
 0xd54   :  { %25846 = vmatpush3.msra.mxu1 %v12493_v47  ;;  %25820 = vmatprep.subr.mxu0 %v30055_v16  ;;  %v12437_v7 = vsub.f32 %v30192_v55, %v12436_v3 }
 0xd55   :  { %25847 = vmatprep.subr.mxu1 %v12500_v58  ;;  %25821 = vmatpush3.msra.mxu0 %v30055_v16 }
 0xd56   :  { %25848 = vmatpush3.msra.mxu1 %v12500_v58  ;;  %25822 = vmatprep.subr.mxu0 %v30065_v38  ;;  %v12438_v42 = vand.u32 4294901760, %v12437_v7 }
 0xd57   :  { %25849 = vmatprep.subr.mxu1 %v12507_v23  ;;  %25823 = vmatpush3.msra.mxu0 %v30065_v38 }
 0xd58   :  { %25850 = vmatpush3.msra.mxu1 %v12507_v23  ;;  %25824 = vmatprep.subr.mxu0 %v30074_v60 }
 0xd59   :  { %25851 = vmatprep.subr.mxu1 %v12514_v22  ;;  %25825 = vmatpush3.msra.mxu0 %v30074_v60 }
 0xd5a   :  { %25852 = vmatpush3.msra.mxu1 %v12514_v22  ;;  %25826 = vmatprep.subr.mxu0 %v30087_v4 }
 0xd5b   :  { %25854 = vmatmul.mubr.f32.vlgmr.msra.gmra.mxu1 %v30183_v29  ;;  %25875 = vmatprep.subr.mxu1 %v30047_v0 }
 0xd5c   :  { %25827 = vmatpush3.msra.mxu0 %v30087_v4  ;;  %25876 = vmatpush3.msra.mxu1 %v30047_v0 }
 0xd5d   :  { %25891 = vmatprep.mubr.f32.mxu1 %v12426_v12  ;;  %25828 = vmatprep.subr.mxu0 %v30105_v15  ;;  %v13434_v12 = vld [vmem:[#allocation5 + $0x200] sm:$0xff] }
 0xd5e   :  { %25877 = vmatprep.subr.mxu1 %v30055_v16  ;;  %25829 = vmatpush3.msra.mxu0 %v30105_v15  ;;  %v30388_v48 = vand.u32 4294901760, %v13434_v12 }
 0xd5f   :  { %25878 = vmatpush3.msra.mxu1 %v30055_v16  ;;  %25830 = vmatprep.subr.mxu0 %v30117_v6 }
 0xd60   :  { %25879 = vmatprep.subr.mxu1 %v30065_v38  ;;  %25831 = vmatpush3.msra.mxu0 %v30117_v6  ;;  %v30400_v52 = vsub.f32 %v13434_v12, %v30388_v48 }
 0xd61   :  { %25880 = vmatpush3.msra.mxu1 %v30065_v38  ;;  %25832 = vmatprep.subr.mxu0 %v30134_v13 }
 0xd62   :  { %25881 = vmatprep.subr.mxu1 %v30074_v60  ;;  %25833 = vmatpush3.msra.mxu0 %v30134_v13  ;;  %v30407_v51 = vand.u32 4294901760, %v30400_v52 }
 0xd63   :  { %25882 = vmatpush3.msra.mxu1 %v30074_v60  ;;  %25835 = vmatmul.mubr.f32.vlgmr.msra.gmra.mxu0 %v12438_v42 }
 0xd64   :  { %25856 = vmatprep.subr.mxu0 %v30060_v59  ;;  %25883 = vmatprep.subr.mxu1 %v30087_v4  ;;  %v13610_v33 = vsub.f32 %v30400_v52, %v30407_v51 }
 0xd65   :  { %25857 = vmatpush3.msra.mxu0 %v30060_v59  ;;  %25872 = vmatprep.mubr.f32.mxu0 %v30127_v18  ;;  %v32451_v59 = vld [vmem:[#allocation34_spill] sm:$0xff] }
 0xd66   :  { %25884 = vmatpush3.msra.mxu1 %v30087_v4  ;;  %25858 = vmatprep.subr.mxu0 %v30072_v37  ;;  %v13611_v58 = vand.u32 4294901760, %v13610_v33 }
 0xd67   :  { %25885 = vmatprep.subr.mxu1 %v30105_v15  ;;  %25859 = vmatpush3.msra.mxu0 %v30072_v37 }
 0xd68   :  { %25886 = vmatpush3.msra.mxu1 %v30105_v15  ;;  %25860 = vmatprep.subr.mxu0 %v30085_v14 }
 0xd69   :  { %25887 = vmatprep.subr.mxu1 %v30117_v6  ;;  %25861 = vmatpush3.msra.mxu0 %v30085_v14 }
 0xd6a   :  { %25888 = vmatpush3.msra.mxu1 %v30117_v6  ;;  %25862 = vmatprep.subr.mxu0 %v30097_v49 }
 0xd6b   :  { %25889 = vmatprep.subr.mxu1 %v30134_v13  ;;  %25863 = vmatpush3.msra.mxu0 %v30097_v49 }
 0xd6c   :  { %25890 = vmatpush3.msra.mxu1 %v30134_v13  ;;  %25864 = vmatprep.subr.mxu0 %v30113_v31 }
 0xd6d   :  { %25892 = vmatmul.mubr.f32.vlgmr.msra.gmra.mxu1 %v12436_v3  ;;  %25913 = vmatprep.subr.mxu1 %v30047_v0 }
 0xd6e   :  { %25865 = vmatpush3.msra.mxu0 %v30113_v31  ;;  %25914 = vmatpush3.msra.mxu1 %v30047_v0  ;;  %v32447_v0 = vld [vmem:[#allocation28_spill] sm:$0xff] }
 0xd6f   :  { %25929 = vmatprep.mubr.f32.mxu1 %v30099_v39  ;;  %25866 = vmatprep.subr.mxu0 %v30132_v9 }
 0xd70   :  { %25915 = vmatprep.subr.mxu1 %v30055_v16  ;;  %25867 = vmatpush3.msra.mxu0 %v30132_v9 }
 0xd71   :  { %25916 = vmatpush3.msra.mxu1 %v30055_v16  ;;  %25868 = vmatprep.subr.mxu0 %v30146_v62  ;;  %v32450_v16 = vld [vmem:[#allocation33_spill] sm:$0xff] }
 0xd72   :  { %25917 = vmatprep.subr.mxu1 %v30065_v38  ;;  %25869 = vmatpush3.msra.mxu0 %v30146_v62 }
 0xd73   :  { %25918 = vmatpush3.msra.mxu1 %v30065_v38  ;;  %25870 = vmatprep.subr.mxu0 %v30158_v10  ;;  %v32452_v38 = vld [vmem:[#allocation29_spill] sm:$0xff] }
 0xd74   :  { %25919 = vmatprep.subr.mxu1 %v30074_v60  ;;  %25871 = vmatpush3.msra.mxu0 %v30158_v10 }
 0xd75   :  { %25920 = vmatpush3.msra.mxu1 %v30074_v60  ;;  %25873 = vmatmul.mubr.f32.vlgmr.msra.gmra.mxu0 %v30192_v55 }
 0xd76   :  { %25894 = vmatprep.subr.mxu0 %v30079_v54  ;;  %25921 = vmatprep.subr.mxu1 %v30087_v4 }
 0xd77   :  { %25895 = vmatpush3.msra.mxu0 %v30079_v54  ;;  %25910 = vmatprep.mubr.f32.mxu0 %v30099_v39  ;;  %v13437_v39 = vld [vmem:[#allocation5 + $0x218] sm:$0xff] }
 0xd78   :  { %25922 = vmatpush3.msra.mxu1 %v30087_v4  ;;  %25896 = vmatprep.subr.mxu0 %v30094_v11  ;;  %v13438_v4 = vld [vmem:[#allocation5 + $0x220] sm:$0xff]  ;;  %v30356_v57 = vand.u32 4294901760, %v13437_v39 }
 0xd79   :  { %25923 = vmatprep.subr.mxu1 %v30105_v15  ;;  %25897 = vmatpush3.msra.mxu0 %v30094_v11  ;;  %v30343_v26 = vand.u32 4294901760, %v13438_v4 }
 0xd7a   :  { %25924 = vmatpush3.msra.mxu1 %v30105_v15  ;;  %25898 = vmatprep.subr.mxu0 %v30110_v21  ;;  %v30367_v9 = vsub.f32 %v13437_v39, %v30356_v57 }
 0xd7b   :  { %25925 = vmatprep.subr.mxu1 %v30117_v6  ;;  %25899 = vmatpush3.msra.mxu0 %v30110_v21  ;;  %v30353_v31 = vsub.f32 %v13438_v4, %v30343_v26 }
 0xd7c   :  { %25926 = vmatpush3.msra.mxu1 %v30117_v6  ;;  %25900 = vmatprep.subr.mxu0 %v30124_v1  ;;  %v13436_v6 = vld [vmem:[#allocation5 + $0x210] sm:$0xff]  ;;  %v30379_v30 = vand.u32 4294901760, %v30367_v9 }
 0xd7d   :  { %25927 = vmatprep.subr.mxu1 %v30134_v13  ;;  %25901 = vmatpush3.msra.mxu0 %v30124_v1  ;;  %v30362_v18 = vand.u32 4294901760, %v30353_v31  ;;  %v30364_v20 = vand.u32 4294901760, %v13436_v6 }
 0xd7e   :  { %25928 = vmatpush3.msra.mxu1 %v30134_v13  ;;  %25902 = vmatprep.subr.mxu0 %v30141_v24  ;;  %v13435_v13 = vld [vmem:[#allocation5 + $0x208] sm:$0xff] }
 0xd7f   :  { %25930 = vmatmul.mubr.f32.vlgmr.msra.gmra.mxu1 %v30183_v29  ;;  %25939 = vmatprep.subr.mxu1 %v29843_v44  ;;  %v30373_v62 = vsub.f32 %v13436_v6, %v30364_v20  ;;  %v30375_v53 = vand.u32 4294901760, %v13435_v13 }
 0xd80   :  { %25903 = vmatpush3.msra.mxu0 %v30141_v24  ;;  %25940 = vmatpush3.msra.mxu1 %v29843_v44  ;;  %v32448_v44 = vld [vmem:[#allocation31_spill] sm:$0xff]  ;;  %v13582_v24 = vsub.f32 %v30353_v31, %v30362_v18 }
 0xd81   :  { %25904 = vmatprep.subr.mxu0 %v30155_v61  ;;  %25941 = vmatprep.subr.mxu1 %v29848_v19  ;;  %v30383_v10 = vand.u32 4294901760, %v30373_v62  ;;  %v30386_v25 = vsub.f32 %v13435_v13, %v30375_v53 }
 0xd82   :  { %25905 = vmatpush3.msra.mxu0 %v30155_v61  ;;  %25942 = vmatpush3.msra.mxu1 %v29848_v19  ;;  %v32449_v19 = vld [vmem:[#allocation32_spill] sm:$0xff]  ;;  %v13583_v61 = vand.u32 4294901760, %v13582_v24 }
 0xd83   :  { %25906 = vmatprep.subr.mxu0 %v30166_v17  ;;  %25943 = vmatprep.mubr.f32.mxu1 %v32385_v43  ;;  %v13596_v5 = vsub.f32 %v30373_v62, %v30383_v10  ;;  %v30397_v41 = vand.u32 4294901760, %v30386_v25 }
 0xd84   :  { %25953 = vmatprep.subr.mxu1 %v29811_v2  ;;  %25907 = vmatpush3.msra.mxu0 %v30166_v17  ;;  %v13589_v17 = vsub.f32 %v30367_v9, %v30379_v30 }
 0xd85   :  { %25944 = vmatmul.mubr.f32.vlgmr.msra.gmra.mxu1 %v32447_v0  ;;  %25908 = vmatprep.subr.mxu0 %v30174_v56  ;;  %v13597_v36 = vand.u32 4294901760, %v13596_v5  ;;  %v13603_v47 = vsub.f32 %v30386_v25, %v30397_v41 }
 0xd86   :  { %25954 = vmatpush3.msra.mxu1 %v29811_v2  ;;  %25909 = vmatpush3.msra.mxu0 %v30174_v56  ;;  %v13590_v56 = vand.u32 4294901760, %v13589_v17 }
 0xd87   :  { %25955 = vmatprep.subr.mxu1 %v29814_v45  ;;  %25911 = vmatmul.mubr.f32.vlgmr.msra.gmra.mxu0 %v30183_v29  ;;  %v13604_v29 = vand.u32 4294901760, %v13603_v47 }
 0xd88   :  { %25956 = vmatpush3.msra.mxu1 %v29814_v45  ;;  %25932 = vmatprep.subr.mxu0 %v29811_v2 }
 0xd89   :  { %25957 = vmatprep.mubr.f32.mxu1 %v32448_v44  ;;  %25967 = vmatprep.subr.mxu1 %v29811_v2 }
 0xd8a   :  { %25933 = vmatpush3.msra.mxu0 %v29811_v2  ;;  %25958 = vmatmul.mubr.f32.vlgmr.msra.gmra.mxu1 %v32449_v19 }
 0xd8b   :  { %25968 = vmatpush3.msra.mxu1 %v29811_v2  ;;  %25934 = vmatprep.subr.mxu0 %v29814_v45  ;;  %v32453_v2 = vld [vmem:[#allocation30_spill] sm:$0xff] }
 0xd8c   :  { %25969 = vmatprep.subr.mxu1 %v29814_v45  ;;  %25935 = vmatpush3.msra.mxu0 %v29814_v45 }
 0xd8d   :  { %25936 = vmatprep.mubr.f32.mxu0 %v32450_v16  ;;  %25970 = vmatpush3.msra.mxu1 %v29814_v45  ;;  %v13441_v45 = vld [vmem:[#allocation5 + $0x238] sm:$0xff] }
 0xd8e   :  { %25937 = vmatmul.mubr.f32.vlgmr.msra.gmra.mxu0 %v32451_v59  ;;  %25946 = vmatprep.subr.mxu0 %v29819_v50 }
 0xd8f   :  { %25947 = vmatpush3.msra.mxu0 %v29819_v50  ;;  %25950 = vmatprep.mubr.f32.mxu0 %v32452_v38  ;;  %v30316_v50 = vand.u32 4294901760, %v13441_v45 }
 0xd90   :  { %25948 = vmatprep.subr.mxu0 %v29823_v8  ;;  %25971 = vmatprep.mubr.f32.mxu1 %v32385_v43 }
 0xd91   :  { %25949 = vmatpush3.msra.mxu0 %v29823_v8  ;;  %25972 = vmatmul.mubr.f32.vlgmr.msra.gmra.mxu1 %v32447_v0  ;;  %v13440_v8 = vld [vmem:[#allocation5 + $0x230] sm:$0xff]  ;;  %v30319_v37 = vsub.f32 %v13441_v45, %v30316_v50 }
 0xd92   :  { %25951 = vmatmul.mubr.f32.vlgmr.msra.gmra.mxu0 %v32453_v2  ;;  %25960 = vmatprep.subr.mxu0 %v29828_v40  ;;  %v30321_v60 = vand.u32 4294901760, %v13440_v8 }
 0xd93   :  { %25961 = vmatpush3.msra.mxu0 %v29828_v40  ;;  %25964 = vmatprep.mubr.f32.mxu0 %v32385_v43  ;;  %v13439_v40 = vld [vmem:[#allocation5 + $0x228] sm:$0xff]  ;;  %v30326_v54 = vand.u32 4294901760, %v30319_v37 }
 0xd94   :  { %25962 = vmatprep.subr.mxu0 %v29831_v28  ;;  %v30331_v14 = vand.u32 4294901760, %v13439_v40 }
 0xd95   :  { %25963 = vmatpush3.msra.mxu0 %v29831_v28  ;;  %v30329_v28 = vsub.f32 %v13440_v8, %v30321_v60  ;;  %v13561_v63 = vsub.f32 %v30319_v37, %v30326_v54 }
 0xd96   :  { %25965 = vmatmul.mubr.f32.vlgmr.msra.gmra.mxu0 %v32447_v0  ;;  %25974 = vmatprep.subr.mxu0 %v30316_v50  ;;  %v30341_v49 = vsub.f32 %v13439_v40, %v30331_v14 }
 0xd97   :  { %25975 = vmatpush3.msra.mxu0 %v30316_v50  ;;  %v30338_v11 = vand.u32 4294901760, %v30329_v28  ;;  %v13562_v32 = vand.u32 4294901760, %v13561_v63 }
 0xd98   :  { %25976 = vmatprep.subr.mxu0 %v30321_v60  ;;  %v30350_v21 = vand.u32 4294901760, %v30341_v49 }
 0xd99   :  { %25977 = vmatpush3.msra.mxu0 %v30321_v60  ;;  %v13568_v15 = vsub.f32 %v30329_v28, %v30338_v11  ;;  %25993 = vmatprep.subr.mxu1 %v13562_v32 }
 0xd9a   :  { %25978 = vmatprep.subr.mxu0 %v30331_v14  ;;  %v13575_v1 = vsub.f32 %v30341_v49, %v30350_v21  ;;  %25994 = vmatpush3.msra.mxu1 %v13562_v32 }
 0xd9b   :  { %25979 = vmatpush3.msra.mxu0 %v30331_v14  ;;  %v13569_v46 = vand.u32 4294901760, %v13568_v15 }
 0xd9c   :  { %25980 = vmatprep.subr.mxu0 %v30343_v26  ;;  %v13576_v34 = vand.u32 4294901760, %v13575_v1 }
 0xd9d   :  { %25981 = vmatpush3.msra.mxu0 %v30343_v26  ;;  %25995 = vmatprep.subr.mxu1 %v13569_v46 }
 0xd9e   :  { %25982 = vmatprep.subr.mxu0 %v30356_v57  ;;  %25996 = vmatpush3.msra.mxu1 %v13569_v46 }
 0xd9f   :  { %25983 = vmatpush3.msra.mxu0 %v30356_v57  ;;  %25997 = vmatprep.subr.mxu1 %v13576_v34 }
 0xda0   :  { %25984 = vmatprep.subr.mxu0 %v30364_v20  ;;  %25998 = vmatpush3.msra.mxu1 %v13576_v34 }
 0xda1   :  { %25985 = vmatpush3.msra.mxu0 %v30364_v20  ;;  %25999 = vmatprep.subr.mxu1 %v13583_v61 }
 0xda2   :  { %25986 = vmatprep.subr.mxu0 %v30375_v53  ;;  %26000 = vmatpush3.msra.mxu1 %v13583_v61 }
 0xda3   :  { %25987 = vmatpush3.msra.mxu0 %v30375_v53  ;;  %26001 = vmatprep.subr.mxu1 %v13590_v56 }
 0xda4   :  { %25988 = vmatprep.subr.mxu0 %v30388_v48  ;;  %26002 = vmatpush3.msra.mxu1 %v13590_v56 }
 0xda5   :  { %25989 = vmatpush3.msra.mxu0 %v30388_v48  ;;  %26003 = vmatprep.subr.mxu1 %v13597_v36 }
 0xda6   :  { %26012 = vmatprep.subr.mxu0 %v30319_v37  ;;  %26004 = vmatpush3.msra.mxu1 %v13597_v36 }
 0xda7   :  { %26005 = vmatprep.subr.mxu1 %v13604_v29 }
 0xda8   :  { %26006 = vmatpush3.msra.mxu1 %v13604_v29 }
 0xda9   :  { %26007 = vmatprep.subr.mxu1 %v13611_v58 }
 0xdaa   :  { %26008 = vmatpush3.msra.mxu1 %v13611_v58 }
 0xdab   :  { %26031 = vmatprep.subr.mxu1 %v30316_v50 }
 0xde6   :  { %v25741_v35 = vpop.f32.mrf.mxu1 }
 0xde8   :  { %v11965_v3 = vpop.f32.mrf.mxu1 }
 0xdee   :  { %v25722_v23 = vpop.f32.mrf.mxu0 }
 0xdef   :  { %v11972_v55 = vadd.f32 %v25741_v35, %v25722_v23 }
 0xdf0   :  { %v11844_v22 = vpop.f32.mrf.mxu0 }
 0xdf1   :  { %v11966_v13 = vadd.f32 %v11965_v3, %v11844_v22 }
 0xdf7   :  { %v25779_v45 = vpop.f32.mrf.mxu1 }
 0xdf9   :  { %v12147_v4 = vpop.f32.mrf.mxu1 }
 0xdff   :  { %v25760_v7 = vpop.f32.mrf.mxu0 }
 0xe00   :  { %v12067_v42 = vadd.f32 %v25760_v7, %v11972_v55 }
 0xe01   :  { %v12059_v40 = vpop.f32.mrf.mxu0 }
 0xe02   :  { %v12156_v8 = vadd.f32 %v25779_v45, %v12067_v42  ;;  %v12060_v12 = vadd.f32 %v12059_v40, %v11966_v13 }
 0xe04   :  { %v12148_v17 = vadd.f32 %v12147_v4, %v12060_v12 }
 0xe09   :  { %v25817_v32 = vpop.f32.mrf.mxu1 }
 0xe0b   :  { %v12335_v46 = vpop.f32.mrf.mxu1 }
 0xe11   :  { %v25798_v63 = vpop.f32.mrf.mxu0 }
 0xe12   :  { %v12257_v39 = vadd.f32 %v25798_v63, %v12156_v8 }
 0xe13   :  { %v12250_v6 = vpop.f32.mrf.mxu0 }
 0xe14   :  { %v12342_v15 = vadd.f32 %v25817_v32, %v12257_v39  ;;  %v12251_v5 = vadd.f32 %v12250_v6, %v12148_v17 }
 0xe16   :  { %v12336_v36 = vadd.f32 %v12335_v46, %v12251_v5 }
 0xe1b   :  { %v25855_v24 = vpop.f32.mrf.mxu1 }
 0xe1d   :  { %v12551_v29 = vpop.f32.mrf.mxu1 }
 0xe23   :  { %v25836_v1 = vpop.f32.mrf.mxu0 }
 0xe24   :  { %v12441_v34 = vadd.f32 %v25836_v1, %v12342_v15 }
 0xe25   :  { %v12430_v56 = vpop.f32.mrf.mxu0 }
 0xe26   :  { %v12558_v61 = vadd.f32 %v25855_v24, %v12441_v34  ;;  %v12431_v47 = vadd.f32 %v12430_v56, %v12336_v36 }
 0xe28   :  { %v12552_v23 = vadd.f32 %v12551_v29, %v12431_v47 }
 0xe2d   :  { %v25893_v33 = vpop.f32.mrf.mxu1 }
 0xe2f   :  { %v12733_v45 = vpop.f32.mrf.mxu1 }
 0xe35   :  { %v25874_v58 = vpop.f32.mrf.mxu0 }
 0xe36   :  { %v12653_v35 = vadd.f32 %v25874_v58, %v12558_v61 }
 0xe37   :  { %v12645_v55 = vpop.f32.mrf.mxu0 }
 0xe38   :  { %v12646_v7 = vadd.f32 %v12645_v55, %v12552_v23  ;;  %v12742_v42 = vadd.f32 %v25893_v33, %v12653_v35 }
 0xe3a   :  { %v12734_v8 = vadd.f32 %v12733_v45, %v12646_v7 }
 0xe3f   :  { %v25931_v22 = vpop.f32.mrf.mxu1 }
 0xe41   :  { %v12921_v3 = vpop.f32.mrf.mxu1 }
 0xe45   :  { %v25945_v63 = vpop.f32.mrf.mxu1 }
 0xe47   :  { %v25912_v40 = vpop.f32.mrf.mxu0  ;;  %v13095_v6 = vpop.f32.mrf.mxu1 }
 0xe48   :  { %v12843_v39 = vadd.f32 %v25912_v40, %v12742_v42 }
 0xe49   :  { %v12836_v4 = vpop.f32.mrf.mxu0 }
 0xe4a   :  { %v30414_v32 = vadd.f32 %v25931_v22, %v12843_v39  ;;  %v12837_v15 = vadd.f32 %v12836_v4, %v12734_v8  ;;  %v25959_v13 = vpop.f32.mrf.mxu1 }
 0xe4c   :  { %v30416_v46 = vadd.f32 %v12921_v3, %v12837_v15  ;;  %v13259_v61 = vpop.f32.mrf.mxu1 }
 0xe4e   :  { %v25938_v1 = vpop.f32.mrf.mxu0 }
 0xe4f   :  { %v13102_v24 = vadd.f32 %v25945_v63, %v25938_v1 }
 0xe50   :  { %v13004_v34 = vpop.f32.mrf.mxu0 }
 0xe51   :  { %v13096_v17 = vadd.f32 %v13095_v6, %v13004_v34  ;;  %v25973_v33 = vpop.f32.mrf.mxu1 }
 0xe52   :  { %v25952_v12 = vpop.f32.mrf.mxu0 }
 0xe53   :  { %v13185_v5 = vadd.f32 %v25952_v12, %v13102_v24  ;;  %v13423_v42 = vpop.f32.mrf.mxu1 }
 0xe54   :  { %v13177_v56 = vpop.f32.mrf.mxu0 }
 0xe55   :  { %v13268_v36 = vadd.f32 %v25959_v13, %v13185_v5  ;;  %v13178_v47 = vadd.f32 %v13177_v56, %v13096_v17 }
 0xe56   :  { %v25966_v29 = vpop.f32.mrf.mxu0 }
 0xe57   :  { %v13260_v58 = vadd.f32 %v13259_v61, %v13178_v47  ;;  %v13351_v35 = vadd.f32 %v25966_v29, %v13268_v36  ;;  %v32455_v29 = vld [vmem:[#allocation36_spill] sm:$0xff] }
 0xe58   :  { %v13344_v23 = vpop.f32.mrf.mxu0 }
 0xe59   :  { %v13430_v55 = vadd.f32 %v25973_v33, %v13351_v35  ;;  %v13345_v7 = vadd.f32 %v13344_v23, %v13260_v58  ;;  %v32456_v58 = vld [vmem:[#allocation35_spill] sm:$0xff]  ;;  %v32457_v35 = vld [vmem:[#allocation37_spill] sm:$0xff] }
 0xe5a   :  { %v32458_v23 = vld [vmem:[#allocation39_spill] sm:$0xff] }
 0xe5b   :  { %v13446_v45 = vsel %vm1108_vm1, %v13430_v55, 0  ;;  %v13424_v8 = vadd.f32 %v13423_v42, %v13345_v7  ;;  %v32459_v55 = vld [vmem:[#allocation48_spill] sm:$0xff]  ;;  %v32460_v7 = vld [vmem:[#allocation41_spill] sm:$0xff] }
 0xe5c   :  { %v30419_v22 = vand.u32 4294901760, %v13446_v45  ;;  %v32461_v42 = vld [vmem:[#allocation52_spill] sm:$0xff] }
 0xe5d   :  { %v13443_v3 = vsel %vm1108_vm1, %v13424_v8, 0  ;;  %v32463_v8 = vld [vmem:[#allocation56_spill] sm:$0xff] }
 0xe5e   :  { %v13532_v63 = vsub.f32 %v13446_v45, %v30419_v22  ;;  %v13521_v40 = vand.u32 4294901760, %v13443_v3  ;;  %v32462_v45 = vld [vmem:[#allocation44_spill] sm:$0xff] }
 0xe60   :  { %v13533_v39 = vand.u32 4294901760, %v13532_v63  ;;  %v13522_v4 = vsub.f32 %v13443_v3, %v13521_v40  ;;  %26009 = vmatprep.mubr.f32.mxu1 %v13521_v40  ;;  %v32465_v3 = vld [vmem:[#allocation60_spill] sm:$0xff] }
 0xe61   :  { %26010 = vmatmul.mubr.f32.vlgmr.msra.gmra.mxu1 %v30419_v22 }
 0xe62   :  { %26032 = vmatpush3.msra.mxu1 %v30316_v50  ;;  %v13523_v15 = vand.u32 4294901760, %v13522_v4  ;;  %v13534_v6 = vsub.f32 %v13532_v63, %v13533_v39 }
 0xe63   :  { %26033 = vmatprep.subr.mxu1 %v30321_v60 }
 0xe64   :  { %26034 = vmatpush3.msra.mxu1 %v30321_v60  ;;  %26047 = vmatprep.mubr.f32.mxu1 %v13523_v15  ;;  %v13524_v1 = vsub.f32 %v13522_v4, %v13523_v15  ;;  %v13535_v34 = vand.u32 4294901760, %v13534_v6  ;;  %v32470_v15 = vld [vmem:[#allocation69_spill] sm:$0xff]  ;;  %v32471_v6 = vld [vmem:[#allocation58_spill] sm:$0xff] }
 0xe65   :  { %26035 = vmatprep.subr.mxu1 %v30331_v14 }
 0xe66   :  { %26036 = vmatpush3.msra.mxu1 %v30331_v14  ;;  %v13525_v13 = vand.u32 4294901760, %v13524_v1  ;;  %v32472_v1 = vld [vmem:[#allocation70_spill] sm:$0xff] }
 0xe67   :  { %26037 = vmatprep.subr.mxu1 %v30343_v26 }
 0xe68   :  { %26038 = vmatpush3.msra.mxu1 %v30343_v26  ;;  %25990 = vmatprep.mubr.f32.mxu0 %v13525_v13  ;;  %v32473_v13 = vld [vmem:[#allocation63_spill] sm:$0xff] }
 0xe69   :  { %26039 = vmatprep.subr.mxu1 %v30356_v57  ;;  %25991 = vmatmul.mubr.f32.vlgmr.msra.gmra.mxu0 %v13535_v34 }
 0xe6a   :  { %26013 = vmatpush3.msra.mxu0 %v30319_v37  ;;  %26040 = vmatpush3.msra.mxu1 %v30356_v57 }
 0xe6b   :  { %26014 = vmatprep.subr.mxu0 %v30329_v28  ;;  %26028 = vmatprep.mubr.f32.mxu0 %v13522_v4  ;;  %v32469_v4 = vld [vmem:[#allocation54_spill] sm:$0xff] }
 0xe6c   :  { %26041 = vmatprep.subr.mxu1 %v30364_v20  ;;  %26015 = vmatpush3.msra.mxu0 %v30329_v28 }
 0xe6d   :  { %26042 = vmatpush3.msra.mxu1 %v30364_v20  ;;  %26016 = vmatprep.subr.mxu0 %v30341_v49 }
 0xe6e   :  { %26043 = vmatprep.subr.mxu1 %v30375_v53  ;;  %26017 = vmatpush3.msra.mxu0 %v30341_v49 }
 0xe6f   :  { %26044 = vmatpush3.msra.mxu1 %v30375_v53  ;;  %26018 = vmatprep.subr.mxu0 %v30353_v31 }
 0xe70   :  { %26045 = vmatprep.subr.mxu1 %v30388_v48  ;;  %26019 = vmatpush3.msra.mxu0 %v30353_v31 }
 0xe71   :  { %26046 = vmatpush3.msra.mxu1 %v30388_v48  ;;  %26020 = vmatprep.subr.mxu0 %v30367_v9 }
 0xe72   :  { %26048 = vmatmul.mubr.f32.vlgmr.msra.gmra.mxu1 %v13533_v39  ;;  %26069 = vmatprep.subr.mxu1 %v30316_v50  ;;  %v32468_v39 = vld [vmem:[#allocation67_spill] sm:$0xff] }
 0xe73   :  { %26021 = vmatpush3.msra.mxu0 %v30367_v9  ;;  %26070 = vmatpush3.msra.mxu1 %v30316_v50 }
 0xe74   :  { %26085 = vmatprep.mubr.f32.mxu1 %v13521_v40  ;;  %26022 = vmatprep.subr.mxu0 %v30373_v62 }
 0xe75   :  { %26071 = vmatprep.subr.mxu1 %v30321_v60  ;;  %26023 = vmatpush3.msra.mxu0 %v30373_v62 }
 0xe76   :  { %26072 = vmatpush3.msra.mxu1 %v30321_v60  ;;  %26024 = vmatprep.subr.mxu0 %v30386_v25 }
 0xe77   :  { %26073 = vmatprep.subr.mxu1 %v30331_v14  ;;  %26025 = vmatpush3.msra.mxu0 %v30386_v25 }
 0xe78   :  { %26074 = vmatpush3.msra.mxu1 %v30331_v14  ;;  %26026 = vmatprep.subr.mxu0 %v30400_v52 }
 0xe79   :  { %26075 = vmatprep.subr.mxu1 %v30343_v26  ;;  %26027 = vmatpush3.msra.mxu0 %v30400_v52 }
 0xe7a   :  { %26076 = vmatpush3.msra.mxu1 %v30343_v26  ;;  %26029 = vmatmul.mubr.f32.vlgmr.msra.gmra.mxu0 %v13532_v63  ;;  %v32466_v63 = vld [vmem:[#allocation66_spill] sm:$0xff] }
 0xe7b   :  { %26050 = vmatprep.subr.mxu0 %v30326_v54  ;;  %26077 = vmatprep.subr.mxu1 %v30356_v57 }
 0xe7c   :  { %26051 = vmatpush3.msra.mxu0 %v30326_v54  ;;  %26066 = vmatprep.mubr.f32.mxu0 %v13521_v40  ;;  %v32467_v40 = vld [vmem:[#allocation51_spill] sm:$0xff] }
 0xe7d   :  { %26078 = vmatpush3.msra.mxu1 %v30356_v57  ;;  %26052 = vmatprep.subr.mxu0 %v30338_v11 }
 0xe7e   :  { %26079 = vmatprep.subr.mxu1 %v30364_v20  ;;  %26053 = vmatpush3.msra.mxu0 %v30338_v11 }
 0xe7f   :  { %26080 = vmatpush3.msra.mxu1 %v30364_v20  ;;  %26054 = vmatprep.subr.mxu0 %v30350_v21 }
 0xe80   :  { %26081 = vmatprep.subr.mxu1 %v30375_v53  ;;  %26055 = vmatpush3.msra.mxu0 %v30350_v21 }
 0xe81   :  { %26082 = vmatpush3.msra.mxu1 %v30375_v53  ;;  %26056 = vmatprep.subr.mxu0 %v30362_v18 }
 0xe82   :  { %26083 = vmatprep.subr.mxu1 %v30388_v48  ;;  %26057 = vmatpush3.msra.mxu0 %v30362_v18 }
 0xe83   :  { %26084 = vmatpush3.msra.mxu1 %v30388_v48  ;;  %26058 = vmatprep.subr.mxu0 %v30379_v30 }
 0xe84   :  { %26086 = vmatmul.mubr.f32.vlgmr.msra.gmra.mxu1 %v30419_v22  ;;  %26059 = vmatpush3.msra.mxu0 %v30379_v30 }
 0xe85   :  { %26060 = vmatprep.subr.mxu0 %v30383_v10  ;;  %26095 = vmatprep.subr.mxu1 %v32371_v27 }
 0xe86   :  { %26061 = vmatpush3.msra.mxu0 %v30383_v10  ;;  %26099 = vmatprep.mubr.msk.f32.mxu1 %vm27424_vm2, %v32371_v27 }
 0xe87   :  { %26062 = vmatprep.subr.mxu0 %v30397_v41 }
 0xe88   :  { %26063 = vmatpush3.msra.mxu0 %v30397_v41 }
 0xe89   :  { %26064 = vmatprep.subr.mxu0 %v30407_v51 }
 0xe8a   :  { %26065 = vmatpush3.msra.mxu0 %v30407_v51 }
 0xe8b   :  { %26067 = vmatmul.mubr.f32.vlgmr.msra.gmra.mxu0 %v30419_v22  ;;  %26088 = vmatprep.subr.mxu0 %v32371_v27  ;;  %v32464_v22 = vld [vmem:[#allocation47_spill] sm:$0xff] }
 0xe8c   :  { %26092 = vmatprep.mubr.msk.f32.mxu0 %vm27424_vm2, %v32371_v27 }
 0xf21   :  { %v26011_v37 = vpop.f32.mrf.mxu1 }
 0xf23   :  { %v13648_v28 = vpop.f32.mrf.mxu1 }
 0xf29   :  { %v25992_v50 = vpop.f32.mrf.mxu0 }
 0xf2a   :  { %v13655_v14 = vadd.f32 %v26011_v37, %v25992_v50 }
 0xf2b   :  { %v13527_v60 = vpop.f32.mrf.mxu0 }
 0xf2c   :  { %v13649_v26 = vadd.f32 %v13648_v28, %v13527_v60 }
 0xf32   :  { %v26049_v11 = vpop.f32.mrf.mxu1 }
 0xf34   :  { %v13830_v57 = vpop.f32.mrf.mxu1 }
 0xf3a   :  { %v26030_v54 = vpop.f32.mrf.mxu0 }
 0xf3b   :  { %v13750_v21 = vadd.f32 %v26030_v54, %v13655_v14 }
 0xf3c   :  { %v13742_v49 = vpop.f32.mrf.mxu0 }
 0xf3d   :  { %v13743_v31 = vadd.f32 %v13742_v49, %v13649_v26  ;;  %v13839_v18 = vadd.f32 %v26049_v11, %v13750_v21 }
 0xf3f   :  { %v13831_v53 = vadd.f32 %v13830_v57, %v13743_v31 }
 0xf44   :  { %v26087_v20 = vpop.f32.mrf.mxu1 }
 0xf46   :  { %v14018_v48 = vpop.f32.mrf.mxu1 }
 0xf4b   :  { %v26068_v9 = vpop.f32.mrf.mxu0 }
 0xf4c   :  { %v13940_v62 = vadd.f32 %v26068_v9, %v13839_v18 }
 0xf4d   :  { %v13933_v30 = vpop.f32.mrf.mxu0 }
 0xf4e   :  { %v14025_v10 = vadd.f32 %v26087_v20, %v13940_v62  ;;  %v13934_v25 = vadd.f32 %v13933_v30, %v13831_v53 }
 0xf50   :  { %v30495_v41 = vadd.f32 %v14025_v10, %v30414_v32  ;;  %v14019_v52 = vadd.f32 %v14018_v48, %v13934_v25  ;;  %v32454_v32 = vld [vmem:[#allocation38_spill] sm:$0xff] }
 0xf52   :  { %v30498_v51 = vadd.f32 %v14019_v52, %v30416_v46  ;;  %v14061_v24 = vand.u32 4294901760, %v30495_v41 }
 0xf54   :  { %26089 = vmatpush3.msra.mxu0 %v14061_v24  ;;  %v14064_v12 = vand.u32 4294901760, %v30498_v51  ;;  %v14139_v61 = vsub.f32 %v30495_v41, %v14061_v24 }
 0xf55   :  { %26090 = vmatprep.subr.mxu0 %v32371_v27 }
 0xf56   :  { %26091 = vmatpush3.msra.mxu0 %v14064_v12  ;;  %v14146_v17 = vsub.f32 %v30498_v51, %v14064_v12  ;;  %v14140_v5 = vand.u32 4294901760, %v14139_v61 }
 0xf57   :  { %26102 = vmatprep.subr.mxu0 %v32371_v27  ;;  %26093 = vmatmul.mubr.f32.vlgmr.msra.gmra.mxu0 %v32454_v32 }
 0xf58   :  { %26103 = vmatpush3.msra.mxu0 %v14139_v61  ;;  %26106 = vmatprep.mubr.msk.f32.mxu0 %vm27424_vm2, %v32371_v27  ;;  %v14141_v46 = vsub.f32 %v14139_v61, %v14140_v5  ;;  %v14147_v56 = vand.u32 4294901760, %v14146_v17  ;;  %v32476_v61 = vld [vmem:[#allocation46_spill] sm:$0xff] }
 0xf59   :  { %26104 = vmatprep.subr.mxu0 %v32371_v27 }
 0xf5a   :  { %26105 = vmatpush3.msra.mxu0 %v14146_v17  ;;  %v14142_v36 = vand.u32 4294901760, %v14141_v46  ;;  %v14148_v47 = vsub.f32 %v14146_v17, %v14147_v56  ;;  %v14031_v17 = vmul.f32 %v30495_v41, %v30495_v41  ;;  %v14030_v46 = vmul.f32 %v30498_v51, %v30498_v51 }
 0xf5b   :  { %26116 = vmatprep.subr.mxu0 %v32371_v27  ;;  %26107 = vmatmul.mubr.f32.vlgmr.msra.gmra.mxu0 %v32455_v29 }
 0xf5c   :  { %26096 = vmatpush3.msra.mxu1 %v14142_v36  ;;  %26117 = vmatpush3.msra.mxu0 %v14140_v5  ;;  %v14149_v33 = vand.u32 4294901760, %v14148_v47  ;;  %v32477_v5 = vld [vmem:[#allocation50_spill] sm:$0xff]  ;;  %v30602_v36 = vand.u32 4294901760, %v14031_v17  ;;  %v32479_v47 = vld [vmem:[#allocation57_spill] sm:$0xff] }
 0xf5d   :  { %26097 = vmatprep.subr.mxu1 %v32371_v27  ;;  %26118 = vmatprep.subr.mxu0 %v32371_v27 }
 0xf5e   :  { %26098 = vmatpush3.msra.mxu1 %v14149_v33  ;;  %26119 = vmatpush3.msra.mxu0 %v14147_v56  ;;  %v32478_v56 = vld [vmem:[#allocation55_spill] sm:$0xff]  ;;  %v30608_v33 = vand.u32 4294901760, %v14030_v46 }
 0xf5f   :  { %26100 = vmatmul.mubr.f32.vlgmr.msra.gmra.mxu1 %v32456_v58  ;;  %26109 = vmatprep.subr.mxu1 %v32371_v27 }
 0xf60   :  { %26110 = vmatpush3.msra.mxu1 %v14061_v24  ;;  %26113 = vmatprep.mubr.msk.f32.mxu1 %vm27424_vm2, %v32371_v27 }
 0xf61   :  { %26111 = vmatprep.subr.mxu1 %v32371_v27  ;;  %26120 = vmatprep.mubr.msk.f32.mxu0 %vm27424_vm2, %v32371_v27 }
 0xf62   :  { %26112 = vmatpush3.msra.mxu1 %v14064_v12  ;;  %26121 = vmatmul.mubr.f32.vlgmr.msra.gmra.mxu0 %v32456_v58 }
 0xf63   :  { %26114 = vmatmul.mubr.f32.vlgmr.msra.gmra.mxu1 %v32457_v35  ;;  %26123 = vmatprep.subr.mxu1 %v32371_v27 }
 0xf64   :  { %26124 = vmatpush3.msra.mxu1 %v14061_v24  ;;  %26127 = vmatprep.mubr.msk.f32.mxu1 %vm27424_vm2, %v32371_v27  ;;  %v32474_v24 = vld [vmem:[#allocation40_spill] sm:$0xff] }
 0xf65   :  { %26125 = vmatprep.subr.mxu1 %v32371_v27  ;;  %26130 = vmatprep.subr.mxu0 %v32371_v27 }
 0xf66   :  { %26126 = vmatpush3.msra.mxu1 %v14064_v12  ;;  %26131 = vmatpush3.msra.mxu0 %v32458_v23  ;;  %v32475_v12 = vld [vmem:[#allocation43_spill] sm:$0xff] }
 0xf67   :  { %26128 = vmatmul.mubr.f32.vlgmr.msra.gmra.mxu1 %v32456_v58  ;;  %26149 = vmatprep.subr.mxu1 %v32371_v27 }
 0xf68   :  { %26150 = vmatpush3.msra.mxu1 %v32459_v55  ;;  %26132 = vmatprep.subr.mxu0 %v32371_v27 }
 0xf69   :  { %26151 = vmatprep.subr.mxu1 %v32371_v27  ;;  %26133 = vmatpush3.msra.mxu0 %v32460_v7 }
 0xf6a   :  { %26152 = vmatpush3.msra.mxu1 %v32461_v42  ;;  %26134 = vmatprep.subr.mxu0 %v32371_v27 }
 0xf6b   :  { %26153 = vmatprep.subr.mxu1 %v32371_v27  ;;  %26135 = vmatpush3.msra.mxu0 %v32462_v45 }
 0xf6c   :  { %26154 = vmatpush3.msra.mxu1 %v32463_v8  ;;  %26136 = vmatprep.subr.mxu0 %v32371_v27 }
 0xf6d   :  { %26155 = vmatprep.subr.mxu1 %v32371_v27  ;;  %26137 = vmatpush3.msra.mxu0 %v32464_v22 }
 0xf6e   :  { %26156 = vmatpush3.msra.mxu1 %v32465_v3  ;;  %26138 = vmatprep.subr.mxu0 %v32371_v27 }
 0xf6f   :  { %26157 = vmatprep.subr.mxu1 %v32371_v27  ;;  %26165 = vmatprep.mubr.msk.f32.mxu1 %vm27424_vm2, %v32371_v27 }
 0xf70   :  { %26158 = vmatpush3.msra.mxu1 %v32466_v63  ;;  %26139 = vmatpush3.msra.mxu0 %v32467_v40 }
 0xf71   :  { %26159 = vmatprep.subr.mxu1 %v32371_v27  ;;  %26140 = vmatprep.subr.mxu0 %v32371_v27 }
 0xf72   :  { %26160 = vmatpush3.msra.mxu1 %v32468_v39  ;;  %26141 = vmatpush3.msra.mxu0 %v32469_v4 }
 0xf73   :  { %26161 = vmatprep.subr.mxu1 %v32371_v27  ;;  %26142 = vmatprep.subr.mxu0 %v32371_v27 }
 0xf74   :  { %26162 = vmatpush3.msra.mxu1 %v32470_v15  ;;  %26143 = vmatpush3.msra.mxu0 %v32471_v6 }
 0xf75   :  { %26163 = vmatprep.subr.mxu1 %v32371_v27  ;;  %26144 = vmatprep.subr.mxu0 %v32371_v27 }
 0xf76   :  { %26164 = vmatpush3.msra.mxu1 %v32472_v1  ;;  %26145 = vmatpush3.msra.mxu0 %v32473_v13 }
 0xf77   :  { %26187 = vmatprep.subr.mxu1 %v32371_v27  ;;  %26146 = vmatprep.mubr.msk.f32.mxu0 %vm27424_vm2, %v32371_v27 }
 0xf78   :  { %26168 = vmatprep.subr.mxu0 %v32371_v27 }
0x1017   :  { %v14105_v34 = vpop.f32.mrf.mxu0 }
0x1019   :  { %v26094_v50 = vpop.f32.mrf.mxu0 }
0x101a   :  { %v30617_v50 = vsub.f32 %v14031_v17, %v30602_v36 }
0x101b   :  { %v14262_v37 = vpop.f32.mrf.mxu0 }
0x101d   :  { %v26108_v60 = vpop.f32.mrf.mxu0 }
0x101e   :  { %v30625_v60 = vsub.f32 %v14030_v46, %v30608_v33 }
0x101f   :  { %v14186_v54 = vpop.f32.mrf.mxu1 }
0x1020   :  { %v14187_v28 = vadd.f32 %v14186_v54, %v14105_v34  ;;  %v32480_v34 = vld [vmem:[#allocation62_spill] sm:$0xff] }
0x1021   :  { %v26101_v14 = vpop.f32.mrf.mxu1  ;;  %v32482_v54 = vld [vmem:[#allocation42_spill] sm:$0xff] }
0x1022   :  { %v14263_v11 = vadd.f32 %v14262_v37, %v14187_v28  ;;  %v14414_v49 = vpop.f32.mrf.mxu0  ;;  %v32481_v37 = vld [vmem:[#allocation65_spill] sm:$0xff]  ;;  %v15139_v28 = vand.u32 4294901760, %v30617_v50 }
0x1023   :  { %v14337_v26 = vpop.f32.mrf.mxu1  ;;  %v32483_v14 = vld [vmem:[#allocation45_spill] sm:$0xff] }
0x1024   :  { %v14338_v21 = vadd.f32 %v14337_v26, %v14263_v11  ;;  %v26122_v31 = vpop.f32.mrf.mxu0  ;;  %v15146_v11 = vand.u32 4294901760, %v30625_v60  ;;  %v15140_v26 = vsub.f32 %v30617_v50, %v15139_v28 }
0x1025   :  { %v26115_v57 = vpop.f32.mrf.mxu1 }
0x1026   :  { %v14415_v18 = vadd.f32 %v14414_v49, %v14338_v21  ;;  %v32484_v49 = vld [vmem:[#allocation49_spill] sm:$0xff]  ;;  %v15147_v31 = vsub.f32 %v30625_v60, %v15146_v11  ;;  %v15141_v57 = vand.u32 4294901760, %v15140_v26 }
0x1027   :  { %v14487_v20 = vpop.f32.mrf.mxu1  ;;  %v32485_v21 = vld [vmem:[#allocation53_spill] sm:$0xff] }
0x1028   :  { %v14488_v9 = vadd.f32 %v14487_v20, %v14415_v18  ;;  %v32486_v18 = vld [vmem:[#allocation59_spill] sm:$0xff]  ;;  %v15148_v20 = vand.u32 4294901760, %v15147_v31 }
0x1029   :  { %v26129_v62 = vpop.f32.mrf.mxu1 }
0x102a   :  { %v14492_v53 = vsel %vm1108_vm1, %v14488_v9, 0  ;;  %v32487_v9 = vld [vmem:[#allocation61_spill] sm:$0xff]  ;;  %v32488_v62 = vld [vmem:[#allocation64_spill] sm:$0xff] }
0x102b   :  { %v30567_v30 = vand.u32 4294901760, %v14492_v53 }
0x102d   :  { %v14568_v10 = vsub.f32 %v14492_v53, %v30567_v30  ;;  %26166 = vmatmul.mubr.f32.vlgmr.msra.gmra.mxu1 %v30567_v30  ;;  %v32489_v53 = vld [vmem:[#allocation68_spill] sm:$0xff] }
0x102e   :  { %26188 = vmatpush3.msra.mxu1 %v32458_v23  ;;  %26203 = vmatprep.mubr.msk.f32.mxu1 %vm27424_vm2, %v32371_v27 }
0x102f   :  { %v14569_v25 = vand.u32 4294901760, %v14568_v10  ;;  %26189 = vmatprep.subr.mxu1 %v32371_v27 }
0x1030   :  { %26190 = vmatpush3.msra.mxu1 %v32460_v7 }
0x1031   :  { %v14570_v48 = vsub.f32 %v14568_v10, %v14569_v25  ;;  %26191 = vmatprep.subr.mxu1 %v32371_v27 }
0x1032   :  { %26192 = vmatpush3.msra.mxu1 %v32462_v45 }
0x1033   :  { %v14571_v52 = vand.u32 4294901760, %v14570_v48  ;;  %26193 = vmatprep.subr.mxu1 %v32371_v27 }
0x1034   :  { %26194 = vmatpush3.msra.mxu1 %v32464_v22 }
0x1035   :  { %26195 = vmatprep.subr.mxu1 %v32371_v27  ;;  %26147 = vmatmul.mubr.f32.vlgmr.msra.gmra.mxu0 %v14571_v52 }
0x1036   :  { %26169 = vmatpush3.msra.mxu0 %v32474_v24  ;;  %26196 = vmatpush3.msra.mxu1 %v32467_v40 }
0x1037   :  { %26170 = vmatprep.subr.mxu0 %v32371_v27  ;;  %26197 = vmatprep.subr.mxu1 %v32371_v27 }
0x1038   :  { %26171 = vmatpush3.msra.mxu0 %v32475_v12  ;;  %26198 = vmatpush3.msra.mxu1 %v32469_v4 }
0x1039   :  { %26172 = vmatprep.subr.mxu0 %v32371_v27  ;;  %26199 = vmatprep.subr.mxu1 %v32371_v27 }
0x103a   :  { %26173 = vmatpush3.msra.mxu0 %v32476_v61  ;;  %26200 = vmatpush3.msra.mxu1 %v32471_v6 }
0x103b   :  { %26174 = vmatprep.subr.mxu0 %v32371_v27  ;;  %26201 = vmatprep.subr.mxu1 %v32371_v27 }
0x103c   :  { %26175 = vmatpush3.msra.mxu0 %v32477_v5  ;;  %26202 = vmatpush3.msra.mxu1 %v32473_v13 }
0x103d   :  { %26176 = vmatprep.subr.mxu0 %v32371_v27  ;;  %26204 = vmatmul.mubr.f32.vlgmr.msra.gmra.mxu1 %v14569_v25 }
0x103e   :  { %26225 = vmatprep.subr.mxu1 %v32371_v27  ;;  %26177 = vmatpush3.msra.mxu0 %v32478_v56 }
0x103f   :  { %26226 = vmatpush3.msra.mxu1 %v32458_v23  ;;  %26178 = vmatprep.subr.mxu0 %v32371_v27 }
0x1040   :  { %26227 = vmatprep.subr.mxu1 %v32371_v27  ;;  %26179 = vmatpush3.msra.mxu0 %v32479_v47 }
0x1041   :  { %26228 = vmatpush3.msra.mxu1 %v32460_v7  ;;  %26180 = vmatprep.subr.mxu0 %v32371_v27 }
0x1042   :  { %26229 = vmatprep.subr.mxu1 %v32371_v27  ;;  %26181 = vmatpush3.msra.mxu0 %v32480_v34 }
0x1043   :  { %26230 = vmatpush3.msra.mxu1 %v32462_v45  ;;  %26182 = vmatprep.subr.mxu0 %v32371_v27 }
0x1044   :  { %26231 = vmatprep.subr.mxu1 %v32371_v27  ;;  %26183 = vmatpush3.msra.mxu0 %v32481_v37 }
0x1045   :  { %26184 = vmatprep.mubr.msk.f32.mxu0 %vm27424_vm2, %v32371_v27  ;;  %26232 = vmatpush3.msra.mxu1 %v32464_v22 }
0x1046   :  { %26185 = vmatmul.mubr.f32.vlgmr.msra.gmra.mxu0 %v14568_v10  ;;  %26206 = vmatprep.subr.mxu0 %v32371_v27 }
0x1047   :  { %26233 = vmatprep.subr.mxu1 %v32371_v27  ;;  %26207 = vmatpush3.msra.mxu0 %v32482_v54 }
0x1048   :  { %26234 = vmatpush3.msra.mxu1 %v32467_v40  ;;  %26208 = vmatprep.subr.mxu0 %v32371_v27 }
0x1049   :  { %26235 = vmatprep.subr.mxu1 %v32371_v27  ;;  %26209 = vmatpush3.msra.mxu0 %v32483_v14 }
0x104a   :  { %26236 = vmatpush3.msra.mxu1 %v32469_v4  ;;  %26210 = vmatprep.subr.mxu0 %v32371_v27 }
0x104b   :  { %26237 = vmatprep.subr.mxu1 %v32371_v27  ;;  %26211 = vmatpush3.msra.mxu0 %v32484_v49 }
0x104c   :  { %26238 = vmatpush3.msra.mxu1 %v32471_v6  ;;  %26212 = vmatprep.subr.mxu0 %v32371_v27 }
0x104d   :  { %26239 = vmatprep.subr.mxu1 %v32371_v27  ;;  %26213 = vmatpush3.msra.mxu0 %v32485_v21 }
0x104e   :  { %26240 = vmatpush3.msra.mxu1 %v32473_v13  ;;  %26241 = vmatprep.mubr.msk.f32.mxu1 %vm27424_vm2, %v32371_v27 }
0x104f   :  { %26214 = vmatprep.subr.mxu0 %v32371_v27  ;;  %26242 = vmatmul.mubr.f32.vlgmr.msra.gmra.mxu1 %v30567_v30 }
0x1050   :  { %26251 = vmatprep.subr.mxu1 %v32371_v27  ;;  %26215 = vmatpush3.msra.mxu0 %v32486_v18 }
0x1051   :  { %26252 = vmatpush3.msra.mxu1 %v15141_v57  ;;  %26216 = vmatprep.subr.mxu0 %v32371_v27 }
0x1052   :  { %26253 = vmatprep.subr.mxu1 %v32371_v27  ;;  %26217 = vmatpush3.msra.mxu0 %v32487_v9 }
0x1053   :  { %26254 = vmatpush3.msra.mxu1 %v15148_v20  ;;  %26218 = vmatprep.subr.mxu0 %v32371_v27 }
0x1054   :  { %26255 = vmatprep.mubr.msk.f32.mxu1 %vm27424_vm2, %v32371_v27  ;;  %26265 = vmatprep.subr.mxu1 %v32371_v27 }
0x1055   :  { %26219 = vmatpush3.msra.mxu0 %v32488_v62  ;;  %26256 = vmatmul.mubr.f32.vlgmr.msra.gmra.mxu1 %v32456_v58 }
0x1056   :  { %26266 = vmatpush3.msra.mxu1 %v30602_v36  ;;  %26220 = vmatprep.subr.mxu0 %v32371_v27 }
0x1057   :  { %26267 = vmatprep.subr.mxu1 %v32371_v27  ;;  %26221 = vmatpush3.msra.mxu0 %v32489_v53 }
0x1058   :  { %26222 = vmatprep.mubr.msk.f32.mxu0 %vm27424_vm2, %v32371_v27  ;;  %26268 = vmatpush3.msra.mxu1 %v30608_v33 }
0x1059   :  { %26223 = vmatmul.mubr.f32.vlgmr.msra.gmra.mxu0 %v30567_v30  ;;  %26244 = vmatprep.subr.mxu0 %v32371_v27 }
0x105a   :  { %26269 = vmatprep.mubr.msk.f32.mxu1 %vm27424_vm2, %v32371_v27  ;;  %26279 = vmatprep.subr.mxu1 %v32371_v27 }
0x105b   :  { %26245 = vmatpush3.msra.mxu0 %v30602_v36  ;;  %26270 = vmatmul.mubr.f32.vlgmr.msra.gmra.mxu1 %v32457_v35 }
0x105c   :  { %26280 = vmatpush3.msra.mxu1 %v30602_v36  ;;  %26246 = vmatprep.subr.mxu0 %v32371_v27 }
0x105d   :  { %26281 = vmatprep.subr.mxu1 %v32371_v27  ;;  %26247 = vmatpush3.msra.mxu0 %v30608_v33 }
0x105e   :  { %26248 = vmatprep.mubr.msk.f32.mxu0 %vm27424_vm2, %v32371_v27  ;;  %26282 = vmatpush3.msra.mxu1 %v30608_v33 }
0x105f   :  { %26249 = vmatmul.mubr.f32.vlgmr.msra.gmra.mxu0 %v32454_v32  ;;  %26258 = vmatprep.subr.mxu0 %v32371_v27 }
0x1060   :  { %26259 = vmatpush3.msra.mxu0 %v30617_v50  ;;  %26262 = vmatprep.mubr.msk.f32.mxu0 %vm27424_vm2, %v32371_v27 }
0x1061   :  { %26260 = vmatprep.subr.mxu0 %v32371_v27  ;;  %26283 = vmatprep.mubr.msk.f32.mxu1 %vm27424_vm2, %v32371_v27 }
0x1062   :  { %26261 = vmatpush3.msra.mxu0 %v30625_v60  ;;  %26284 = vmatmul.mubr.f32.vlgmr.msra.gmra.mxu1 %v32456_v58 }
0x1063   :  { %26263 = vmatmul.mubr.f32.vlgmr.msra.gmra.mxu0 %v32455_v29  ;;  %26272 = vmatprep.subr.mxu0 %v32371_v27 }
0x1064   :  { %26273 = vmatpush3.msra.mxu0 %v15139_v28  ;;  %26276 = vmatprep.mubr.msk.f32.mxu0 %vm27424_vm2, %v32371_v27 }
0x1065   :  { %26274 = vmatprep.subr.mxu0 %v32371_v27  ;;  %26305 = vmatprep.subr.mxu1 %v32371_v27 }
0x1066   :  { %26275 = vmatpush3.msra.mxu0 %v15146_v11  ;;  %26306 = vmatpush3.msra.mxu1 %v32459_v55 }
0x1067   :  { %26277 = vmatmul.mubr.f32.vlgmr.msra.gmra.mxu0 %v32456_v58  ;;  %26307 = vmatprep.subr.mxu1 %v32371_v27 }
0x1068   :  { %26308 = vmatpush3.msra.mxu1 %v32461_v42  ;;  %26286 = vmatprep.subr.mxu0 %v32371_v27 }
0x1069   :  { %26309 = vmatprep.subr.mxu1 %v32371_v27  ;;  %26287 = vmatpush3.msra.mxu0 %v32458_v23 }
0x106a   :  { %26310 = vmatpush3.msra.mxu1 %v32463_v8  ;;  %26288 = vmatprep.subr.mxu0 %v32371_v27 }
0x106b   :  { %26311 = vmatprep.subr.mxu1 %v32371_v27  ;;  %26289 = vmatpush3.msra.mxu0 %v32460_v7 }
0x106c   :  { %26312 = vmatpush3.msra.mxu1 %v32465_v3  ;;  %26290 = vmatprep.subr.mxu0 %v32371_v27 }
0x106d   :  { %26313 = vmatprep.subr.mxu1 %v32371_v27  ;;  %26291 = vmatpush3.msra.mxu0 %v32462_v45 }
0x106e   :  { %26314 = vmatpush3.msra.mxu1 %v32466_v63  ;;  %26292 = vmatprep.subr.mxu0 %v32371_v27 }
0x106f   :  { %26315 = vmatprep.subr.mxu1 %v32371_v27  ;;  %26293 = vmatpush3.msra.mxu0 %v32464_v22 }
0x1070   :  { %26316 = vmatpush3.msra.mxu1 %v32468_v39  ;;  %26294 = vmatprep.subr.mxu0 %v32371_v27 }
0x1071   :  { %26317 = vmatprep.subr.mxu1 %v32371_v27  ;;  %26321 = vmatprep.mubr.msk.f32.mxu1 %vm27424_vm2, %v32371_v27 }
0x1072   :  { %26318 = vmatpush3.msra.mxu1 %v32470_v15  ;;  %26295 = vmatpush3.msra.mxu0 %v32467_v40 }
0x1073   :  { %26319 = vmatprep.subr.mxu1 %v32371_v27  ;;  %26296 = vmatprep.subr.mxu0 %v32371_v27 }
0x1074   :  { %26320 = vmatpush3.msra.mxu1 %v32472_v1  ;;  %26297 = vmatpush3.msra.mxu0 %v32469_v4 }
0x1075   :  { %26343 = vmatprep.subr.mxu1 %v32371_v27  ;;  %26298 = vmatprep.subr.mxu0 %v32371_v27 }
0x1076   :  { %26299 = vmatpush3.msra.mxu0 %v32471_v6  ;;  %26302 = vmatprep.mubr.msk.f32.mxu0 %vm27424_vm2, %v32371_v27 }
0x1077   :  { %26300 = vmatprep.subr.mxu0 %v32371_v27 }
0x1078   :  { %26301 = vmatpush3.msra.mxu0 %v32473_v13 }
0x1079   :  { %26324 = vmatprep.subr.mxu0 %v32371_v27 }
0x10ed   :  { %v14684_v30 = vpop.f32.mrf.mxu1 }
0x10ef   :  { %v26167_v10 = vpop.f32.mrf.mxu1 }
0x10f5   :  { %v14573_v25 = vpop.f32.mrf.mxu0 }
0x10f6   :  { %v14685_v48 = vadd.f32 %v14684_v30, %v14573_v25 }
0x10f7   :  { %v26148_v52 = vpop.f32.mrf.mxu0 }
0x10fd   :  { %v14853_v17 = vpop.f32.mrf.mxu1 }
0x10ff   :  { %v26205_v46 = vpop.f32.mrf.mxu1 }
0x1106   :  { %v14772_v36 = vpop.f32.mrf.mxu0 }
0x1107   :  { %v14773_v33 = vadd.f32 %v14772_v36, %v14685_v48 }
0x1108   :  { %v26186_v50 = vpop.f32.mrf.mxu0 }
0x1109   :  { %v14854_v60 = vadd.f32 %v14853_v17, %v14773_v33 }
0x110f   :  { %v15027_v28 = vpop.f32.mrf.mxu1 }
0x1111   :  { %v26243_v11 = vpop.f32.mrf.mxu1 }
0x1115   :  { %v15185_v26 = vpop.f32.mrf.mxu1 }
0x1117   :  { %v26257_v31 = vpop.f32.mrf.mxu1 }
0x1119   :  { %v14948_v57 = vpop.f32.mrf.mxu0 }
0x111a   :  { %v14949_v20 = vadd.f32 %v14948_v57, %v14854_v60  ;;  %v32491_v57 = vld [vmem:[#allocation19_spill] sm:$0xff] }
0x111b   :  { %v26224_v1 = vpop.f32.mrf.mxu0  ;;  %v15336_v15 = vpop.f32.mrf.mxu1 }
0x111c   :  { %v30737_v39 = vadd.f32 %v15027_v28, %v14949_v20 }
0x111d   :  { %v26271_v10 = vpop.f32.mrf.mxu1 }
0x111f   :  { %v15104_v63 = vpop.f32.mrf.mxu0 }
0x1120   :  { %v15186_v25 = vadd.f32 %v15185_v26, %v15104_v63  ;;  %v32490_v26 = vld [vmem:[#allocation11_spill] sm:$0xff] }
0x1121   :  { %v26250_v30 = vpop.f32.mrf.mxu0 }
0x1122   :  { %v15486_v52 = vpop.f32.mrf.mxu1 }
0x1123   :  { %v15261_v46 = vpop.f32.mrf.mxu0 }
0x1124   :  { %v15262_v3 = vadd.f32 %v15261_v46, %v15186_v25  ;;  %v26285_v48 = vpop.f32.mrf.mxu1 }
0x1125   :  { %v26264_v36 = vpop.f32.mrf.mxu0 }
0x1126   :  { %v15337_v17 = vadd.f32 %v15336_v15, %v15262_v3 }
0x1127   :  { %v15413_v33 = vpop.f32.mrf.mxu0 }
0x1128   :  { %v15414_v50 = vadd.f32 %v15413_v33, %v15337_v17 }
0x1129   :  { %v26278_v11 = vpop.f32.mrf.mxu0 }
0x112a   :  { %v15487_v31 = vadd.f32 %v15486_v52, %v15414_v50 }
0x112c   :  { %v15491_v60 = vsel %vm1108_vm1, %v15487_v31, 0 }
0x112d   :  { %v30740_v1 = vand.u32 4294901760, %v15491_v60 }
0x112f   :  { %v15567_v28 = vsub.f32 %v15491_v60, %v30740_v1  ;;  %26322 = vmatmul.mubr.f32.vlgmr.msra.gmra.mxu1 %v30740_v1 }
0x1130   :  { %26344 = vmatpush3.msra.mxu1 %v32458_v23  ;;  %26359 = vmatprep.mubr.msk.f32.mxu1 %vm27424_vm2, %v32371_v27 }
0x1131   :  { %v15568_v63 = vand.u32 4294901760, %v15567_v28  ;;  %26345 = vmatprep.subr.mxu1 %v32371_v27 }
0x1132   :  { %26346 = vmatpush3.msra.mxu1 %v32460_v7 }
0x1133   :  { %v15569_v3 = vsub.f32 %v15567_v28, %v15568_v63  ;;  %26347 = vmatprep.subr.mxu1 %v32371_v27 }
0x1134   :  { %26348 = vmatpush3.msra.mxu1 %v32462_v45 }
0x1135   :  { %v15570_v15 = vand.u32 4294901760, %v15569_v3  ;;  %26349 = vmatprep.subr.mxu1 %v32371_v27 }
0x1136   :  { %26350 = vmatpush3.msra.mxu1 %v32464_v22 }
0x1137   :  { %26351 = vmatprep.subr.mxu1 %v32371_v27  ;;  %26303 = vmatmul.mubr.f32.vlgmr.msra.gmra.mxu0 %v15570_v15 }
0x1138   :  { %26325 = vmatpush3.msra.mxu0 %v32474_v24  ;;  %26352 = vmatpush3.msra.mxu1 %v32467_v40 }
0x1139   :  { %26326 = vmatprep.subr.mxu0 %v32371_v27  ;;  %26353 = vmatprep.subr.mxu1 %v32371_v27 }
0x113a   :  { %26327 = vmatpush3.msra.mxu0 %v32475_v12  ;;  %26354 = vmatpush3.msra.mxu1 %v32469_v4 }
0x113b   :  { %26328 = vmatprep.subr.mxu0 %v32371_v27  ;;  %26355 = vmatprep.subr.mxu1 %v32371_v27 }
0x113c   :  { %26329 = vmatpush3.msra.mxu0 %v32476_v61  ;;  %26356 = vmatpush3.msra.mxu1 %v32471_v6 }
0x113d   :  { %26330 = vmatprep.subr.mxu0 %v32371_v27  ;;  %26357 = vmatprep.subr.mxu1 %v32371_v27 }
0x113e   :  { %26331 = vmatpush3.msra.mxu0 %v32477_v5  ;;  %26358 = vmatpush3.msra.mxu1 %v32473_v13 }
0x113f   :  { %26332 = vmatprep.subr.mxu0 %v32371_v27  ;;  %26360 = vmatmul.mubr.f32.vlgmr.msra.gmra.mxu1 %v15568_v63 }
0x1140   :  { %26381 = vmatprep.subr.mxu1 %v32371_v27  ;;  %26333 = vmatpush3.msra.mxu0 %v32478_v56 }
0x1141   :  { %26382 = vmatpush3.msra.mxu1 %v32458_v23  ;;  %26334 = vmatprep.subr.mxu0 %v32371_v27 }
0x1142   :  { %26383 = vmatprep.subr.mxu1 %v32371_v27  ;;  %26335 = vmatpush3.msra.mxu0 %v32479_v47 }
0x1143   :  { %26384 = vmatpush3.msra.mxu1 %v32460_v7  ;;  %26336 = vmatprep.subr.mxu0 %v32371_v27 }
0x1144   :  { %26385 = vmatprep.subr.mxu1 %v32371_v27  ;;  %26337 = vmatpush3.msra.mxu0 %v32480_v34 }
0x1145   :  { %26386 = vmatpush3.msra.mxu1 %v32462_v45  ;;  %26338 = vmatprep.subr.mxu0 %v32371_v27 }
0x1146   :  { %26387 = vmatprep.subr.mxu1 %v32371_v27  ;;  %26339 = vmatpush3.msra.mxu0 %v32481_v37 }
0x1147   :  { %26340 = vmatprep.mubr.msk.f32.mxu0 %vm27424_vm2, %v32371_v27  ;;  %26388 = vmatpush3.msra.mxu1 %v32464_v22 }
0x1148   :  { %26341 = vmatmul.mubr.f32.vlgmr.msra.gmra.mxu0 %v15567_v28  ;;  %26362 = vmatprep.subr.mxu0 %v32371_v27  ;;  %v16030_v28 = vmul.f32 0.001953125, %v30737_v39  ;;  %v32492_v39 = vld [vmem:[#allocation71_spill] sm:$0xff] }
0x1149   :  { %26389 = vmatprep.subr.mxu1 %v32371_v27  ;;  %26363 = vmatpush3.msra.mxu0 %v32482_v54 }
0x114a   :  { %26390 = vmatpush3.msra.mxu1 %v32467_v40  ;;  %26364 = vmatprep.subr.mxu0 %v32371_v27  ;;  %v16032_v15 = vmul.f32 %v16030_v28, %v16030_v28 }
0x114b   :  { %26391 = vmatprep.subr.mxu1 %v32371_v27  ;;  %26365 = vmatpush3.msra.mxu0 %v32483_v14 }
0x114c   :  { %26392 = vmatpush3.msra.mxu1 %v32469_v4  ;;  %26366 = vmatprep.subr.mxu0 %v32371_v27 }
0x114d   :  { %26393 = vmatprep.subr.mxu1 %v32371_v27  ;;  %26367 = vmatpush3.msra.mxu0 %v32484_v49  ;;  %v17070_v49 = vld [vmem:[#allocation5 + $0x288] sm:$0xff] }
0x114e   :  { %26394 = vmatpush3.msra.mxu1 %v32471_v6  ;;  %26368 = vmatprep.subr.mxu0 %v32371_v27  ;;  %v30982_v37 = vand.u32 4294901760, %v17070_v49 }
0x114f   :  { %26395 = vmatprep.subr.mxu1 %v32371_v27  ;;  %26369 = vmatpush3.msra.mxu0 %v32485_v21 }
0x1150   :  { %26396 = vmatpush3.msra.mxu1 %v32473_v13  ;;  %26397 = vmatprep.mubr.msk.f32.mxu1 %vm27424_vm2, %v32371_v27  ;;  %v30993_v47 = vsub.f32 %v17070_v49, %v30982_v37 }
0x1151   :  { %26370 = vmatprep.subr.mxu0 %v32371_v27  ;;  %26398 = vmatmul.mubr.f32.vlgmr.msra.gmra.mxu1 %v30740_v1 }
0x1152   :  { %26371 = vmatpush3.msra.mxu0 %v32486_v18  ;;  %26378 = vmatprep.mubr.msk.f32.mxu0 %vm27424_vm2, %v32371_v27  ;;  %v31004_v56 = vand.u32 4294901760, %v30993_v47 }
0x1153   :  { %26372 = vmatprep.subr.mxu0 %v32371_v27  ;;  %26411 = vmatprep.mubr.f32.mxu1 %v32490_v26 }
0x1154   :  { %26373 = vmatpush3.msra.mxu0 %v32487_v9  ;;  %v17238_v61 = vsub.f32 %v30993_v47, %v31004_v56 }
0x1155   :  { %26374 = vmatprep.subr.mxu0 %v32371_v27 }
0x1156   :  { %26375 = vmatpush3.msra.mxu0 %v32488_v62  ;;  %v17071_v62 = vld [vmem:[#allocation5 + $0x290] sm:$0xff] }
0x1157   :  { %26376 = vmatprep.subr.mxu0 %v32371_v27  ;;  %v30971_v21 = vand.u32 4294901760, %v17071_v62 }
0x1158   :  { %26377 = vmatpush3.msra.mxu0 %v32489_v53 }
0x1159   :  { %26379 = vmatmul.mubr.f32.vlgmr.msra.gmra.mxu0 %v30740_v1  ;;  %v30980_v54 = vsub.f32 %v17071_v62, %v30971_v21 }
0x115a   :  { %26404 = vmatprep.mubr.f32.mxu0 %v32491_v57 }
0x11ef   :  { %v15683_v20 = vpop.f32.mrf.mxu1 }
0x11f1   :  { %v26323_v10 = vpop.f32.mrf.mxu1 }
0x11f7   :  { %v15572_v30 = vpop.f32.mrf.mxu0 }
0x11f8   :  { %v15684_v33 = vadd.f32 %v15683_v20, %v15572_v30  ;;  %v16035_v30 = vld [vmem:[%s32089_s3 + $0x5] sm:$0x1] }
0x11f9   :  { %v26304_v25 = vpop.f32.mrf.mxu0 }
0x11fa   :  { %v16034_v25 = vld [vmem:[%s32089_s3 + $0x4] sm:$0x1] }
0x11ff   :  { %v15852_v52 = vpop.f32.mrf.mxu1 }
0x1201   :  { %v26361_v46 = vpop.f32.mrf.mxu1 }
0x1208   :  { %v15771_v48 = vpop.f32.mrf.mxu0 }
0x1209   :  { %v15772_v11 = vadd.f32 %v15771_v48, %v15684_v33 }
0x120a   :  { %v26342_v36 = vpop.f32.mrf.mxu0 }
0x120b   :  { %v15853_v31 = vadd.f32 %v15852_v52, %v15772_v11 }
0x1211   :  { %v16026_v17 = vpop.f32.mrf.mxu1 }
0x1213   :  { %v26399_v50 = vpop.f32.mrf.mxu1 }
0x1219   :  { %v15947_v60 = vpop.f32.mrf.mxu0 }
0x121a   :  { %v15948_v63 = vadd.f32 %v15947_v60, %v15853_v31 }
0x121b   :  { %v26380_v1 = vpop.f32.mrf.mxu0 }
0x121c   :  { %v16027_v3 = vadd.f32 %v16026_v17, %v15948_v63 }
0x121e   :  { %v16031_v57 = vmul.f32 0.001953125, %v16027_v3 }
0x1220   :  { %v16033_v10 = vsub.f32 %v16031_v57, %v16032_v15  ;;  %v32497_v15 = vld [vmem:[#allocation20_spill] sm:$0xff] }
0x1222   :  { %v16036_v53 = vadd.f32 1e-05, %v16033_v10 }
0x1224   :  { %27347 = vrsqrt.f32 %v16036_v53 }
0x1231   :  { %v27348_v46 = vpop.eup %27347 }
0x1232   :  { %v16038_v20 = vmul.f32 %v27348_v46, %v16034_v25  ;;  %v32498_v25 = vld [vmem:[#allocation13_spill] sm:$0xff] }
0x1234   :  { %v16039_v52 = vmul.f32 %v16038_v20, %v16030_v28  ;;  %v16044_v48 = vrot.slane %v16038_v20, %v32492_v39 }
0x1236   :  { %v16040_v36 = vsub.f32 %v16035_v30, %v16039_v52  ;;  %v16045_v17 = vmul.f32 %v16044_v48, %v30498_v51  ;;  %v16046_v33 = vmul.f32 %v16044_v48, %v30495_v41  ;;  %v32499_v30 = vld [vmem:[#allocation14_spill] sm:$0xff]  ;;  %v32500_v52 = vld [vmem:[#allocation12_spill] sm:$0xff]  ;;  %v32501_v48 = vld [vmem:[#allocation15_spill] sm:$0xff] }
0x1238   :  { %v16050_v53 = vrot.slane %v16040_v36, %v32492_v39  ;;  %v32502_v36 = vld [vmem:[#allocation16_spill] sm:$0xff] }
0x123a   :  { %v16051_v50 = vadd.f32 %v16050_v53, %v16045_v17  ;;  %v16052_v11 = vadd.f32 %v16050_v53, %v16046_v33  ;;  %v32503_v17 = vld [vmem:[#allocation25_spill] sm:$0xff]  ;;  %v32504_v33 = vld [vmem:[#allocation26_spill] sm:$0xff] }
0x123b   :  { %v32505_v53 = vld [vmem:[#allocation21_spill] sm:$0xff] }
0x123c   :  { %v16053_v31 = vmax.f32 %v16051_v50, 0.0  ;;  %v16054_v60 = vmax.f32 %v16052_v11, 0.0  ;;  %v32506_v50 = vld [vmem:[#allocation22_spill] sm:$0xff] }
0x123d   :  { %v32508_v11 = vld [vmem:[#allocation18_spill] sm:$0xff] }
0x123e   :  { %v30829_v63 = vand.u32 4294901760, %v16054_v60  ;;  %v30831_v1 = vand.u32 4294901760, %v16053_v31 }
0x1240   :  { %v30834_v3 = vsub.f32 %v16054_v60, %v30829_v63  ;;  %v30837_v28 = vsub.f32 %v16053_v31, %v30831_v1  ;;  %26400 = vmatprep.subr.mxu0 %v30829_v63  ;;  %v32509_v31 = vld [vmem:[#allocation23_spill] sm:$0xff]  ;;  %v32510_v60 = vld [vmem:[#allocation24_spill] sm:$0xff] }
0x1241   :  { %26401 = vmatpush3.msra.mxu0 %v30829_v63 }
0x1242   :  { %32493 = vst [vmem:[#allocation28_spill] sm:$0xff] %v30834_v3  ;;  %32494 = vst [vmem:[#allocation31_spill] sm:$0xff] %v30837_v28  ;;  %26402 = vmatprep.subr.mxu0 %v30831_v1  ;;  %v30843_v41 = vand.u32 4294901760, %v30834_v3  ;;  %v30846_v51 = vand.u32 4294901760, %v30837_v28 }
0x1243   :  { %26403 = vmatpush3.msra.mxu0 %v30831_v1 }
0x1244   :  { %32495 = vst [vmem:[#allocation32_spill] sm:$0xff] %v30843_v41  ;;  %32496 = vst [vmem:[#allocation33_spill] sm:$0xff] %v30846_v51  ;;  %26414 = vmatprep.subr.mxu0 %v30834_v3  ;;  %26405 = vmatmul.mubr.f32.vlgmr.msra.gmra.mxu0 %v32497_v15  ;;  %v16174_v57 = vsub.f32 %v30834_v3, %v30843_v41  ;;  %v16181_v10 = vsub.f32 %v30837_v28, %v30846_v51  ;;  %v17076_v15 = vld [vmem:[#allocation5 + $0x2b8] sm:$0xff] }
0x1245   :  { %26415 = vmatpush3.msra.mxu0 %v30834_v3  ;;  %26418 = vmatprep.mubr.f32.mxu0 %v32498_v25 }
0x1246   :  { %26416 = vmatprep.subr.mxu0 %v30837_v28  ;;  %v30858_v46 = vand.u32 4294901760, %v16174_v57  ;;  %v30863_v20 = vand.u32 4294901760, %v16181_v10  ;;  %v30923_v57 = vand.u32 4294901760, %v17076_v15  ;;  %v17075_v10 = vld [vmem:[#allocation5 + $0x2b0] sm:$0xff] }
0x1247   :  { %26417 = vmatpush3.msra.mxu0 %v30837_v28 }
0x1248   :  { %26407 = vmatprep.subr.mxu1 %v30858_v46  ;;  %26428 = vmatprep.subr.mxu0 %v30843_v41  ;;  %v30926_v25 = vsub.f32 %v17076_v15, %v30923_v57 }
0x1249   :  { %26408 = vmatpush3.msra.mxu1 %v30858_v46  ;;  %26419 = vmatmul.mubr.f32.vlgmr.msra.gmra.mxu0 %v32499_v30  ;;  %v30928_v30 = vand.u32 4294901760, %v17075_v10 }
0x124a   :  { %26429 = vmatpush3.msra.mxu0 %v30843_v41  ;;  %26409 = vmatprep.subr.mxu1 %v30863_v20 }
0x124b   :  { %26430 = vmatprep.subr.mxu0 %v30846_v51  ;;  %26410 = vmatpush3.msra.mxu1 %v30863_v20 }
0x124c   :  { %26431 = vmatpush3.msra.mxu0 %v30846_v51  ;;  %26412 = vmatmul.mubr.f32.vlgmr.msra.gmra.mxu1 %v32500_v52 }
0x124d   :  { %26421 = vmatprep.subr.mxu1 %v30829_v63  ;;  %26432 = vmatprep.mubr.f32.mxu0 %v32490_v26 }
0x124e   :  { %26442 = vmatprep.subr.mxu0 %v30829_v63  ;;  %26422 = vmatpush3.msra.mxu1 %v30829_v63 }
0x124f   :  { %26433 = vmatmul.mubr.f32.vlgmr.msra.gmra.mxu0 %v32500_v52  ;;  %26423 = vmatprep.subr.mxu1 %v30831_v1 }
0x1250   :  { %26443 = vmatpush3.msra.mxu0 %v30829_v63  ;;  %26424 = vmatpush3.msra.mxu1 %v30831_v1 }
0x1251   :  { %26444 = vmatprep.subr.mxu0 %v30831_v1  ;;  %26425 = vmatprep.mubr.f32.mxu1 %v32501_v48  ;;  %v30933_v48 = vand.u32 4294901760, %v30926_v25 }
0x1252   :  { %26445 = vmatpush3.msra.mxu0 %v30831_v1  ;;  %26426 = vmatmul.mubr.f32.vlgmr.msra.gmra.mxu1 %v32502_v36  ;;  %v30936_v36 = vsub.f32 %v17075_v10, %v30928_v30 }
0x1253   :  { %26435 = vmatprep.subr.mxu1 %v30829_v63  ;;  %26446 = vmatprep.mubr.f32.mxu0 %v32503_v17 }
0x1254   :  { %26456 = vmatprep.subr.mxu0 %v30834_v3  ;;  %26436 = vmatpush3.msra.mxu1 %v30829_v63 }
0x1255   :  { %26447 = vmatmul.mubr.f32.vlgmr.msra.gmra.mxu0 %v32504_v33  ;;  %26437 = vmatprep.subr.mxu1 %v30831_v1  ;;  %v17073_v33 = vld [vmem:[#allocation5 + $0x2a0] sm:$0xff] }
0x1256   :  { %26457 = vmatpush3.msra.mxu0 %v30834_v3  ;;  %26438 = vmatpush3.msra.mxu1 %v30831_v1 }
0x1257   :  { %26458 = vmatprep.subr.mxu0 %v30837_v28  ;;  %26439 = vmatprep.mubr.f32.mxu1 %v32490_v26  ;;  %v32507_v26 = vld [vmem:[#allocation17_spill] sm:$0xff] }
0x1258   :  { %26459 = vmatpush3.msra.mxu0 %v30837_v28  ;;  %26440 = vmatmul.mubr.f32.vlgmr.msra.gmra.mxu1 %v32500_v52  ;;  %v17074_v52 = vld [vmem:[#allocation5 + $0x2a8] sm:$0xff] }
0x1259   :  { %26449 = vmatprep.subr.mxu1 %v30858_v46  ;;  %26460 = vmatprep.mubr.f32.mxu0 %v32505_v53  ;;  %v30938_v17 = vand.u32 4294901760, %v17074_v52  ;;  %v17196_v53 = vsub.f32 %v30926_v25, %v30933_v48 }
0x125a   :  { %26470 = vmatprep.subr.mxu0 %v30843_v41  ;;  %26450 = vmatpush3.msra.mxu1 %v30858_v46 }
0x125b   :  { %26461 = vmatmul.mubr.f32.vlgmr.msra.gmra.mxu0 %v32506_v50  ;;  %26451 = vmatprep.subr.mxu1 %v30863_v20  ;;  %v30945_v50 = vand.u32 4294901760, %v30936_v36 }
0x125c   :  { %26471 = vmatpush3.msra.mxu0 %v30843_v41  ;;  %26452 = vmatpush3.msra.mxu1 %v30863_v20 }
0x125d   :  { %26472 = vmatprep.subr.mxu0 %v30846_v51  ;;  %26453 = vmatprep.mubr.f32.mxu1 %v32507_v26  ;;  %v17203_v15 = vsub.f32 %v30936_v36, %v30945_v50 }
0x125e   :  { %26473 = vmatpush3.msra.mxu0 %v30846_v51  ;;  %26454 = vmatmul.mubr.f32.vlgmr.msra.gmra.mxu1 %v32508_v11 }
0x125f   :  { %26463 = vmatprep.subr.mxu1 %v30829_v63  ;;  %26467 = vmatprep.mubr.f32.mxu1 %v32509_v31  ;;  %v17072_v31 = vld [vmem:[#allocation5 + $0x298] sm:$0xff]  ;;  %v17204_v9 = vand.u32 4294901760, %v17203_v15 }
0x1260   :  { %26464 = vmatpush3.msra.mxu1 %v30829_v63  ;;  %26474 = vmatprep.mubr.f32.mxu0 %v32507_v26 }
0x1261   :  { %26465 = vmatprep.subr.mxu1 %v30831_v1  ;;  %26475 = vmatmul.mubr.f32.vlgmr.msra.gmra.mxu0 %v32508_v11 }
0x1262   :  { %26466 = vmatpush3.msra.mxu1 %v30831_v1  ;;  %26484 = vmatprep.subr.mxu0 %v30923_v57 }
0x1263   :  { %26468 = vmatmul.mubr.f32.vlgmr.msra.gmra.mxu1 %v32510_v60  ;;  %26477 = vmatprep.subr.mxu1 %v30829_v63  ;;  %v17197_v60 = vand.u32 4294901760, %v17196_v53 }
0x1264   :  { %26478 = vmatpush3.msra.mxu1 %v30829_v63  ;;  %26481 = vmatprep.mubr.f32.mxu1 %v32507_v26  ;;  %v30948_v26 = vsub.f32 %v17074_v52, %v30938_v17  ;;  %v30963_v52 = vand.u32 4294901760, %v17072_v31 }
0x1265   :  { %26479 = vmatprep.subr.mxu1 %v30831_v1  ;;  %26485 = vmatpush3.msra.mxu0 %v30923_v57 }
0x1266   :  { %26480 = vmatpush3.msra.mxu1 %v30831_v1  ;;  %26486 = vmatprep.subr.mxu0 %v30928_v30  ;;  %v30957_v10 = vand.u32 4294901760, %v30948_v26 }
0x1267   :  { %26482 = vmatmul.mubr.f32.vlgmr.msra.gmra.mxu1 %v32508_v11  ;;  %26487 = vmatpush3.msra.mxu0 %v30928_v30  ;;  %v30950_v11 = vand.u32 4294901760, %v17073_v33 }
0x1268   :  { %26488 = vmatprep.subr.mxu0 %v30938_v17  ;;  %26503 = vmatprep.subr.mxu1 %v17197_v60  ;;  %v17210_v53 = vsub.f32 %v30948_v26, %v30957_v10 }
0x1269   :  { %26489 = vmatpush3.msra.mxu0 %v30938_v17  ;;  %v30960_v39 = vsub.f32 %v17073_v33, %v30950_v11  ;;  %26504 = vmatpush3.msra.mxu1 %v17197_v60  ;;  %v30974_v33 = vsub.f32 %v17072_v31, %v30963_v52  ;;  %v17069_v31 = vld [vmem:[#allocation5 + $0x280] sm:$0xff] }
0x126a   :  { %26490 = vmatprep.subr.mxu0 %v30950_v11  ;;  %26505 = vmatprep.subr.mxu1 %v17204_v9  ;;  %v17211_v14 = vand.u32 4294901760, %v17210_v53  ;;  %v30990_v53 = vand.u32 4294901760, %v30980_v54  ;;  %v30995_v62 = vand.u32 4294901760, %v17069_v31 }
0x126b   :  { %26491 = vmatpush3.msra.mxu0 %v30950_v11  ;;  %v30969_v18 = vand.u32 4294901760, %v30960_v39  ;;  %26506 = vmatpush3.msra.mxu1 %v17204_v9  ;;  %v30986_v60 = vand.u32 4294901760, %v30974_v33 }
0x126c   :  { %26492 = vmatprep.subr.mxu0 %v30963_v52  ;;  %26507 = vmatprep.subr.mxu1 %v17211_v14  ;;  %v31007_v49 = vsub.f32 %v17069_v31, %v30995_v62  ;;  %v17239_v31 = vand.u32 4294901760, %v17238_v61 }
0x126d   :  { %v17217_v15 = vsub.f32 %v30960_v39, %v30969_v18  ;;  %26493 = vmatpush3.msra.mxu0 %v30963_v52  ;;  %26508 = vmatpush3.msra.mxu1 %v17211_v14  ;;  %v17224_v9 = vsub.f32 %v30974_v33, %v30986_v60 }
0x126e   :  { %26494 = vmatprep.subr.mxu0 %v30971_v21  ;;  %v31014_v12 = vand.u32 4294901760, %v31007_v49 }
0x126f   :  { %v17218_v34 = vand.u32 4294901760, %v17217_v15  ;;  %26495 = vmatpush3.msra.mxu0 %v30971_v21  ;;  %v17231_v15 = vsub.f32 %v30980_v54, %v30990_v53  ;;  %v17225_v5 = vand.u32 4294901760, %v17224_v9 }
0x1270   :  { %26496 = vmatprep.subr.mxu0 %v30982_v37 }
0x1271   :  { %26509 = vmatprep.subr.mxu1 %v17218_v34  ;;  %26497 = vmatpush3.msra.mxu0 %v30982_v37  ;;  %v17232_v14 = vand.u32 4294901760, %v17231_v15 }
0x1272   :  { %26510 = vmatpush3.msra.mxu1 %v17218_v34  ;;  %26498 = vmatprep.subr.mxu0 %v30995_v62  ;;  %v17245_v34 = vsub.f32 %v31007_v49, %v31014_v12 }
0x1273   :  { %26499 = vmatpush3.msra.mxu0 %v30995_v62  ;;  %26511 = vmatprep.subr.mxu1 %v17225_v5 }
0x1274   :  { %26522 = vmatprep.subr.mxu0 %v30926_v25  ;;  %26512 = vmatpush3.msra.mxu1 %v17225_v5  ;;  %v17246_v9 = vand.u32 4294901760, %v17245_v34 }
0x1275   :  { %26513 = vmatprep.subr.mxu1 %v17232_v14 }
0x1276   :  { %26514 = vmatpush3.msra.mxu1 %v17232_v14 }
0x1277   :  { %26515 = vmatprep.subr.mxu1 %v17239_v31 }
0x1278   :  { %26516 = vmatpush3.msra.mxu1 %v17239_v31 }
0x1279   :  { %26517 = vmatprep.subr.mxu1 %v17246_v9 }
0x127a   :  { %26518 = vmatpush3.msra.mxu1 %v17246_v9 }
0x127b   :  { %26541 = vmatprep.subr.mxu1 %v30923_v57 }
0x1304   :  { %v26406_v15 = vpop.f32.mrf.mxu0 }
0x1306   :  { %v16128_v24 = vpop.f32.mrf.mxu0 }
0x1309   :  { %v26420_v13 = vpop.f32.mrf.mxu0 }
0x130b   :  { %v16301_v6 = vpop.f32.mrf.mxu0 }
0x130c   :  { %v26413_v4 = vpop.f32.mrf.mxu1 }
0x130d   :  { %v16226_v40 = vadd.f32 %v26413_v4, %v26406_v15 }
0x130e   :  { %v16219_v5 = vpop.f32.mrf.mxu1 }
0x130f   :  { %v16309_v61 = vadd.f32 %v26420_v13, %v16226_v40  ;;  %v26434_v22 = vpop.f32.mrf.mxu0 }
0x1311   :  { %v31021_v8 = vpop.f32.mrf.mxu0 }
0x1312   :  { %v26427_v45 = vpop.f32.mrf.mxu1 }
0x1313   :  { %v16392_v14 = vadd.f32 %v26427_v45, %v16309_v61 }
0x1314   :  { %v16383_v34 = vpop.f32.mrf.mxu1 }
0x1315   :  { %v16475_v42 = vadd.f32 %v26434_v22, %v16392_v14  ;;  %v26448_v31 = vpop.f32.mrf.mxu0 }
0x1317   :  { %v16639_v7 = vpop.f32.mrf.mxu0 }
0x1318   :  { %v26441_v9 = vpop.f32.mrf.mxu1 }
0x1319   :  { %v31023_v55 = vadd.f32 %v26441_v9, %v16475_v42 }
0x131a   :  { %v31025_v23 = vpop.f32.mrf.mxu1 }
0x131b   :  { %v26462_v35 = vpop.f32.mrf.mxu0 }
0x131d   :  { %v16812_v4 = vpop.f32.mrf.mxu0 }
0x131e   :  { %v26455_v58 = vpop.f32.mrf.mxu1 }
0x131f   :  { %v16737_v29 = vadd.f32 %v26455_v58, %v26448_v31 }
0x1320   :  { %v16730_v15 = vpop.f32.mrf.mxu1 }
0x1321   :  { %v16820_v40 = vadd.f32 %v26462_v35, %v16737_v29  ;;  %v16731_v13 = vadd.f32 %v16730_v15, %v16639_v7  ;;  %v26476_v51 = vpop.f32.mrf.mxu0 }
0x1323   :  { %v16813_v32 = vadd.f32 %v16812_v4, %v16731_v13  ;;  %v26469_v27 = vpop.f32.mrf.mxu1  ;;  %v16979_v41 = vpop.f32.mrf.mxu0  ;;  %v16560_v13 = vld [vmem:[#allocation5 + $0x250] sm:$0xff] }
0x1324   :  { %v16903_v45 = vadd.f32 %v26469_v27, %v16820_v40 }
0x1325   :  { %v16894_v61 = vpop.f32.mrf.mxu1 }
0x1326   :  { %v16986_v22 = vadd.f32 %v26476_v51, %v16903_v45  ;;  %v16895_v14 = vadd.f32 %v16894_v61, %v16813_v32 }
0x1327   :  { %v26483_v2 = vpop.f32.mrf.mxu1 }
0x1328   :  { %v16980_v42 = vadd.f32 %v16979_v41, %v16895_v14  ;;  %v17065_v9 = vadd.f32 %v26483_v2, %v16986_v22  ;;  %v31120_v22 = vand.u32 4294901760, %v16560_v13 }
0x1329   :  { %v17058_v28 = vpop.f32.mrf.mxu1 }
0x132a   :  { %v17081_v38 = vsel %vm1108_vm1, %v17065_v9, 0  ;;  %v17059_v3 = vadd.f32 %v17058_v28, %v16980_v42  ;;  %v16558_v9 = vld [vmem:[#allocation5 + $0x240] sm:$0xff] }
0x132b   :  { %v31028_v58 = vand.u32 4294901760, %v17081_v38 }
0x132c   :  { %v17078_v29 = vsel %vm1108_vm1, %v17059_v3, 0  ;;  %v16220_v3 = vadd.f32 %v16219_v5, %v16128_v24 }
0x132d   :  { %v31032_v35 = vsub.f32 %v17081_v38, %v31028_v58  ;;  %v31034_v7 = vand.u32 4294901760, %v17078_v29 }
0x132e   :  { %v16302_v31 = vadd.f32 %v16301_v6, %v16220_v3  ;;  %v16565_v6 = vld [vmem:[#allocation5 + $0x278] sm:$0xff] }
0x132f   :  { %v17168_v27 = vand.u32 4294901760, %v31032_v35  ;;  %v17157_v32 = vsub.f32 %v17078_v29, %v31034_v7  ;;  %26519 = vmatprep.mubr.f32.mxu1 %v31034_v7 }
0x1330   :  { %26520 = vmatmul.mubr.f32.vlgmr.msra.gmra.mxu1 %v31028_v58  ;;  %v16384_v24 = vadd.f32 %v16383_v34, %v16302_v31 }
0x1331   :  { %26542 = vmatpush3.msra.mxu1 %v30923_v57  ;;  %v17158_v2 = vand.u32 4294901760, %v17157_v32  ;;  %v17169_v28 = vsub.f32 %v31032_v35, %v17168_v27 }
0x1332   :  { %26543 = vmatprep.subr.mxu1 %v30928_v30  ;;  %v16469_v5 = vadd.f32 %v31021_v8, %v16384_v24 }
0x1333   :  { %26544 = vmatpush3.msra.mxu1 %v30928_v30  ;;  %26557 = vmatprep.mubr.f32.mxu1 %v17158_v2  ;;  %v17159_v38 = vsub.f32 %v17157_v32, %v17158_v2  ;;  %v17170_v51 = vand.u32 4294901760, %v17169_v28 }
0x1334   :  { %26545 = vmatprep.subr.mxu1 %v30938_v17  ;;  %v16548_v4 = vadd.f32 %v31025_v23, %v16469_v5 }
0x1335   :  { %26546 = vmatpush3.msra.mxu1 %v30938_v17  ;;  %v17160_v41 = vand.u32 4294901760, %v17159_v38 }
0x1336   :  { %26547 = vmatprep.subr.mxu1 %v30950_v11 }
0x1337   :  { %26548 = vmatpush3.msra.mxu1 %v30950_v11  ;;  %26500 = vmatprep.mubr.f32.mxu0 %v17160_v41 }
0x1338   :  { %26549 = vmatprep.subr.mxu1 %v30963_v52  ;;  %26501 = vmatmul.mubr.f32.vlgmr.msra.gmra.mxu0 %v17170_v51 }
0x1339   :  { %26523 = vmatpush3.msra.mxu0 %v30926_v25  ;;  %26550 = vmatpush3.msra.mxu1 %v30963_v52  ;;  %v31062_v25 = vand.u32 4294901760, %v16565_v6 }
0x133a   :  { %26524 = vmatprep.subr.mxu0 %v30936_v36  ;;  %26538 = vmatprep.mubr.f32.mxu0 %v17157_v32 }
0x133b   :  { %26551 = vmatprep.subr.mxu1 %v30971_v21  ;;  %26525 = vmatpush3.msra.mxu0 %v30936_v36  ;;  %v16564_v36 = vld [vmem:[#allocation5 + $0x270] sm:$0xff]  ;;  %v31075_v8 = vsub.f32 %v16565_v6, %v31062_v25  ;;  %v17667_v6 = vsel %vm1108_vm1, %v31023_v55, 0 }
0x133c   :  { %26552 = vmatpush3.msra.mxu1 %v30971_v21  ;;  %26526 = vmatprep.subr.mxu0 %v30948_v26  ;;  %v31070_v34 = vand.u32 4294901760, %v16564_v36  ;;  %v31198_v5 = vand.u32 4294901760, %v17667_v6 }
0x133d   :  { %26553 = vmatprep.subr.mxu1 %v30982_v37  ;;  %26527 = vmatpush3.msra.mxu0 %v30948_v26  ;;  %v16563_v26 = vld [vmem:[#allocation5 + $0x268] sm:$0xff]  ;;  %v31094_v23 = vand.u32 4294901760, %v31075_v8 }
0x133e   :  { %26554 = vmatpush3.msra.mxu1 %v30982_v37  ;;  %26528 = vmatprep.subr.mxu0 %v30960_v39  ;;  %v31080_v15 = vand.u32 4294901760, %v16563_v26 }
0x133f   :  { %26555 = vmatprep.subr.mxu1 %v30995_v62  ;;  %26529 = vmatpush3.msra.mxu0 %v30960_v39  ;;  %v16562_v39 = vld [vmem:[#allocation5 + $0x260] sm:$0xff] }
0x1340   :  { %26556 = vmatpush3.msra.mxu1 %v30995_v62  ;;  %26530 = vmatprep.subr.mxu0 %v30974_v33  ;;  %v31089_v40 = vand.u32 4294901760, %v16562_v39 }
0x1341   :  { %26558 = vmatmul.mubr.f32.vlgmr.msra.gmra.mxu1 %v17168_v27  ;;  %26579 = vmatprep.subr.mxu1 %v30923_v57 }
0x1342   :  { %26531 = vmatpush3.msra.mxu0 %v30974_v33  ;;  %26580 = vmatpush3.msra.mxu1 %v30923_v57  ;;  %v16561_v57 = vld [vmem:[#allocation5 + $0x258] sm:$0xff]  ;;  %v31087_v33 = vsub.f32 %v16564_v36, %v31070_v34  ;;  %v31112_v45 = vsub.f32 %v16562_v39, %v31089_v40 }
0x1343   :  { %26595 = vmatprep.mubr.f32.mxu1 %v31034_v7  ;;  %26532 = vmatprep.subr.mxu0 %v30980_v54 }
0x1344   :  { %26581 = vmatprep.subr.mxu1 %v30928_v30  ;;  %26533 = vmatpush3.msra.mxu0 %v30980_v54  ;;  %v17664_v54 = vsel %vm1108_vm1, %v16548_v4, 0  ;;  %v31139_v29 = vand.u32 4294901760, %v31112_v45 }
0x1345   :  { %26582 = vmatpush3.msra.mxu1 %v30928_v30  ;;  %26534 = vmatprep.subr.mxu0 %v30993_v47  ;;  %v31102_v30 = vand.u32 4294901760, %v16561_v57  ;;  %v31114_v61 = vand.u32 4294901760, %v17664_v54 }
0x1346   :  { %26583 = vmatprep.subr.mxu1 %v30938_v17  ;;  %26535 = vmatpush3.msra.mxu0 %v30993_v47  ;;  %v31100_v47 = vsub.f32 %v16563_v26, %v31080_v15  ;;  %v17803_v2 = vsub.f32 %v31112_v45, %v31139_v29 }
0x1347   :  { %26584 = vmatpush3.msra.mxu1 %v30938_v17  ;;  %26536 = vmatprep.subr.mxu0 %v31007_v49  ;;  %v31109_v17 = vand.u32 4294901760, %v31087_v33  ;;  %v31128_v42 = vsub.f32 %v16561_v57, %v31102_v30 }
0x1348   :  { %26585 = vmatprep.subr.mxu1 %v30950_v11  ;;  %26537 = vmatpush3.msra.mxu0 %v31007_v49  ;;  %v16559_v49 = vld [vmem:[#allocation5 + $0x248] sm:$0xff]  ;;  %v31125_v14 = vand.u32 4294901760, %v31100_v47  ;;  %v17804_v51 = vand.u32 4294901760, %v17803_v2 }
0x1349   :  { %26586 = vmatpush3.msra.mxu1 %v30950_v11  ;;  %26539 = vmatmul.mubr.f32.vlgmr.msra.gmra.mxu0 %v31032_v35  ;;  %v17782_v11 = vsub.f32 %v31075_v8, %v31094_v23  ;;  %v31142_v35 = vsub.f32 %v17664_v54, %v31114_v61  ;;  %v31156_v32 = vand.u32 4294901760, %v31128_v42 }
0x134a   :  { %26560 = vmatprep.subr.mxu0 %v30933_v48  ;;  %26587 = vmatprep.subr.mxu1 %v30963_v52  ;;  %v17796_v27 = vsub.f32 %v31100_v47, %v31125_v14 }
0x134b   :  { %26561 = vmatpush3.msra.mxu0 %v30933_v48  ;;  %26576 = vmatprep.mubr.f32.mxu0 %v31034_v7  ;;  %v31132_v48 = vand.u32 4294901760, %v16559_v49  ;;  %v31147_v7 = vsub.f32 %v16560_v13, %v31120_v22  ;;  %v17744_v28 = vand.u32 4294901760, %v31142_v35  ;;  %v17810_v3 = vsub.f32 %v31128_v42, %v31156_v32 }
0x134c   :  { %26588 = vmatpush3.msra.mxu1 %v30963_v52  ;;  %26562 = vmatprep.subr.mxu0 %v30945_v50  ;;  %v17789_v52 = vsub.f32 %v31087_v33, %v31109_v17 }
0x134d   :  { %26589 = vmatprep.subr.mxu1 %v30971_v21  ;;  %26563 = vmatpush3.msra.mxu0 %v30945_v50  ;;  %v17783_v50 = vand.u32 4294901760, %v17782_v11  ;;  %v31170_v38 = vand.u32 4294901760, %v31147_v7  ;;  %v17811_v36 = vand.u32 4294901760, %v17810_v3 }
0x134e   :  { %26590 = vmatpush3.msra.mxu1 %v30971_v21  ;;  %26564 = vmatprep.subr.mxu0 %v30957_v10  ;;  %v31149_v21 = vand.u32 4294901760, %v16558_v9 }
0x134f   :  { %26591 = vmatprep.subr.mxu1 %v30982_v37  ;;  %26565 = vmatpush3.msra.mxu0 %v30957_v10  ;;  %v31161_v10 = vsub.f32 %v16559_v49, %v31132_v48  ;;  %v17817_v31 = vsub.f32 %v31147_v7, %v31170_v38 }
0x1350   :  { %26592 = vmatpush3.msra.mxu1 %v30982_v37  ;;  %26566 = vmatprep.subr.mxu0 %v30969_v18  ;;  %v17790_v37 = vand.u32 4294901760, %v17789_v52 }
0x1351   :  { %26593 = vmatprep.subr.mxu1 %v30995_v62  ;;  %26567 = vmatpush3.msra.mxu0 %v30969_v18  ;;  %v31173_v18 = vsub.f32 %v16558_v9, %v31149_v21  ;;  %v31181_v41 = vand.u32 4294901760, %v31161_v10  ;;  %v17818_v55 = vand.u32 4294901760, %v17817_v31 }
0x1352   :  { %26594 = vmatpush3.msra.mxu1 %v30995_v62  ;;  %26568 = vmatprep.subr.mxu0 %v30986_v60  ;;  %v17797_v62 = vand.u32 4294901760, %v17796_v27 }
0x1353   :  { %26596 = vmatmul.mubr.f32.vlgmr.msra.gmra.mxu1 %v31028_v58  ;;  %26617 = vmatprep.subr.mxu1 %v17783_v50  ;;  %v31189_v24 = vand.u32 4294901760, %v31173_v18 }
0x1354   :  { %26569 = vmatpush3.msra.mxu0 %v30986_v60  ;;  %26618 = vmatpush3.msra.mxu1 %v17783_v50  ;;  %v17745_v60 = vsub.f32 %v31142_v35, %v17744_v28 }
0x1355   :  { %26633 = vmatprep.mubr.f32.mxu1 %v31114_v61  ;;  %26570 = vmatprep.subr.mxu0 %v30990_v53 }
0x1356   :  { %26619 = vmatprep.subr.mxu1 %v17790_v37  ;;  %26571 = vmatpush3.msra.mxu0 %v30990_v53  ;;  %v17824_v53 = vsub.f32 %v31161_v10, %v31181_v41  ;;  %v17746_v26 = vand.u32 4294901760, %v17745_v60 }
0x1357   :  { %26620 = vmatpush3.msra.mxu1 %v17790_v37  ;;  %26572 = vmatprep.subr.mxu0 %v31004_v56 }
0x1358   :  { %26621 = vmatprep.subr.mxu1 %v17797_v62  ;;  %26573 = vmatpush3.msra.mxu0 %v31004_v56  ;;  %v17831_v56 = vsub.f32 %v31173_v18, %v31189_v24  ;;  %v17825_v39 = vand.u32 4294901760, %v17824_v53 }
0x1359   :  { %26622 = vmatpush3.msra.mxu1 %v17797_v62  ;;  %26574 = vmatprep.subr.mxu0 %v31014_v12 }
0x135a   :  { %26623 = vmatprep.subr.mxu1 %v17804_v51  ;;  %26575 = vmatpush3.msra.mxu0 %v31014_v12  ;;  %v31207_v12 = vsub.f32 %v17667_v6, %v31198_v5 }
0x135b   :  { %26624 = vmatpush3.msra.mxu1 %v17804_v51  ;;  %26577 = vmatmul.mubr.f32.vlgmr.msra.gmra.mxu0 %v31028_v58  ;;  %v17832_v58 = vand.u32 4294901760, %v17831_v56 }
0x135c   :  { %26598 = vmatprep.subr.mxu0 %v31062_v25  ;;  %26625 = vmatprep.subr.mxu1 %v17811_v36  ;;  %v17754_v4 = vand.u32 4294901760, %v31207_v12 }
0x135d   :  { %26599 = vmatpush3.msra.mxu0 %v31062_v25  ;;  %26614 = vmatprep.mubr.f32.mxu0 %v17746_v26 }
0x135e   :  { %26626 = vmatpush3.msra.mxu1 %v17811_v36  ;;  %26600 = vmatprep.subr.mxu0 %v31070_v34  ;;  %v17755_v57 = vsub.f32 %v31207_v12, %v17754_v4 }
0x135f   :  { %26627 = vmatprep.subr.mxu1 %v17818_v55  ;;  %26601 = vmatpush3.msra.mxu0 %v31070_v34 }
0x1360   :  { %26628 = vmatpush3.msra.mxu1 %v17818_v55  ;;  %26602 = vmatprep.subr.mxu0 %v31080_v15  ;;  %v17756_v54 = vand.u32 4294901760, %v17755_v57 }
0x1361   :  { %26629 = vmatprep.subr.mxu1 %v17825_v39  ;;  %26603 = vmatpush3.msra.mxu0 %v31080_v15 }
0x1362   :  { %26630 = vmatpush3.msra.mxu1 %v17825_v39  ;;  %26604 = vmatprep.subr.mxu0 %v31089_v40 }
0x1363   :  { %26631 = vmatprep.subr.mxu1 %v17832_v58  ;;  %26605 = vmatpush3.msra.mxu0 %v31089_v40 }
0x1364   :  { %26632 = vmatpush3.msra.mxu1 %v17832_v58  ;;  %26606 = vmatprep.subr.mxu0 %v31102_v30 }
0x1365   :  { %26634 = vmatmul.mubr.f32.vlgmr.msra.gmra.mxu1 %v31198_v5  ;;  %26655 = vmatprep.subr.mxu1 %v31062_v25 }
0x1366   :  { %26607 = vmatpush3.msra.mxu0 %v31102_v30  ;;  %26656 = vmatpush3.msra.mxu1 %v31062_v25 }
0x1367   :  { %26671 = vmatprep.mubr.f32.mxu1 %v17744_v28  ;;  %26608 = vmatprep.subr.mxu0 %v31120_v22 }
0x1368   :  { %26657 = vmatprep.subr.mxu1 %v31070_v34  ;;  %26609 = vmatpush3.msra.mxu0 %v31120_v22 }
0x1369   :  { %26658 = vmatpush3.msra.mxu1 %v31070_v34  ;;  %26610 = vmatprep.subr.mxu0 %v31132_v48 }
0x136a   :  { %26659 = vmatprep.subr.mxu1 %v31080_v15  ;;  %26611 = vmatpush3.msra.mxu0 %v31132_v48 }
0x136b   :  { %26660 = vmatpush3.msra.mxu1 %v31080_v15  ;;  %26612 = vmatprep.subr.mxu0 %v31149_v21 }
0x136c   :  { %26661 = vmatprep.subr.mxu1 %v31089_v40  ;;  %26613 = vmatpush3.msra.mxu0 %v31149_v21 }
0x136d   :  { %26662 = vmatpush3.msra.mxu1 %v31089_v40  ;;  %26615 = vmatmul.mubr.f32.vlgmr.msra.gmra.mxu0 %v17756_v54 }
0x136e   :  { %26636 = vmatprep.subr.mxu0 %v31075_v8  ;;  %26663 = vmatprep.subr.mxu1 %v31102_v30 }
0x136f   :  { %26637 = vmatpush3.msra.mxu0 %v31075_v8  ;;  %26652 = vmatprep.mubr.f32.mxu0 %v31142_v35  ;;  %v18753_v35 = vld [vmem:[#allocation5 + $0x2c8] sm:$0xff] }
0x1370   :  { %26664 = vmatpush3.msra.mxu1 %v31102_v30  ;;  %26638 = vmatprep.subr.mxu0 %v31087_v33  ;;  %v31390_v27 = vand.u32 4294901760, %v18753_v35 }
0x1371   :  { %26665 = vmatprep.subr.mxu1 %v31120_v22  ;;  %26639 = vmatpush3.msra.mxu0 %v31087_v33 }
0x1372   :  { %26666 = vmatpush3.msra.mxu1 %v31120_v22  ;;  %26640 = vmatprep.subr.mxu0 %v31100_v47  ;;  %v31401_v28 = vsub.f32 %v18753_v35, %v31390_v27 }
0x1373   :  { %26667 = vmatprep.subr.mxu1 %v31132_v48  ;;  %26641 = vmatpush3.msra.mxu0 %v31100_v47 }
0x1374   :  { %26668 = vmatpush3.msra.mxu1 %v31132_v48  ;;  %26642 = vmatprep.subr.mxu0 %v31112_v45  ;;  %v31412_v3 = vand.u32 4294901760, %v31401_v28 }
0x1375   :  { %26669 = vmatprep.subr.mxu1 %v31149_v21  ;;  %26643 = vmatpush3.msra.mxu0 %v31112_v45 }
0x1376   :  { %26670 = vmatpush3.msra.mxu1 %v31149_v21  ;;  %26644 = vmatprep.subr.mxu0 %v31128_v42  ;;  %v18921_v31 = vsub.f32 %v31401_v28, %v31412_v3 }
0x1377   :  { %26672 = vmatmul.mubr.f32.vlgmr.msra.gmra.mxu1 %v17754_v4  ;;  %26693 = vmatprep.subr.mxu1 %v31062_v25 }
0x1378   :  { %26645 = vmatpush3.msra.mxu0 %v31128_v42  ;;  %26694 = vmatpush3.msra.mxu1 %v31062_v25  ;;  %v18758_v25 = vld [vmem:[#allocation5 + $0x2f0] sm:$0xff]  ;;  %v18922_v6 = vand.u32 4294901760, %v18921_v31 }
0x1379   :  { %26709 = vmatprep.mubr.f32.mxu1 %v31114_v61  ;;  %26646 = vmatprep.subr.mxu0 %v31147_v7  ;;  %v31336_v8 = vand.u32 4294901760, %v18758_v25 }
0x137a   :  { %26695 = vmatprep.subr.mxu1 %v31070_v34  ;;  %26647 = vmatpush3.msra.mxu0 %v31147_v7 }
0x137b   :  { %26696 = vmatpush3.msra.mxu1 %v31070_v34  ;;  %26648 = vmatprep.subr.mxu0 %v31161_v10  ;;  %v31344_v33 = vsub.f32 %v18758_v25, %v31336_v8 }
0x137c   :  { %26697 = vmatprep.subr.mxu1 %v31080_v15  ;;  %26649 = vmatpush3.msra.mxu0 %v31161_v10  ;;  %v18752_v10 = vld [vmem:[#allocation5 + $0x2c0] sm:$0xff] }
0x137d   :  { %26698 = vmatpush3.msra.mxu1 %v31080_v15  ;;  %26650 = vmatprep.subr.mxu0 %v31173_v18  ;;  %v18757_v15 = vld [vmem:[#allocation5 + $0x2e8] sm:$0xff]  ;;  %v31353_v47 = vand.u32 4294901760, %v31344_v33 }
0x137e   :  { %26699 = vmatprep.subr.mxu1 %v31089_v40  ;;  %26651 = vmatpush3.msra.mxu0 %v31173_v18 }
0x137f   :  { %26700 = vmatpush3.msra.mxu1 %v31089_v40  ;;  %26653 = vmatmul.mubr.f32.vlgmr.msra.gmra.mxu0 %v31207_v12  ;;  %v18756_v40 = vld [vmem:[#allocation5 + $0x2e0] sm:$0xff]  ;;  %v18886_v49 = vsub.f32 %v31344_v33, %v31353_v47 }
0x1380   :  { %26674 = vmatprep.subr.mxu0 %v31094_v23  ;;  %26701 = vmatprep.subr.mxu1 %v31102_v30  ;;  %v31358_v13 = vand.u32 4294901760, %v18756_v40 }
0x1381   :  { %26675 = vmatpush3.msra.mxu0 %v31094_v23  ;;  %26690 = vmatprep.mubr.f32.mxu0 %v31114_v61  ;;  %v18887_v42 = vand.u32 4294901760, %v18886_v49 }
0x1382   :  { %26702 = vmatpush3.msra.mxu1 %v31102_v30  ;;  %26676 = vmatprep.subr.mxu0 %v31109_v17  ;;  %v31368_v11 = vsub.f32 %v18756_v40, %v31358_v13 }
0x1383   :  { %26703 = vmatprep.subr.mxu1 %v31120_v22  ;;  %26677 = vmatpush3.msra.mxu0 %v31109_v17  ;;  %v18755_v17 = vld [vmem:[#allocation5 + $0x2d8] sm:$0xff] }
0x1384   :  { %26704 = vmatpush3.msra.mxu1 %v31120_v22  ;;  %26678 = vmatprep.subr.mxu0 %v31125_v14  ;;  %v31371_v22 = vand.u32 4294901760, %v18755_v17 }
0x1385   :  { %26705 = vmatprep.subr.mxu1 %v31132_v48  ;;  %26679 = vmatpush3.msra.mxu0 %v31125_v14  ;;  %v18754_v14 = vld [vmem:[#allocation5 + $0x2d0] sm:$0xff] }
0x1386   :  { %26706 = vmatpush3.msra.mxu1 %v31132_v48  ;;  %26680 = vmatprep.subr.mxu0 %v31139_v29  ;;  %v31377_v48 = vand.u32 4294901760, %v31368_v11  ;;  %v31379_v52 = vand.u32 4294901760, %v18754_v14 }
0x1387   :  { %26707 = vmatprep.subr.mxu1 %v31149_v21  ;;  %26681 = vmatpush3.msra.mxu0 %v31139_v29  ;;  %v31382_v29 = vsub.f32 %v18755_v17, %v31371_v22 }
0x1388   :  { %26708 = vmatpush3.msra.mxu1 %v31149_v21  ;;  %26682 = vmatprep.subr.mxu0 %v31156_v32  ;;  %v18900_v7 = vsub.f32 %v31368_v11, %v31377_v48  ;;  %v31388_v21 = vsub.f32 %v18754_v14, %v31379_v52 }
0x1389   :  { %26710 = vmatmul.mubr.f32.vlgmr.msra.gmra.mxu1 %v31198_v5  ;;  %26719 = vmatprep.subr.mxu1 %v30858_v46 }
0x138a   :  { %26683 = vmatpush3.msra.mxu0 %v31156_v32  ;;  %26720 = vmatpush3.msra.mxu1 %v30858_v46  ;;  %v32512_v46 = vld [vmem:[#allocation29_spill] sm:$0xff]  ;;  %v31394_v32 = vand.u32 4294901760, %v31382_v29  ;;  %v18901_v37 = vand.u32 4294901760, %v18900_v7  ;;  %v31398_v2 = vand.u32 4294901760, %v31388_v21 }
0x138b   :  { %26684 = vmatprep.subr.mxu0 %v31170_v38  ;;  %26721 = vmatprep.subr.mxu1 %v30863_v20 }
0x138c   :  { %26685 = vmatpush3.msra.mxu0 %v31170_v38  ;;  %26722 = vmatpush3.msra.mxu1 %v30863_v20  ;;  %v31403_v38 = vand.u32 4294901760, %v18752_v10  ;;  %v18907_v18 = vsub.f32 %v31382_v29, %v31394_v32  ;;  %v18914_v62 = vsub.f32 %v31388_v21, %v31398_v2 }
0x138d   :  { %26686 = vmatprep.subr.mxu0 %v31181_v41  ;;  %26723 = vmatprep.mubr.f32.mxu1 %v32385_v43 }
0x138e   :  { %26733 = vmatprep.subr.mxu1 %v30829_v63  ;;  %26687 = vmatpush3.msra.mxu0 %v31181_v41  ;;  %v31415_v41 = vsub.f32 %v18752_v10, %v31403_v38  ;;  %v18908_v51 = vand.u32 4294901760, %v18907_v18  ;;  %v18915_v60 = vand.u32 4294901760, %v18914_v62 }
0x138f   :  { %26724 = vmatmul.mubr.f32.vlgmr.msra.gmra.mxu1 %v32447_v0  ;;  %26688 = vmatprep.subr.mxu0 %v31189_v24 }
0x1390   :  { %26734 = vmatpush3.msra.mxu1 %v30829_v63  ;;  %26689 = vmatpush3.msra.mxu0 %v31189_v24  ;;  %v31422_v24 = vand.u32 4294901760, %v31415_v41 }
0x1391   :  { %26735 = vmatprep.subr.mxu1 %v30831_v1  ;;  %26691 = vmatmul.mubr.f32.vlgmr.msra.gmra.mxu0 %v31198_v5 }
0x1392   :  { %26736 = vmatpush3.msra.mxu1 %v30831_v1  ;;  %26712 = vmatprep.subr.mxu0 %v30829_v63  ;;  %v18928_v36 = vsub.f32 %v31415_v41, %v31422_v24 }
0x1393   :  { %26737 = vmatprep.mubr.f32.mxu1 %v32448_v44  ;;  %26747 = vmatprep.subr.mxu1 %v30829_v63  ;;  %v32511_v44 = vld [vmem:[#allocation28_spill] sm:$0xff] }
0x1394   :  { %26713 = vmatpush3.msra.mxu0 %v30829_v63  ;;  %26738 = vmatmul.mubr.f32.vlgmr.msra.gmra.mxu1 %v32449_v19  ;;  %v32513_v19 = vld [vmem:[#allocation31_spill] sm:$0xff]  ;;  %v18929_v53 = vand.u32 4294901760, %v18928_v36 }
0x1395   :  { %26748 = vmatpush3.msra.mxu1 %v30829_v63  ;;  %26714 = vmatprep.subr.mxu0 %v30831_v1  ;;  %v32514_v63 = vld [vmem:[#allocation30_spill] sm:$0xff] }
0x1396   :  { %26749 = vmatprep.subr.mxu1 %v30831_v1  ;;  %26715 = vmatpush3.msra.mxu0 %v30831_v1 }
0x1397   :  { %26716 = vmatprep.mubr.f32.mxu0 %v32450_v16  ;;  %26750 = vmatpush3.msra.mxu1 %v30831_v1  ;;  %v32515_v16 = vld [vmem:[#allocation32_spill] sm:$0xff]  ;;  %v18759_v1 = vld [vmem:[#allocation5 + $0x2f8] sm:$0xff] }
0x1398   :  { %26717 = vmatmul.mubr.f32.vlgmr.msra.gmra.mxu0 %v32451_v59  ;;  %26726 = vmatprep.subr.mxu0 %v32511_v44  ;;  %v32516_v59 = vld [vmem:[#allocation33_spill] sm:$0xff]  ;;  %v31331_v20 = vand.u32 4294901760, %v18759_v1 }
0x1399   :  { %26727 = vmatpush3.msra.mxu0 %v32511_v44  ;;  %26730 = vmatprep.mubr.f32.mxu0 %v32512_v46 }
0x139a   :  { %26728 = vmatprep.subr.mxu0 %v32513_v19  ;;  %26751 = vmatprep.mubr.f32.mxu1 %v32385_v43  ;;  %v31334_v34 = vsub.f32 %v18759_v1, %v31331_v20 }
0x139b   :  { %26729 = vmatpush3.msra.mxu0 %v32513_v19  ;;  %26752 = vmatmul.mubr.f32.vlgmr.msra.gmra.mxu1 %v32447_v0 }
0x139c   :  { %26731 = vmatmul.mubr.f32.vlgmr.msra.gmra.mxu0 %v32514_v63  ;;  %26740 = vmatprep.subr.mxu0 %v32515_v16 }
0x139d   :  { %26741 = vmatpush3.msra.mxu0 %v32515_v16  ;;  %26744 = vmatprep.mubr.f32.mxu0 %v32385_v43  ;;  %v31341_v43 = vand.u32 4294901760, %v31334_v34 }
0x139e   :  { %26742 = vmatprep.subr.mxu0 %v32516_v59 }
0x139f   :  { %26743 = vmatpush3.msra.mxu0 %v32516_v59  ;;  %v18879_v23 = vsub.f32 %v31334_v34, %v31341_v43 }
0x13a0   :  { %26745 = vmatmul.mubr.f32.vlgmr.msra.gmra.mxu0 %v32447_v0  ;;  %26754 = vmatprep.subr.mxu0 %v31331_v20  ;;  %v31346_v0 = vand.u32 4294901760, %v18757_v15 }
0x13a1   :  { %26755 = vmatpush3.msra.mxu0 %v31331_v20  ;;  %v18880_v45 = vand.u32 4294901760, %v18879_v23 }
0x13a2   :  { %26756 = vmatprep.subr.mxu0 %v31336_v8  ;;  %v31356_v30 = vsub.f32 %v18757_v15, %v31346_v0 }
0x13a3   :  { %26757 = vmatpush3.msra.mxu0 %v31336_v8  ;;  %26773 = vmatprep.subr.mxu1 %v18880_v45 }
0x13a4   :  { %26758 = vmatprep.subr.mxu0 %v31346_v0  ;;  %v31365_v61 = vand.u32 4294901760, %v31356_v30  ;;  %26774 = vmatpush3.msra.mxu1 %v18880_v45 }
0x13a5   :  { %26759 = vmatpush3.msra.mxu0 %v31346_v0  ;;  %26775 = vmatprep.subr.mxu1 %v18887_v42 }
0x13a6   :  { %26760 = vmatprep.subr.mxu0 %v31358_v13  ;;  %v18893_v9 = vsub.f32 %v31356_v30, %v31365_v61  ;;  %26776 = vmatpush3.msra.mxu1 %v18887_v42 }
0x13a7   :  { %26761 = vmatpush3.msra.mxu0 %v31358_v13 }
0x13a8   :  { %26762 = vmatprep.subr.mxu0 %v31371_v22  ;;  %v18894_v50 = vand.u32 4294901760, %v18893_v9 }
0x13a9   :  { %26763 = vmatpush3.msra.mxu0 %v31371_v22 }
0x13aa   :  { %26764 = vmatprep.subr.mxu0 %v31379_v52  ;;  %26777 = vmatprep.subr.mxu1 %v18894_v50 }
0x13ab   :  { %26765 = vmatpush3.msra.mxu0 %v31379_v52  ;;  %26778 = vmatpush3.msra.mxu1 %v18894_v50 }
0x13ac   :  { %26766 = vmatprep.subr.mxu0 %v31390_v27  ;;  %26779 = vmatprep.subr.mxu1 %v18901_v37 }
0x13ad   :  { %26767 = vmatpush3.msra.mxu0 %v31390_v27  ;;  %26780 = vmatpush3.msra.mxu1 %v18901_v37 }
0x13ae   :  { %26768 = vmatprep.subr.mxu0 %v31403_v38  ;;  %26781 = vmatprep.subr.mxu1 %v18908_v51 }
0x13af   :  { %26769 = vmatpush3.msra.mxu0 %v31403_v38  ;;  %26782 = vmatpush3.msra.mxu1 %v18908_v51 }
0x13b0   :  { %26792 = vmatprep.subr.mxu0 %v31334_v34  ;;  %26783 = vmatprep.subr.mxu1 %v18915_v60 }
0x13b1   :  { %26784 = vmatpush3.msra.mxu1 %v18915_v60 }
0x13b2   :  { %26785 = vmatprep.subr.mxu1 %v18922_v6 }
0x13b3   :  { %26786 = vmatpush3.msra.mxu1 %v18922_v6 }
0x13b4   :  { %26787 = vmatprep.subr.mxu1 %v18929_v53 }
0x13b5   :  { %26788 = vmatpush3.msra.mxu1 %v18929_v53 }
0x13b6   :  { %26811 = vmatprep.subr.mxu1 %v31331_v20 }
0x13f0   :  { %v26521_v5 = vpop.f32.mrf.mxu1 }
0x13f2   :  { %v17283_v56 = vpop.f32.mrf.mxu1 }
0x13f8   :  { %v26502_v26 = vpop.f32.mrf.mxu0 }
0x13f9   :  { %v17290_v55 = vadd.f32 %v26521_v5, %v26502_v26 }
0x13fa   :  { %v17162_v39 = vpop.f32.mrf.mxu0 }
0x13fb   :  { %v17284_v12 = vadd.f32 %v17283_v56, %v17162_v39 }
0x1401   :  { %v26559_v58 = vpop.f32.mrf.mxu1 }
0x1403   :  { %v17465_v19 = vpop.f32.mrf.mxu1 }
0x1409   :  { %v26540_v4 = vpop.f32.mrf.mxu0 }
0x140a   :  { %v17385_v57 = vadd.f32 %v26540_v4, %v17290_v55 }
0x140b   :  { %v17377_v54 = vpop.f32.mrf.mxu0 }
0x140c   :  { %v17378_v44 = vadd.f32 %v17377_v54, %v17284_v12  ;;  %v17474_v46 = vadd.f32 %v26559_v58, %v17385_v57 }
0x140e   :  { %v17466_v63 = vadd.f32 %v17465_v19, %v17378_v44 }
0x1413   :  { %v26597_v16 = vpop.f32.mrf.mxu1 }
0x1415   :  { %v17653_v23 = vpop.f32.mrf.mxu1 }
0x141b   :  { %v26578_v59 = vpop.f32.mrf.mxu0 }
0x141c   :  { %v17575_v1 = vadd.f32 %v26578_v59, %v17474_v46 }
0x141d   :  { %v17568_v25 = vpop.f32.mrf.mxu0 }
0x141e   :  { %v17569_v15 = vadd.f32 %v17568_v25, %v17466_v63  ;;  %v17660_v40 = vadd.f32 %v26597_v16, %v17575_v1 }
0x1420   :  { %v17654_v17 = vadd.f32 %v17653_v23, %v17569_v15 }
0x1425   :  { %v26635_v45 = vpop.f32.mrf.mxu1 }
0x1427   :  { %v17869_v50 = vpop.f32.mrf.mxu1 }
0x142d   :  { %v26616_v49 = vpop.f32.mrf.mxu0 }
0x142e   :  { %v17759_v14 = vadd.f32 %v26616_v49, %v17660_v40 }
0x142f   :  { %v17748_v42 = vpop.f32.mrf.mxu0 }
0x1430   :  { %v17749_v9 = vadd.f32 %v17748_v42, %v17654_v17  ;;  %v17876_v35 = vadd.f32 %v26635_v45, %v17759_v14 }
0x1432   :  { %v17870_v7 = vadd.f32 %v17869_v50, %v17749_v9 }
0x1437   :  { %v26673_v10 = vpop.f32.mrf.mxu1 }
0x1439   :  { %v18051_v31 = vpop.f32.mrf.mxu1 }
0x143f   :  { %v26654_v37 = vpop.f32.mrf.mxu0 }
0x1440   :  { %v17971_v18 = vadd.f32 %v26654_v37, %v17876_v35 }
0x1441   :  { %v17963_v62 = vpop.f32.mrf.mxu0 }
0x1442   :  { %v17964_v51 = vadd.f32 %v17963_v62, %v17870_v7  ;;  %v18060_v60 = vadd.f32 %v26673_v10, %v17971_v18 }
0x1444   :  { %v18052_v6 = vadd.f32 %v18051_v31, %v17964_v51 }
0x1449   :  { %v26711_v36 = vpop.f32.mrf.mxu1 }
0x144b   :  { %v18239_v53 = vpop.f32.mrf.mxu1 }
0x144f   :  { %v26725_v5 = vpop.f32.mrf.mxu1 }
0x1451   :  { %v26692_v26 = vpop.f32.mrf.mxu0  ;;  %v18413_v58 = vpop.f32.mrf.mxu1 }
0x1452   :  { %v18161_v55 = vadd.f32 %v26692_v26, %v18060_v60 }
0x1453   :  { %v18154_v56 = vpop.f32.mrf.mxu0 }
0x1454   :  { %v31429_v39 = vadd.f32 %v26711_v36, %v18161_v55  ;;  %v18155_v12 = vadd.f32 %v18154_v56, %v18052_v6  ;;  %v26739_v54 = vpop.f32.mrf.mxu1 }
0x1456   :  { %v31431_v4 = vadd.f32 %v18239_v53, %v18155_v12  ;;  %v18577_v63 = vpop.f32.mrf.mxu1 }
0x1458   :  { %v26718_v57 = vpop.f32.mrf.mxu0 }
0x1459   :  { %v18420_v46 = vadd.f32 %v26725_v5, %v26718_v57 }
0x145a   :  { %v18322_v44 = vpop.f32.mrf.mxu0 }
0x145b   :  { %v18414_v16 = vadd.f32 %v18413_v58, %v18322_v44  ;;  %v26753_v23 = vpop.f32.mrf.mxu1 }
0x145c   :  { %v26732_v19 = vpop.f32.mrf.mxu0 }
0x145d   :  { %v18503_v59 = vadd.f32 %v26732_v19, %v18420_v46  ;;  %v18741_v9 = vpop.f32.mrf.mxu1  ;;  %v32519_v46 = vld [vmem:[#allocation36_spill] sm:$0xff] }
0x145e   :  { %v18495_v1 = vpop.f32.mrf.mxu0 }
0x145f   :  { %v18586_v25 = vadd.f32 %v26739_v54, %v18503_v59  ;;  %v18496_v15 = vadd.f32 %v18495_v1, %v18414_v16  ;;  %v32521_v16 = vld [vmem:[#allocation37_spill] sm:$0xff]  ;;  %v32522_v59 = vld [vmem:[#allocation39_spill] sm:$0xff]  ;;  %v32523_v1 = vld [vmem:[#allocation48_spill] sm:$0xff] }
0x1460   :  { %v26746_v40 = vpop.f32.mrf.mxu0 }
0x1461   :  { %v18578_v17 = vadd.f32 %v18577_v63, %v18496_v15  ;;  %v18669_v45 = vadd.f32 %v26746_v40, %v18586_v25  ;;  %v32520_v63 = vld [vmem:[#allocation35_spill] sm:$0xff]  ;;  %v32524_v25 = vld [vmem:[#allocation41_spill] sm:$0xff]  ;;  %v32525_v15 = vld [vmem:[#allocation52_spill] sm:$0xff] }
0x1462   :  { %v18662_v49 = vpop.f32.mrf.mxu0  ;;  %v32526_v40 = vld [vmem:[#allocation44_spill] sm:$0xff] }
0x1463   :  { %v18748_v14 = vadd.f32 %v26753_v23, %v18669_v45  ;;  %v18663_v42 = vadd.f32 %v18662_v49, %v18578_v17  ;;  %v32527_v23 = vld [vmem:[#allocation56_spill] sm:$0xff]  ;;  %v32528_v17 = vld [vmem:[#allocation47_spill] sm:$0xff]  ;;  %v32530_v49 = vld [vmem:[#allocation66_spill] sm:$0xff] }
0x1464   :  { %v32529_v45 = vld [vmem:[#allocation60_spill] sm:$0xff] }
0x1465   :  { %v18764_v35 = vsel %vm1108_vm1, %v18748_v14, 0  ;;  %v18742_v50 = vadd.f32 %v18741_v9, %v18663_v42  ;;  %v32531_v14 = vld [vmem:[#allocation51_spill] sm:$0xff]  ;;  %v32533_v9 = vld [vmem:[#allocation54_spill] sm:$0xff] }
0x1466   :  { %v31434_v7 = vand.u32 4294901760, %v18764_v35  ;;  %v32532_v42 = vld [vmem:[#allocation67_spill] sm:$0xff] }
0x1467   :  { %v18761_v10 = vsel %vm1108_vm1, %v18742_v50, 0  ;;  %v32535_v50 = vld [vmem:[#allocation58_spill] sm:$0xff] }
0x1468   :  { %v18850_v37 = vsub.f32 %v18764_v35, %v31434_v7  ;;  %v18839_v18 = vand.u32 4294901760, %v18761_v10  ;;  %v32534_v35 = vld [vmem:[#allocation69_spill] sm:$0xff] }
0x146a   :  { %v18851_v62 = vand.u32 4294901760, %v18850_v37  ;;  %v18840_v51 = vsub.f32 %v18761_v10, %v18839_v18  ;;  %26789 = vmatprep.mubr.f32.mxu1 %v18839_v18  ;;  %v32537_v10 = vld [vmem:[#allocation63_spill] sm:$0xff] }
0x146b   :  { %26790 = vmatmul.mubr.f32.vlgmr.msra.gmra.mxu1 %v31434_v7 }
0x146c   :  { %26812 = vmatpush3.msra.mxu1 %v31331_v20  ;;  %v18841_v60 = vand.u32 4294901760, %v18840_v51  ;;  %v18852_v31 = vsub.f32 %v18850_v37, %v18851_v62 }
0x146d   :  { %26813 = vmatprep.subr.mxu1 %v31336_v8 }
0x146e   :  { %26814 = vmatpush3.msra.mxu1 %v31336_v8  ;;  %26827 = vmatprep.mubr.f32.mxu1 %v18841_v60  ;;  %v18842_v6 = vsub.f32 %v18840_v51, %v18841_v60  ;;  %v18853_v53 = vand.u32 4294901760, %v18852_v31 }
0x146f   :  { %26815 = vmatprep.subr.mxu1 %v31346_v0 }
0x1470   :  { %26816 = vmatpush3.msra.mxu1 %v31346_v0  ;;  %v18843_v36 = vand.u32 4294901760, %v18842_v6 }
0x1471   :  { %26817 = vmatprep.subr.mxu1 %v31358_v13 }
0x1472   :  { %26818 = vmatpush3.msra.mxu1 %v31358_v13  ;;  %26770 = vmatprep.mubr.f32.mxu0 %v18843_v36 }
0x1473   :  { %26819 = vmatprep.subr.mxu1 %v31371_v22  ;;  %26771 = vmatmul.mubr.f32.vlgmr.msra.gmra.mxu0 %v18853_v53 }
0x1474   :  { %26793 = vmatpush3.msra.mxu0 %v31334_v34  ;;  %26820 = vmatpush3.msra.mxu1 %v31371_v22 }
0x1475   :  { %26794 = vmatprep.subr.mxu0 %v31344_v33  ;;  %26808 = vmatprep.mubr.f32.mxu0 %v18840_v51 }
0x1476   :  { %26821 = vmatprep.subr.mxu1 %v31379_v52  ;;  %26795 = vmatpush3.msra.mxu0 %v31344_v33 }
0x1477   :  { %26822 = vmatpush3.msra.mxu1 %v31379_v52  ;;  %26796 = vmatprep.subr.mxu0 %v31356_v30 }
0x1478   :  { %26823 = vmatprep.subr.mxu1 %v31390_v27  ;;  %26797 = vmatpush3.msra.mxu0 %v31356_v30 }
0x1479   :  { %26824 = vmatpush3.msra.mxu1 %v31390_v27  ;;  %26798 = vmatprep.subr.mxu0 %v31368_v11 }
0x147a   :  { %26825 = vmatprep.subr.mxu1 %v31403_v38  ;;  %26799 = vmatpush3.msra.mxu0 %v31368_v11 }
0x147b   :  { %26826 = vmatpush3.msra.mxu1 %v31403_v38  ;;  %26800 = vmatprep.subr.mxu0 %v31382_v29 }
0x147c   :  { %26828 = vmatmul.mubr.f32.vlgmr.msra.gmra.mxu1 %v18851_v62  ;;  %26849 = vmatprep.subr.mxu1 %v31331_v20 }
0x147d   :  { %26801 = vmatpush3.msra.mxu0 %v31382_v29  ;;  %26850 = vmatpush3.msra.mxu1 %v31331_v20  ;;  %v32517_v20 = vmov 0.0  }
0x147e   :  { %26865 = vmatprep.mubr.f32.mxu1 %v18839_v18  ;;  %26802 = vmatprep.subr.mxu0 %v31388_v21 }
0x147f   :  { %26851 = vmatprep.subr.mxu1 %v31336_v8  ;;  %26803 = vmatpush3.msra.mxu0 %v31388_v21 }
0x1480   :  { %26852 = vmatpush3.msra.mxu1 %v31336_v8  ;;  %26804 = vmatprep.subr.mxu0 %v31401_v28 }
0x1481   :  { %26853 = vmatprep.subr.mxu1 %v31346_v0  ;;  %26805 = vmatpush3.msra.mxu0 %v31401_v28 }
0x1482   :  { %26854 = vmatpush3.msra.mxu1 %v31346_v0  ;;  %26806 = vmatprep.subr.mxu0 %v31415_v41 }
0x1483   :  { %26855 = vmatprep.subr.mxu1 %v31358_v13  ;;  %26807 = vmatpush3.msra.mxu0 %v31415_v41 }
0x1484   :  { %26856 = vmatpush3.msra.mxu1 %v31358_v13  ;;  %26809 = vmatmul.mubr.f32.vlgmr.msra.gmra.mxu0 %v18850_v37 }
0x1485   :  { %26830 = vmatprep.subr.mxu0 %v31341_v43  ;;  %26857 = vmatprep.subr.mxu1 %v31371_v22 }
0x1486   :  { %26831 = vmatpush3.msra.mxu0 %v31341_v43  ;;  %26846 = vmatprep.mubr.f32.mxu0 %v18839_v18 }
0x1487   :  { %26858 = vmatpush3.msra.mxu1 %v31371_v22  ;;  %26832 = vmatprep.subr.mxu0 %v31353_v47 }
0x1488   :  { %26859 = vmatprep.subr.mxu1 %v31379_v52  ;;  %26833 = vmatpush3.msra.mxu0 %v31353_v47 }
0x1489   :  { %26860 = vmatpush3.msra.mxu1 %v31379_v52  ;;  %26834 = vmatprep.subr.mxu0 %v31365_v61 }
0x148a   :  { %26861 = vmatprep.subr.mxu1 %v31390_v27  ;;  %26835 = vmatpush3.msra.mxu0 %v31365_v61 }
0x148b   :  { %26862 = vmatpush3.msra.mxu1 %v31390_v27  ;;  %26836 = vmatprep.subr.mxu0 %v31377_v48 }
0x148c   :  { %26863 = vmatprep.subr.mxu1 %v31403_v38  ;;  %26837 = vmatpush3.msra.mxu0 %v31377_v48 }
0x148d   :  { %26864 = vmatpush3.msra.mxu1 %v31403_v38  ;;  %26838 = vmatprep.subr.mxu0 %v31394_v32 }
0x148e   :  { %26866 = vmatmul.mubr.f32.vlgmr.msra.gmra.mxu1 %v31434_v7  ;;  %26839 = vmatpush3.msra.mxu0 %v31394_v32 }
0x148f   :  { %26840 = vmatprep.subr.mxu0 %v31398_v2  ;;  %26875 = vmatprep.subr.mxu1 %v32517_v20 }
0x1490   :  { %26841 = vmatpush3.msra.mxu0 %v31398_v2  ;;  %26879 = vmatprep.mubr.msk.f32.mxu1 %vm27424_vm2, %v32517_v20 }
0x1491   :  { %26842 = vmatprep.subr.mxu0 %v31412_v3 }
0x1492   :  { %26843 = vmatpush3.msra.mxu0 %v31412_v3 }
0x1493   :  { %26844 = vmatprep.subr.mxu0 %v31422_v24 }
0x1494   :  { %26845 = vmatpush3.msra.mxu0 %v31422_v24 }
0x1495   :  { %26847 = vmatmul.mubr.f32.vlgmr.msra.gmra.mxu0 %v31434_v7  ;;  %26868 = vmatprep.subr.mxu0 %v32517_v20  ;;  %v32536_v7 = vld [vmem:[#allocation70_spill] sm:$0xff] }
0x1496   :  { %26872 = vmatprep.mubr.msk.f32.mxu0 %vm27424_vm2, %v32517_v20 }
0x152b   :  { %v26791_v8 = vpop.f32.mrf.mxu1 }
0x152d   :  { %v18966_v0 = vpop.f32.mrf.mxu1 }
0x1533   :  { %v26772_v34 = vpop.f32.mrf.mxu0 }
0x1534   :  { %v18973_v47 = vadd.f32 %v26791_v8, %v26772_v34 }
0x1535   :  { %v18845_v43 = vpop.f32.mrf.mxu0 }
0x1536   :  { %v18967_v61 = vadd.f32 %v18966_v0, %v18845_v43 }
0x153c   :  { %v26829_v30 = vpop.f32.mrf.mxu1 }
0x153e   :  { %v19148_v48 = vpop.f32.mrf.mxu1 }
0x1544   :  { %v26810_v33 = vpop.f32.mrf.mxu0 }
0x1545   :  { %v19068_v11 = vadd.f32 %v26810_v33, %v18973_v47 }
0x1546   :  { %v19060_v13 = vpop.f32.mrf.mxu0 }
0x1547   :  { %v19061_v22 = vadd.f32 %v19060_v13, %v18967_v61  ;;  %v19157_v52 = vadd.f32 %v26829_v30, %v19068_v11 }
0x1549   :  { %v19149_v32 = vadd.f32 %v19148_v48, %v19061_v22 }
0x154e   :  { %v26867_v29 = vpop.f32.mrf.mxu1 }
0x1550   :  { %v19336_v3 = vpop.f32.mrf.mxu1 }
0x1555   :  { %v26848_v21 = vpop.f32.mrf.mxu0 }
0x1556   :  { %v19258_v27 = vadd.f32 %v26848_v21, %v19157_v52  ;;  %v32538_v21 = vld [vmem:[#allocation40_spill] sm:$0xff] }
0x1557   :  { %v19251_v2 = vpop.f32.mrf.mxu0 }
0x1558   :  { %v19343_v28 = vadd.f32 %v26867_v29, %v19258_v27  ;;  %v19252_v38 = vadd.f32 %v19251_v2, %v19149_v32  ;;  %v32539_v27 = vld [vmem:[#allocation43_spill] sm:$0xff]  ;;  %v32540_v32 = vld [vmem:[#allocation46_spill] sm:$0xff] }
0x155a   :  { %v31510_v41 = vadd.f32 %v19343_v28, %v31429_v39  ;;  %v19337_v24 = vadd.f32 %v19336_v3, %v19252_v38  ;;  %v32518_v39 = vld [vmem:[#allocation38_spill] sm:$0xff]  ;;  %v32542_v3 = vld [vmem:[#allocation55_spill] sm:$0xff] }
0x155b   :  { %v32541_v28 = vld [vmem:[#allocation50_spill] sm:$0xff] }
0x155c   :  { %v31513_v5 = vadd.f32 %v19337_v24, %v31431_v4  ;;  %v19379_v26 = vand.u32 4294901760, %v31510_v41  ;;  %v19349_v2 = vmul.f32 %v31510_v41, %v31510_v41 }
0x155e   :  { %26869 = vmatpush3.msra.mxu0 %v19379_v26  ;;  %v19382_v55 = vand.u32 4294901760, %v31513_v5  ;;  %v19457_v56 = vsub.f32 %v31510_v41, %v19379_v26  ;;  %v19348_v38 = vmul.f32 %v31513_v5, %v31513_v5  ;;  %v31617_v24 = vand.u32 4294901760, %v19349_v2 }
0x155f   :  { %26870 = vmatprep.subr.mxu0 %v32517_v20 }
0x1560   :  { %26871 = vmatpush3.msra.mxu0 %v19382_v55  ;;  %v19464_v12 = vsub.f32 %v31513_v5, %v19382_v55  ;;  %v19458_v58 = vand.u32 4294901760, %v19457_v56 }
0x1561   :  { %26882 = vmatprep.subr.mxu0 %v32517_v20  ;;  %26873 = vmatmul.mubr.f32.vlgmr.msra.gmra.mxu0 %v32518_v39 }
0x1562   :  { %26883 = vmatpush3.msra.mxu0 %v19457_v56  ;;  %26886 = vmatprep.mubr.msk.f32.mxu0 %vm27424_vm2, %v32517_v20  ;;  %v19459_v4 = vsub.f32 %v19457_v56, %v19458_v58  ;;  %v19465_v57 = vand.u32 4294901760, %v19464_v12  ;;  %v32544_v56 = vld [vmem:[#allocation62_spill] sm:$0xff] }
0x1563   :  { %26884 = vmatprep.subr.mxu0 %v32517_v20 }
0x1564   :  { %26885 = vmatpush3.msra.mxu0 %v19464_v12  ;;  %v19460_v54 = vand.u32 4294901760, %v19459_v4  ;;  %v19466_v44 = vsub.f32 %v19464_v12, %v19465_v57  ;;  %v31632_v12 = vsub.f32 %v19349_v2, %v31617_v24 }
0x1565   :  { %26896 = vmatprep.subr.mxu0 %v32517_v20  ;;  %26887 = vmatmul.mubr.f32.vlgmr.msra.gmra.mxu0 %v32519_v46 }
0x1566   :  { %26876 = vmatpush3.msra.mxu1 %v19460_v54  ;;  %26897 = vmatpush3.msra.mxu0 %v19458_v58  ;;  %v19467_v19 = vand.u32 4294901760, %v19466_v44  ;;  %v32545_v58 = vld [vmem:[#allocation65_spill] sm:$0xff]  ;;  %v20457_v54 = vand.u32 4294901760, %v31632_v12 }
0x1567   :  { %26877 = vmatprep.subr.mxu1 %v32517_v20  ;;  %26898 = vmatprep.subr.mxu0 %v32517_v20  ;;  %v32547_v44 = vld [vmem:[#allocation45_spill] sm:$0xff] }
0x1568   :  { %26878 = vmatpush3.msra.mxu1 %v19467_v19  ;;  %26899 = vmatpush3.msra.mxu0 %v19465_v57  ;;  %v32546_v57 = vld [vmem:[#allocation42_spill] sm:$0xff] }
0x1569   :  { %26880 = vmatmul.mubr.f32.vlgmr.msra.gmra.mxu1 %v32520_v63  ;;  %26889 = vmatprep.subr.mxu1 %v32517_v20 }
0x156a   :  { %26890 = vmatpush3.msra.mxu1 %v19379_v26  ;;  %26893 = vmatprep.mubr.msk.f32.mxu1 %vm27424_vm2, %v32517_v20 }
0x156b   :  { %26891 = vmatprep.subr.mxu1 %v32517_v20  ;;  %26900 = vmatprep.mubr.msk.f32.mxu0 %vm27424_vm2, %v32517_v20 }
0x156c   :  { %26892 = vmatpush3.msra.mxu1 %v19382_v55  ;;  %26901 = vmatmul.mubr.f32.vlgmr.msra.gmra.mxu0 %v32520_v63 }
0x156d   :  { %26894 = vmatmul.mubr.f32.vlgmr.msra.gmra.mxu1 %v32521_v16  ;;  %26903 = vmatprep.subr.mxu1 %v32517_v20 }
0x156e   :  { %26904 = vmatpush3.msra.mxu1 %v19379_v26  ;;  %26907 = vmatprep.mubr.msk.f32.mxu1 %vm27424_vm2, %v32517_v20  ;;  %v32543_v26 = vld [vmem:[#allocation57_spill] sm:$0xff] }
0x156f   :  { %26905 = vmatprep.subr.mxu1 %v32517_v20  ;;  %26910 = vmatprep.subr.mxu0 %v32517_v20 }
0x1570   :  { %26906 = vmatpush3.msra.mxu1 %v19382_v55  ;;  %26911 = vmatpush3.msra.mxu0 %v32522_v59  ;;  %v31623_v55 = vand.u32 4294901760, %v19348_v38 }
0x1571   :  { %26908 = vmatmul.mubr.f32.vlgmr.msra.gmra.mxu1 %v32520_v63  ;;  %26929 = vmatprep.subr.mxu1 %v32517_v20 }
0x1572   :  { %26930 = vmatpush3.msra.mxu1 %v32523_v1  ;;  %26912 = vmatprep.subr.mxu0 %v32517_v20  ;;  %v31640_v4 = vsub.f32 %v19348_v38, %v31623_v55 }
0x1573   :  { %26931 = vmatprep.subr.mxu1 %v32517_v20  ;;  %26913 = vmatpush3.msra.mxu0 %v32524_v25 }
0x1574   :  { %26932 = vmatpush3.msra.mxu1 %v32525_v15  ;;  %26914 = vmatprep.subr.mxu0 %v32517_v20  ;;  %v20464_v19 = vand.u32 4294901760, %v31640_v4 }
0x1575   :  { %26933 = vmatprep.subr.mxu1 %v32517_v20  ;;  %26915 = vmatpush3.msra.mxu0 %v32526_v40 }
0x1576   :  { %26934 = vmatpush3.msra.mxu1 %v32527_v23  ;;  %26916 = vmatprep.subr.mxu0 %v32517_v20 }
0x1577   :  { %26935 = vmatprep.subr.mxu1 %v32517_v20  ;;  %26917 = vmatpush3.msra.mxu0 %v32528_v17 }
0x1578   :  { %26936 = vmatpush3.msra.mxu1 %v32529_v45  ;;  %26918 = vmatprep.subr.mxu0 %v32517_v20 }
0x1579   :  { %26937 = vmatprep.subr.mxu1 %v32517_v20  ;;  %26945 = vmatprep.mubr.msk.f32.mxu1 %vm27424_vm2, %v32517_v20 }
0x157a   :  { %26938 = vmatpush3.msra.mxu1 %v32530_v49  ;;  %26919 = vmatpush3.msra.mxu0 %v32531_v14 }
0x157b   :  { %26939 = vmatprep.subr.mxu1 %v32517_v20  ;;  %26920 = vmatprep.subr.mxu0 %v32517_v20 }
0x157c   :  { %26940 = vmatpush3.msra.mxu1 %v32532_v42  ;;  %26921 = vmatpush3.msra.mxu0 %v32533_v9 }
0x157d   :  { %26941 = vmatprep.subr.mxu1 %v32517_v20  ;;  %26922 = vmatprep.subr.mxu0 %v32517_v20 }
0x157e   :  { %26942 = vmatpush3.msra.mxu1 %v32534_v35  ;;  %26923 = vmatpush3.msra.mxu0 %v32535_v50 }
0x157f   :  { %26943 = vmatprep.subr.mxu1 %v32517_v20  ;;  %26924 = vmatprep.subr.mxu0 %v32517_v20 }
0x1580   :  { %26944 = vmatpush3.msra.mxu1 %v32536_v7  ;;  %26925 = vmatpush3.msra.mxu0 %v32537_v10 }
0x1581   :  { %26967 = vmatprep.subr.mxu1 %v32517_v20  ;;  %26926 = vmatprep.mubr.msk.f32.mxu0 %vm27424_vm2, %v32517_v20 }
0x1582   :  { %26948 = vmatprep.subr.mxu0 %v32517_v20 }
0x1621   :  { %v19423_v37 = vpop.f32.mrf.mxu0 }
0x1623   :  { %v26874_v18 = vpop.f32.mrf.mxu0 }
0x1624   :  { %v20458_v18 = vsub.f32 %v31632_v12, %v20457_v54 }
0x1625   :  { %v19580_v62 = vpop.f32.mrf.mxu0 }
0x1627   :  { %v26888_v51 = vpop.f32.mrf.mxu0 }
0x1628   :  { %v20465_v51 = vsub.f32 %v31640_v4, %v20464_v19 }
0x1629   :  { %v19504_v60 = vpop.f32.mrf.mxu1 }
0x162a   :  { %v19505_v31 = vadd.f32 %v19504_v60, %v19423_v37  ;;  %v32548_v37 = vld [vmem:[#allocation49_spill] sm:$0xff]  ;;  %v20459_v60 = vand.u32 4294901760, %v20458_v18 }
0x162b   :  { %v26881_v6 = vpop.f32.mrf.mxu1 }
0x162c   :  { %v19581_v36 = vadd.f32 %v19580_v62, %v19505_v31  ;;  %v19732_v53 = vpop.f32.mrf.mxu0  ;;  %v32549_v62 = vld [vmem:[#allocation53_spill] sm:$0xff]  ;;  %v32550_v31 = vld [vmem:[#allocation59_spill] sm:$0xff]  ;;  %v20466_v6 = vand.u32 4294901760, %v20465_v51 }
0x162d   :  { %v19655_v34 = vpop.f32.mrf.mxu1 }
0x162e   :  { %v19656_v8 = vadd.f32 %v19655_v34, %v19581_v36  ;;  %v26902_v43 = vpop.f32.mrf.mxu0  ;;  %v32551_v36 = vld [vmem:[#allocation61_spill] sm:$0xff]  ;;  %v32553_v34 = vld [vmem:[#allocation68_spill] sm:$0xff] }
0x162f   :  { %v26895_v33 = vpop.f32.mrf.mxu1 }
0x1630   :  { %v19733_v0 = vadd.f32 %v19732_v53, %v19656_v8  ;;  %v32552_v53 = vld [vmem:[#allocation64_spill] sm:$0xff] }
0x1631   :  { %v19805_v47 = vpop.f32.mrf.mxu1 }
0x1632   :  { %v19806_v30 = vadd.f32 %v19805_v47, %v19733_v0 }
0x1633   :  { %v26909_v13 = vpop.f32.mrf.mxu1 }
0x1634   :  { %v19810_v61 = vsel %vm1108_vm1, %v19806_v30, 0 }
0x1635   :  { %v31582_v11 = vand.u32 4294901760, %v19810_v61 }
0x1637   :  { %v19886_v22 = vsub.f32 %v19810_v61, %v31582_v11  ;;  %26946 = vmatmul.mubr.f32.vlgmr.msra.gmra.mxu1 %v31582_v11 }
0x1638   :  { %26968 = vmatpush3.msra.mxu1 %v32522_v59  ;;  %26983 = vmatprep.mubr.msk.f32.mxu1 %vm27424_vm2, %v32517_v20 }
0x1639   :  { %v19887_v48 = vand.u32 4294901760, %v19886_v22  ;;  %26969 = vmatprep.subr.mxu1 %v32517_v20 }
0x163a   :  { %26970 = vmatpush3.msra.mxu1 %v32524_v25 }
0x163b   :  { %v19888_v52 = vsub.f32 %v19886_v22, %v19887_v48  ;;  %26971 = vmatprep.subr.mxu1 %v32517_v20 }
0x163c   :  { %26972 = vmatpush3.msra.mxu1 %v32526_v40 }
0x163d   :  { %v19889_v29 = vand.u32 4294901760, %v19888_v52  ;;  %26973 = vmatprep.subr.mxu1 %v32517_v20 }
0x163e   :  { %26974 = vmatpush3.msra.mxu1 %v32528_v17 }
0x163f   :  { %26975 = vmatprep.subr.mxu1 %v32517_v20  ;;  %26927 = vmatmul.mubr.f32.vlgmr.msra.gmra.mxu0 %v19889_v29 }
0x1640   :  { %26949 = vmatpush3.msra.mxu0 %v32538_v21  ;;  %26976 = vmatpush3.msra.mxu1 %v32531_v14 }
0x1641   :  { %26950 = vmatprep.subr.mxu0 %v32517_v20  ;;  %26977 = vmatprep.subr.mxu1 %v32517_v20 }
0x1642   :  { %26951 = vmatpush3.msra.mxu0 %v32539_v27  ;;  %26978 = vmatpush3.msra.mxu1 %v32533_v9 }
0x1643   :  { %26952 = vmatprep.subr.mxu0 %v32517_v20  ;;  %26979 = vmatprep.subr.mxu1 %v32517_v20 }
0x1644   :  { %26953 = vmatpush3.msra.mxu0 %v32540_v32  ;;  %26980 = vmatpush3.msra.mxu1 %v32535_v50 }
0x1645   :  { %26954 = vmatprep.subr.mxu0 %v32517_v20  ;;  %26981 = vmatprep.subr.mxu1 %v32517_v20 }
0x1646   :  { %26955 = vmatpush3.msra.mxu0 %v32541_v28  ;;  %26982 = vmatpush3.msra.mxu1 %v32537_v10 }
0x1647   :  { %26956 = vmatprep.subr.mxu0 %v32517_v20  ;;  %26984 = vmatmul.mubr.f32.vlgmr.msra.gmra.mxu1 %v19887_v48 }
0x1648   :  { %27005 = vmatprep.subr.mxu1 %v32517_v20  ;;  %26957 = vmatpush3.msra.mxu0 %v32542_v3 }
0x1649   :  { %27006 = vmatpush3.msra.mxu1 %v32522_v59  ;;  %26958 = vmatprep.subr.mxu0 %v32517_v20 }
0x164a   :  { %27007 = vmatprep.subr.mxu1 %v32517_v20  ;;  %26959 = vmatpush3.msra.mxu0 %v32543_v26 }
0x164b   :  { %27008 = vmatpush3.msra.mxu1 %v32524_v25  ;;  %26960 = vmatprep.subr.mxu0 %v32517_v20 }
0x164c   :  { %27009 = vmatprep.subr.mxu1 %v32517_v20  ;;  %26961 = vmatpush3.msra.mxu0 %v32544_v56 }
0x164d   :  { %27010 = vmatpush3.msra.mxu1 %v32526_v40  ;;  %26962 = vmatprep.subr.mxu0 %v32517_v20 }
0x164e   :  { %27011 = vmatprep.subr.mxu1 %v32517_v20  ;;  %26963 = vmatpush3.msra.mxu0 %v32545_v58 }
0x164f   :  { %26964 = vmatprep.mubr.msk.f32.mxu0 %vm27424_vm2, %v32517_v20  ;;  %27012 = vmatpush3.msra.mxu1 %v32528_v17 }
0x1650   :  { %26965 = vmatmul.mubr.f32.vlgmr.msra.gmra.mxu0 %v19886_v22  ;;  %26986 = vmatprep.subr.mxu0 %v32517_v20 }
0x1651   :  { %27013 = vmatprep.subr.mxu1 %v32517_v20  ;;  %26987 = vmatpush3.msra.mxu0 %v32546_v57 }
0x1652   :  { %27014 = vmatpush3.msra.mxu1 %v32531_v14  ;;  %26988 = vmatprep.subr.mxu0 %v32517_v20 }
0x1653   :  { %27015 = vmatprep.subr.mxu1 %v32517_v20  ;;  %26989 = vmatpush3.msra.mxu0 %v32547_v44 }
0x1654   :  { %27016 = vmatpush3.msra.mxu1 %v32533_v9  ;;  %26990 = vmatprep.subr.mxu0 %v32517_v20 }
0x1655   :  { %27017 = vmatprep.subr.mxu1 %v32517_v20  ;;  %26991 = vmatpush3.msra.mxu0 %v32548_v37 }
0x1656   :  { %27018 = vmatpush3.msra.mxu1 %v32535_v50  ;;  %26992 = vmatprep.subr.mxu0 %v32517_v20 }
0x1657   :  { %27019 = vmatprep.subr.mxu1 %v32517_v20  ;;  %26993 = vmatpush3.msra.mxu0 %v32549_v62 }
0x1658   :  { %27020 = vmatpush3.msra.mxu1 %v32537_v10  ;;  %27021 = vmatprep.mubr.msk.f32.mxu1 %vm27424_vm2, %v32517_v20 }
0x1659   :  { %26994 = vmatprep.subr.mxu0 %v32517_v20  ;;  %27022 = vmatmul.mubr.f32.vlgmr.msra.gmra.mxu1 %v31582_v11 }
0x165a   :  { %27031 = vmatprep.subr.mxu1 %v32517_v20  ;;  %26995 = vmatpush3.msra.mxu0 %v32550_v31 }
0x165b   :  { %27032 = vmatpush3.msra.mxu1 %v20459_v60  ;;  %26996 = vmatprep.subr.mxu0 %v32517_v20 }
0x165c   :  { %27033 = vmatprep.subr.mxu1 %v32517_v20  ;;  %26997 = vmatpush3.msra.mxu0 %v32551_v36 }
0x165d   :  { %27034 = vmatpush3.msra.mxu1 %v20466_v6  ;;  %26998 = vmatprep.subr.mxu0 %v32517_v20 }
0x165e   :  { %27035 = vmatprep.mubr.msk.f32.mxu1 %vm27424_vm2, %v32517_v20  ;;  %27045 = vmatprep.subr.mxu1 %v32517_v20 }
0x165f   :  { %26999 = vmatpush3.msra.mxu0 %v32552_v53  ;;  %27036 = vmatmul.mubr.f32.vlgmr.msra.gmra.mxu1 %v32520_v63 }
0x1660   :  { %27046 = vmatpush3.msra.mxu1 %v31617_v24  ;;  %27000 = vmatprep.subr.mxu0 %v32517_v20 }
0x1661   :  { %27047 = vmatprep.subr.mxu1 %v32517_v20  ;;  %27001 = vmatpush3.msra.mxu0 %v32553_v34 }
0x1662   :  { %27002 = vmatprep.mubr.msk.f32.mxu0 %vm27424_vm2, %v32517_v20  ;;  %27048 = vmatpush3.msra.mxu1 %v31623_v55 }
0x1663   :  { %27003 = vmatmul.mubr.f32.vlgmr.msra.gmra.mxu0 %v31582_v11  ;;  %27024 = vmatprep.subr.mxu0 %v32517_v20 }
0x1664   :  { %27049 = vmatprep.mubr.msk.f32.mxu1 %vm27424_vm2, %v32517_v20  ;;  %27059 = vmatprep.subr.mxu1 %v32517_v20 }
0x1665   :  { %27025 = vmatpush3.msra.mxu0 %v31617_v24  ;;  %27050 = vmatmul.mubr.f32.vlgmr.msra.gmra.mxu1 %v32521_v16 }
0x1666   :  { %27060 = vmatpush3.msra.mxu1 %v31617_v24  ;;  %27026 = vmatprep.subr.mxu0 %v32517_v20 }
0x1667   :  { %27061 = vmatprep.subr.mxu1 %v32517_v20  ;;  %27027 = vmatpush3.msra.mxu0 %v31623_v55 }
0x1668   :  { %27028 = vmatprep.mubr.msk.f32.mxu0 %vm27424_vm2, %v32517_v20  ;;  %27062 = vmatpush3.msra.mxu1 %v31623_v55 }
0x1669   :  { %27029 = vmatmul.mubr.f32.vlgmr.msra.gmra.mxu0 %v32518_v39  ;;  %27038 = vmatprep.subr.mxu0 %v32517_v20 }
0x166a   :  { %27039 = vmatpush3.msra.mxu0 %v31632_v12  ;;  %27042 = vmatprep.mubr.msk.f32.mxu0 %vm27424_vm2, %v32517_v20 }
0x166b   :  { %27040 = vmatprep.subr.mxu0 %v32517_v20  ;;  %27063 = vmatprep.mubr.msk.f32.mxu1 %vm27424_vm2, %v32517_v20 }
0x166c   :  { %27041 = vmatpush3.msra.mxu0 %v31640_v4  ;;  %27064 = vmatmul.mubr.f32.vlgmr.msra.gmra.mxu1 %v32520_v63 }
0x166d   :  { %27043 = vmatmul.mubr.f32.vlgmr.msra.gmra.mxu0 %v32519_v46  ;;  %27052 = vmatprep.subr.mxu0 %v32517_v20 }
0x166e   :  { %27053 = vmatpush3.msra.mxu0 %v20457_v54  ;;  %27056 = vmatprep.mubr.msk.f32.mxu0 %vm27424_vm2, %v32517_v20 }
0x166f   :  { %27054 = vmatprep.subr.mxu0 %v32517_v20  ;;  %27085 = vmatprep.subr.mxu1 %v32517_v20 }
0x1670   :  { %27055 = vmatpush3.msra.mxu0 %v20464_v19  ;;  %27086 = vmatpush3.msra.mxu1 %v32523_v1 }
0x1671   :  { %27057 = vmatmul.mubr.f32.vlgmr.msra.gmra.mxu0 %v32520_v63  ;;  %27087 = vmatprep.subr.mxu1 %v32517_v20 }
0x1672   :  { %27088 = vmatpush3.msra.mxu1 %v32525_v15  ;;  %27066 = vmatprep.subr.mxu0 %v32517_v20 }
0x1673   :  { %27089 = vmatprep.subr.mxu1 %v32517_v20  ;;  %27067 = vmatpush3.msra.mxu0 %v32522_v59 }
0x1674   :  { %27090 = vmatpush3.msra.mxu1 %v32527_v23  ;;  %27068 = vmatprep.subr.mxu0 %v32517_v20 }
0x1675   :  { %27091 = vmatprep.subr.mxu1 %v32517_v20  ;;  %27069 = vmatpush3.msra.mxu0 %v32524_v25 }
0x1676   :  { %27092 = vmatpush3.msra.mxu1 %v32529_v45  ;;  %27070 = vmatprep.subr.mxu0 %v32517_v20 }
0x1677   :  { %27093 = vmatprep.subr.mxu1 %v32517_v20  ;;  %27071 = vmatpush3.msra.mxu0 %v32526_v40 }
0x1678   :  { %27094 = vmatpush3.msra.mxu1 %v32530_v49  ;;  %27072 = vmatprep.subr.mxu0 %v32517_v20 }
0x1679   :  { %27095 = vmatprep.subr.mxu1 %v32517_v20  ;;  %27073 = vmatpush3.msra.mxu0 %v32528_v17 }
0x167a   :  { %27096 = vmatpush3.msra.mxu1 %v32532_v42  ;;  %27074 = vmatprep.subr.mxu0 %v32517_v20 }
0x167b   :  { %27097 = vmatprep.subr.mxu1 %v32517_v20  ;;  %27101 = vmatprep.mubr.msk.f32.mxu1 %vm27424_vm2, %v32517_v20 }
0x167c   :  { %27098 = vmatpush3.msra.mxu1 %v32534_v35  ;;  %27075 = vmatpush3.msra.mxu0 %v32531_v14 }
0x167d   :  { %27099 = vmatprep.subr.mxu1 %v32517_v20  ;;  %27076 = vmatprep.subr.mxu0 %v32517_v20 }
0x167e   :  { %27100 = vmatpush3.msra.mxu1 %v32536_v7  ;;  %27077 = vmatpush3.msra.mxu0 %v32533_v9 }
0x167f   :  { %27123 = vmatprep.subr.mxu1 %v32517_v20  ;;  %27078 = vmatprep.subr.mxu0 %v32517_v20 }
0x1680   :  { %27079 = vmatpush3.msra.mxu0 %v32535_v50  ;;  %27082 = vmatprep.mubr.msk.f32.mxu0 %vm27424_vm2, %v32517_v20 }
0x1681   :  { %27080 = vmatprep.subr.mxu0 %v32517_v20 }
0x1682   :  { %27081 = vmatpush3.msra.mxu0 %v32537_v10 }
0x1683   :  { %27104 = vmatprep.subr.mxu0 %v32517_v20 }
0x16f7   :  { %v20002_v39 = vpop.f32.mrf.mxu1 }
0x16f9   :  { %v26947_v46 = vpop.f32.mrf.mxu1 }
0x16ff   :  { %v19891_v63 = vpop.f32.mrf.mxu0 }
0x1700   :  { %v20003_v16 = vadd.f32 %v20002_v39, %v19891_v63 }
0x1701   :  { %v26928_v1 = vpop.f32.mrf.mxu0 }
0x1707   :  { %v20171_v15 = vpop.f32.mrf.mxu1 }
0x1709   :  { %v26985_v23 = vpop.f32.mrf.mxu1 }
0x1710   :  { %v20090_v45 = vpop.f32.mrf.mxu0 }
0x1711   :  { %v20091_v49 = vadd.f32 %v20090_v45, %v20003_v16  ;;  %v21352_v16 = vld [vmem:[%s32089_s3 + $0x6] sm:$0x1]  ;;  %v21353_v45 = vld [vmem:[%s32089_s3 + $0x7] sm:$0x1] }
0x1712   :  { %v26966_v42 = vpop.f32.mrf.mxu0 }
0x1713   :  { %v20172_v35 = vadd.f32 %v20171_v15, %v20091_v49  ;;  %v32554_v42 = vld [vmem:[#allocation71_spill] sm:$0xff] }
0x1719   :  { %v20345_v7 = vpop.f32.mrf.mxu1 }
0x171b   :  { %v27023_v8 = vpop.f32.mrf.mxu1 }
0x171f   :  { %v20503_v43 = vpop.f32.mrf.mxu1 }
0x1721   :  { %v27037_v33 = vpop.f32.mrf.mxu1 }
0x1723   :  { %v20266_v0 = vpop.f32.mrf.mxu0 }
0x1724   :  { %v20267_v47 = vadd.f32 %v20266_v0, %v20172_v35 }
0x1725   :  { %v27004_v30 = vpop.f32.mrf.mxu0  ;;  %v20654_v13 = vpop.f32.mrf.mxu1 }
0x1726   :  { %v31752_v61 = vadd.f32 %v20345_v7, %v20267_v47 }
0x1727   :  { %v27051_v11 = vpop.f32.mrf.mxu1 }
0x1729   :  { %v20422_v22 = vpop.f32.mrf.mxu0 }
0x172a   :  { %v20504_v52 = vadd.f32 %v20503_v43, %v20422_v22  ;;  %v32556_v22 = vld [vmem:[#allocation27_spill] sm:$0xff] }
0x172b   :  { %v27030_v48 = vpop.f32.mrf.mxu0 }
0x172c   :  { %v20804_v29 = vpop.f32.mrf.mxu1 }
0x172d   :  { %v20579_v2 = vpop.f32.mrf.mxu0 }
0x172e   :  { %v20580_v38 = vadd.f32 %v20579_v2, %v20504_v52  ;;  %v27065_v24 = vpop.f32.mrf.mxu1 }
0x172f   :  { %v27044_v55 = vpop.f32.mrf.mxu0 }
0x1730   :  { %v20655_v12 = vadd.f32 %v20654_v13, %v20580_v38 }
0x1731   :  { %v20731_v4 = vpop.f32.mrf.mxu0 }
0x1732   :  { %v20732_v54 = vadd.f32 %v20731_v4, %v20655_v12 }
0x1733   :  { %v27058_v19 = vpop.f32.mrf.mxu0 }
0x1734   :  { %v20805_v18 = vadd.f32 %v20804_v29, %v20732_v54 }
0x1736   :  { %v20809_v51 = vsel %vm1108_vm1, %v20805_v18, 0 }
0x1737   :  { %v31755_v60 = vand.u32 4294901760, %v20809_v51 }
0x1739   :  { %v20885_v6 = vsub.f32 %v20809_v51, %v31755_v60  ;;  %27102 = vmatmul.mubr.f32.vlgmr.msra.gmra.mxu1 %v31755_v60 }
0x173a   :  { %27124 = vmatpush3.msra.mxu1 %v32522_v59  ;;  %27139 = vmatprep.mubr.msk.f32.mxu1 %vm27424_vm2, %v32517_v20 }
0x173b   :  { %v20886_v39 = vand.u32 4294901760, %v20885_v6  ;;  %27125 = vmatprep.subr.mxu1 %v32517_v20 }
0x173c   :  { %27126 = vmatpush3.msra.mxu1 %v32524_v25 }
0x173d   :  { %v20887_v46 = vsub.f32 %v20885_v6, %v20886_v39  ;;  %27127 = vmatprep.subr.mxu1 %v32517_v20 }
0x173e   :  { %27128 = vmatpush3.msra.mxu1 %v32526_v40 }
0x173f   :  { %v20888_v63 = vand.u32 4294901760, %v20887_v46  ;;  %27129 = vmatprep.subr.mxu1 %v32517_v20 }
0x1740   :  { %27130 = vmatpush3.msra.mxu1 %v32528_v17 }
0x1741   :  { %27131 = vmatprep.subr.mxu1 %v32517_v20  ;;  %27083 = vmatmul.mubr.f32.vlgmr.msra.gmra.mxu0 %v20888_v63 }
0x1742   :  { %27105 = vmatpush3.msra.mxu0 %v32538_v21  ;;  %27132 = vmatpush3.msra.mxu1 %v32531_v14 }
0x1743   :  { %27106 = vmatprep.subr.mxu0 %v32517_v20  ;;  %27133 = vmatprep.subr.mxu1 %v32517_v20 }
0x1744   :  { %27107 = vmatpush3.msra.mxu0 %v32539_v27  ;;  %27134 = vmatpush3.msra.mxu1 %v32533_v9 }
0x1745   :  { %27108 = vmatprep.subr.mxu0 %v32517_v20  ;;  %27135 = vmatprep.subr.mxu1 %v32517_v20 }
0x1746   :  { %27109 = vmatpush3.msra.mxu0 %v32540_v32  ;;  %27136 = vmatpush3.msra.mxu1 %v32535_v50 }
0x1747   :  { %27110 = vmatprep.subr.mxu0 %v32517_v20  ;;  %27137 = vmatprep.subr.mxu1 %v32517_v20 }
0x1748   :  { %27111 = vmatpush3.msra.mxu0 %v32541_v28  ;;  %27138 = vmatpush3.msra.mxu1 %v32537_v10 }
0x1749   :  { %27112 = vmatprep.subr.mxu0 %v32517_v20  ;;  %27140 = vmatmul.mubr.f32.vlgmr.msra.gmra.mxu1 %v20886_v39  ;;  %v21844_v39 = vld [vmem:[%s32093_s7 + $0x30] sm:$0xff] }
0x174a   :  { %27161 = vmatprep.subr.mxu1 %v32517_v20  ;;  %27113 = vmatpush3.msra.mxu0 %v32542_v3  ;;  %v31889_v63 = vand.u32 4294901760, %v21844_v39 }
0x174b   :  { %27162 = vmatpush3.msra.mxu1 %v32522_v59  ;;  %27114 = vmatprep.subr.mxu0 %v32517_v20 }
0x174c   :  { %27163 = vmatprep.subr.mxu1 %v32517_v20  ;;  %27115 = vmatpush3.msra.mxu0 %v32543_v26 }
0x174d   :  { %27164 = vmatpush3.msra.mxu1 %v32524_v25  ;;  %27116 = vmatprep.subr.mxu0 %v32517_v20 }
0x174e   :  { %27165 = vmatprep.subr.mxu1 %v32517_v20  ;;  %27117 = vmatpush3.msra.mxu0 %v32544_v56  ;;  %v21348_v56 = vmul.f32 0.001953125, %v31752_v61  ;;  %v32555_v61 = vld [vmem:[#allocation72_spill] sm:$0xff] }
0x174f   :  { %27166 = vmatpush3.msra.mxu1 %v32526_v40  ;;  %27118 = vmatprep.subr.mxu0 %v32517_v20 }
0x1750   :  { %27167 = vmatprep.subr.mxu1 %v32517_v20  ;;  %27119 = vmatpush3.msra.mxu0 %v32545_v58 }
0x1751   :  { %27120 = vmatprep.mubr.msk.f32.mxu0 %vm27424_vm2, %v32517_v20  ;;  %27168 = vmatpush3.msra.mxu1 %v32528_v17 }
0x1752   :  { %27121 = vmatmul.mubr.f32.vlgmr.msra.gmra.mxu0 %v20885_v6  ;;  %27142 = vmatprep.subr.mxu0 %v32517_v20 }
0x1753   :  { %27169 = vmatprep.subr.mxu1 %v32517_v20  ;;  %27143 = vmatpush3.msra.mxu0 %v32546_v57 }
0x1754   :  { %27170 = vmatpush3.msra.mxu1 %v32531_v14  ;;  %27144 = vmatprep.subr.mxu0 %v32517_v20 }
0x1755   :  { %27171 = vmatprep.subr.mxu1 %v32517_v20  ;;  %27145 = vmatpush3.msra.mxu0 %v32547_v44 }
0x1756   :  { %27172 = vmatpush3.msra.mxu1 %v32533_v9  ;;  %27146 = vmatprep.subr.mxu0 %v32517_v20 }
0x1757   :  { %27173 = vmatprep.subr.mxu1 %v32517_v20  ;;  %27147 = vmatpush3.msra.mxu0 %v32548_v37  ;;  %v21350_v37 = vmul.f32 %v21348_v56, %v21348_v56 }
0x1758   :  { %27174 = vmatpush3.msra.mxu1 %v32535_v50  ;;  %27148 = vmatprep.subr.mxu0 %v32517_v20 }
0x1759   :  { %27175 = vmatprep.subr.mxu1 %v32517_v20  ;;  %27149 = vmatpush3.msra.mxu0 %v32549_v62 }
0x175a   :  { %27176 = vmatpush3.msra.mxu1 %v32537_v10  ;;  %27177 = vmatprep.mubr.msk.f32.mxu1 %vm27424_vm2, %v32517_v20 }
0x175b   :  { %27150 = vmatprep.subr.mxu0 %v32517_v20  ;;  %27178 = vmatmul.mubr.f32.vlgmr.msra.gmra.mxu1 %v31755_v60 }
0x175c   :  { %27151 = vmatpush3.msra.mxu0 %v32550_v31  ;;  %27158 = vmatprep.mubr.msk.f32.mxu0 %vm27424_vm2, %v32517_v20 }
0x175d   :  { %27152 = vmatprep.subr.mxu0 %v32517_v20  ;;  %27187 = vmatprep.subr.mxu1 %v32517_v20 }
0x175e   :  { %27153 = vmatpush3.msra.mxu0 %v32551_v36  ;;  %27191 = vmatprep.mubr.msk.f32.mxu1 %vm27424_vm2, %v32517_v20 }
0x175f   :  { %27154 = vmatprep.subr.mxu0 %v32517_v20 }
0x1760   :  { %27155 = vmatpush3.msra.mxu0 %v32552_v53  ;;  %v21375_v53 = vld [vmem:[%s32092_s6] sm:$0xff] }
0x1761   :  { %27156 = vmatprep.subr.mxu0 %v32517_v20 }
0x1762   :  { %27157 = vmatpush3.msra.mxu0 %v32553_v34  ;;  %v21377_v34 = vsel %vm71_vm0, %v21375_v53, 0 }
0x1763   :  { %27159 = vmatmul.mubr.f32.vlgmr.msra.gmra.mxu0 %v31755_v60  ;;  %27180 = vmatprep.subr.mxu0 %v32517_v20  ;;  %v21446_v15 = vand.u32 4294901760, %v21377_v34  ;;  %v21845_v60 = vld [vmem:[%s32093_s7 + $0x38] sm:$0xff] }
0x1764   :  { %27184 = vmatprep.mubr.msk.f32.mxu0 %vm27424_vm2, %v32517_v20  ;;  %v31881_v6 = vand.u32 4294901760, %v21845_v60 }
0x1765   :  { %v21447_v7 = vsub.f32 %v21377_v34, %v21446_v15 }
0x1766   :  { %v31887_v46 = vsub.f32 %v21845_v60, %v31881_v6 }
0x1767   :  { %v21448_v47 = vand.u32 4294901760, %v21447_v7 }
0x1769   :  { %v21449_v52 = vsub.f32 %v21447_v7, %v21448_v47 }
0x176b   :  { %v21450_v55 = vand.u32 4294901760, %v21449_v52 }
0x17f9   :  { %v21001_v59 = vpop.f32.mrf.mxu1 }
0x17fb   :  { %v27103_v25 = vpop.f32.mrf.mxu1 }
0x17fc   :  { %v21951_v25 = vand.u32 4294901760, %v31887_v46 }
0x1801   :  { %v20890_v40 = vpop.f32.mrf.mxu0 }
0x1802   :  { %v21002_v27 = vadd.f32 %v21001_v59, %v20890_v40  ;;  %v21843_v59 = vld [vmem:[%s32093_s7 + $0x28] sm:$0xff]  ;;  %v31898_v40 = vsub.f32 %v21844_v39, %v31889_v63 }
0x1803   :  { %v27084_v17 = vpop.f32.mrf.mxu0 }
0x1804   :  { %v31900_v17 = vand.u32 4294901760, %v21843_v59 }
0x1809   :  { %v21170_v14 = vpop.f32.mrf.mxu1 }
0x180b   :  { %v27141_v9 = vpop.f32.mrf.mxu1 }
0x180c   :  { %v21952_v9 = vsub.f32 %v31887_v46, %v21951_v25 }
0x1812   :  { %v21089_v50 = vpop.f32.mrf.mxu0 }
0x1813   :  { %v21090_v28 = vadd.f32 %v21089_v50, %v21002_v27  ;;  %v21958_v50 = vand.u32 4294901760, %v31898_v40  ;;  %v21841_v27 = vld [vmem:[%s32093_s7 + $0x18] sm:$0xff] }
0x1814   :  { %v27122_v10 = vpop.f32.mrf.mxu0 }
0x1815   :  { %v21171_v3 = vadd.f32 %v21170_v14, %v21090_v28  ;;  %v21842_v14 = vld [vmem:[%s32093_s7 + $0x20] sm:$0xff]  ;;  %v31912_v10 = vsub.f32 %v21843_v59, %v31900_v17  ;;  %v21959_v28 = vsub.f32 %v31898_v40, %v21958_v50 }
0x181b   :  { %v21344_v21 = vpop.f32.mrf.mxu1 }
0x181d   :  { %v27179_v32 = vpop.f32.mrf.mxu1 }
0x181e   :  { %v21953_v32 = vand.u32 4294901760, %v21952_v9 }
0x1823   :  { %v21265_v26 = vpop.f32.mrf.mxu0 }
0x1824   :  { %v21266_v58 = vadd.f32 %v21265_v26, %v21171_v3  ;;  %v21965_v3 = vand.u32 4294901760, %v31912_v10 }
0x1825   :  { %v27160_v57 = vpop.f32.mrf.mxu0 }
0x1826   :  { %v21345_v44 = vadd.f32 %v21344_v21, %v21266_v58  ;;  %v31914_v21 = vand.u32 4294901760, %v21842_v14  ;;  %v21840_v58 = vld [vmem:[%s32093_s7 + $0x10] sm:$0xff]  ;;  %v21960_v57 = vand.u32 4294901760, %v21959_v28 }
0x1828   :  { %v21349_v62 = vmul.f32 0.001953125, %v21345_v44  ;;  %v31926_v26 = vsub.f32 %v21842_v14, %v31914_v21  ;;  %v21966_v44 = vsub.f32 %v31912_v10, %v21965_v3 }
0x182a   :  { %v21351_v31 = vsub.f32 %v21349_v62, %v21350_v37  ;;  %v21972_v37 = vand.u32 4294901760, %v31926_v26  ;;  %v31939_v62 = vand.u32 4294901760, %v21840_v58  ;;  %v21967_v53 = vand.u32 4294901760, %v21966_v44 }
0x182c   :  { %v21354_v36 = vadd.f32 1e-05, %v21351_v31  ;;  %v21973_v34 = vsub.f32 %v31926_v26, %v21972_v37 }
0x182e   :  { %27349 = vrsqrt.f32 %v21354_v36  ;;  %v21839_v36 = vld [vmem:[%s32093_s7 + $0x8] sm:$0xff] }
0x183b   :  { %v27350_v1 = vpop.eup %27349 }
0x183c   :  { %v21356_v23 = vmul.f32 %v27350_v1, %v21352_v16  ;;  %v31953_v16 = vsub.f32 %v21840_v58, %v31939_v62  ;;  %v31955_v1 = vand.u32 4294901760, %v21839_v36 }
0x183e   :  { %v21357_v49 = vmul.f32 %v21356_v23, %v21348_v56  ;;  %v21362_v35 = vrot.slane %v21356_v23, %v32554_v42  ;;  %v31929_v56 = vand.u32 4294901760, %v21841_v27  ;;  %v21838_v23 = vld [vmem:[%s32093_s7] sm:$0xff]  ;;  %s27425_s7 = smov [#allocation7]  }
0x183f   :  { %s22394_s20 = sshll.u32 %s27425_s7, 4  ;;  %s22395_s20 = int_to_ptr.vmem [resolvable:$true] %s22394_s20 }
0x1840   :  { %v21358_v8 = vsub.f32 %v21353_v45, %v21357_v49  ;;  %v21364_v43 = vmul.f32 %v21362_v35, %v31510_v41  ;;  %v21363_v0 = vmul.f32 %v21362_v35, %v31513_v5  ;;  %v31943_v31 = vsub.f32 %v21841_v27, %v31929_v56  ;;  %s27393_s5 = scalar_lea.vmem %s22395_s20, 128  ;;  %p27398_p11 = scmp.lt.s32.totalorder %s22395_s20, %s22395_s20 }
0x1841   :  { %v21974_v45 = vand.u32 4294901760, %v21973_v34  ;;  %v21986_v49 = vand.u32 4294901760, %v31953_v16  ;;  %v31968_v35 = vand.u32 4294901760, %v21838_v23  ;;  %p27394_p10 = scmp.ne.s32.totalorder %s22395_s20, %s27393_s5  ;;  %p27399_p12 = scmp.lt.s32.totalorder %s27393_s5, %s27393_s5 }
0x1842   :  { %v21368_v33 = vrot.slane %v21358_v8, %v32554_v42  ;;  %v31966_v42 = vsub.f32 %v21839_v36, %v31955_v1 }
0x1843   :  { %v21987_v8 = vsub.f32 %v31953_v16, %v21986_v49  ;;  %p27400_p13 = por %p27399_p12, %p27398_p11 }
0x1844   :  { %v21370_v30 = vadd.f32 %v21368_v33, %v21364_v43  ;;  %v21369_v13 = vadd.f32 %v21368_v33, %v21363_v0  ;;  %v21993_v43 = vand.u32 4294901760, %v31966_v42  ;;  %v31981_v33 = vsub.f32 %v21838_v23, %v31968_v35 }
0x1845   :  { %p27401_p0 = pnand %p27400_p13, %p27394_p10 }
0x1846   :  { %v21372_v11 = vadd.f32 %v21370_v30, %v32555_v61  ;;  %v21371_v48 = vadd.f32 %v21369_v13, %v32556_v22  ;;  %v21994_v30 = vsub.f32 %v31966_v42, %v21993_v43  ;;  %v22000_v13 = vand.u32 4294901760, %v31981_v33 }
0x1848   :  { %v21374_v29 = vmax.f32 %v21372_v11, 0.0  ;;  %v21373_v2 = vmax.f32 %v21371_v48, 0.0  ;;  %v21995_v61 = vand.u32 4294901760, %v21994_v30  ;;  %v22001_v11 = vsub.f32 %v31981_v33, %v22000_v13 }
0x184a   :  { %v21408_v38 = vand.u32 4294901760, %v21374_v29  ;;  %v21411_v24 = vand.u32 4294901760, %v21373_v2  ;;  %v22002_v22 = vand.u32 4294901760, %v22001_v11 }
0x184c   :  { %27181 = vmatpush3.msra.mxu0 %v21408_v38  ;;  %v21486_v12 = vsub.f32 %v21374_v29, %v21408_v38  ;;  %v21493_v41 = vsub.f32 %v21373_v2, %v21411_v24 }
0x184d   :  { %27182 = vmatprep.subr.mxu0 %v32517_v20 }
0x184e   :  { %27183 = vmatpush3.msra.mxu0 %v21411_v24  ;;  %v21487_v5 = vand.u32 4294901760, %v21486_v12  ;;  %v21494_v4 = vand.u32 4294901760, %v21493_v41 }
0x184f   :  { %27194 = vmatprep.subr.mxu0 %v32517_v20  ;;  %27185 = vmatmul.mubr.f32.vlgmr.msra.gmra.mxu0 %v21450_v55 }
0x1850   :  { %27195 = vmatpush3.msra.mxu0 %v21486_v12  ;;  %27198 = vmatprep.mubr.msk.f32.mxu0 %vm27424_vm2, %v32517_v20  ;;  %v21488_v54 = vsub.f32 %v21486_v12, %v21487_v5  ;;  %v21495_v19 = vsub.f32 %v21493_v41, %v21494_v4 }
0x1851   :  { %27196 = vmatprep.subr.mxu0 %v32517_v20 }
0x1852   :  { %27197 = vmatpush3.msra.mxu0 %v21493_v41  ;;  %v21489_v18 = vand.u32 4294901760, %v21488_v54  ;;  %v21496_v51 = vand.u32 4294901760, %v21495_v19 }
0x1853   :  { %27208 = vmatprep.subr.mxu0 %v32517_v20  ;;  %27199 = vmatmul.mubr.f32.vlgmr.msra.gmra.mxu0 %v21447_v7 }
0x1854   :  { %27188 = vmatpush3.msra.mxu1 %v21489_v18  ;;  %27209 = vmatpush3.msra.mxu0 %v21487_v5 }
0x1855   :  { %27189 = vmatprep.subr.mxu1 %v32517_v20  ;;  %27210 = vmatprep.subr.mxu0 %v32517_v20 }
0x1856   :  { %27190 = vmatpush3.msra.mxu1 %v21496_v51  ;;  %27211 = vmatpush3.msra.mxu0 %v21494_v4 }
0x1857   :  { %27192 = vmatmul.mubr.f32.vlgmr.msra.gmra.mxu1 %v21446_v15  ;;  %27201 = vmatprep.subr.mxu1 %v32517_v20 }
0x1858   :  { %27202 = vmatpush3.msra.mxu1 %v21408_v38  ;;  %27205 = vmatprep.mubr.msk.f32.mxu1 %vm27424_vm2, %v32517_v20 }
0x1859   :  { %27203 = vmatprep.subr.mxu1 %v32517_v20  ;;  %27212 = vmatprep.mubr.msk.f32.mxu0 %vm27424_vm2, %v32517_v20 }
0x185a   :  { %27204 = vmatpush3.msra.mxu1 %v21411_v24  ;;  %27213 = vmatmul.mubr.f32.vlgmr.msra.gmra.mxu0 %v21446_v15 }
0x185b   :  { %27206 = vmatmul.mubr.f32.vlgmr.msra.gmra.mxu1 %v21448_v47  ;;  %27215 = vmatprep.subr.mxu1 %v32517_v20  ;;  %v21988_v47 = vand.u32 4294901760, %v21987_v8 }
0x185c   :  { %27216 = vmatpush3.msra.mxu1 %v21408_v38  ;;  %27219 = vmatprep.mubr.msk.f32.mxu1 %vm27424_vm2, %v32517_v20 }
0x185d   :  { %27217 = vmatprep.subr.mxu1 %v32517_v20  ;;  %27222 = vmatprep.subr.mxu0 %v32517_v20 }
0x185e   :  { %27218 = vmatpush3.msra.mxu1 %v21411_v24  ;;  %27238 = vmatprep.mubr.msk.f32.mxu0 %vm27424_vm2, %v32517_v20 }
0x185f   :  { %27220 = vmatmul.mubr.f32.vlgmr.msra.gmra.mxu1 %v21446_v15  ;;  %27241 = vmatprep.subr.mxu1 %v32517_v20  ;;  %v21979_v15 = vand.u32 4294901760, %v31943_v31 }
0x1860   :  { %27257 = vmatprep.mubr.msk.f32.mxu1 %vm27424_vm2, %v32517_v20  ;;  %27223 = vmatpush3.msra.mxu0 %v31881_v6 }
0x1861   :  { %27224 = vmatprep.subr.mxu0 %v32517_v20  ;;  %27242 = vmatpush3.msra.mxu1 %v21953_v32  ;;  %v21980_v7 = vsub.f32 %v31943_v31, %v21979_v15 }
0x1862   :  { %27225 = vmatpush3.msra.mxu0 %v31889_v63  ;;  %27243 = vmatprep.subr.mxu1 %v32517_v20 }
0x1863   :  { %27226 = vmatprep.subr.mxu0 %v32517_v20  ;;  %27244 = vmatpush3.msra.mxu1 %v21960_v57  ;;  %v21981_v0 = vand.u32 4294901760, %v21980_v7 }
0x1864   :  { %27227 = vmatpush3.msra.mxu0 %v31900_v17  ;;  %27245 = vmatprep.subr.mxu1 %v32517_v20 }
0x1865   :  { %27228 = vmatprep.subr.mxu0 %v32517_v20  ;;  %27246 = vmatpush3.msra.mxu1 %v21967_v53 }
0x1866   :  { %27229 = vmatpush3.msra.mxu0 %v31914_v21  ;;  %27247 = vmatprep.subr.mxu1 %v32517_v20 }
0x1867   :  { %27230 = vmatprep.subr.mxu0 %v32517_v20  ;;  %27248 = vmatpush3.msra.mxu1 %v21974_v45 }
0x1868   :  { %27231 = vmatpush3.msra.mxu0 %v31929_v56  ;;  %27249 = vmatprep.subr.mxu1 %v32517_v20 }
0x1869   :  { %27232 = vmatprep.subr.mxu0 %v32517_v20  ;;  %27250 = vmatpush3.msra.mxu1 %v21981_v0 }
0x186a   :  { %27233 = vmatpush3.msra.mxu0 %v31939_v62  ;;  %27251 = vmatprep.subr.mxu1 %v32517_v20 }
0x186b   :  { %27234 = vmatprep.subr.mxu0 %v32517_v20  ;;  %27252 = vmatpush3.msra.mxu1 %v21988_v47 }
0x186c   :  { %27235 = vmatpush3.msra.mxu0 %v31955_v1  ;;  %27253 = vmatprep.subr.mxu1 %v32517_v20 }
0x186d   :  { %27236 = vmatprep.subr.mxu0 %v32517_v20  ;;  %27254 = vmatpush3.msra.mxu1 %v21995_v61 }
0x186e   :  { %27237 = vmatpush3.msra.mxu0 %v31968_v35  ;;  %27255 = vmatprep.subr.mxu1 %v32517_v20 }
0x186f   :  { %27260 = vmatprep.subr.mxu0 %v32517_v20  ;;  %27256 = vmatpush3.msra.mxu1 %v22002_v22 }
0x1870   :  { %27279 = vmatprep.subr.mxu1 %v32517_v20 }
0x190f   :  { %v21452_v48 = vpop.f32.mrf.mxu0 }
0x1911   :  { %v27186_v52 = vpop.f32.mrf.mxu0 }
0x1913   :  { %v21609_v29 = vpop.f32.mrf.mxu0 }
0x1915   :  { %v27200_v2 = vpop.f32.mrf.mxu0 }
0x1917   :  { %v21533_v38 = vpop.f32.mrf.mxu1 }
0x1918   :  { %v21534_v24 = vadd.f32 %v21533_v38, %v21452_v48 }
0x1919   :  { %v27193_v55 = vpop.f32.mrf.mxu1 }
0x191a   :  { %v21610_v12 = vadd.f32 %v21609_v29, %v21534_v24  ;;  %v21761_v41 = vpop.f32.mrf.mxu0 }
0x191b   :  { %v21684_v5 = vpop.f32.mrf.mxu1 }
0x191c   :  { %v21685_v4 = vadd.f32 %v21684_v5, %v21610_v12  ;;  %v27214_v54 = vpop.f32.mrf.mxu0 }
0x191d   :  { %v27207_v19 = vpop.f32.mrf.mxu1 }
0x191e   :  { %v21762_v18 = vadd.f32 %v21761_v41, %v21685_v4 }
0x191f   :  { %v21834_v51 = vpop.f32.mrf.mxu1 }
0x1920   :  { %v21835_v60 = vadd.f32 %v21834_v51, %v21762_v18 }
0x1921   :  { %v27221_v39 = vpop.f32.mrf.mxu1 }
0x1922   :  { %v21847_v59 = vsel %vm1108_vm1, %v21835_v60, 0 }
0x1923   :  { %v31999_v14 = vand.u32 4294901760, %v21847_v59 }
0x1925   :  { %v21923_v9 = vsub.f32 %v21847_v59, %v31999_v14  ;;  %27258 = vmatmul.mubr.f32.vlgmr.msra.gmra.mxu1 %v31999_v14 }
0x1926   :  { %27280 = vmatpush3.msra.mxu1 %v31881_v6  ;;  %27295 = vmatprep.mubr.msk.f32.mxu1 %vm27424_vm2, %v32517_v20 }
0x1927   :  { %v21924_v27 = vand.u32 4294901760, %v21923_v9  ;;  %27281 = vmatprep.subr.mxu1 %v32517_v20 }
0x1928   :  { %27282 = vmatpush3.msra.mxu1 %v31889_v63 }
0x1929   :  { %v21925_v32 = vsub.f32 %v21923_v9, %v21924_v27  ;;  %27283 = vmatprep.subr.mxu1 %v32517_v20 }
0x192a   :  { %27284 = vmatpush3.msra.mxu1 %v31900_v17 }
0x192b   :  { %v21926_v28 = vand.u32 4294901760, %v21925_v32  ;;  %27285 = vmatprep.subr.mxu1 %v32517_v20 }
0x192c   :  { %27286 = vmatpush3.msra.mxu1 %v31914_v21 }
0x192d   :  { %27287 = vmatprep.subr.mxu1 %v32517_v20  ;;  %27239 = vmatmul.mubr.f32.vlgmr.msra.gmra.mxu0 %v21926_v28 }
0x192e   :  { %27261 = vmatpush3.msra.mxu0 %v31887_v46  ;;  %27288 = vmatpush3.msra.mxu1 %v31929_v56 }
0x192f   :  { %27262 = vmatprep.subr.mxu0 %v32517_v20  ;;  %27289 = vmatprep.subr.mxu1 %v32517_v20 }
0x1930   :  { %27263 = vmatpush3.msra.mxu0 %v31898_v40  ;;  %27290 = vmatpush3.msra.mxu1 %v31939_v62 }
0x1931   :  { %27264 = vmatprep.subr.mxu0 %v32517_v20  ;;  %27291 = vmatprep.subr.mxu1 %v32517_v20 }
0x1932   :  { %27265 = vmatpush3.msra.mxu0 %v31912_v10  ;;  %27292 = vmatpush3.msra.mxu1 %v31955_v1 }
0x1933   :  { %27266 = vmatprep.subr.mxu0 %v32517_v20  ;;  %27293 = vmatprep.subr.mxu1 %v32517_v20 }
0x1934   :  { %27267 = vmatpush3.msra.mxu0 %v31926_v26  ;;  %27294 = vmatpush3.msra.mxu1 %v31968_v35 }
0x1935   :  { %27268 = vmatprep.subr.mxu0 %v32517_v20  ;;  %27296 = vmatmul.mubr.f32.vlgmr.msra.gmra.mxu1 %v21924_v27 }
0x1936   :  { %27317 = vmatprep.subr.mxu1 %v32517_v20  ;;  %27269 = vmatpush3.msra.mxu0 %v31943_v31 }
0x1937   :  { %27318 = vmatpush3.msra.mxu1 %v31881_v6  ;;  %27270 = vmatprep.subr.mxu0 %v32517_v20 }
0x1938   :  { %27319 = vmatprep.subr.mxu1 %v32517_v20  ;;  %27271 = vmatpush3.msra.mxu0 %v31953_v16 }
0x1939   :  { %27320 = vmatpush3.msra.mxu1 %v31889_v63  ;;  %27272 = vmatprep.subr.mxu0 %v32517_v20 }
0x193a   :  { %27321 = vmatprep.subr.mxu1 %v32517_v20  ;;  %27273 = vmatpush3.msra.mxu0 %v31966_v42 }
0x193b   :  { %27322 = vmatpush3.msra.mxu1 %v31900_v17  ;;  %27274 = vmatprep.subr.mxu0 %v32517_v20 }
0x193c   :  { %27323 = vmatprep.subr.mxu1 %v32517_v20  ;;  %27275 = vmatpush3.msra.mxu0 %v31981_v33 }
0x193d   :  { %27276 = vmatprep.mubr.msk.f32.mxu0 %vm27424_vm2, %v32517_v20  ;;  %27324 = vmatpush3.msra.mxu1 %v31914_v21 }
0x193e   :  { %27277 = vmatmul.mubr.f32.vlgmr.msra.gmra.mxu0 %v21923_v9  ;;  %27298 = vmatprep.subr.mxu0 %v32517_v20 }
0x193f   :  { %27325 = vmatprep.subr.mxu1 %v32517_v20  ;;  %27299 = vmatpush3.msra.mxu0 %v21951_v25 }
0x1940   :  { %27326 = vmatpush3.msra.mxu1 %v31929_v56  ;;  %27300 = vmatprep.subr.mxu0 %v32517_v20 }
0x1941   :  { %27327 = vmatprep.subr.mxu1 %v32517_v20  ;;  %27301 = vmatpush3.msra.mxu0 %v21958_v50 }
0x1942   :  { %27328 = vmatpush3.msra.mxu1 %v31939_v62  ;;  %27302 = vmatprep.subr.mxu0 %v32517_v20 }
0x1943   :  { %27329 = vmatprep.subr.mxu1 %v32517_v20  ;;  %27303 = vmatpush3.msra.mxu0 %v21965_v3 }
0x1944   :  { %27330 = vmatpush3.msra.mxu1 %v31955_v1  ;;  %27304 = vmatprep.subr.mxu0 %v32517_v20 }
0x1945   :  { %27331 = vmatprep.subr.mxu1 %v32517_v20  ;;  %27305 = vmatpush3.msra.mxu0 %v21972_v37 }
0x1946   :  { %27332 = vmatpush3.msra.mxu1 %v31968_v35  ;;  %27333 = vmatprep.mubr.msk.f32.mxu1 %vm27424_vm2, %v32517_v20 }
0x1947   :  { %27306 = vmatprep.subr.mxu0 %v32517_v20  ;;  %27334 = vmatmul.mubr.f32.vlgmr.msra.gmra.mxu1 %v31999_v14 }
0x1948   :  { %27307 = vmatpush3.msra.mxu0 %v21979_v15  ;;  %27314 = vmatprep.mubr.msk.f32.mxu0 %vm27424_vm2, %v32517_v20 }
0x1949   :  { %27308 = vmatprep.subr.mxu0 %v32517_v20 }
0x194a   :  { %27309 = vmatpush3.msra.mxu0 %v21986_v49 }
0x194b   :  { %27310 = vmatprep.subr.mxu0 %v32517_v20 }
0x194c   :  { %27311 = vmatpush3.msra.mxu0 %v21993_v43 }
0x194d   :  { %27312 = vmatprep.subr.mxu0 %v32517_v20 }
0x194e   :  { %27313 = vmatpush3.msra.mxu0 %v22000_v13 }
0x194f   :  { %27315 = vmatmul.mubr.f32.vlgmr.msra.gmra.mxu0 %v31999_v14 }
0x19e5   :  { %v22039_v6 = vpop.f32.mrf.mxu1 }
0x19e7   :  { %v27259_v46 = vpop.f32.mrf.mxu1 }
0x19ed   :  { %v21928_v63 = vpop.f32.mrf.mxu0 }
0x19ee   :  { %v22040_v3 = vadd.f32 %v22039_v6, %v21928_v63 }
0x19ef   :  { %v27240_v25 = vpop.f32.mrf.mxu0 }
0x19f5   :  { %v22208_v40 = vpop.f32.mrf.mxu1 }
0x19f7   :  { %v27297_v17 = vpop.f32.mrf.mxu1 }
0x19fe   :  { %v22127_v50 = vpop.f32.mrf.mxu0 }
0x19ff   :  { %v22128_v56 = vadd.f32 %v22127_v50, %v22040_v3 }
0x1a00   :  { %v27278_v10 = vpop.f32.mrf.mxu0 }
0x1a01   :  { %v22209_v58 = vadd.f32 %v22208_v40, %v22128_v56 }
0x1a07   :  { %v22382_v21 = vpop.f32.mrf.mxu1 }
0x1a09   :  { %v27335_v26 = vpop.f32.mrf.mxu1 }
0x1a0f   :  { %v22303_v57 = vpop.f32.mrf.mxu0 }
0x1a10   :  { %v22304_v20 = vadd.f32 %v22303_v57, %v22209_v58 }
0x1a11   :  { %v27316_v44 = vpop.f32.mrf.mxu0 }
0x1a12   :  { %v22383_v37 = vadd.f32 %v22382_v21, %v22304_v20 }
0x1a14   :  { %22387 = vst.msk [vmem:[#allocation7] sm:$0xff] %vm22386_vm3, %v22383_v37 }
0x1a15   :  { %27404 = shalt.err (!%p27401_p0)
}
0x1a16   :  { %22397 = dma.vmem_to_hbm [thread:$0]  %s22395_s20, 128, %s32094_s8, [#allocation4]  }
0x1a17   :  { %27417 = dma.done.wait [#allocation4], 128  }
0x1a18   :  { %27418 = vsyncadd [#allocation4], 4294967168 }
0x1a19   :  { %22401 = vsyncpa [#allocation3], 1 }
0x1a1a   :  { %22402 = vsyncpa [#allocation6], 1 }
0x1a1b   :  { %22403 = vsyncpa [#allocation4], 1 }

</bundles_post_ra>
